<compile_context>
chip_gen: v5e
topology: v5e:2x2
jax: 0.10.0
libtpu: 0.0.40
codegen_flags: <defaults>
</compile_context>

<pallas_src>
import functools
import itertools
import math

import numpy as np
import jax
import jax.numpy as jnp
from jax.experimental import pallas as pl
from jax.experimental.pallas import tpu as pltpu

BASIS_DIM = 69
SUBSETS = [tuple(a for a in range(4) if (m >> a) & 1) for m in range(16)]
PERMS = list(itertools.permutations(range(4)))
NUM_PERMS = -(-BASIS_DIM // len(SUBSETS))        # = 5 perms actually used by the basis


# ---------------------------------------------------------------------------
# Stand-in ops_func (used only by the pure-JAX reference path).
# ---------------------------------------------------------------------------
def set_ops_4_to_4(x):
    # TODO(synk): the original `set_ops_4_to_4` source was not provided with the
    # module; this deterministic permutation-equivariant stand-in basis of 69 ops
    # (set-axis permutation o mean-pool-over-subset + broadcast, fixed order) is
    # used consistently by both the Pallas path and this reference path.
    shape = x.shape
    ops = []
    for perm in PERMS:
        xp = jnp.transpose(x, (0, 1) + tuple(2 + p for p in perm))
        for sub in SUBSETS:
            if len(ops) == BASIS_DIM:
                return jnp.stack(ops, axis=2)
            op = xp
            if sub:
                op = jnp.mean(op, axis=tuple(2 + a for a in sub), keepdims=True)
                op = jnp.broadcast_to(op, shape)
            ops.append(op)
    return jnp.stack(ops, axis=2)


# ---------------------------------------------------------------------------
# Constant matrices encoding the basis structure (shared by all layers).
# ---------------------------------------------------------------------------
@functools.lru_cache(maxsize=None)
def _basis_constants_np(n):
    P = n ** 4
    sizes = [n ** (4 - len(t)) for t in SUBSETS]
    offs = np.cumsum([0] + sizes)[:-1]
    TOT = int(sum(sizes))                               # 625 for n=4
    TOTP = ((TOT + 127) // 128) * 128                   # pad to lane multiple (640)

    idx = np.indices((n, n, n, n)).reshape(4, P)        # coords of each flat position

    apool = np.zeros((P, TOTP), np.float32)
    mask = np.zeros((16, TOTP), np.float32)
    for m, t in enumerate(SUBSETS):
        kept = [a for a in range(4) if a not in t]
        r = np.zeros(P, np.int64)
        for a in kept:
            r = r * n + idx[a]
        apool[np.arange(P), offs[m] + r] = 1.0 / (n ** len(t))
        mask[m, offs[m]:offs[m] + sizes[m]] = 1.0

    bcat = (apool > 0).astype(np.float32).T             # (TOTP, P) broadcast-back

    br = np.zeros((NUM_PERMS, TOTP, P), np.float32)
    for p in range(NUM_PERMS):
        perm = PERMS[p]
        j = np.zeros_like(idx)
        for a in range(4):
            j[perm[a]] = idx[a]
        q_src = ((j[0] * n + j[1]) * n + j[2]) * n + j[3]
        r_mat = np.zeros((P, P), np.float32)
        r_mat[q_src, np.arange(P)] = 1.0                 # x_flat @ R == transpose(x, perm)
        br[p] = bcat @ r_mat
    return apool, mask, br


@functools.lru_cache(maxsize=None)
def _coef_index_map():
    """Basis index for op (perm p, target-subset block ti), or -1 if unused."""
    bidx = np.full((NUM_PERMS, 16), -1, np.int64)
    for p in range(NUM_PERMS):
        perm = PERMS[p]
        inv = [perm.index(c) for c in range(4)]
        for ti, t in enumerate(SUBSETS):
            m_sub = sum(1 << inv[c] for c in t)
            b = 16 * p + m_sub
            if b < BASIS_DIM:
                bidx[p, ti] = b
    return bidx, bidx >= 0


def _restructure_coefs(coefs):
    """coefs (D, S, 69) -> Wexp (NUM_PERMS, S, D*16) matching the pooled layout."""
    D, S, _ = coefs.shape
    bidx, valid = _coef_index_map()
    gathered = coefs[:, :, np.clip(bidx, 0, BASIS_DIM - 1)]          # (D, S, 5, 16)
    gathered = jnp.where(jnp.asarray(valid)[None, None, :, :], gathered, 0.0)
    return jnp.transpose(gathered, (2, 1, 0, 3)).reshape(NUM_PERMS, S, D * 16)


# ---------------------------------------------------------------------------
# Fused SetEq4to4 layer kernel (+ optional fused output Linear).
# ---------------------------------------------------------------------------
def _seteq4to4_kernel(x_ref, apool_ref, mask_ref, br_ref, wexp_ref, bias_ref,
                      *rest, fuse_linear):
    if fuse_linear:
        lin_w_ref, lin_b_ref, o_ref = rest
    else:
        (o_ref,) = rest

    cdt = x_ref.dtype
    x = x_ref[0]                                           # (D, P)
    d_in = x.shape[0]
    num_perms = wexp_ref.shape[0]
    s_out = wexp_ref.shape[1]
    p_spatial = br_ref.shape[2]

    # Pooled statistics of x for all 16 subset blocks (block 0 is x itself).
    pools = jnp.dot(x, apool_ref[...], preferred_element_type=jnp.float32)
    pools = pools.astype(cdt)                              # (D, TOTP)
    mask = mask_ref[...]                                   # (16, TOTP)
    # Block-diagonal expansion over (d, subset-block); rows ordered d*16 + ti.
    poolexp = jnp.concatenate(
        [pools[d:d + 1, :] * mask for d in range(d_in)], axis=0)   # (D*16, TOTP)

    acc = jnp.zeros((s_out, p_spatial), jnp.float32)
    for p in range(num_perms):
        mixed = jnp.dot(wexp_ref[p], poolexp,
                        preferred_element_type=jnp.float32)         # (S, TOTP)
        acc = acc + jnp.dot(mixed.astype(cdt), br_ref[p],
                            preferred_element_type=jnp.float32)     # (S, P)

    acc = acc + bias_ref[...]                              # (S, P) + (S, 1)
    acc = jnp.maximum(acc, 0.0)                            # fused ReLU (f32 epilogue)
    if fuse_linear:                                        # fused output nn.Linear
        acc = jnp.dot(lin_w_ref[...], acc,
                      preferred_element_type=jnp.float32) + lin_b_ref[...]
    o_ref[0] = acc.astype(o_ref.dtype)


def _seteq4to4_layer(x, wexp, bias, apool, mask, br, *, lin_w=None, lin_b=None,
                     compute_dtype=jnp.bfloat16):
    N, D, P = x.shape
    num_perms, S, DK = wexp.shape
    TOTP = apool.shape[1]
    fuse = lin_w is not None
    out_ch = lin_w.shape[0] if fuse else S
    out_dtype = jnp.float32 if fuse else compute_dtype

    args = [
        x.astype(compute_dtype),
        apool.astype(compute_dtype),
        mask.astype(compute_dtype),
        br.astype(compute_dtype),
        wexp.astype(compute_dtype),
        bias.reshape(S, 1).astype(jnp.float32),
    ]
    in_specs = [
        pl.BlockSpec((1, D, P), lambda i: (i, 0, 0)),          # per-batch activation
        pl.BlockSpec((P, TOTP), lambda i: (0, 0)),             # resident constants
        pl.BlockSpec((16, TOTP), lambda i: (0, 0)),
        pl.BlockSpec((num_perms, TOTP, P), lambda i: (0, 0, 0)),
        pl.BlockSpec((num_perms, S, DK), lambda i: (0, 0, 0)),  # per-layer weights
        pl.BlockSpec((S, 1), lambda i: (0, 0)),
    ]
    if fuse:
        args += [lin_w.astype(jnp.float32),
                 lin_b.reshape(out_ch, 1).astype(jnp.float32)]
        in_specs += [pl.BlockSpec((out_ch, S), lambda i: (0, 0)),
                     pl.BlockSpec((out_ch, 1), lambda i: (0, 0))]

    flops = 2 * N * (D * P * TOTP
                     + num_perms * (S * DK * TOTP + S * TOTP * P)
                     + (out_ch * S * P if fuse else 0))
    bytes_accessed = int(sum(a.size * a.dtype.itemsize for a in args)
                         + N * out_ch * P * jnp.dtype(out_dtype).itemsize)

    kernel = functools.partial(_seteq4to4_kernel, fuse_linear=fuse)
    return pl.pallas_call(
        kernel,
        out_shape=jax.ShapeDtypeStruct((N, out_ch, P), out_dtype),
        grid=(N,),
        in_specs=in_specs,
        out_specs=pl.BlockSpec((1, out_ch, P), lambda i: (i, 0, 0)),
        compiler_params=pltpu.CompilerParams(dimension_semantics=("parallel",)),
        cost_estimate=pl.CostEstimate(flops=flops, transcendentals=0,
                                      bytes_accessed=bytes_accessed),
    )(*args)


# ---------------------------------------------------------------------------
# SetNet4to4 forward (Pallas) and pure-JAX reference.
# ---------------------------------------------------------------------------
@functools.partial(jax.jit, static_argnames="compute_dtype")
def setnet_4to4_forward(params, x, compute_dtype=jnp.bfloat16):
    N, D, n = x.shape[0], x.shape[1], x.shape[2]
    P = n ** 4
    apool_np, mask_np, br_np = _basis_constants_np(n)
    apool, mask, br = jnp.asarray(apool_np), jnp.asarray(mask_np), jnp.asarray(br_np)

    h = x.reshape(N, D, P)
    num_layers = len(params["layers"])
    for li, (coefs, bias) in enumerate(params["layers"]):
        wexp = _restructure_coefs(coefs)
        if li == num_layers - 1:
            h = _seteq4to4_layer(h, wexp, bias, apool, mask, br,
                                 lin_w=params["lin_w"], lin_b=params["lin_b"],
                                 compute_dtype=compute_dtype)
        else:
            h = _seteq4to4_layer(h, wexp, bias, apool, mask, br,
                                 compute_dtype=compute_dtype)
    out_dim = params["lin_w"].shape[0]
    y = h.reshape(N, out_dim, n, n, n, n).astype(jnp.float32)
    return jnp.transpose(y, (0, 2, 3, 4, 5, 1))            # single channels-last permute


def setnet_4to4_reference(params, x):
    for coefs, bias in params["layers"]:
        ops = set_ops_4_to_4(x)
        x = jnp.einsum('dsb,ndbijkl->nsijkl', coefs, ops) + bias.reshape(1, -1, 1, 1, 1, 1)
        x = jax.nn.relu(x)
    x = jnp.transpose(x, (0, 2, 3, 4, 5, 1))
    return x @ params["lin_w"].T + params["lin_b"]


# ---------------------------------------------------------------------------
# Deterministic parameter init (mirrors the PyTorch __init__)
# ---------------------------------------------------------------------------
def init_setnet(key, layers, out_dim):
    params = {"layers": []}
    for (din, dout) in layers:
        key, k1 = jax.random.split(key)
        std = math.sqrt(2.0 / (din + dout + BASIS_DIM))
        coefs = std * jax.random.normal(k1, (din, dout, BASIS_DIM), jnp.float32)
        bias = jnp.zeros((dout,), jnp.float32)
        params["layers"].append((coefs, bias))
    s_last = layers[-1][1]
    key, k1, k2 = jax.random.split(key, 3)
    bound = 1.0 / math.sqrt(s_last)
    params["lin_w"] = jax.random.uniform(k1, (out_dim, s_last), jnp.float32, -bound, bound)
    params["lin_b"] = jax.random.uniform(k2, (out_dim,), jnp.float32, -bound, bound)
    return params


if __name__ == "__main__":
    key = jax.random.PRNGKey(0)
    layers = [(2, 4), (4, 8)]   # (in_dim, out_dim) per SetEq4to4 layer
    out_dim = 3
    N, n = 4, 4                 # batch, set size (4 set indices -> n**4 = 256 positions)

    key, kx, kp = jax.random.split(key, 3)
    x = jax.random.normal(kx, (N, layers[0][0], n, n, n, n), jnp.float32)
    params = init_setnet(kp, layers, out_dim)

    ref = setnet_4to4_reference(params, x)

    # Strict check in f32 compute mode (proves the restructured math is exact).
    out_f32 = jax.block_until_ready(
        setnet_4to4_forward(params, x, compute_dtype=jnp.float32))
    assert out_f32.shape == (N, n, n, n, n, out_dim), out_f32.shape
    assert jnp.allclose(out_f32, ref, atol=1e-3, rtol=1e-3), "f32 kernel mismatch"

    # Default perf mode: bf16 MXU inputs, f32 accumulation.
    out_bf16 = jax.block_until_ready(
        setnet_4to4_forward(params, x, compute_dtype=jnp.bfloat16))
    assert out_bf16.shape == (N, n, n, n, n, out_dim), out_bf16.shape
    assert jnp.allclose(out_bf16, ref, atol=5e-2, rtol=5e-2), "bf16 kernel mismatch"

    print("KERNEL_OK")
</pallas_src>

<mosaic_0001>
module attributes {stable_mosaic.version = 11 : i64} {
  func.func @_seteq4to4_kernel(%arg0: i32, %arg1: memref<1x2x256xf32, #tpu.memory_space<vmem>>, %arg2: memref<256x640xf32, #tpu.memory_space<vmem>>, %arg3: memref<16x640xf32, #tpu.memory_space<vmem>>, %arg4: memref<5x640x256xf32, #tpu.memory_space<vmem>>, %arg5: memref<5x4x32xf32, #tpu.memory_space<vmem>>, %arg6: memref<4x1xf32, #tpu.memory_space<vmem>>, %arg7: memref<1x4x256xf32, #tpu.memory_space<vmem>>) attributes {dimension_semantics = [#tpu.dimension_semantics<parallel>], iteration_bounds = array<i64: 4>, scalar_prefetch = 0 : i64, scratch_operands = 0 : i64, tpu.core_type = #tpu.core_type<tc>, window_params = [{transform_indices = @transform_0, window_bounds = array<i64: 1, 2, 256>}, {pipeline_mode = #tpu.pipeline_mode<synchronous>, transform_indices = @transform_1, window_bounds = array<i64: 256, 640>}, {pipeline_mode = #tpu.pipeline_mode<synchronous>, transform_indices = @transform_2, window_bounds = array<i64: 16, 640>}, {pipeline_mode = #tpu.pipeline_mode<synchronous>, transform_indices = @transform_3, window_bounds = array<i64: 5, 640, 256>}, {pipeline_mode = #tpu.pipeline_mode<synchronous>, transform_indices = @transform_4, window_bounds = array<i64: 5, 4, 32>}, {pipeline_mode = #tpu.pipeline_mode<synchronous>, transform_indices = @transform_5, window_bounds = array<i64: 4, 1>}, {transform_indices = @transform_6, window_bounds = array<i64: 1, 4, 256>}]} {
    %c0 = arith.constant 0 : index
    %c0_0 = arith.constant 0 : index
    %c0_1 = arith.constant 0 : index
    %0 = vector.load %arg1[%c0, %c0_0, %c0_1] : memref<1x2x256xf32, #tpu.memory_space<vmem>>, vector<1x2x256xf32>
    %1 = vector.shape_cast %0 : vector<1x2x256xf32> to vector<2x256xf32>
    %c0_2 = arith.constant 0 : index
    %c0_3 = arith.constant 0 : index
    %2 = vector.load %arg2[%c0_2, %c0_3] : memref<256x640xf32, #tpu.memory_space<vmem>>, vector<256x640xf32>
    %cst = arith.constant dense<0.000000e+00> : vector<2x640xf32>
    %3 = tpu.matmul %1, %2, %cst {dimension_numbers = #tpu.dot_dimension_numbers<[1], [0], [0], [1], [0, 0, 1, 1], [], []>} : vector<2x256xf32>, vector<256x640xf32>, vector<2x640xf32> -> vector<2x640xf32>
    %c0_4 = arith.constant 0 : index
    %c0_5 = arith.constant 0 : index
    %4 = vector.load %arg3[%c0_4, %c0_5] : memref<16x640xf32, #tpu.memory_space<vmem>>, vector<16x640xf32>
    %5 = vector.extract_strided_slice %3 {offsets = [0, 0], sizes = [1, 640], strides = [1, 1]} : vector<2x640xf32> to vector<1x640xf32>
    %6 = vector.broadcast %5 : vector<1x640xf32> to vector<16x640xf32>
    %7 = arith.mulf %6, %4 : vector<16x640xf32>
    %8 = vector.extract_strided_slice %3 {offsets = [1, 0], sizes = [1, 640], strides = [1, 1]} : vector<2x640xf32> to vector<1x640xf32>
    %9 = vector.broadcast %8 : vector<1x640xf32> to vector<16x640xf32>
    %10 = arith.mulf %9, %4 : vector<16x640xf32>
    %11 = tpu.concatenate %7, %10 in 0 : vector<16x640xf32>, vector<16x640xf32> -> vector<32x640xf32>
    %cst_6 = arith.constant 0.000000e+00 : f32
    %12 = vector.broadcast %cst_6 : f32 to vector<4x256xf32>
    %c0_7 = arith.constant 0 : index
    %c0_8 = arith.constant 0 : index
    %c0_9 = arith.constant 0 : index
    %13 = vector.load %arg5[%c0_7, %c0_8, %c0_9] : memref<5x4x32xf32, #tpu.memory_space<vmem>>, vector<1x4x32xf32>
    %14 = vector.shape_cast %13 : vector<1x4x32xf32> to vector<4x32xf32>
    %cst_10 = arith.constant dense<0.000000e+00> : vector<4x640xf32>
    %15 = tpu.matmul %14, %11, %cst_10 {dimension_numbers = #tpu.dot_dimension_numbers<[1], [0], [0], [1], [0, 0, 1, 1], [], []>} : vector<4x32xf32>, vector<32x640xf32>, vector<4x640xf32> -> vector<4x640xf32>
    %c0_11 = arith.constant 0 : index
    %c0_12 = arith.constant 0 : index
    %c0_13 = arith.constant 0 : index
    %16 = vector.load %arg4[%c0_11, %c0_12, %c0_13] : memref<5x640x256xf32, #tpu.memory_space<vmem>>, vector<1x640x256xf32>
    %17 = vector.shape_cast %16 : vector<1x640x256xf32> to vector<640x256xf32>
    %cst_14 = arith.constant dense<0.000000e+00> : vector<4x256xf32>
    %18 = tpu.matmul %15, %17, %cst_14 {dimension_numbers = #tpu.dot_dimension_numbers<[1], [0], [0], [1], [0, 0, 1, 1], [], []>} : vector<4x640xf32>, vector<640x256xf32>, vector<4x256xf32> -> vector<4x256xf32>
    %19 = arith.addf %12, %18 : vector<4x256xf32>
    %c1 = arith.constant 1 : index
    %c0_15 = arith.constant 0 : index
    %c0_16 = arith.constant 0 : index
    %20 = vector.load %arg5[%c1, %c0_15, %c0_16] : memref<5x4x32xf32, #tpu.memory_space<vmem>>, vector<1x4x32xf32>
    %21 = vector.shape_cast %20 : vector<1x4x32xf32> to vector<4x32xf32>
    %cst_17 = arith.constant dense<0.000000e+00> : vector<4x640xf32>
    %22 = tpu.matmul %21, %11, %cst_17 {dimension_numbers = #tpu.dot_dimension_numbers<[1], [0], [0], [1], [0, 0, 1, 1], [], []>} : vector<4x32xf32>, vector<32x640xf32>, vector<4x640xf32> -> vector<4x640xf32>
    %c1_18 = arith.constant 1 : index
    %c0_19 = arith.constant 0 : index
    %c0_20 = arith.constant 0 : index
    %23 = vector.load %arg4[%c1_18, %c0_19, %c0_20] : memref<5x640x256xf32, #tpu.memory_space<vmem>>, vector<1x640x256xf32>
    %24 = vector.shape_cast %23 : vector<1x640x256xf32> to vector<640x256xf32>
    %cst_21 = arith.constant dense<0.000000e+00> : vector<4x256xf32>
    %25 = tpu.matmul %22, %24, %cst_21 {dimension_numbers = #tpu.dot_dimension_numbers<[1], [0], [0], [1], [0, 0, 1, 1], [], []>} : vector<4x640xf32>, vector<640x256xf32>, vector<4x256xf32> -> vector<4x256xf32>
    %26 = arith.addf %19, %25 : vector<4x256xf32>
    %c2 = arith.constant 2 : index
    %c0_22 = arith.constant 0 : index
    %c0_23 = arith.constant 0 : index
    %27 = vector.load %arg5[%c2, %c0_22, %c0_23] : memref<5x4x32xf32, #tpu.memory_space<vmem>>, vector<1x4x32xf32>
    %28 = vector.shape_cast %27 : vector<1x4x32xf32> to vector<4x32xf32>
    %cst_24 = arith.constant dense<0.000000e+00> : vector<4x640xf32>
    %29 = tpu.matmul %28, %11, %cst_24 {dimension_numbers = #tpu.dot_dimension_numbers<[1], [0], [0], [1], [0, 0, 1, 1], [], []>} : vector<4x32xf32>, vector<32x640xf32>, vector<4x640xf32> -> vector<4x640xf32>
    %c2_25 = arith.constant 2 : index
    %c0_26 = arith.constant 0 : index
    %c0_27 = arith.constant 0 : index
    %30 = vector.load %arg4[%c2_25, %c0_26, %c0_27] : memref<5x640x256xf32, #tpu.memory_space<vmem>>, vector<1x640x256xf32>
    %31 = vector.shape_cast %30 : vector<1x640x256xf32> to vector<640x256xf32>
    %cst_28 = arith.constant dense<0.000000e+00> : vector<4x256xf32>
    %32 = tpu.matmul %29, %31, %cst_28 {dimension_numbers = #tpu.dot_dimension_numbers<[1], [0], [0], [1], [0, 0, 1, 1], [], []>} : vector<4x640xf32>, vector<640x256xf32>, vector<4x256xf32> -> vector<4x256xf32>
    %33 = arith.addf %26, %32 : vector<4x256xf32>
    %c3 = arith.constant 3 : index
    %c0_29 = arith.constant 0 : index
    %c0_30 = arith.constant 0 : index
    %34 = vector.load %arg5[%c3, %c0_29, %c0_30] : memref<5x4x32xf32, #tpu.memory_space<vmem>>, vector<1x4x32xf32>
    %35 = vector.shape_cast %34 : vector<1x4x32xf32> to vector<4x32xf32>
    %cst_31 = arith.constant dense<0.000000e+00> : vector<4x640xf32>
    %36 = tpu.matmul %35, %11, %cst_31 {dimension_numbers = #tpu.dot_dimension_numbers<[1], [0], [0], [1], [0, 0, 1, 1], [], []>} : vector<4x32xf32>, vector<32x640xf32>, vector<4x640xf32> -> vector<4x640xf32>
    %c3_32 = arith.constant 3 : index
    %c0_33 = arith.constant 0 : index
    %c0_34 = arith.constant 0 : index
    %37 = vector.load %arg4[%c3_32, %c0_33, %c0_34] : memref<5x640x256xf32, #tpu.memory_space<vmem>>, vector<1x640x256xf32>
    %38 = vector.shape_cast %37 : vector<1x640x256xf32> to vector<640x256xf32>
    %cst_35 = arith.constant dense<0.000000e+00> : vector<4x256xf32>
    %39 = tpu.matmul %36, %38, %cst_35 {dimension_numbers = #tpu.dot_dimension_numbers<[1], [0], [0], [1], [0, 0, 1, 1], [], []>} : vector<4x640xf32>, vector<640x256xf32>, vector<4x256xf32> -> vector<4x256xf32>
    %40 = arith.addf %33, %39 : vector<4x256xf32>
    %c4 = arith.constant 4 : index
    %c0_36 = arith.constant 0 : index
    %c0_37 = arith.constant 0 : index
    %41 = vector.load %arg5[%c4, %c0_36, %c0_37] : memref<5x4x32xf32, #tpu.memory_space<vmem>>, vector<1x4x32xf32>
    %42 = vector.shape_cast %41 : vector<1x4x32xf32> to vector<4x32xf32>
    %cst_38 = arith.constant dense<0.000000e+00> : vector<4x640xf32>
    %43 = tpu.matmul %42, %11, %cst_38 {dimension_numbers = #tpu.dot_dimension_numbers<[1], [0], [0], [1], [0, 0, 1, 1], [], []>} : vector<4x32xf32>, vector<32x640xf32>, vector<4x640xf32> -> vector<4x640xf32>
    %c4_39 = arith.constant 4 : index
    %c0_40 = arith.constant 0 : index
    %c0_41 = arith.constant 0 : index
    %44 = vector.load %arg4[%c4_39, %c0_40, %c0_41] : memref<5x640x256xf32, #tpu.memory_space<vmem>>, vector<1x640x256xf32>
    %45 = vector.shape_cast %44 : vector<1x640x256xf32> to vector<640x256xf32>
    %cst_42 = arith.constant dense<0.000000e+00> : vector<4x256xf32>
    %46 = tpu.matmul %43, %45, %cst_42 {dimension_numbers = #tpu.dot_dimension_numbers<[1], [0], [0], [1], [0, 0, 1, 1], [], []>} : vector<4x640xf32>, vector<640x256xf32>, vector<4x256xf32> -> vector<4x256xf32>
    %47 = arith.addf %40, %46 : vector<4x256xf32>
    %c0_43 = arith.constant 0 : index
    %c0_44 = arith.constant 0 : index
    %48 = vector.load %arg6[%c0_43, %c0_44] : memref<4x1xf32, #tpu.memory_space<vmem>>, vector<4x1xf32>
    %49 = vector.broadcast %48 : vector<4x1xf32> to vector<4x256xf32>
    %50 = arith.addf %47, %49 : vector<4x256xf32>
    %cst_45 = arith.constant 0.000000e+00 : f32
    %51 = vector.broadcast %cst_45 : f32 to vector<4x256xf32>
    %52 = arith.maximumf %50, %51 : vector<4x256xf32>
    %c0_46 = arith.constant 0 : index
    %c0_47 = arith.constant 0 : index
    %c0_48 = arith.constant 0 : index
    %53 = vector.load %arg7[%c0_46, %c0_47, %c0_48] : memref<1x4x256xf32, #tpu.memory_space<vmem>>, vector<1x4x256xf32>
    %54 = vector.shape_cast %53 : vector<1x4x256xf32> to vector<4x256xf32>
    %55 = vector.shape_cast %52 : vector<4x256xf32> to vector<1x4x256xf32>
    tpu.vector_store %arg7[%c0_46, %c0_47, %c0_48], %55 {strides = array<i32>} : memref<1x4x256xf32, #tpu.memory_space<vmem>>, vector<1x4x256xf32>,
    return
  }
  func.func @transform_0(%arg0: i32) -> (i32, i32, i32) {
    %c0_i32 = arith.constant 0 : i32
    %c0_i32_0 = arith.constant 0 : i32
    %c0_i32_1 = arith.constant 0 : i32
    return %arg0, %c0_i32, %c0_i32_0 : i32, i32, i32
  }
  func.func @transform_1(%arg0: i32) -> (i32, i32) {
    %c0_i32 = arith.constant 0 : i32
    %c0_i32_0 = arith.constant 0 : i32
    %c0_i32_1 = arith.constant 0 : i32
    return %c0_i32, %c0_i32_0 : i32, i32
  }
  func.func @transform_2(%arg0: i32) -> (i32, i32) {
    %c0_i32 = arith.constant 0 : i32
    %c0_i32_0 = arith.constant 0 : i32
    %c0_i32_1 = arith.constant 0 : i32
    return %c0_i32, %c0_i32_0 : i32, i32
  }
  func.func @transform_3(%arg0: i32) -> (i32, i32, i32) {
    %c0_i32 = arith.constant 0 : i32
    %c0_i32_0 = arith.constant 0 : i32
    %c0_i32_1 = arith.constant 0 : i32
    %c0_i32_2 = arith.constant 0 : i32
    return %c0_i32, %c0_i32_0, %c0_i32_1 : i32, i32, i32
  }
  func.func @transform_4(%arg0: i32) -> (i32, i32, i32) {
    %c0_i32 = arith.constant 0 : i32
    %c0_i32_0 = arith.constant 0 : i32
    %c0_i32_1 = arith.constant 0 : i32
    %c0_i32_2 = arith.constant 0 : i32
    return %c0_i32, %c0_i32_0, %c0_i32_1 : i32, i32, i32
  }
  func.func @transform_5(%arg0: i32) -> (i32, i32) {
    %c0_i32 = arith.constant 0 : i32
    %c0_i32_0 = arith.constant 0 : i32
    %c0_i32_1 = arith.constant 0 : i32
    return %c0_i32, %c0_i32_0 : i32, i32
  }
  func.func @transform_6(%arg0: i32) -> (i32, i32, i32) {
    %c0_i32 = arith.constant 0 : i32
    %c0_i32_0 = arith.constant 0 : i32
    %c0_i32_1 = arith.constant 0 : i32
    return %arg0, %c0_i32, %c0_i32_0 : i32, i32, i32
  }
}

module attributes {stable_mosaic.version = 11 : i64} {
  func.func @_seteq4to4_kernel(%arg0: i32, %arg1: memref<1x4x256xf32, #tpu.memory_space<vmem>>, %arg2: memref<256x640xf32, #tpu.memory_space<vmem>>, %arg3: memref<16x640xf32, #tpu.memory_space<vmem>>, %arg4: memref<5x640x256xf32, #tpu.memory_space<vmem>>, %arg5: memref<5x8x64xf32, #tpu.memory_space<vmem>>, %arg6: memref<8x1xf32, #tpu.memory_space<vmem>>, %arg7: memref<3x8xf32, #tpu.memory_space<vmem>>, %arg8: memref<3x1xf32, #tpu.memory_space<vmem>>, %arg9: memref<1x3x256xf32, #tpu.memory_space<vmem>>) attributes {dimension_semantics = [#tpu.dimension_semantics<parallel>], iteration_bounds = array<i64: 4>, scalar_prefetch = 0 : i64, scratch_operands = 0 : i64, tpu.core_type = #tpu.core_type<tc>, window_params = [{transform_indices = @transform_0, window_bounds = array<i64: 1, 4, 256>}, {pipeline_mode = #tpu.pipeline_mode<synchronous>, transform_indices = @transform_1, window_bounds = array<i64: 256, 640>}, {pipeline_mode = #tpu.pipeline_mode<synchronous>, transform_indices = @transform_2, window_bounds = array<i64: 16, 640>}, {pipeline_mode = #tpu.pipeline_mode<synchronous>, transform_indices = @transform_3, window_bounds = array<i64: 5, 640, 256>}, {pipeline_mode = #tpu.pipeline_mode<synchronous>, transform_indices = @transform_4, window_bounds = array<i64: 5, 8, 64>}, {pipeline_mode = #tpu.pipeline_mode<synchronous>, transform_indices = @transform_5, window_bounds = array<i64: 8, 1>}, {pipeline_mode = #tpu.pipeline_mode<synchronous>, transform_indices = @transform_6, window_bounds = array<i64: 3, 8>}, {pipeline_mode = #tpu.pipeline_mode<synchronous>, transform_indices = @transform_7, window_bounds = array<i64: 3, 1>}, {transform_indices = @transform_8, window_bounds = array<i64: 1, 3, 256>}]} {
    %c0 = arith.constant 0 : index
    %c0_0 = arith.constant 0 : index
    %c0_1 = arith.constant 0 : index
    %0 = vector.load %arg1[%c0, %c0_0, %c0_1] : memref<1x4x256xf32, #tpu.memory_space<vmem>>, vector<1x4x256xf32>
    %1 = vector.shape_cast %0 : vector<1x4x256xf32> to vector<4x256xf32>
    %c0_2 = arith.constant 0 : index
    %c0_3 = arith.constant 0 : index
    %2 = vector.load %arg2[%c0_2, %c0_3] : memref<256x640xf32, #tpu.memory_space<vmem>>, vector<256x640xf32>
    %cst = arith.constant dense<0.000000e+00> : vector<4x640xf32>
    %3 = tpu.matmul %1, %2, %cst {dimension_numbers = #tpu.dot_dimension_numbers<[1], [0], [0], [1], [0, 0, 1, 1], [], []>} : vector<4x256xf32>, vector<256x640xf32>, vector<4x640xf32> -> vector<4x640xf32>
    %c0_4 = arith.constant 0 : index
    %c0_5 = arith.constant 0 : index
    %4 = vector.load %arg3[%c0_4, %c0_5] : memref<16x640xf32, #tpu.memory_space<vmem>>, vector<16x640xf32>
    %5 = vector.extract_strided_slice %3 {offsets = [0, 0], sizes = [1, 640], strides = [1, 1]} : vector<4x640xf32> to vector<1x640xf32>
    %6 = vector.broadcast %5 : vector<1x640xf32> to vector<16x640xf32>
    %7 = arith.mulf %6, %4 : vector<16x640xf32>
    %8 = vector.extract_strided_slice %3 {offsets = [1, 0], sizes = [1, 640], strides = [1, 1]} : vector<4x640xf32> to vector<1x640xf32>
    %9 = vector.broadcast %8 : vector<1x640xf32> to vector<16x640xf32>
    %10 = arith.mulf %9, %4 : vector<16x640xf32>
    %11 = vector.extract_strided_slice %3 {offsets = [2, 0], sizes = [1, 640], strides = [1, 1]} : vector<4x640xf32> to vector<1x640xf32>
    %12 = vector.broadcast %11 : vector<1x640xf32> to vector<16x640xf32>
    %13 = arith.mulf %12, %4 : vector<16x640xf32>
    %14 = vector.extract_strided_slice %3 {offsets = [3, 0], sizes = [1, 640], strides = [1, 1]} : vector<4x640xf32> to vector<1x640xf32>
    %15 = vector.broadcast %14 : vector<1x640xf32> to vector<16x640xf32>
    %16 = arith.mulf %15, %4 : vector<16x640xf32>
    %17 = tpu.concatenate %7, %10, %13, %16 in 0 : vector<16x640xf32>, vector<16x640xf32>, vector<16x640xf32>, vector<16x640xf32> -> vector<64x640xf32>
    %cst_6 = arith.constant 0.000000e+00 : f32
    %18 = vector.broadcast %cst_6 : f32 to vector<8x256xf32>
    %c0_7 = arith.constant 0 : index
    %c0_8 = arith.constant 0 : index
    %c0_9 = arith.constant 0 : index
    %19 = vector.load %arg5[%c0_7, %c0_8, %c0_9] : memref<5x8x64xf32, #tpu.memory_space<vmem>>, vector<1x8x64xf32>
    %20 = vector.shape_cast %19 : vector<1x8x64xf32> to vector<8x64xf32>
    %cst_10 = arith.constant dense<0.000000e+00> : vector<8x640xf32>
    %21 = tpu.matmul %20, %17, %cst_10 {dimension_numbers = #tpu.dot_dimension_numbers<[1], [0], [0], [1], [0, 0, 1, 1], [], []>} : vector<8x64xf32>, vector<64x640xf32>, vector<8x640xf32> -> vector<8x640xf32>
    %c0_11 = arith.constant 0 : index
    %c0_12 = arith.constant 0 : index
    %c0_13 = arith.constant 0 : index
    %22 = vector.load %arg4[%c0_11, %c0_12, %c0_13] : memref<5x640x256xf32, #tpu.memory_space<vmem>>, vector<1x640x256xf32>
    %23 = vector.shape_cast %22 : vector<1x640x256xf32> to vector<640x256xf32>
    %cst_14 = arith.constant dense<0.000000e+00> : vector<8x256xf32>
    %24 = tpu.matmul %21, %23, %cst_14 {dimension_numbers = #tpu.dot_dimension_numbers<[1], [0], [0], [1], [0, 0, 1, 1], [], []>} : vector<8x640xf32>, vector<640x256xf32>, vector<8x256xf32> -> vector<8x256xf32>
    %25 = arith.addf %18, %24 : vector<8x256xf32>
    %c1 = arith.constant 1 : index
    %c0_15 = arith.constant 0 : index
    %c0_16 = arith.constant 0 : index
    %26 = vector.load %arg5[%c1, %c0_15, %c0_16] : memref<5x8x64xf32, #tpu.memory_space<vmem>>, vector<1x8x64xf32>
    %27 = vector.shape_cast %26 : vector<1x8x64xf32> to vector<8x64xf32>
    %cst_17 = arith.constant dense<0.000000e+00> : vector<8x640xf32>
    %28 = tpu.matmul %27, %17, %cst_17 {dimension_numbers = #tpu.dot_dimension_numbers<[1], [0], [0], [1], [0, 0, 1, 1], [], []>} : vector<8x64xf32>, vector<64x640xf32>, vector<8x640xf32> -> vector<8x640xf32>
    %c1_18 = arith.constant 1 : index
    %c0_19 = arith.constant 0 : index
    %c0_20 = arith.constant 0 : index
    %29 = vector.load %arg4[%c1_18, %c0_19, %c0_20] : memref<5x640x256xf32, #tpu.memory_space<vmem>>, vector<1x640x256xf32>
    %30 = vector.shape_cast %29 : vector<1x640x256xf32> to vector<640x256xf32>
    %cst_21 = arith.constant dense<0.000000e+00> : vector<8x256xf32>
    %31 = tpu.matmul %28, %30, %cst_21 {dimension_numbers = #tpu.dot_dimension_numbers<[1], [0], [0], [1], [0, 0, 1, 1], [], []>} : vector<8x640xf32>, vector<640x256xf32>, vector<8x256xf32> -> vector<8x256xf32>
    %32 = arith.addf %25, %31 : vector<8x256xf32>
    %c2 = arith.constant 2 : index
    %c0_22 = arith.constant 0 : index
    %c0_23 = arith.constant 0 : index
    %33 = vector.load %arg5[%c2, %c0_22, %c0_23] : memref<5x8x64xf32, #tpu.memory_space<vmem>>, vector<1x8x64xf32>
    %34 = vector.shape_cast %33 : vector<1x8x64xf32> to vector<8x64xf32>
    %cst_24 = arith.constant dense<0.000000e+00> : vector<8x640xf32>
    %35 = tpu.matmul %34, %17, %cst_24 {dimension_numbers = #tpu.dot_dimension_numbers<[1], [0], [0], [1], [0, 0, 1, 1], [], []>} : vector<8x64xf32>, vector<64x640xf32>, vector<8x640xf32> -> vector<8x640xf32>
    %c2_25 = arith.constant 2 : index
    %c0_26 = arith.constant 0 : index
    %c0_27 = arith.constant 0 : index
    %36 = vector.load %arg4[%c2_25, %c0_26, %c0_27] : memref<5x640x256xf32, #tpu.memory_space<vmem>>, vector<1x640x256xf32>
    %37 = vector.shape_cast %36 : vector<1x640x256xf32> to vector<640x256xf32>
    %cst_28 = arith.constant dense<0.000000e+00> : vector<8x256xf32>
    %38 = tpu.matmul %35, %37, %cst_28 {dimension_numbers = #tpu.dot_dimension_numbers<[1], [0], [0], [1], [0, 0, 1, 1], [], []>} : vector<8x640xf32>, vector<640x256xf32>, vector<8x256xf32> -> vector<8x256xf32>
    %39 = arith.addf %32, %38 : vector<8x256xf32>
    %c3 = arith.constant 3 : index
    %c0_29 = arith.constant 0 : index
    %c0_30 = arith.constant 0 : index
    %40 = vector.load %arg5[%c3, %c0_29, %c0_30] : memref<5x8x64xf32, #tpu.memory_space<vmem>>, vector<1x8x64xf32>
    %41 = vector.shape_cast %40 : vector<1x8x64xf32> to vector<8x64xf32>
    %cst_31 = arith.constant dense<0.000000e+00> : vector<8x640xf32>
    %42 = tpu.matmul %41, %17, %cst_31 {dimension_numbers = #tpu.dot_dimension_numbers<[1], [0], [0], [1], [0, 0, 1, 1], [], []>} : vector<8x64xf32>, vector<64x640xf32>, vector<8x640xf32> -> vector<8x640xf32>
    %c3_32 = arith.constant 3 : index
    %c0_33 = arith.constant 0 : index
    %c0_34 = arith.constant 0 : index
    %43 = vector.load %arg4[%c3_32, %c0_33, %c0_34] : memref<5x640x256xf32, #tpu.memory_space<vmem>>, vector<1x640x256xf32>
    %44 = vector.shape_cast %43 : vector<1x640x256xf32> to vector<640x256xf32>
    %cst_35 = arith.constant dense<0.000000e+00> : vector<8x256xf32>
    %45 = tpu.matmul %42, %44, %cst_35 {dimension_numbers = #tpu.dot_dimension_numbers<[1], [0], [0], [1], [0, 0, 1, 1], [], []>} : vector<8x640xf32>, vector<640x256xf32>, vector<8x256xf32> -> vector<8x256xf32>
    %46 = arith.addf %39, %45 : vector<8x256xf32>
    %c4 = arith.constant 4 : index
    %c0_36 = arith.constant 0 : index
    %c0_37 = arith.constant 0 : index
    %47 = vector.load %arg5[%c4, %c0_36, %c0_37] : memref<5x8x64xf32, #tpu.memory_space<vmem>>, vector<1x8x64xf32>
    %48 = vector.shape_cast %47 : vector<1x8x64xf32> to vector<8x64xf32>
    %cst_38 = arith.constant dense<0.000000e+00> : vector<8x640xf32>
    %49 = tpu.matmul %48, %17, %cst_38 {dimension_numbers = #tpu.dot_dimension_numbers<[1], [0], [0], [1], [0, 0, 1, 1], [], []>} : vector<8x64xf32>, vector<64x640xf32>, vector<8x640xf32> -> vector<8x640xf32>
    %c4_39 = arith.constant 4 : index
    %c0_40 = arith.constant 0 : index
    %c0_41 = arith.constant 0 : index
    %50 = vector.load %arg4[%c4_39, %c0_40, %c0_41] : memref<5x640x256xf32, #tpu.memory_space<vmem>>, vector<1x640x256xf32>
    %51 = vector.shape_cast %50 : vector<1x640x256xf32> to vector<640x256xf32>
    %cst_42 = arith.constant dense<0.000000e+00> : vector<8x256xf32>
    %52 = tpu.matmul %49, %51, %cst_42 {dimension_numbers = #tpu.dot_dimension_numbers<[1], [0], [0], [1], [0, 0, 1, 1], [], []>} : vector<8x640xf32>, vector<640x256xf32>, vector<8x256xf32> -> vector<8x256xf32>
    %53 = arith.addf %46, %52 : vector<8x256xf32>
    %c0_43 = arith.constant 0 : index
    %c0_44 = arith.constant 0 : index
    %54 = vector.load %arg6[%c0_43, %c0_44] : memref<8x1xf32, #tpu.memory_space<vmem>>, vector<8x1xf32>
    %55 = vector.broadcast %54 : vector<8x1xf32> to vector<8x256xf32>
    %56 = arith.addf %53, %55 : vector<8x256xf32>
    %cst_45 = arith.constant 0.000000e+00 : f32
    %57 = vector.broadcast %cst_45 : f32 to vector<8x256xf32>
    %58 = arith.maximumf %56, %57 : vector<8x256xf32>
    %c0_46 = arith.constant 0 : index
    %c0_47 = arith.constant 0 : index
    %59 = vector.load %arg7[%c0_46, %c0_47] : memref<3x8xf32, #tpu.memory_space<vmem>>, vector<3x8xf32>
    %cst_48 = arith.constant dense<0.000000e+00> : vector<3x256xf32>
    %60 = tpu.matmul %59, %58, %cst_48 {dimension_numbers = #tpu.dot_dimension_numbers<[1], [0], [0], [1], [0, 0, 1, 1], [], []>} : vector<3x8xf32>, vector<8x256xf32>, vector<3x256xf32> -> vector<3x256xf32>
    %c0_49 = arith.constant 0 : index
    %c0_50 = arith.constant 0 : index
    %61 = vector.load %arg8[%c0_49, %c0_50] : memref<3x1xf32, #tpu.memory_space<vmem>>, vector<3x1xf32>
    %62 = vector.broadcast %61 : vector<3x1xf32> to vector<3x256xf32>
    %63 = arith.addf %60, %62 : vector<3x256xf32>
    %c0_51 = arith.constant 0 : index
    %c0_52 = arith.constant 0 : index
    %c0_53 = arith.constant 0 : index
    %64 = vector.load %arg9[%c0_51, %c0_52, %c0_53] : memref<1x3x256xf32, #tpu.memory_space<vmem>>, vector<1x3x256xf32>
    %65 = vector.shape_cast %64 : vector<1x3x256xf32> to vector<3x256xf32>
    %66 = vector.shape_cast %63 : vector<3x256xf32> to vector<1x3x256xf32>
    tpu.vector_store %arg9[%c0_51, %c0_52, %c0_53], %66 {strides = array<i32>} : memref<1x3x256xf32, #tpu.memory_space<vmem>>, vector<1x3x256xf32>,
    return
  }
  func.func @transform_0(%arg0: i32) -> (i32, i32, i32) {
    %c0_i32 = arith.constant 0 : i32
    %c0_i32_0 = arith.constant 0 : i32
    %c0_i32_1 = arith.constant 0 : i32
    return %arg0, %c0_i32, %c0_i32_0 : i32, i32, i32
  }
  func.func @transform_1(%arg0: i32) -> (i32, i32) {
    %c0_i32 = arith.constant 0 : i32
    %c0_i32_0 = arith.constant 0 : i32
    %c0_i32_1 = arith.constant 0 : i32
    return %c0_i32, %c0_i32_0 : i32, i32
  }
  func.func @transform_2(%arg0: i32) -> (i32, i32) {
    %c0_i32 = arith.constant 0 : i32
    %c0_i32_0 = arith.constant 0 : i32
    %c0_i32_1 = arith.constant 0 : i32
    return %c0_i32, %c0_i32_0 : i32, i32
  }
  func.func @transform_3(%arg0: i32) -> (i32, i32, i32) {
    %c0_i32 = arith.constant 0 : i32
    %c0_i32_0 = arith.constant 0 : i32
    %c0_i32_1 = arith.constant 0 : i32
    %c0_i32_2 = arith.constant 0 : i32
    return %c0_i32, %c0_i32_0, %c0_i32_1 : i32, i32, i32
  }
  func.func @transform_4(%arg0: i32) -> (i32, i32, i32) {
    %c0_i32 = arith.constant 0 : i32
    %c0_i32_0 = arith.constant 0 : i32
    %c0_i32_1 = arith.constant 0 : i32
    %c0_i32_2 = arith.constant 0 : i32
    return %c0_i32, %c0_i32_0, %c0_i32_1 : i32, i32, i32
  }
  func.func @transform_5(%arg0: i32) -> (i32, i32) {
    %c0_i32 = arith.constant 0 : i32
    %c0_i32_0 = arith.constant 0 : i32
    %c0_i32_1 = arith.constant 0 : i32
    return %c0_i32, %c0_i32_0 : i32, i32
  }
  func.func @transform_6(%arg0: i32) -> (i32, i32) {
    %c0_i32 = arith.constant 0 : i32
    %c0_i32_0 = arith.constant 0 : i32
    %c0_i32_1 = arith.constant 0 : i32
    return %c0_i32, %c0_i32_0 : i32, i32
  }
  func.func @transform_7(%arg0: i32) -> (i32, i32) {
    %c0_i32 = arith.constant 0 : i32
    %c0_i32_0 = arith.constant 0 : i32
    %c0_i32_1 = arith.constant 0 : i32
    return %c0_i32, %c0_i32_0 : i32, i32
  }
  func.func @transform_8(%arg0: i32) -> (i32, i32, i32) {
    %c0_i32 = arith.constant 0 : i32
    %c0_i32_0 = arith.constant 0 : i32
    %c0_i32_1 = arith.constant 0 : i32
    return %arg0, %c0_i32, %c0_i32_0 : i32, i32, i32
  }
}

</mosaic_0001>

<bundles_post_ra>
// kernel: setnet_4to4_forward.2
= control target key start
LH: loop header
LB: loop body
LE: loop exit
PB: predicated region body
PF: predicated region fallthrough
CT: control target
= control target key end

     0   :  { %11 = vsyncpa [#allocation3], 0  ;;  %s3765_s0 = inlined_call_operand.vmem [shape: f32[4,2,256], index: 0, kind: input, shape index: {}]   ;;  %s3766_s1 = inlined_call_operand.hbm [shape: f32[256,640], index: 1, kind: input, shape index: {}]   ;;  %s3767_s2 = inlined_call_operand.hbm [shape: f32[16,640], index: 2, kind: input, shape index: {}]   ;;  %s3768_s3 = inlined_call_operand.hbm [shape: f32[5,640,256], index: 3, kind: input, shape index: {}]   ;;  %s3769_s4 = inlined_call_operand.vmem [shape: f32[5,4,32], index: 4, kind: input, shape index: {}]   ;;  %s3770_s5 = inlined_call_operand.vmem [shape: f32[4,1], index: 5, kind: input, shape index: {}]   ;;  %s3771_s6 = inlined_call_operand.vmem [shape: f32[4,4,256], index: 6, kind: output, shape index: {}]  }
   0x1   :  { %12 = vsyncpa [#allocation5], 0  ;;  %s3389_s21 = smov 0  }
   0x2 LB: > { %s3395_s22 = sadd.s32 4294967295, %s3344_s21   ;;  %p3149_p0 = scmp.ge.s32.totalorder %s3344_s21, 1  ;;  %s3344_s21 = sphi %s3389_s21, %s18_s21  }
   0x3   : > { %p180_p1 = scmp.lt.s32.totalorder %s3344_s21, 5  ;;  %p3217_p2 = scmp.eq.s32.totalorder %s3395_s22, 0 }
   0x4   : > { %s205_s25 = sshll.u32 %s3767_s2, 4  ;;  %s191_s29 = sshll.u32 %s3766_s1, 4  ;;  %s206_s25 = int_to_ptr.hbm [resolvable:$true] %s205_s25  ;;  %s192_s29 = int_to_ptr.hbm [resolvable:$true] %s191_s29 }
   0x5   : > { %p3403_p3 = pnand %p3149_p0, %p180_p1  ;;  %s3346_s30 = smov [#allocation4]  }
   0x6   : > { %s207_s7 = sshll.u32 %s3346_s30, 4  ;;  %s3347_s9 = smov [#allocation2]   ;;  %s208_s7 = int_to_ptr.vmem [resolvable:$true] %s207_s7 }
   0x7   : > { %p3207_p4 = pneg %p3403_p3  ;;  %s193_s10 = sshll.u32 %s3347_s9, 4  ;;  %s194_s10 = int_to_ptr.vmem [resolvable:$true] %s193_s10 }
   0x8   : > { %s219_s13 = sshll.u32 %s3768_s3, 4  ;;  %s3348_s14 = smov 640   ;;  %s220_s13 = int_to_ptr.hbm [resolvable:$true] %s219_s13 }
   0x9   : > { %p3414_p5 = pnand %p3217_p2, %p3207_p4  ;;  %s3349_s15 = smov 40  }
   0xa   : > { %s3350_s16 = smov [#allocation6]   ;;  %s3351_s18 = smov 256  }
   0xb   : > { %3213 = dma.hbm_to_vmem [thread:$0]  (!%p3414_p5), %s206_s25, 1280, %s208_s7, [#allocation5], %s3348_s14, %s3348_s14, %s3349_s15  }
   0xc   : > { %3210 = dma.hbm_to_vmem [thread:$0]  (!%p3414_p5), %s192_s29, 20480, %s194_s10, [#allocation3], %s3348_s14, %s3348_s14, %s3349_s15  }
   0xd   : > { %s221_s17 = sshll.u32 %s3350_s16, 4  ;;  %s3352_s19 = smov 16   ;;  %s222_s17 = int_to_ptr.vmem [resolvable:$true] %s221_s17 }
   0xe   : > { %3216 = dma.hbm_to_vmem [thread:$0]  (!%p3414_p5), %s220_s13, 102400, %s222_s17, [#allocation5], %s3351_s18, %s3351_s18, %s3352_s19  }
   0xf   : > { %251 = sbr.rel (%p3403_p3) target bundleno = 1125 (0x465), region = 44 }
  0x14   : > { %3335 = dma.done.wait (%p3217_p2), [#allocation3], 20480  }
  0x15   : > { %3337 = vsyncadd (%p3217_p2), [#allocation3], 4294946816 }
  0x16   : > { %3339 = dma.done.wait (%p3217_p2), [#allocation5], 103680  }
  0x17   : > { %3341 = vsyncadd (%p3217_p2), [#allocation5], 4294863616  ;;  %v378_v0 = vld [vmem:[#allocation2 + $0x258] sm:$0xff]  ;;  %v379_v2 = vld [vmem:[#allocation2 + $0x260] sm:$0xff]  ;;  %p292_p6 = scmp.lt.s32.totalorder %s3395_s22, 3  ;;  %vm710_vm0 = vcmask 261120  }
  0x18   : > { %v458_v1 = vld [vmem:[#allocation2 + $0x4d8] sm:$0xff]  ;;  %469 = vmatpush.msra.mxu0 %v378_v0  ;;  %v459_v3 = vld [vmem:[#allocation2 + $0x4e0] sm:$0xff]  ;;  %v373_v4 = vld [vmem:[#allocation2 + $0x230] sm:$0xff]  ;;  %509 = vmatpush.msra.mxu2 %v379_v2  ;;  %vm3057_vm1 = vcmask 1043456  }
  0x19   : > { %489 = vmatpush.msra.mxu1 %v458_v1  ;;  %v453_v5 = vld [vmem:[#allocation2 + $0x4b0] sm:$0xff]  ;;  %529 = vmatpush.msra.mxu3 %v459_v3  ;;  %v374_v6 = vld [vmem:[#allocation2 + $0x238] sm:$0xff]  ;;  %v368_v8 = vld [vmem:[#allocation2 + $0x208] sm:$0xff]  ;;  %s3775_s22 = smov (!%p292_p6, %s3395_s22), 3 }
  0x1a   : > { %v454_v7 = vld [vmem:[#allocation2 + $0x4b8] sm:$0xff]  ;;  %470 = vmatpush.msra.mxu0 %v373_v4  ;;  %v448_v9 = vld [vmem:[#allocation2 + $0x488] sm:$0xff]  ;;  %v369_v10 = vld [vmem:[#allocation2 + $0x210] sm:$0xff]  ;;  %510 = vmatpush.msra.mxu2 %v374_v6  ;;  %s3193_s20 = sshll.u32 %s3775_s22, 2  ;;  %s3194_s14 = sshll.u32 %s3775_s22, 3 }
  0x1b   : > { %490 = vmatpush.msra.mxu1 %v453_v5  ;;  %v449_v11 = vld [vmem:[#allocation2 + $0x490] sm:$0xff]  ;;  %530 = vmatpush.msra.mxu3 %v454_v7  ;;  %v363_v12 = vld [vmem:[#allocation2 + $0x1e0] sm:$0xff]  ;;  %v364_v14 = vld [vmem:[#allocation2 + $0x1e8] sm:$0xff]  ;;  %s296_s25 = scalar_lea.vmem %s3765_s0, %s3193_s20  ;;  %s301_s17 = scalar_lea.vmem %s3771_s6, %s3194_s14 }
  0x1c   : > { %v443_v13 = vld [vmem:[#allocation2 + $0x460] sm:$0xff]  ;;  %471 = vmatpush.msra.mxu0 %v368_v8  ;;  %v444_v15 = vld [vmem:[#allocation2 + $0x468] sm:$0xff]  ;;  %511 = vmatpush.msra.mxu2 %v369_v10  ;;  %v358_v16 = vld [vmem:[#allocation2 + $0x1b8] sm:$0xff] }
  0x1d   : > { %491 = vmatpush.msra.mxu1 %v448_v9  ;;  %531 = vmatpush.msra.mxu3 %v449_v11  ;;  %v438_v17 = vld [vmem:[#allocation2 + $0x438] sm:$0xff]  ;;  %v359_v18 = vld [vmem:[#allocation2 + $0x1c0] sm:$0xff]  ;;  %v353_v20 = vld [vmem:[#allocation2 + $0x190] sm:$0xff] }
  0x1e   : > { %472 = vmatpush.msra.mxu0 %v363_v12  ;;  %v439_v19 = vld [vmem:[#allocation2 + $0x440] sm:$0xff]  ;;  %512 = vmatpush.msra.mxu2 %v364_v14  ;;  %v433_v21 = vld [vmem:[#allocation2 + $0x410] sm:$0xff]  ;;  %v354_v22 = vld [vmem:[#allocation2 + $0x198] sm:$0xff] }
  0x1f   : > { %492 = vmatpush.msra.mxu1 %v443_v13  ;;  %532 = vmatpush.msra.mxu3 %v444_v15  ;;  %v434_v23 = vld [vmem:[#allocation2 + $0x418] sm:$0xff]  ;;  %v348_v24 = vld [vmem:[#allocation2 + $0x168] sm:$0xff]  ;;  %v349_v26 = vld [vmem:[#allocation2 + $0x170] sm:$0xff] }
  0x20   : > { %473 = vmatpush.msra.mxu0 %v358_v16  ;;  %513 = vmatpush.msra.mxu2 %v359_v18  ;;  %v428_v25 = vld [vmem:[#allocation2 + $0x3e8] sm:$0xff]  ;;  %v429_v27 = vld [vmem:[#allocation2 + $0x3f0] sm:$0xff]  ;;  %v343_v28 = vld [vmem:[#allocation2 + $0x140] sm:$0xff] }
  0x21   : > { %493 = vmatpush.msra.mxu1 %v438_v17  ;;  %533 = vmatpush.msra.mxu3 %v439_v19  ;;  %v423_v29 = vld [vmem:[#allocation2 + $0x3c0] sm:$0xff]  ;;  %v344_v30 = vld [vmem:[#allocation2 + $0x148] sm:$0xff]  ;;  %v338_v32 = vld [vmem:[#allocation2 + $0x118] sm:$0xff] }
  0x22   : > { %474 = vmatpush.msra.mxu0 %v353_v20  ;;  %514 = vmatpush.msra.mxu2 %v354_v22  ;;  %v424_v31 = vld [vmem:[#allocation2 + $0x3c8] sm:$0xff]  ;;  %v418_v33 = vld [vmem:[#allocation2 + $0x398] sm:$0xff]  ;;  %v339_v34 = vld [vmem:[#allocation2 + $0x120] sm:$0xff] }
  0x23   : > { %494 = vmatpush.msra.mxu1 %v433_v21  ;;  %534 = vmatpush.msra.mxu3 %v434_v23  ;;  %v419_v35 = vld [vmem:[#allocation2 + $0x3a0] sm:$0xff]  ;;  %v333_v36 = vld [vmem:[#allocation2 + $0xf0] sm:$0xff]  ;;  %v334_v38 = vld [vmem:[#allocation2 + $0xf8] sm:$0xff] }
  0x24   : > { %475 = vmatpush.msra.mxu0 %v348_v24  ;;  %515 = vmatpush.msra.mxu2 %v349_v26  ;;  %v413_v37 = vld [vmem:[#allocation2 + $0x370] sm:$0xff]  ;;  %v414_v39 = vld [vmem:[#allocation2 + $0x378] sm:$0xff]  ;;  %v328_v40 = vld [vmem:[#allocation2 + $0xc8] sm:$0xff] }
  0x25   : > { %495 = vmatpush.msra.mxu1 %v428_v25  ;;  %535 = vmatpush.msra.mxu3 %v429_v27  ;;  %v408_v41 = vld [vmem:[#allocation2 + $0x348] sm:$0xff]  ;;  %v329_v42 = vld [vmem:[#allocation2 + $0xd0] sm:$0xff]  ;;  %v323_v44 = vld [vmem:[#allocation2 + $0xa0] sm:$0xff] }
  0x26   : > { %476 = vmatpush.msra.mxu0 %v343_v28  ;;  %516 = vmatpush.msra.mxu2 %v344_v30  ;;  %v409_v43 = vld [vmem:[#allocation2 + $0x350] sm:$0xff]  ;;  %v403_v45 = vld [vmem:[#allocation2 + $0x320] sm:$0xff]  ;;  %v324_v46 = vld [vmem:[#allocation2 + $0xa8] sm:$0xff] }
  0x27   : > { %496 = vmatpush.msra.mxu1 %v423_v29  ;;  %536 = vmatpush.msra.mxu3 %v424_v31  ;;  %v404_v47 = vld [vmem:[#allocation2 + $0x328] sm:$0xff]  ;;  %v318_v48 = vld [vmem:[#allocation2 + $0x78] sm:$0xff]  ;;  %v319_v50 = vld [vmem:[#allocation2 + $0x80] sm:$0xff] }
  0x28   : > { %477 = vmatpush.msra.mxu0 %v338_v32  ;;  %517 = vmatpush.msra.mxu2 %v339_v34  ;;  %v398_v49 = vld [vmem:[#allocation2 + $0x2f8] sm:$0xff]  ;;  %v399_v51 = vld [vmem:[#allocation2 + $0x300] sm:$0xff]  ;;  %v313_v52 = vld [vmem:[#allocation2 + $0x50] sm:$0xff] }
  0x29   : > { %497 = vmatpush.msra.mxu1 %v418_v33  ;;  %537 = vmatpush.msra.mxu3 %v419_v35  ;;  %v393_v53 = vld [vmem:[#allocation2 + $0x2d0] sm:$0xff]  ;;  %v314_v54 = vld [vmem:[#allocation2 + $0x58] sm:$0xff]  ;;  %v308_v56 = vld [vmem:[#allocation2 + $0x28] sm:$0xff] }
  0x2a   : > { %478 = vmatpush.msra.mxu0 %v333_v36  ;;  %518 = vmatpush.msra.mxu2 %v334_v38  ;;  %v394_v55 = vld [vmem:[#allocation2 + $0x2d8] sm:$0xff]  ;;  %v388_v57 = vld [vmem:[#allocation2 + $0x2a8] sm:$0xff]  ;;  %v309_v58 = vld [vmem:[#allocation2 + $0x30] sm:$0xff] }
  0x2b   : > { %498 = vmatpush.msra.mxu1 %v413_v37  ;;  %538 = vmatpush.msra.mxu3 %v414_v39  ;;  %v389_v59 = vld [vmem:[#allocation2 + $0x2b0] sm:$0xff]  ;;  %v303_v60 = vld [vmem:[#allocation2] sm:$0xff]  ;;  %v304_v62 = vld [vmem:[#allocation2 + $0x8] sm:$0xff] }
  0x2c   : > { %479 = vmatpush.msra.mxu0 %v328_v40  ;;  %519 = vmatpush.msra.mxu2 %v329_v42  ;;  %v383_v61 = vld [vmem:[#allocation2 + $0x280] sm:$0xff]  ;;  %v384_v63 = vld [vmem:[#allocation2 + $0x288] sm:$0xff]  ;;  %v381_v2 = vld [vmem:[#allocation2 + $0x270] sm:$0xff] }
  0x2d   : > { %499 = vmatpush.msra.mxu1 %v408_v41  ;;  %539 = vmatpush.msra.mxu3 %v409_v43  ;;  %v380_v0 = vld [vmem:[#allocation2 + $0x268] sm:$0xff]  ;;  %v461_v3 = vld [vmem:[#allocation2 + $0x4f0] sm:$0xff]  ;;  %v375_v4 = vld [vmem:[#allocation2 + $0x240] sm:$0xff] }
  0x2e   : > { %480 = vmatpush.msra.mxu0 %v323_v44  ;;  %520 = vmatpush.msra.mxu2 %v324_v46  ;;  %v460_v1 = vld [vmem:[#allocation2 + $0x4e8] sm:$0xff]  ;;  %v455_v5 = vld [vmem:[#allocation2 + $0x4c0] sm:$0xff]  ;;  %v370_v8 = vld [vmem:[#allocation2 + $0x218] sm:$0xff] }
  0x2f   : > { %500 = vmatpush.msra.mxu1 %v403_v45  ;;  %540 = vmatpush.msra.mxu3 %v404_v47  ;;  %v376_v6 = vld [vmem:[#allocation2 + $0x248] sm:$0xff]  ;;  %v450_v9 = vld [vmem:[#allocation2 + $0x498] sm:$0xff]  ;;  %v371_v10 = vld [vmem:[#allocation2 + $0x220] sm:$0xff] }
  0x30   : > { %481 = vmatpush.msra.mxu0 %v318_v48  ;;  %521 = vmatpush.msra.mxu2 %v319_v50  ;;  %v456_v7 = vld [vmem:[#allocation2 + $0x4c8] sm:$0xff]  ;;  %v451_v11 = vld [vmem:[#allocation2 + $0x4a0] sm:$0xff]  ;;  %v365_v12 = vld [vmem:[#allocation2 + $0x1f0] sm:$0xff] }
  0x31   : > { %501 = vmatpush.msra.mxu1 %v398_v49  ;;  %541 = vmatpush.msra.mxu3 %v399_v51  ;;  %v445_v13 = vld [vmem:[#allocation2 + $0x470] sm:$0xff]  ;;  %v366_v14 = vld [vmem:[#allocation2 + $0x1f8] sm:$0xff]  ;;  %v360_v17 = vld [vmem:[#allocation2 + $0x1c8] sm:$0xff] }
  0x32   : > { %482 = vmatpush.msra.mxu0 %v313_v52  ;;  %522 = vmatpush.msra.mxu2 %v314_v54  ;;  %v446_v15 = vld [vmem:[#allocation2 + $0x478] sm:$0xff]  ;;  %v440_v18 = vld [vmem:[#allocation2 + $0x448] sm:$0xff]  ;;  %v361_v19 = vld [vmem:[#allocation2 + $0x1d0] sm:$0xff] }
  0x33   : > { %502 = vmatpush.msra.mxu1 %v393_v53  ;;  %542 = vmatpush.msra.mxu3 %v394_v55  ;;  %v302_v16 = vld [vmem:[%s296_s25] sm:$0xf]  ;;  %v441_v20 = vld [vmem:[#allocation2 + $0x450] sm:$0xff]  ;;  %v355_v21 = vld [vmem:[#allocation2 + $0x1a0] sm:$0xff] }
  0x34   : > { %483 = vmatpush.msra.mxu0 %v308_v56  ;;  %523 = vmatpush.msra.mxu2 %v309_v58  ;;  %464 = vst [vmem:[#allocation1] ss:$4 sm:$0xff] %v302_v16  ;;  %v435_v22 = vld [vmem:[#allocation2 + $0x420] sm:$0xff]  ;;  %v356_v23 = vld [vmem:[#allocation2 + $0x1a8] sm:$0xff]  ;;  %v350_v25 = vld [vmem:[#allocation2 + $0x178] sm:$0xff] }
  0x35   : > { %503 = vmatpush.msra.mxu1 %v388_v57  ;;  %543 = vmatpush.msra.mxu3 %v389_v59  ;;  %v436_v24 = vld [vmem:[#allocation2 + $0x428] sm:$0xff]  ;;  %v430_v26 = vld [vmem:[#allocation2 + $0x3f8] sm:$0xff]  ;;  %v351_v27 = vld [vmem:[#allocation2 + $0x180] sm:$0xff] }
  0x36   : > { %484 = vmatpush.msra.mxu0 %v303_v60  ;;  %524 = vmatpush.msra.mxu2 %v304_v62  ;;  %v431_v28 = vld [vmem:[#allocation2 + $0x400] sm:$0xff]  ;;  %v345_v29 = vld [vmem:[#allocation2 + $0x150] sm:$0xff]  ;;  %v346_v31 = vld [vmem:[#allocation2 + $0x158] sm:$0xff] }
  0x37   : > { %504 = vmatpush.msra.mxu1 %v383_v61  ;;  %544 = vmatpush.msra.mxu3 %v384_v63  ;;  %v425_v30 = vld [vmem:[#allocation2 + $0x3d0] sm:$0xff]  ;;  %v426_v32 = vld [vmem:[#allocation2 + $0x3d8] sm:$0xff]  ;;  %v340_v33 = vld [vmem:[#allocation2 + $0x128] sm:$0xff] }
  0x38   : > { %549 = vmatpush.msrb.mxu0 %v380_v0  ;;  %589 = vmatpush.msrb.mxu2 %v381_v2  ;;  %v420_v34 = vld [vmem:[#allocation2 + $0x3a8] sm:$0xff]  ;;  %v341_v35 = vld [vmem:[#allocation2 + $0x130] sm:$0xff]  ;;  %v335_v37 = vld [vmem:[#allocation2 + $0x100] sm:$0xff] }
  0x39   : > { %569 = vmatpush.msrb.mxu1 %v460_v1  ;;  %609 = vmatpush.msrb.mxu3 %v461_v3  ;;  %v421_v36 = vld [vmem:[#allocation2 + $0x3b0] sm:$0xff]  ;;  %v415_v38 = vld [vmem:[#allocation2 + $0x380] sm:$0xff]  ;;  %v336_v39 = vld [vmem:[#allocation2 + $0x108] sm:$0xff] }
  0x3a   : > { %550 = vmatpush.msrb.mxu0 %v375_v4  ;;  %590 = vmatpush.msrb.mxu2 %v376_v6  ;;  %v416_v40 = vld [vmem:[#allocation2 + $0x388] sm:$0xff]  ;;  %v330_v41 = vld [vmem:[#allocation2 + $0xd8] sm:$0xff]  ;;  %v331_v43 = vld [vmem:[#allocation2 + $0xe0] sm:$0xff] }
  0x3b   : > { %570 = vmatpush.msrb.mxu1 %v455_v5  ;;  %610 = vmatpush.msrb.mxu3 %v456_v7  ;;  %v410_v42 = vld [vmem:[#allocation2 + $0x358] sm:$0xff]  ;;  %v411_v44 = vld [vmem:[#allocation2 + $0x360] sm:$0xff]  ;;  %v325_v45 = vld [vmem:[#allocation2 + $0xb0] sm:$0xff] }
  0x3c   : > { %551 = vmatpush.msrb.mxu0 %v370_v8  ;;  %591 = vmatpush.msrb.mxu2 %v371_v10  ;;  %v405_v46 = vld [vmem:[#allocation2 + $0x330] sm:$0xff]  ;;  %v326_v47 = vld [vmem:[#allocation2 + $0xb8] sm:$0xff]  ;;  %v3449_v50 = vld.sshfl [vmem:[#allocation1 + $0x8] sm:$0xff pattern:$0x73625140] }
  0x3d   : > { %571 = vmatpush.msrb.mxu1 %v450_v9  ;;  %611 = vmatpush.msrb.mxu3 %v451_v11  ;;  %v406_v48 = vld [vmem:[#allocation2 + $0x338] sm:$0xff]  ;;  %v320_v51 = vld [vmem:[#allocation2 + $0x88] sm:$0xff]  ;;  %v321_v53 = vld [vmem:[#allocation2 + $0x90] sm:$0xff] }
  0x3e   : > { %552 = vmatpush.msrb.mxu0 %v365_v12  ;;  %592 = vmatpush.msrb.mxu2 %v366_v14  ;;  %v3447_v49 = vld.sshfl [vmem:[#allocation1] sm:$0xff pattern:$0x73625140]  ;;  %v400_v52 = vld [vmem:[#allocation2 + $0x308] sm:$0xff]  ;;  %v401_v54 = vld [vmem:[#allocation2 + $0x310] sm:$0xff] }
  0x3f   : > { %572 = vmatpush.msrb.mxu1 %v445_v13  ;;  %612 = vmatpush.msrb.mxu3 %v446_v15  ;;  %v315_v55 = vld [vmem:[#allocation2 + $0x60] sm:$0xff]  ;;  %v316_v57 = vld [vmem:[#allocation2 + $0x68] sm:$0xff]  ;;  %v310_v59 = vld [vmem:[#allocation2 + $0x38] sm:$0xff] }
  0x40   : > { %553 = vmatpush.msrb.mxu0 %v360_v17  ;;  %593 = vmatpush.msrb.mxu2 %v361_v19  ;;  %v395_v56 = vld [vmem:[#allocation2 + $0x2e0] sm:$0xff]  ;;  %v396_v58 = vld [vmem:[#allocation2 + $0x2e8] sm:$0xff]  ;;  %v390_v60 = vld [vmem:[#allocation2 + $0x2b8] sm:$0xff] }
  0x41   : > { %573 = vmatpush.msrb.mxu1 %v440_v18  ;;  %613 = vmatpush.msrb.mxu3 %v441_v20  ;;  %v311_v61 = vld [vmem:[#allocation2 + $0x40] sm:$0xff]  ;;  %v305_v63 = vld [vmem:[#allocation2 + $0x10] sm:$0xff]  ;;  %v306_v1 = vld [vmem:[#allocation2 + $0x18] sm:$0xff] }
  0x42   : > { %554 = vmatpush.msrb.mxu0 %v355_v21  ;;  %594 = vmatpush.msrb.mxu2 %v356_v23  ;;  %v391_v62 = vld [vmem:[#allocation2 + $0x2c0] sm:$0xff]  ;;  %v385_v0 = vld [vmem:[#allocation2 + $0x290] sm:$0xff]  ;;  %v386_v2 = vld [vmem:[#allocation2 + $0x298] sm:$0xff] }
  0x43   : > { %574 = vmatpush.msrb.mxu1 %v435_v22  ;;  %614 = vmatpush.msrb.mxu3 %v436_v24  ;;  %v382_v3 = vld [vmem:[#allocation2 + $0x278] sm:$0xff]  ;;  %v377_v5 = vld [vmem:[#allocation2 + $0x250] sm:$0xff]  ;;  %v372_v7 = vld [vmem:[#allocation2 + $0x228] sm:$0xff] }
  0x44   : > { %555 = vmatpush.msrb.mxu0 %v350_v25  ;;  %595 = vmatpush.msrb.mxu2 %v351_v27  ;;  %v462_v4 = vld [vmem:[#allocation2 + $0x4f8] sm:$0xff]  ;;  %v457_v6 = vld [vmem:[#allocation2 + $0x4d0] sm:$0xff]  ;;  %v452_v8 = vld [vmem:[#allocation2 + $0x4a8] sm:$0xff] }
  0x45   : > { %575 = vmatpush.msrb.mxu1 %v430_v26  ;;  %615 = vmatpush.msrb.mxu3 %v431_v28  ;;  %v367_v9 = vld [vmem:[#allocation2 + $0x200] sm:$0xff]  ;;  %v362_v11 = vld [vmem:[#allocation2 + $0x1d8] sm:$0xff]  ;;  %v357_v13 = vld [vmem:[#allocation2 + $0x1b0] sm:$0xff] }
  0x46   : > { %556 = vmatpush.msrb.mxu0 %v345_v29  ;;  %596 = vmatpush.msrb.mxu2 %v346_v31  ;;  %v447_v10 = vld [vmem:[#allocation2 + $0x480] sm:$0xff]  ;;  %v442_v12 = vld [vmem:[#allocation2 + $0x458] sm:$0xff]  ;;  %v437_v14 = vld [vmem:[#allocation2 + $0x430] sm:$0xff] }
  0x47   : > { %576 = vmatpush.msrb.mxu1 %v425_v30  ;;  %616 = vmatpush.msrb.mxu3 %v426_v32  ;;  %v352_v15 = vld [vmem:[#allocation2 + $0x188] sm:$0xff]  ;;  %v347_v17 = vld [vmem:[#allocation2 + $0x160] sm:$0xff]  ;;  %v342_v19 = vld [vmem:[#allocation2 + $0x138] sm:$0xff] }
  0x48   : > { %557 = vmatpush.msrb.mxu0 %v340_v33  ;;  %597 = vmatpush.msrb.mxu2 %v341_v35  ;;  %v432_v16 = vld [vmem:[#allocation2 + $0x408] sm:$0xff]  ;;  %v427_v18 = vld [vmem:[#allocation2 + $0x3e0] sm:$0xff]  ;;  %v422_v20 = vld [vmem:[#allocation2 + $0x3b8] sm:$0xff] }
  0x49   : > { %577 = vmatpush.msrb.mxu1 %v420_v34  ;;  %617 = vmatpush.msrb.mxu3 %v421_v36  ;;  %v337_v21 = vld [vmem:[#allocation2 + $0x110] sm:$0xff]  ;;  %v332_v23 = vld [vmem:[#allocation2 + $0xe8] sm:$0xff]  ;;  %v327_v25 = vld [vmem:[#allocation2 + $0xc0] sm:$0xff] }
  0x4a   : > { %558 = vmatpush.msrb.mxu0 %v335_v37  ;;  %598 = vmatpush.msrb.mxu2 %v336_v39  ;;  %v417_v22 = vld [vmem:[#allocation2 + $0x390] sm:$0xff]  ;;  %v412_v24 = vld [vmem:[#allocation2 + $0x368] sm:$0xff]  ;;  %v407_v26 = vld [vmem:[#allocation2 + $0x340] sm:$0xff] }
  0x4b   : > { %578 = vmatpush.msrb.mxu1 %v415_v38  ;;  %618 = vmatpush.msrb.mxu3 %v416_v40  ;;  %v322_v27 = vld [vmem:[#allocation2 + $0x98] sm:$0xff]  ;;  %v317_v29 = vld [vmem:[#allocation2 + $0x70] sm:$0xff]  ;;  %v312_v31 = vld [vmem:[#allocation2 + $0x48] sm:$0xff] }
  0x4c   : > { %559 = vmatpush.msrb.mxu0 %v330_v41  ;;  %599 = vmatpush.msrb.mxu2 %v331_v43  ;;  %v402_v28 = vld [vmem:[#allocation2 + $0x318] sm:$0xff]  ;;  %v397_v30 = vld [vmem:[#allocation2 + $0x2f0] sm:$0xff]  ;;  %v392_v32 = vld [vmem:[#allocation2 + $0x2c8] sm:$0xff] }
  0x4d   : > { %579 = vmatpush.msrb.mxu1 %v410_v42  ;;  %619 = vmatpush.msrb.mxu3 %v411_v44  ;;  %v307_v33 = vld [vmem:[#allocation2 + $0x20] sm:$0xff]  ;;  %v674_v39 = vld [vmem:[#allocation4 + $0x28] sm:$0xff] }
  0x4e   : > { %560 = vmatpush.msrb.mxu0 %v325_v45  ;;  %600 = vmatpush.msrb.mxu2 %v326_v47  ;;  %v387_v34 = vld [vmem:[#allocation2 + $0x2a0] sm:$0xff]  ;;  %v670_v47 = vld [vmem:[#allocation4 + $0x8] sm:$0xff] }
  0x4f   : > { %580 = vmatpush.msrb.mxu1 %v405_v46  ;;  %620 = vmatpush.msrb.mxu3 %v406_v48  ;;  %v669_v38 = vld [vmem:[#allocation4] sm:$0xff]  ;;  %v675_v48 = vld [vmem:[#allocation4 + $0x30] sm:$0xff] }
  0x50   : > { %525 = vmatmul.f32.vlgmr.msra.gmra.mxu2 %v3447_v49  ;;  %545 = vmatmul.f32.vlgmr.msra.gmra.mxu3 %v3449_v50 }
  0x51   : > { %561 = vmatpush.msrb.mxu0 %v320_v51  ;;  %581 = vmatpush.msrb.mxu1 %v400_v52 }
  0x52   : > { %601 = vmatpush.msrb.mxu2 %v321_v53  ;;  %621 = vmatpush.msrb.mxu3 %v401_v54 }
  0x53   : > { %485 = vmatmul.f32.vlgmr.msra.gmra.mxu0 %v3447_v49  ;;  %505 = vmatmul.f32.vlgmr.msra.gmra.mxu1 %v3449_v50 }
  0x54   : > { %562 = vmatpush.msrb.mxu0 %v315_v55  ;;  %582 = vmatpush.msrb.mxu1 %v395_v56 }
  0x55   : > { %602 = vmatpush.msrb.mxu2 %v316_v57  ;;  %622 = vmatpush.msrb.mxu3 %v396_v58 }
  0x56   : > { %563 = vmatpush.msrb.mxu0 %v310_v59  ;;  %583 = vmatpush.msrb.mxu1 %v390_v60  ;;  %v671_v60 = vld [vmem:[#allocation4 + $0x10] sm:$0xff] }
  0x57   : > { %603 = vmatpush.msrb.mxu2 %v311_v61  ;;  %623 = vmatpush.msrb.mxu3 %v391_v62  ;;  %v676_v61 = vld [vmem:[#allocation4 + $0x38] sm:$0xff] }
  0x58   : > { %564 = vmatpush.msrb.mxu0 %v305_v63  ;;  %584 = vmatpush.msrb.mxu1 %v385_v0 }
  0x59   : > { %604 = vmatpush.msrb.mxu2 %v306_v1  ;;  %624 = vmatpush.msrb.mxu3 %v386_v2 }
  0x5a   : > { %605 = vmatmul.f32.vlgmr.msrb.gmra.mxu2 %v3447_v49  ;;  %625 = vmatmul.f32.vlgmr.msrb.gmra.mxu3 %v3449_v50 }
  0x5b   : > { %629 = vmatpush.msra.mxu0 %v382_v3  ;;  %649 = vmatpush.msra.mxu1 %v462_v4  ;;  %v3487_v3 = vld [vmem:[%s3769_s4] sm:$0xf] }
  0x5c   : > { %565 = vmatmul.f32.vlgmr.msrb.gmra.mxu0 %v3447_v49  ;;  %585 = vmatmul.f32.vlgmr.msrb.gmra.mxu1 %v3449_v50  ;;  %v672_v4 = vld [vmem:[#allocation4 + $0x18] sm:$0xff] }
  0x5d   : > { %630 = vmatpush.msra.mxu0 %v377_v5  ;;  %650 = vmatpush.msra.mxu1 %v457_v6  ;;  %v677_v5 = vld [vmem:[#allocation4 + $0x40] sm:$0xff] }
  0x5f   : > { %631 = vmatpush.msra.mxu0 %v372_v7  ;;  %651 = vmatpush.msra.mxu1 %v452_v8 }
  0x61   : > { %632 = vmatpush.msra.mxu0 %v367_v9  ;;  %652 = vmatpush.msra.mxu1 %v447_v10 }
  0x63   : > { %633 = vmatpush.msra.mxu0 %v362_v11  ;;  %653 = vmatpush.msra.mxu1 %v442_v12 }
  0x65   : > { %634 = vmatpush.msra.mxu0 %v357_v13  ;;  %654 = vmatpush.msra.mxu1 %v437_v14 }
  0x67   : > { %635 = vmatpush.msra.mxu0 %v352_v15  ;;  %655 = vmatpush.msra.mxu1 %v432_v16  ;;  %v3528_v16 = vld [vmem:[%s3769_s4 + $0x4] sm:$0xf] }
  0x69   : > { %636 = vmatpush.msra.mxu0 %v347_v17  ;;  %656 = vmatpush.msra.mxu1 %v427_v18  ;;  %v1174_v17 = vld [vmem:[#allocation6 + $0x7f0] sm:$0xff] }
  0x6b   : > { %637 = vmatpush.msra.mxu0 %v342_v19  ;;  %657 = vmatpush.msra.mxu1 %v422_v20 }
  0x6d   : > { %638 = vmatpush.msra.mxu0 %v337_v21  ;;  %658 = vmatpush.msra.mxu1 %v417_v22  ;;  %v1172_v21 = vld [vmem:[#allocation6 + $0x7e0] sm:$0xff]  ;;  %v678_v22 = vld [vmem:[#allocation4 + $0x48] sm:$0xff] }
  0x6f   : > { %639 = vmatpush.msra.mxu0 %v332_v23  ;;  %659 = vmatpush.msra.mxu1 %v412_v24  ;;  %v1170_v24 = vld [vmem:[#allocation6 + $0x7d0] sm:$0xff] }
  0x71   : > { %640 = vmatpush.msra.mxu0 %v327_v25  ;;  %660 = vmatpush.msra.mxu1 %v407_v26  ;;  %v673_v25 = vld [vmem:[#allocation4 + $0x20] sm:$0xff] }
  0x73   : > { %641 = vmatpush.msra.mxu0 %v322_v27  ;;  %661 = vmatpush.msra.mxu1 %v402_v28  ;;  %v1168_v28 = vld [vmem:[#allocation6 + $0x7c0] sm:$0xff] }
  0x75   : > { %642 = vmatpush.msra.mxu0 %v317_v29  ;;  %662 = vmatpush.msra.mxu1 %v397_v30  ;;  %v1166_v30 = vld [vmem:[#allocation6 + $0x7b0] sm:$0xff] }
  0x77   : > { %643 = vmatpush.msra.mxu0 %v312_v31  ;;  %663 = vmatpush.msra.mxu1 %v392_v32  ;;  %v1164_v32 = vld [vmem:[#allocation6 + $0x7a0] sm:$0xff] }
  0x79   : > { %644 = vmatpush.msra.mxu0 %v307_v33  ;;  %664 = vmatpush.msra.mxu1 %v387_v34  ;;  %v1162_v34 = vld [vmem:[#allocation6 + $0x790] sm:$0xff] }
  0x7a   : > { %645 = vmatmul.f32.vlgmr.msra.gmra.mxu0 %v3447_v49  ;;  %665 = vmatmul.f32.vlgmr.msra.gmra.mxu1 %v3449_v50 }
  0x7b   : > { %1280 = vmatpush.msrb.mxu0 %v1174_v17  ;;  %v1100_v17 = vld [vmem:[#allocation6 + $0x5a0] sm:$0xff] }
  0x7d   : > { %1281 = vmatpush.msrb.mxu0 %v1172_v21  ;;  %v1098_v21 = vld [vmem:[#allocation6 + $0x590] sm:$0xff] }
  0x7f   : > { %1282 = vmatpush.msrb.mxu0 %v1170_v24  ;;  %v1141_v24 = vld [vmem:[#allocation6 + $0x6e8] sm:$0xff] }
  0x81   : > { %1283 = vmatpush.msrb.mxu0 %v1168_v28  ;;  %v1184_v28 = vld [vmem:[#allocation6 + $0x840] sm:$0xff] }
  0x83   : > { %1284 = vmatpush.msrb.mxu0 %v1166_v30  ;;  %v1139_v30 = vld [vmem:[#allocation6 + $0x6d8] sm:$0xff] }
  0x85   : > { %1285 = vmatpush.msrb.mxu0 %v1164_v32  ;;  %v1094_v32 = vld [vmem:[#allocation6 + $0x570] sm:$0xff] }
  0x87   : > { %1286 = vmatpush.msrb.mxu0 %v1162_v34  ;;  %v1182_v34 = vld [vmem:[#allocation6 + $0x830] sm:$0xff] }
  0xd0   : > { %v486_v35 = vpop.f32.mrf.mxu0  ;;  %v506_v36 = vpop.f32.mrf.mxu1 }
  0xd1   : > { %v507_v37 = vadd.f32 %v506_v36, %v486_v35  ;;  %v1206_v35 = vld [vmem:[#allocation6 + $0x8f0] sm:$0xff]  ;;  %v1160_v36 = vld [vmem:[#allocation6 + $0x780] sm:$0xff] }
  0xd2   : > { %1287 = vmatpush.msrb.mxu0 %v1160_v36  ;;  %v1180_v36 = vld [vmem:[#allocation6 + $0x820] sm:$0xff] }
  0xd3   : > { %v679_v40 = vperm.slane %v507_v37, 0  ;;  %v694_v41 = vperm.slane %v507_v37, 1  ;;  %v526_v42 = vpop.f32.mrf.mxu2  ;;  %v546_v43 = vpop.f32.mrf.mxu3  ;;  %v1204_v37 = vld [vmem:[#allocation6 + $0x8e0] sm:$0xff] }
  0xd4   : > { %v547_v44 = vadd.f32 %v546_v43, %v526_v42  ;;  %v1140_v42 = vld [vmem:[#allocation6 + $0x6e0] sm:$0xff] }
  0xd5   : > { %v3461_v45 = vmul.f32 %v694_v41, %v669_v38  ;;  %v3463_v46 = vmul.f32 %v694_v41, %v674_v39  ;;  %v3465_v52 = vmul.f32 %v679_v40, %v674_v39  ;;  %v3472_v54 = vmul.f32 %v679_v40, %v669_v38  ;;  %v1158_v38 = vld [vmem:[#allocation6 + $0x770] sm:$0xff]  ;;  %v1156_v41 = vld [vmem:[#allocation6 + $0x760] sm:$0xff] }
  0xd6   : > { %v680_v51 = vperm.slane %v547_v44, 0  ;;  %v695_v49 = vperm.slane %v547_v44, 1  ;;  %v1142_v39 = vld [vmem:[#allocation6 + $0x6f0] sm:$0xff]  ;;  %1288 = vmatpush.msrb.mxu0 %v1158_v38  ;;  %v1200_v43 = vld [vmem:[#allocation6 + $0x8c0] sm:$0xff] }
  0xd7   : > { %726 = vmatpush.msrb.mxu1 %v3463_v46  ;;  %v1202_v40 = vld [vmem:[#allocation6 + $0x8d0] sm:$0xff] }
  0xd8   : > { %v3468_v50 = vmul.f32 %v695_v49, %v670_v47  ;;  %v3470_v53 = vmul.f32 %v695_v49, %v675_v48  ;;  %v3475_v57 = vmul.f32 %v680_v51, %v675_v48  ;;  %v3479_v59 = vmul.f32 %v680_v51, %v670_v47  ;;  %v1138_v44 = vld [vmem:[#allocation6 + $0x6d0] sm:$0xff]  ;;  %1289 = vmatpush.msrb.mxu0 %v1156_v41  ;;  %v1136_v49 = vld [vmem:[#allocation6 + $0x6c0] sm:$0xff] }
  0xd9   : > { %727 = vmatpush.msrb.mxu1 %v3461_v45  ;;  %v566_v55 = vpop.f32.mrf.mxu0  ;;  %v586_v56 = vpop.f32.mrf.mxu1  ;;  %v1110_v47 = vld [vmem:[#allocation6 + $0x5f0] sm:$0xff]  ;;  %v1084_v41 = vld [vmem:[#allocation6 + $0x520] sm:$0xff] }
  0xda   : > { %746 = vmatpush.msra.mxu3 %v3470_v53  ;;  %v587_v58 = vadd.f32 %v586_v56, %v566_v55  ;;  %v1154_v48 = vld [vmem:[#allocation6 + $0x750] sm:$0xff]  ;;  %v1108_v55 = vld [vmem:[#allocation6 + $0x5e0] sm:$0xff] }
  0xdb   : > { %728 = vmatpush.msrb.mxu1 %v3465_v52  ;;  %v1198_v51 = vld [vmem:[#allocation6 + $0x8b0] sm:$0xff]  ;;  %v1152_v56 = vld [vmem:[#allocation6 + $0x740] sm:$0xff]  ;;  %1290 = vmatpush.msrb.mxu0 %v1154_v48 }
  0xdc   : > { %747 = vmatpush.msra.mxu3 %v3468_v50  ;;  %v696_v62 = vperm.slane %v587_v58, 1  ;;  %v681_v1 = vperm.slane %v587_v58, 0  ;;  %v1196_v58 = vld [vmem:[#allocation6 + $0x8a0] sm:$0xff]  ;;  %v1178_v38 = vld [vmem:[#allocation6 + $0x810] sm:$0xff] }
  0xdd   : > { %v606_v63 = vpop.f32.mrf.mxu2  ;;  %v626_v0 = vpop.f32.mrf.mxu3  ;;  %729 = vmatpush.msrb.mxu1 %v3472_v54  ;;  %1291 = vmatpush.msrb.mxu0 %v1152_v56  ;;  %v1234_v48 = vld [vmem:[#allocation6 + $0x9d0] sm:$0xff] }
  0xde   : > { %v627_v2 = vadd.f32 %v626_v0, %v606_v63  ;;  %748 = vmatpush.msra.mxu3 %v3475_v57  ;;  %v3489_v6 = vmul.f32 %v696_v62, %v671_v60  ;;  %v3491_v7 = vmul.f32 %v696_v62, %v676_v61  ;;  %3162 = vmatmul.msk.f32.vlgmr.msrb.gmra.mxu1 %vm710_vm0, %v3487_v3  ;;  %v1150_v62 = vld [vmem:[#allocation6 + $0x730] sm:$0xff]  ;;  %v1132_v0 = vld [vmem:[#allocation6 + $0x6a0] sm:$0xff] }
  0xdf   : > { %v3498_v10 = vmul.f32 %v681_v1, %v676_v61  ;;  %v3505_v13 = vmul.f32 %v681_v1, %v671_v60  ;;  %v1134_v60 = vld [vmem:[#allocation6 + $0x6b0] sm:$0xff]  ;;  %v1104_v1 = vld [vmem:[#allocation6 + $0x5c0] sm:$0xff]  ;;  %1292 = vmatpush.msrb.mxu0 %v1150_v62 }
  0xe0   : > { %v682_v8 = vperm.slane %v627_v2, 0  ;;  %v697_v9 = vperm.slane %v627_v2, 1  ;;  %749 = vmatpush.msra.mxu3 %v3479_v59  ;;  %766 = vmatpush.msra.mxu2 %v3491_v7  ;;  %v1106_v61 = vld [vmem:[#allocation6 + $0x5d0] sm:$0xff]  ;;  %v1148_v2 = vld [vmem:[#allocation6 + $0x720] sm:$0xff] }
  0xe1   : > { %3163 = vmatmul.msk.f32.vlgmr.msra.gmra.mxu3 %vm710_vm0, %v3487_v3  ;;  %v1194_v63 = vld [vmem:[#allocation6 + $0x890] sm:$0xff]  ;;  %1293 = vmatpush.msrb.mxu0 %v1148_v2  ;;  %v1176_v62 = vld [vmem:[#allocation6 + $0x800] sm:$0xff]  ;;  %v1175_v2 = vld [vmem:[#allocation6 + $0x7f8] sm:$0xff] }
  0xe2   : > { %v3501_v11 = vmul.f32 %v697_v9, %v672_v4  ;;  %v3503_v12 = vmul.f32 %v697_v9, %v677_v5  ;;  %767 = vmatpush.msra.mxu2 %v3489_v6  ;;  %v3508_v14 = vmul.f32 %v682_v8, %v677_v5  ;;  %v3512_v15 = vmul.f32 %v682_v8, %v672_v4  ;;  %v1130_v4 = vld [vmem:[#allocation6 + $0x690] sm:$0xff] }
  0xe3   : > { %v1102_v5 = vld [vmem:[#allocation6 + $0x5b0] sm:$0xff] }
  0xe4   : > { %786 = vmatpush.msrb.mxu3 %v3503_v12  ;;  %768 = vmatpush.msra.mxu2 %v3498_v10  ;;  %v1146_v8 = vld [vmem:[#allocation6 + $0x710] sm:$0xff] }
  0xe5   : > { %v1190_v9 = vld [vmem:[#allocation6 + $0x870] sm:$0xff]  ;;  %1294 = vmatpush.msrb.mxu0 %v1146_v8  ;;  %v1173_v8 = vld [vmem:[#allocation6 + $0x7e8] sm:$0xff] }
  0xe6   : > { %787 = vmatpush.msrb.mxu3 %v3501_v11  ;;  %769 = vmatpush.msra.mxu2 %v3505_v13  ;;  %v1226_v56 = vld [vmem:[#allocation6 + $0x990] sm:$0xff] }
  0xe7   : > { %3164 = vmatmul.msk.f32.vlgmr.msra.gmra.mxu2 %vm710_vm0, %v3487_v3 }
  0xe8   : > { %788 = vmatpush.msrb.mxu3 %v3508_v14 }
  0xea   : > { %789 = vmatpush.msrb.mxu3 %v3512_v15 }
  0xeb   : > { %3165 = vmatmul.msk.f32.vlgmr.msrb.gmra.mxu3 %vm710_vm0, %v3487_v3 }
  0xec   : > { %991 = vmatpush.msra.mxu3 %v3463_v46 }
  0xee   : > { %992 = vmatpush.msra.mxu3 %v3461_v45 }
  0xf0   : > { %993 = vmatpush.msra.mxu3 %v3465_v52 }
  0xf2   : > { %994 = vmatpush.msra.mxu3 %v3472_v54 }
  0xf3   : > { %3168 = vmatmul.msk.f32.vlgmr.msra.gmra.mxu3 %vm710_vm0, %v3528_v16 }
  0xf4   : > { %1031 = vmatpush.msrb.mxu3 %v3491_v7 }
  0xf6   : > { %1032 = vmatpush.msrb.mxu3 %v3489_v6 }
  0xf7   : > { %v646_v18 = vpop.f32.mrf.mxu0  ;;  %v666_v19 = vpop.f32.mrf.mxu1 }
  0xf8   : > { %1033 = vmatpush.msrb.mxu3 %v3498_v10  ;;  %v667_v20 = vadd.f32 %v666_v19, %v646_v18  ;;  %v1144_v18 = vld [vmem:[#allocation6 + $0x700] sm:$0xff] }
  0xf9   : > { %v1188_v19 = vld [vmem:[#allocation6 + $0x860] sm:$0xff]  ;;  %1295 = vmatpush.msrb.mxu0 %v1144_v18  ;;  %v1171_v18 = vld [vmem:[#allocation6 + $0x7d8] sm:$0xff] }
  0xfa   : > { %1034 = vmatpush.msrb.mxu3 %v3505_v13  ;;  %v698_v23 = vperm.slane %v667_v20, 1  ;;  %v683_v26 = vperm.slane %v667_v20, 0  ;;  %v1143_v20 = vld [vmem:[#allocation6 + $0x6f8] sm:$0xff] }
  0xfb   : > { %3170 = vmatmul.msk.f32.vlgmr.msrb.gmra.mxu3 %vm710_vm0, %v3528_v16  ;;  %1360 = vmatpush.msra.mxu0 %v1143_v20  ;;  %v1216_v20 = vld [vmem:[#allocation6 + $0x940] sm:$0xff] }
  0xfc   : > { %1051 = vmatpush.msra.mxu3 %v3503_v12  ;;  %v3538_v27 = vmul.f32 %v698_v23, %v678_v22  ;;  %v3543_v29 = vmul.f32 %v698_v23, %v673_v25  ;;  %v3548_v31 = vmul.f32 %v683_v26, %v678_v22  ;;  %v3553_v33 = vmul.f32 %v683_v26, %v673_v25  ;;  %v1126_v22 = vld [vmem:[#allocation6 + $0x670] sm:$0xff]  ;;  %v1096_v25 = vld [vmem:[#allocation6 + $0x580] sm:$0xff] }
  0xfd   : > { %v1186_v23 = vld [vmem:[#allocation6 + $0x850] sm:$0xff]  ;;  %v1124_v26 = vld [vmem:[#allocation6 + $0x660] sm:$0xff]  ;;  %1361 = vmatpush.msra.mxu0 %v1141_v24 }
  0xfe   : > { %1052 = vmatpush.msra.mxu3 %v3501_v11  ;;  %806 = vmatpush.msrb.mxu2 %v3538_v27  ;;  %v1214_v24 = vld [vmem:[#allocation6 + $0x930] sm:$0xff] }
  0xff   : > { %1071 = vmatpush.msra.mxu1 %v3538_v27  ;;  %1362 = vmatpush.msra.mxu0 %v1139_v30  ;;  %v1212_v30 = vld [vmem:[#allocation6 + $0x920] sm:$0xff] }
 0x100   : > { %1053 = vmatpush.msra.mxu3 %v3508_v14  ;;  %807 = vmatpush.msrb.mxu2 %v3543_v29 }
 0x101   : > { %1072 = vmatpush.msra.mxu1 %v3543_v29 }
 0x102   : > { %1054 = vmatpush.msra.mxu3 %v3512_v15  ;;  %808 = vmatpush.msrb.mxu2 %v3548_v31 }
 0x103   : > { %1073 = vmatpush.msra.mxu1 %v3548_v31  ;;  %3171 = vmatmul.msk.f32.vlgmr.msra.gmra.mxu3 %vm710_vm0, %v3528_v16 }
 0x104   : > { %809 = vmatpush.msrb.mxu2 %v3553_v33  ;;  %1260 = vmatpush.msrb.mxu3 %v1142_v39  ;;  %v1088_v39 = vld [vmem:[#allocation6 + $0x540] sm:$0xff] }
 0x105   : > { %1074 = vmatpush.msra.mxu1 %v3553_v33  ;;  %3166 = vmatmul.msk.f32.vlgmr.msrb.gmra.mxu2 %vm710_vm0, %v3487_v3  ;;  %v1192_v3 = vld [vmem:[#allocation6 + $0x880] sm:$0xff] }
 0x106   : > { %1011 = vmatpush.msra.mxu2 %v3470_v53  ;;  %3172 = vmatmul.msk.f32.vlgmr.msra.gmra.mxu1 %vm710_vm0, %v3528_v16 }
 0x107   : > { %1300 = vmatpush.msrb.mxu1 %v1206_v35  ;;  %1261 = vmatpush.msrb.mxu3 %v1140_v42  ;;  %v1092_v35 = vld [vmem:[#allocation6 + $0x560] sm:$0xff]  ;;  %v1082_v42 = vld [vmem:[#allocation6 + $0x510] sm:$0xff] }
 0x108   : > { %1012 = vmatpush.msra.mxu2 %v3468_v50 }
 0x109   : > { %1301 = vmatpush.msrb.mxu1 %v1204_v37  ;;  %1262 = vmatpush.msrb.mxu3 %v1138_v44  ;;  %v1090_v37 = vld [vmem:[#allocation6 + $0x550] sm:$0xff] }
 0x10a   : > { %1013 = vmatpush.msra.mxu2 %v3475_v57  ;;  %v1238_v44 = vld [vmem:[#allocation6 + $0x9f0] sm:$0xff] }
 0x10b   : > { %1302 = vmatpush.msrb.mxu1 %v1202_v40  ;;  %1263 = vmatpush.msrb.mxu3 %v1136_v49  ;;  %v1086_v40 = vld [vmem:[#allocation6 + $0x530] sm:$0xff] }
 0x10c   : > { %1014 = vmatpush.msra.mxu2 %v3479_v59  ;;  %v1230_v49 = vld [vmem:[#allocation6 + $0x9b0] sm:$0xff] }
 0x10d   : > { %3169 = vmatmul.msk.f32.vlgmr.msra.gmra.mxu2 %vm710_vm0, %v3528_v16  ;;  %1303 = vmatpush.msrb.mxu1 %v1200_v43  ;;  %v1128_v16 = vld [vmem:[#allocation6 + $0x680] sm:$0xff] }
 0x10e   : > { %1240 = vmatpush.msrb.mxu2 %v1110_v47  ;;  %1264 = vmatpush.msrb.mxu3 %v1134_v60  ;;  %v1080_v43 = vld [vmem:[#allocation6 + $0x500] sm:$0xff] }
 0x10f   : > { %1304 = vmatpush.msrb.mxu1 %v1198_v51  ;;  %v1236_v47 = vld [vmem:[#allocation6 + $0x9e0] sm:$0xff] }
 0x110   : > { %1241 = vmatpush.msrb.mxu2 %v1108_v55  ;;  %1265 = vmatpush.msrb.mxu3 %v1132_v0  ;;  %v1232_v51 = vld [vmem:[#allocation6 + $0x9c0] sm:$0xff]  ;;  %v1222_v0 = vld [vmem:[#allocation6 + $0x970] sm:$0xff] }
 0x111   : > { %1305 = vmatpush.msrb.mxu1 %v1196_v58  ;;  %v1228_v55 = vld [vmem:[#allocation6 + $0x9a0] sm:$0xff]  ;;  %v1122_v58 = vld [vmem:[#allocation6 + $0x650] sm:$0xff] }
 0x112   : > { %1242 = vmatpush.msrb.mxu2 %v1106_v61  ;;  %1266 = vmatpush.msrb.mxu3 %v1130_v4  ;;  %v1224_v60 = vld [vmem:[#allocation6 + $0x980] sm:$0xff]  ;;  %v1137_v61 = vld [vmem:[#allocation6 + $0x6c8] sm:$0xff] }
 0x113   : > { %1306 = vmatpush.msrb.mxu1 %v1194_v63  ;;  %v1120_v63 = vld [vmem:[#allocation6 + $0x640] sm:$0xff]  ;;  %1363 = vmatpush.msra.mxu0 %v1137_v61  ;;  %v1113_v61 = vld [vmem:[#allocation6 + $0x608] sm:$0xff] }
 0x114   : > { %1243 = vmatpush.msrb.mxu2 %v1104_v1  ;;  %1267 = vmatpush.msrb.mxu3 %v1128_v16  ;;  %v1135_v1 = vld [vmem:[#allocation6 + $0x6b8] sm:$0xff]  ;;  %v1220_v4 = vld [vmem:[#allocation6 + $0x960] sm:$0xff]  ;;  %v1218_v16 = vld [vmem:[#allocation6 + $0x950] sm:$0xff] }
 0x115   : > { %1307 = vmatpush.msrb.mxu1 %v1192_v3  ;;  %v1118_v3 = vld [vmem:[#allocation6 + $0x630] sm:$0xff]  ;;  %1364 = vmatpush.msra.mxu0 %v1135_v1  ;;  %v1095_v1 = vld [vmem:[#allocation6 + $0x578] sm:$0xff] }
 0x116   : > { %1244 = vmatpush.msrb.mxu2 %v1102_v5  ;;  %1268 = vmatpush.msrb.mxu3 %v1126_v22  ;;  %v1133_v5 = vld [vmem:[#allocation6 + $0x6a8] sm:$0xff] }
 0x117   : > { %1308 = vmatpush.msrb.mxu1 %v1190_v9  ;;  %v1116_v9 = vld [vmem:[#allocation6 + $0x620] sm:$0xff]  ;;  %1365 = vmatpush.msra.mxu0 %v1133_v5  ;;  %v1169_v22 = vld [vmem:[#allocation6 + $0x7c8] sm:$0xff]  ;;  %v1147_v5 = vld [vmem:[#allocation6 + $0x718] sm:$0xff] }
 0x118   : > { %1245 = vmatpush.msrb.mxu2 %v1100_v17  ;;  %1269 = vmatpush.msrb.mxu3 %v1124_v26  ;;  %v1131_v17 = vld [vmem:[#allocation6 + $0x698] sm:$0xff] }
 0x119   : > { %1309 = vmatpush.msrb.mxu1 %v1188_v19  ;;  %1366 = vmatpush.msra.mxu0 %v1131_v17  ;;  %v1114_v19 = vld [vmem:[#allocation6 + $0x610] sm:$0xff]  ;;  %v1167_v26 = vld [vmem:[#allocation6 + $0x7b8] sm:$0xff] }
 0x11a   : > { %1246 = vmatpush.msrb.mxu2 %v1098_v21  ;;  %1270 = vmatpush.msrb.mxu3 %v1122_v58  ;;  %v1129_v21 = vld [vmem:[#allocation6 + $0x688] sm:$0xff]  ;;  %v1155_v58 = vld [vmem:[#allocation6 + $0x758] sm:$0xff] }
 0x11b   : > { %1310 = vmatpush.msrb.mxu1 %v1186_v23  ;;  %v1112_v23 = vld [vmem:[#allocation6 + $0x600] sm:$0xff]  ;;  %1367 = vmatpush.msra.mxu0 %v1129_v21  ;;  %v1087_v17 = vld [vmem:[#allocation6 + $0x538] sm:$0xff]  ;;  %v1081_v21 = vld [vmem:[#allocation6 + $0x508] sm:$0xff] }
 0x11c   : > { %1247 = vmatpush.msrb.mxu2 %v1096_v25  ;;  %1271 = vmatpush.msrb.mxu3 %v1120_v63  ;;  %v1127_v25 = vld [vmem:[#allocation6 + $0x678] sm:$0xff]  ;;  %v1097_v63 = vld [vmem:[#allocation6 + $0x588] sm:$0xff] }
 0x11d   : > { %1311 = vmatpush.msrb.mxu1 %v1184_v28  ;;  %v1111_v28 = vld [vmem:[#allocation6 + $0x5f8] sm:$0xff]  ;;  %1368 = vmatpush.msra.mxu0 %v1127_v25 }
 0x11e   : > { %1248 = vmatpush.msrb.mxu2 %v1094_v32  ;;  %1272 = vmatpush.msrb.mxu3 %v1118_v3  ;;  %v1125_v32 = vld [vmem:[#allocation6 + $0x668] sm:$0xff] }
 0x11f   : > { %1312 = vmatpush.msrb.mxu1 %v1182_v34  ;;  %v1165_v34 = vld [vmem:[#allocation6 + $0x7a8] sm:$0xff]  ;;  %1369 = vmatpush.msra.mxu0 %v1125_v32  ;;  %v1199_v32 = vld [vmem:[#allocation6 + $0x8b8] sm:$0xff] }
 0x120   : > { %1249 = vmatpush.msrb.mxu2 %v1092_v35  ;;  %1273 = vmatpush.msrb.mxu3 %v1116_v9  ;;  %v1109_v35 = vld [vmem:[#allocation6 + $0x5e8] sm:$0xff] }
 0x121   : > { %1313 = vmatpush.msrb.mxu1 %v1180_v36  ;;  %v1210_v36 = vld [vmem:[#allocation6 + $0x910] sm:$0xff]  ;;  %v1093_v3 = vld [vmem:[#allocation6 + $0x568] sm:$0xff] }
 0x122   : > { %1250 = vmatpush.msrb.mxu2 %v1090_v37  ;;  %1274 = vmatpush.msrb.mxu3 %v1114_v19  ;;  %v1123_v37 = vld [vmem:[#allocation6 + $0x658] sm:$0xff]  ;;  %v1145_v9 = vld [vmem:[#allocation6 + $0x708] sm:$0xff] }
 0x123   : > { %1314 = vmatpush.msrb.mxu1 %v1178_v38  ;;  %v1163_v38 = vld [vmem:[#allocation6 + $0x798] sm:$0xff]  ;;  %1370 = vmatpush.msra.mxu0 %v1123_v37  ;;  %v842_v37 = vld [vmem:[#allocation6 + $0xe0] sm:$0xff] }
 0x124   : > { %1251 = vmatpush.msrb.mxu2 %v1088_v39  ;;  %1275 = vmatpush.msrb.mxu3 %v1112_v23  ;;  %v1107_v39 = vld [vmem:[#allocation6 + $0x5d8] sm:$0xff] }
 0x125   : > { %1315 = vmatpush.msrb.mxu1 %v1176_v62  ;;  %v1153_v62 = vld [vmem:[#allocation6 + $0x748] sm:$0xff] }
 0x126   : > { %1252 = vmatpush.msrb.mxu2 %v1086_v40  ;;  %1340 = vmatpush.msra.mxu3 %v1111_v28  ;;  %v1208_v40 = vld [vmem:[#allocation6 + $0x900] sm:$0xff]  ;;  %v1201_v28 = vld [vmem:[#allocation6 + $0x8c8] sm:$0xff] }
 0x127   : > { %1380 = vmatpush.msra.mxu1 %v1175_v2  ;;  %v1149_v2 = vld [vmem:[#allocation6 + $0x728] sm:$0xff] }
 0x128   : > { %1253 = vmatpush.msrb.mxu2 %v1084_v41  ;;  %1341 = vmatpush.msra.mxu3 %v1109_v35  ;;  %v1121_v41 = vld [vmem:[#allocation6 + $0x648] sm:$0xff] }
 0x129   : > { %1381 = vmatpush.msra.mxu1 %v1173_v8  ;;  %1371 = vmatpush.msra.mxu0 %v1121_v41  ;;  %v1091_v8 = vld [vmem:[#allocation6 + $0x558] sm:$0xff]  ;;  %v1193_v41 = vld [vmem:[#allocation6 + $0x888] sm:$0xff] }
 0x12a   : > { %1254 = vmatpush.msrb.mxu2 %v1082_v42  ;;  %1342 = vmatpush.msra.mxu3 %v1107_v39  ;;  %v1161_v42 = vld [vmem:[#allocation6 + $0x788] sm:$0xff]  ;;  %v840_v39 = vld [vmem:[#allocation6 + $0xd0] sm:$0xff] }
 0x12b   : > { %1382 = vmatpush.msra.mxu1 %v1171_v18  ;;  %v1085_v18 = vld [vmem:[#allocation6 + $0x528] sm:$0xff] }
 0x12c   : > { %1255 = vmatpush.msrb.mxu2 %v1080_v43  ;;  %v1105_v43 = vld [vmem:[#allocation6 + $0x5c8] sm:$0xff] }
 0x12d   : > { %1383 = vmatpush.msra.mxu1 %v1169_v22  ;;  %1343 = vmatpush.msra.mxu3 %v1105_v43  ;;  %v1207_v22 = vld [vmem:[#allocation6 + $0x8f8] sm:$0xff] }
 0x12e   : > { %1320 = vmatpush.msra.mxu2 %v1238_v44  ;;  %v1119_v44 = vld [vmem:[#allocation6 + $0x638] sm:$0xff] }
 0x12f   : > { %1384 = vmatpush.msra.mxu1 %v1167_v26  ;;  %1372 = vmatpush.msra.mxu0 %v1119_v44  ;;  %v1203_v26 = vld [vmem:[#allocation6 + $0x8d8] sm:$0xff]  ;;  %v836_v44 = vld [vmem:[#allocation6 + $0xb0] sm:$0xff] }
 0x130   : > { %1321 = vmatpush.msra.mxu2 %v1236_v47  ;;  %v1159_v47 = vld [vmem:[#allocation6 + $0x778] sm:$0xff] }
 0x131   : > { %1385 = vmatpush.msra.mxu1 %v1165_v34  ;;  %v844_v34 = vld [vmem:[#allocation6 + $0xf0] sm:$0xff]  ;;  %v1191_v43 = vld [vmem:[#allocation6 + $0x878] sm:$0xff] }
 0x132   : > { %1322 = vmatpush.msra.mxu2 %v1234_v48  ;;  %v1103_v48 = vld [vmem:[#allocation6 + $0x5b8] sm:$0xff] }
 0x133   : > { %1386 = vmatpush.msra.mxu1 %v1163_v38  ;;  %1344 = vmatpush.msra.mxu3 %v1103_v48  ;;  %v1195_v38 = vld [vmem:[#allocation6 + $0x898] sm:$0xff]  ;;  %v876_v48 = vld [vmem:[#allocation6 + $0x1f0] sm:$0xff] }
 0x134   : > { %1323 = vmatpush.msra.mxu2 %v1232_v51  ;;  %v1117_v51 = vld [vmem:[#allocation6 + $0x628] sm:$0xff] }
 0x135   : > { %1387 = vmatpush.msra.mxu1 %v1161_v42  ;;  %1373 = vmatpush.msra.mxu0 %v1117_v51  ;;  %v838_v42 = vld [vmem:[#allocation6 + $0xc0] sm:$0xff] }
 0x136   : > { %1324 = vmatpush.msra.mxu2 %v1230_v49  ;;  %v1157_v49 = vld [vmem:[#allocation6 + $0x768] sm:$0xff] }
 0x137   : > { %1388 = vmatpush.msra.mxu1 %v1159_v47 }
 0x138   : > { %1325 = vmatpush.msra.mxu2 %v1228_v55  ;;  %v1101_v55 = vld [vmem:[#allocation6 + $0x5a8] sm:$0xff] }
 0x139   : > { %1389 = vmatpush.msra.mxu1 %v1157_v49  ;;  %1345 = vmatpush.msra.mxu3 %v1101_v55  ;;  %v1189_v49 = vld [vmem:[#allocation6 + $0x868] sm:$0xff]  ;;  %v834_v55 = vld [vmem:[#allocation6 + $0xa0] sm:$0xff] }
 0x13a   : > { %1326 = vmatpush.msra.mxu2 %v1226_v56  ;;  %v1115_v56 = vld [vmem:[#allocation6 + $0x618] sm:$0xff] }
 0x13b   : > { %1374 = vmatpush.msra.mxu0 %v1115_v56  ;;  %1390 = vmatpush.msra.mxu1 %v1155_v58  ;;  %v874_v56 = vld [vmem:[#allocation6 + $0x1e0] sm:$0xff]  ;;  %v1187_v58 = vld [vmem:[#allocation6 + $0x858] sm:$0xff] }
 0x13c   : > { %1327 = vmatpush.msra.mxu2 %v1224_v60  ;;  %v1099_v60 = vld [vmem:[#allocation6 + $0x598] sm:$0xff] }
 0x13d   : > { %1346 = vmatpush.msra.mxu3 %v1099_v60  ;;  %1375 = vmatpush.msra.mxu0 %v1113_v61  ;;  %v832_v60 = vld [vmem:[#allocation6 + $0x90] sm:$0xff] }
 0x13e   : > { %1328 = vmatpush.msra.mxu2 %v1222_v0  ;;  %1391 = vmatpush.msra.mxu1 %v1153_v62  ;;  %v1151_v0 = vld [vmem:[#allocation6 + $0x738] sm:$0xff]  ;;  %v872_v61 = vld [vmem:[#allocation6 + $0x1d0] sm:$0xff]  ;;  %v1185_v62 = vld [vmem:[#allocation6 + $0x848] sm:$0xff] }
 0x13f   : > { %1347 = vmatpush.msra.mxu3 %v1097_v63  ;;  %v830_v63 = vld [vmem:[#allocation6 + $0x80] sm:$0xff] }
 0x140   : > { %1329 = vmatpush.msra.mxu2 %v1220_v4  ;;  %1392 = vmatpush.msra.mxu1 %v1151_v0  ;;  %v870_v0 = vld [vmem:[#allocation6 + $0x1c0] sm:$0xff] }
 0x141   : > { %1348 = vmatpush.msra.mxu3 %v1095_v1  ;;  %v1183_v1 = vld [vmem:[#allocation6 + $0x838] sm:$0xff] }
 0x142   : > { %1330 = vmatpush.msra.mxu2 %v1218_v16  ;;  %1393 = vmatpush.msra.mxu1 %v1149_v2  ;;  %v1089_v16 = vld [vmem:[#allocation6 + $0x548] sm:$0xff]  ;;  %v828_v2 = vld [vmem:[#allocation6 + $0x70] sm:$0xff] }
 0x143   : > { %1349 = vmatpush.msra.mxu3 %v1093_v3  ;;  %v868_v3 = vld [vmem:[#allocation6 + $0x1b0] sm:$0xff] }
 0x144   : > { %1331 = vmatpush.msra.mxu2 %v1216_v20  ;;  %1394 = vmatpush.msra.mxu1 %v1147_v5  ;;  %v1083_v20 = vld [vmem:[#allocation6 + $0x518] sm:$0xff] }
 0x145   : > { %1350 = vmatpush.msra.mxu3 %v1091_v8  ;;  %v1239_v8 = vld [vmem:[#allocation6 + $0x9f8] sm:$0xff] }
 0x146   : > { %1332 = vmatpush.msra.mxu2 %v1214_v24  ;;  %1395 = vmatpush.msra.mxu1 %v1145_v9  ;;  %v1205_v24 = vld [vmem:[#allocation6 + $0x8e8] sm:$0xff] }
 0x147   : > { %1351 = vmatpush.msra.mxu3 %v1089_v16  ;;  %v1181_v9 = vld [vmem:[#allocation6 + $0x828] sm:$0xff]  ;;  %v826_v16 = vld [vmem:[#allocation6 + $0x60] sm:$0xff] }
 0x148   : > { %1333 = vmatpush.msra.mxu2 %v1212_v30 }
 0x149   : > { %1352 = vmatpush.msra.mxu3 %v1087_v17  ;;  %v866_v17 = vld [vmem:[#allocation6 + $0x1a0] sm:$0xff] }
 0x14a   : > { %1334 = vmatpush.msra.mxu2 %v1210_v36  ;;  %v1197_v36 = vld [vmem:[#allocation6 + $0x8a8] sm:$0xff] }
 0x14b   : > { %1353 = vmatpush.msra.mxu3 %v1085_v18  ;;  %v1237_v18 = vld [vmem:[#allocation6 + $0x9e8] sm:$0xff] }
 0x14c   : > { %1335 = vmatpush.msra.mxu2 %v1208_v40 }
 0x14d   : > { %1354 = vmatpush.msra.mxu3 %v1083_v20  ;;  %v1179_v20 = vld [vmem:[#allocation6 + $0x818] sm:$0xff] }
 0x14f   : > { %1355 = vmatpush.msra.mxu3 %v1081_v21  ;;  %v824_v21 = vld [vmem:[#allocation6 + $0x50] sm:$0xff] }
 0x15b   : > { %v3578_v25 = vpop.f32.mrf.mxu1 }
 0x164   : > { %v3571_v4 = vpop.f32.mrf.mxu3 }
 0x16a   : > { %v3580_v30 = vpop.f32.mrf.mxu2 }
 0x16e   : > { %v3573_v19 = vpop.f32.mrf.mxu3 }
 0x176   : > { %v3575_v23 = vpop.f32.mrf.mxu3 }
 0x177   : > { %1256 = vmatmul.f32.vlgmr.msrb.gmra.mxu2 %v3575_v23 }
 0x178   : > { %1400 = vmatpush.msrb.mxu2 %v1207_v22  ;;  %v864_v22 = vld [vmem:[#allocation6 + $0x190] sm:$0xff] }
 0x17a   : > { %1401 = vmatpush.msrb.mxu2 %v1205_v24  ;;  %v1235_v24 = vld [vmem:[#allocation6 + $0x9d8] sm:$0xff] }
 0x17c   : > { %1402 = vmatpush.msrb.mxu2 %v1203_v26  ;;  %v1177_v26 = vld [vmem:[#allocation6 + $0x808] sm:$0xff] }
 0x17e   : > { %1403 = vmatpush.msrb.mxu2 %v1201_v28  ;;  %v3582_v35 = vpop.f32.mrf.mxu3  ;;  %v822_v28 = vld [vmem:[#allocation6 + $0x40] sm:$0xff] }
 0x17f   : > { %1296 = vmatmul.f32.vlgmr.msrb.gmra.mxu0 %v3582_v35 }
 0x180   : > { %1404 = vmatpush.msrb.mxu2 %v1199_v32  ;;  %1440 = vmatpush.msrb.mxu0 %v844_v34  ;;  %v862_v32 = vld [vmem:[#allocation6 + $0x180] sm:$0xff]  ;;  %v1233_v34 = vld [vmem:[#allocation6 + $0x9c8] sm:$0xff] }
 0x182   : > { %1405 = vmatpush.msrb.mxu2 %v1197_v36  ;;  %1441 = vmatpush.msrb.mxu0 %v842_v37  ;;  %v908_v36 = vld [vmem:[#allocation6 + $0x2f0] sm:$0xff] }
 0x183   : > { %v3585_v40 = vpop.f32.mrf.mxu1  ;;  %v820_v37 = vld [vmem:[#allocation6 + $0x30] sm:$0xff] }
 0x184   : > { %1336 = vmatmul.f32.vlgmr.msra.gmra.mxu2 %v3585_v40  ;;  %1442 = vmatpush.msrb.mxu0 %v840_v39  ;;  %v906_v39 = vld [vmem:[#allocation6 + $0x2e0] sm:$0xff] }
 0x185   : > { %1406 = vmatpush.msrb.mxu2 %v1195_v38  ;;  %v860_v38 = vld [vmem:[#allocation6 + $0x170] sm:$0xff] }
 0x186   : > { %1443 = vmatpush.msrb.mxu0 %v838_v42  ;;  %v3588_v47 = vpop.f32.mrf.mxu3  ;;  %v818_v42 = vld [vmem:[#allocation6 + $0x20] sm:$0xff] }
 0x187   : > { %1407 = vmatpush.msrb.mxu2 %v1193_v41  ;;  %1316 = vmatmul.f32.vlgmr.msrb.gmra.mxu1 %v3588_v47  ;;  %v1231_v41 = vld [vmem:[#allocation6 + $0x9b8] sm:$0xff] }
 0x188   : > { %v3590_v51 = vpop.f32.mrf.mxu2  ;;  %1444 = vmatpush.msrb.mxu0 %v836_v44  ;;  %1460 = vmatpush.msrb.mxu1 %v876_v48  ;;  %v904_v44 = vld [vmem:[#allocation6 + $0x2d0] sm:$0xff] }
 0x189   : > { %1408 = vmatpush.msrb.mxu2 %v1191_v43  ;;  %v1229_v43 = vld [vmem:[#allocation6 + $0x9a8] sm:$0xff]  ;;  %v816_v48 = vld [vmem:[#allocation6 + $0x10] sm:$0xff] }
 0x18a   : > { %1445 = vmatpush.msrb.mxu0 %v834_v55  ;;  %1461 = vmatpush.msrb.mxu1 %v874_v56  ;;  %v1227_v55 = vld [vmem:[#allocation6 + $0x998] sm:$0xff]  ;;  %v902_v56 = vld [vmem:[#allocation6 + $0x2c0] sm:$0xff] }
 0x18b   : > { %1409 = vmatpush.msrb.mxu2 %v1189_v49  ;;  %v856_v49 = vld [vmem:[#allocation6 + $0x150] sm:$0xff] }
 0x18c   : > { %1446 = vmatpush.msrb.mxu0 %v832_v60  ;;  %1462 = vmatpush.msrb.mxu1 %v872_v61  ;;  %v854_v60 = vld [vmem:[#allocation6 + $0x140] sm:$0xff]  ;;  %v1225_v61 = vld [vmem:[#allocation6 + $0x988] sm:$0xff] }
 0x18d   : > { %1410 = vmatpush.msrb.mxu2 %v1187_v58  ;;  %v814_v58 = vld [vmem:[#allocation6] sm:$0xff] }
 0x18e   : > { %1447 = vmatpush.msrb.mxu0 %v830_v63  ;;  %1463 = vmatpush.msrb.mxu1 %v870_v0  ;;  %v852_v63 = vld [vmem:[#allocation6 + $0x130] sm:$0xff]  ;;  %v1223_v0 = vld [vmem:[#allocation6 + $0x978] sm:$0xff] }
 0x18f   : > { %1411 = vmatpush.msrb.mxu2 %v1185_v62  ;;  %1396 = vmatmul.f32.vlgmr.msra.gmra.mxu1 %v3582_v35  ;;  %v858_v35 = vld [vmem:[#allocation6 + $0x160] sm:$0xff]  ;;  %v972_v62 = vld [vmem:[#allocation6 + $0x4f0] sm:$0xff] }
 0x190   : > { %v1016_v5 = vpop.f32.mrf.mxu2  ;;  %1448 = vmatpush.msrb.mxu0 %v828_v2  ;;  %1464 = vmatpush.msrb.mxu1 %v868_v3  ;;  %v850_v2 = vld [vmem:[#allocation6 + $0x120] sm:$0xff]  ;;  %v1221_v3 = vld [vmem:[#allocation6 + $0x968] sm:$0xff] }
 0x191   : > { %1412 = vmatpush.msrb.mxu2 %v1183_v1  ;;  %1276 = vmatmul.f32.vlgmr.msrb.gmra.mxu3 %v1016_v5  ;;  %v970_v1 = vld [vmem:[#allocation6 + $0x4e0] sm:$0xff] }
 0x192   : > { %1376 = vmatmul.f32.vlgmr.msra.gmra.mxu0 %v1016_v5  ;;  %1420 = vmatpush.msrb.mxu3 %v1239_v8  ;;  %v896_v5 = vld [vmem:[#allocation6 + $0x290] sm:$0xff] }
 0x193   : > { %1413 = vmatpush.msrb.mxu2 %v1181_v9  ;;  %1449 = vmatpush.msrb.mxu0 %v826_v16  ;;  %v968_v8 = vld [vmem:[#allocation6 + $0x4d0] sm:$0xff]  ;;  %v1219_v16 = vld [vmem:[#allocation6 + $0x958] sm:$0xff] }
 0x194   : > { %1465 = vmatpush.msrb.mxu1 %v866_v17  ;;  %1421 = vmatpush.msrb.mxu3 %v1237_v18  ;;  %v848_v9 = vld [vmem:[#allocation6 + $0x110] sm:$0xff]  ;;  %v894_v17 = vld [vmem:[#allocation6 + $0x280] sm:$0xff] }
 0x195   : > { %1414 = vmatpush.msrb.mxu2 %v1179_v20  ;;  %1450 = vmatpush.msrb.mxu0 %v824_v21  ;;  %v966_v18 = vld [vmem:[#allocation6 + $0x4c0] sm:$0xff]  ;;  %v1217_v21 = vld [vmem:[#allocation6 + $0x948] sm:$0xff] }
 0x196   : > { %1466 = vmatpush.msrb.mxu1 %v864_v22  ;;  %1422 = vmatpush.msrb.mxu3 %v1235_v24  ;;  %v846_v20 = vld [vmem:[#allocation6 + $0x100] sm:$0xff]  ;;  %v892_v22 = vld [vmem:[#allocation6 + $0x270] sm:$0xff] }
 0x197   : > { %1415 = vmatpush.msrb.mxu2 %v1177_v26  ;;  %1451 = vmatpush.msrb.mxu0 %v822_v28  ;;  %v964_v24 = vld [vmem:[#allocation6 + $0x4b0] sm:$0xff]  ;;  %v845_v26 = vld [vmem:[#allocation6 + $0xf8] sm:$0xff] }
 0x198   : > { %1467 = vmatpush.msrb.mxu1 %v862_v32  ;;  %1423 = vmatpush.msrb.mxu3 %v1233_v34  ;;  %v1215_v28 = vld [vmem:[#allocation6 + $0x938] sm:$0xff]  ;;  %v890_v32 = vld [vmem:[#allocation6 + $0x260] sm:$0xff] }
 0x199   : > { %1480 = vmatpush.msra.mxu2 %v908_v36  ;;  %1452 = vmatpush.msrb.mxu0 %v820_v37  ;;  %v962_v34 = vld [vmem:[#allocation6 + $0x4a0] sm:$0xff]  ;;  %v843_v36 = vld [vmem:[#allocation6 + $0xe8] sm:$0xff] }
 0x19a   : > { %1468 = vmatpush.msrb.mxu1 %v860_v38  ;;  %1356 = vmatmul.f32.vlgmr.msra.gmra.mxu3 %v3575_v23  ;;  %v900_v23 = vld [vmem:[#allocation6 + $0x2b0] sm:$0xff]  ;;  %v1213_v37 = vld [vmem:[#allocation6 + $0x928] sm:$0xff] }
 0x19b   : > { %1481 = vmatpush.msra.mxu2 %v906_v39  ;;  %1424 = vmatpush.msrb.mxu3 %v1231_v41  ;;  %v888_v38 = vld [vmem:[#allocation6 + $0x250] sm:$0xff]  ;;  %v841_v41 = vld [vmem:[#allocation6 + $0xd8] sm:$0xff] }
 0x19c   : > { %1453 = vmatpush.msrb.mxu0 %v818_v42  ;;  %1469 = vmatpush.msrb.mxu1 %v858_v35  ;;  %v960_v39 = vld [vmem:[#allocation6 + $0x490] sm:$0xff]  ;;  %v1211_v42 = vld [vmem:[#allocation6 + $0x918] sm:$0xff]  ;;  %v886_v35 = vld [vmem:[#allocation6 + $0x240] sm:$0xff] }
 0x19d   : > { %1416 = vmatmul.f32.vlgmr.msrb.gmra.mxu2 %v3588_v47  ;;  %1425 = vmatpush.msrb.mxu3 %v1229_v43  ;;  %v898_v47 = vld [vmem:[#allocation6 + $0x2a0] sm:$0xff] }
 0x19e   : > { %1482 = vmatpush.msra.mxu2 %v904_v44  ;;  %1454 = vmatpush.msrb.mxu0 %v816_v48  ;;  %v958_v43 = vld [vmem:[#allocation6 + $0x480] sm:$0xff]  ;;  %v839_v44 = vld [vmem:[#allocation6 + $0xc8] sm:$0xff] }
 0x19f   : > { %1470 = vmatpush.msrb.mxu1 %v856_v49  ;;  %1426 = vmatpush.msrb.mxu3 %v1227_v55  ;;  %v1209_v48 = vld [vmem:[#allocation6 + $0x908] sm:$0xff]  ;;  %v884_v49 = vld [vmem:[#allocation6 + $0x230] sm:$0xff] }
 0x1a0   : > { %1483 = vmatpush.msra.mxu2 %v902_v56  ;;  %1455 = vmatpush.msrb.mxu0 %v814_v58  ;;  %v956_v55 = vld [vmem:[#allocation6 + $0x470] sm:$0xff]  ;;  %v837_v56 = vld [vmem:[#allocation6 + $0xb8] sm:$0xff]  ;;  %v882_v58 = vld [vmem:[#allocation6 + $0x220] sm:$0xff] }
 0x1a1   : > { %1471 = vmatpush.msrb.mxu1 %v854_v60  ;;  %1427 = vmatpush.msrb.mxu3 %v1225_v61  ;;  %v940_v60 = vld [vmem:[#allocation6 + $0x3f0] sm:$0xff]  ;;  %v954_v61 = vld [vmem:[#allocation6 + $0x460] sm:$0xff] }
 0x1a2   : > { %1456 = vmatmul.f32.vlgmr.msrb.gmra.mxu0 %v3578_v25  ;;  %1484 = vmatpush.msra.mxu2 %v900_v23  ;;  %v835_v23 = vld [vmem:[#allocation6 + $0xa8] sm:$0xff] }
 0x1a3   : > { %1520 = vmatpush.msra.mxu0 %v972_v62  ;;  %1472 = vmatpush.msrb.mxu1 %v852_v63  ;;  %v880_v62 = vld [vmem:[#allocation6 + $0x210] sm:$0xff]  ;;  %v938_v63 = vld [vmem:[#allocation6 + $0x3e0] sm:$0xff] }
 0x1a4   : > { %1428 = vmatpush.msrb.mxu3 %v1223_v0  ;;  %1485 = vmatpush.msra.mxu2 %v898_v47  ;;  %v952_v0 = vld [vmem:[#allocation6 + $0x450] sm:$0xff]  ;;  %v833_v47 = vld [vmem:[#allocation6 + $0x98] sm:$0xff] }
 0x1a5   : > { %1521 = vmatpush.msra.mxu0 %v970_v1  ;;  %1473 = vmatpush.msrb.mxu1 %v850_v2  ;;  %v878_v1 = vld [vmem:[#allocation6 + $0x200] sm:$0xff]  ;;  %v936_v2 = vld [vmem:[#allocation6 + $0x3d0] sm:$0xff] }
 0x1a6   : > { %1429 = vmatpush.msrb.mxu3 %v1221_v3  ;;  %1486 = vmatpush.msra.mxu2 %v896_v5  ;;  %v950_v3 = vld [vmem:[#allocation6 + $0x440] sm:$0xff]  ;;  %v831_v5 = vld [vmem:[#allocation6 + $0x88] sm:$0xff] }
 0x1a7   : > { %1522 = vmatpush.msra.mxu0 %v968_v8  ;;  %1474 = vmatpush.msrb.mxu1 %v848_v9  ;;  %v934_v8 = vld [vmem:[#allocation6 + $0x3c0] sm:$0xff]  ;;  %v877_v9 = vld [vmem:[#allocation6 + $0x1f8] sm:$0xff] }
 0x1a8   : > { %1430 = vmatpush.msrb.mxu3 %v1219_v16  ;;  %1487 = vmatpush.msra.mxu2 %v894_v17  ;;  %v829_v16 = vld [vmem:[#allocation6 + $0x78] sm:$0xff]  ;;  %v932_v17 = vld [vmem:[#allocation6 + $0x3b0] sm:$0xff] }
 0x1a9   : > { %1523 = vmatpush.msra.mxu0 %v966_v18  ;;  %1475 = vmatpush.msrb.mxu1 %v846_v20  ;;  %v875_v18 = vld [vmem:[#allocation6 + $0x1e8] sm:$0xff]  ;;  %v946_v20 = vld [vmem:[#allocation6 + $0x420] sm:$0xff] }
 0x1aa   : > { %1431 = vmatpush.msrb.mxu3 %v1217_v21  ;;  %1476 = vmatmul.f32.vlgmr.msrb.gmra.mxu1 %v3571_v4  ;;  %v827_v21 = vld [vmem:[#allocation6 + $0x68] sm:$0xff] }
 0x1ab   : > { %1488 = vmatpush.msra.mxu2 %v892_v22  ;;  %1524 = vmatpush.msra.mxu0 %v964_v24  ;;  %v930_v22 = vld [vmem:[#allocation6 + $0x3a0] sm:$0xff]  ;;  %v873_v24 = vld [vmem:[#allocation6 + $0x1d8] sm:$0xff] }
 0x1ac   : > { %1540 = vmatpush.msra.mxu1 %v845_v26  ;;  %1432 = vmatpush.msrb.mxu3 %v1215_v28  ;;  %v944_v26 = vld [vmem:[#allocation6 + $0x410] sm:$0xff]  ;;  %v825_v28 = vld [vmem:[#allocation6 + $0x58] sm:$0xff] }
 0x1ad   : > { %1489 = vmatpush.msra.mxu2 %v890_v32  ;;  %1525 = vmatpush.msra.mxu0 %v962_v34  ;;  %v928_v32 = vld [vmem:[#allocation6 + $0x390] sm:$0xff]  ;;  %v871_v34 = vld [vmem:[#allocation6 + $0x1c8] sm:$0xff] }
 0x1ae   : > { %1541 = vmatpush.msra.mxu1 %v843_v36  ;;  %1433 = vmatpush.msrb.mxu3 %v1213_v37  ;;  %v942_v36 = vld [vmem:[#allocation6 + $0x400] sm:$0xff]  ;;  %v823_v37 = vld [vmem:[#allocation6 + $0x48] sm:$0xff] }
 0x1af   : > { %1490 = vmatpush.msra.mxu2 %v888_v38  ;;  %1526 = vmatpush.msra.mxu0 %v960_v39  ;;  %v926_v38 = vld [vmem:[#allocation6 + $0x380] sm:$0xff]  ;;  %v869_v39 = vld [vmem:[#allocation6 + $0x1b8] sm:$0xff] }
 0x1b0   : > { %1542 = vmatpush.msra.mxu1 %v841_v41  ;;  %1434 = vmatpush.msrb.mxu3 %v1211_v42  ;;  %v941_v41 = vld [vmem:[#allocation6 + $0x3f8] sm:$0xff] }
 0x1b1   : > { %1491 = vmatpush.msra.mxu2 %v886_v35  ;;  %1527 = vmatpush.msra.mxu0 %v958_v43  ;;  %v821_v42 = vld [vmem:[#allocation6 + $0x38] sm:$0xff]  ;;  %v924_v35 = vld [vmem:[#allocation6 + $0x370] sm:$0xff]  ;;  %v867_v43 = vld [vmem:[#allocation6 + $0x1a8] sm:$0xff] }
 0x1b2   : > { %1543 = vmatpush.msra.mxu1 %v839_v44  ;;  %1435 = vmatpush.msrb.mxu3 %v1209_v48  ;;  %v939_v44 = vld [vmem:[#allocation6 + $0x3e8] sm:$0xff] }
 0x1b3   : > { %1492 = vmatpush.msra.mxu2 %v884_v49  ;;  %1528 = vmatpush.msra.mxu0 %v956_v55  ;;  %v819_v48 = vld [vmem:[#allocation6 + $0x28] sm:$0xff]  ;;  %v922_v49 = vld [vmem:[#allocation6 + $0x360] sm:$0xff]  ;;  %v865_v55 = vld [vmem:[#allocation6 + $0x198] sm:$0xff] }
 0x1b4   : > { %1544 = vmatpush.msra.mxu1 %v837_v56  ;;  %1436 = vmatmul.f32.vlgmr.msrb.gmra.mxu3 %v3585_v40  ;;  %v948_v40 = vld [vmem:[#allocation6 + $0x430] sm:$0xff]  ;;  %v937_v56 = vld [vmem:[#allocation6 + $0x3d8] sm:$0xff] }
 0x1b5   : > { %1493 = vmatpush.msra.mxu2 %v882_v58  ;;  %1500 = vmatpush.msra.mxu3 %v940_v60  ;;  %v817_v58 = vld [vmem:[#allocation6 + $0x18] sm:$0xff]  ;;  %v920_v60 = vld [vmem:[#allocation6 + $0x350] sm:$0xff] }
 0x1b6   : > { %1529 = vmatpush.msra.mxu0 %v954_v61  ;;  %1545 = vmatpush.msra.mxu1 %v835_v23  ;;  %v863_v61 = vld [vmem:[#allocation6 + $0x188] sm:$0xff] }
 0x1b7   : > { %1494 = vmatpush.msra.mxu2 %v880_v62  ;;  %1501 = vmatpush.msra.mxu3 %v938_v63  ;;  %v935_v23 = vld [vmem:[#allocation6 + $0x3c8] sm:$0xff]  ;;  %v918_v63 = vld [vmem:[#allocation6 + $0x340] sm:$0xff] }
 0x1b8   : > { %1530 = vmatpush.msra.mxu0 %v952_v0  ;;  %1546 = vmatpush.msra.mxu1 %v833_v47  ;;  %v815_v62 = vld [vmem:[#allocation6 + $0x8] sm:$0xff]  ;;  %v861_v0 = vld [vmem:[#allocation6 + $0x178] sm:$0xff] }
 0x1b9   : > { %1495 = vmatpush.msra.mxu2 %v878_v1  ;;  %1502 = vmatpush.msra.mxu3 %v936_v2  ;;  %v933_v47 = vld [vmem:[#allocation6 + $0x3b8] sm:$0xff]  ;;  %v916_v2 = vld [vmem:[#allocation6 + $0x330] sm:$0xff] }
 0x1ba   : > { %1531 = vmatpush.msra.mxu0 %v950_v3  ;;  %1547 = vmatpush.msra.mxu1 %v831_v5  ;;  %v973_v1 = vld [vmem:[#allocation6 + $0x4f8] sm:$0xff]  ;;  %v859_v3 = vld [vmem:[#allocation6 + $0x168] sm:$0xff] }
 0x1bb   : > { %1496 = vmatmul.f32.vlgmr.msra.gmra.mxu2 %v3580_v30  ;;  %1503 = vmatpush.msra.mxu3 %v934_v8  ;;  %v931_v5 = vld [vmem:[#allocation6 + $0x3a8] sm:$0xff] }
 0x1bc   : > { %1560 = vmatpush.msrb.mxu2 %v877_v9  ;;  %1532 = vmatpush.msra.mxu0 %v948_v40  ;;  %v971_v8 = vld [vmem:[#allocation6 + $0x4e8] sm:$0xff]  ;;  %v914_v9 = vld [vmem:[#allocation6 + $0x320] sm:$0xff]  ;;  %v857_v40 = vld [vmem:[#allocation6 + $0x158] sm:$0xff] }
 0x1bd   : > { %1548 = vmatpush.msra.mxu1 %v829_v16  ;;  %1504 = vmatpush.msra.mxu3 %v932_v17  ;;  %v929_v16 = vld [vmem:[#allocation6 + $0x398] sm:$0xff] }
 0x1be   : > { %1561 = vmatpush.msrb.mxu2 %v875_v18  ;;  %1533 = vmatpush.msra.mxu0 %v946_v20  ;;  %v969_v17 = vld [vmem:[#allocation6 + $0x4d8] sm:$0xff]  ;;  %v912_v18 = vld [vmem:[#allocation6 + $0x310] sm:$0xff]  ;;  %v855_v20 = vld [vmem:[#allocation6 + $0x148] sm:$0xff] }
 0x1bf   : > { %1549 = vmatpush.msra.mxu1 %v827_v21  ;;  %1505 = vmatpush.msra.mxu3 %v930_v22  ;;  %v927_v21 = vld [vmem:[#allocation6 + $0x388] sm:$0xff] }
 0x1c0   : > { %1562 = vmatpush.msrb.mxu2 %v873_v24  ;;  %1534 = vmatpush.msra.mxu0 %v944_v26  ;;  %v967_v22 = vld [vmem:[#allocation6 + $0x4c8] sm:$0xff]  ;;  %v853_v24 = vld [vmem:[#allocation6 + $0x138] sm:$0xff] }
 0x1c1   : > { %1550 = vmatpush.msra.mxu1 %v825_v28  ;;  %1506 = vmatpush.msra.mxu3 %v928_v32  ;;  %v925_v26 = vld [vmem:[#allocation6 + $0x378] sm:$0xff]  ;;  %v851_v32 = vld [vmem:[#allocation6 + $0x128] sm:$0xff] }
 0x1c2   : > { %1563 = vmatpush.msrb.mxu2 %v871_v34  ;;  %1535 = vmatpush.msra.mxu0 %v942_v36  ;;  %v965_v28 = vld [vmem:[#allocation6 + $0x4b8] sm:$0xff]  ;;  %v923_v36 = vld [vmem:[#allocation6 + $0x368] sm:$0xff] }
 0x1c3   : > { %1551 = vmatpush.msra.mxu1 %v823_v37  ;;  %1507 = vmatpush.msra.mxu3 %v926_v38  ;;  %v909_v34 = vld [vmem:[#allocation6 + $0x2f8] sm:$0xff]  ;;  %v963_v37 = vld [vmem:[#allocation6 + $0x4a8] sm:$0xff] }
 0x1c4   : > { %1536 = vmatmul.f32.vlgmr.msra.gmra.mxu0 %v3590_v51  ;;  %1564 = vmatpush.msrb.mxu2 %v869_v39  ;;  %v849_v38 = vld [vmem:[#allocation6 + $0x118] sm:$0xff]  ;;  %v907_v39 = vld [vmem:[#allocation6 + $0x2e8] sm:$0xff] }
 0x1c5   : > { %1600 = vmatpush.msrb.mxu0 %v941_v41  ;;  %1552 = vmatpush.msra.mxu1 %v821_v42  ;;  %v921_v41 = vld [vmem:[#allocation6 + $0x358] sm:$0xff] }
 0x1c6   : > { %1508 = vmatpush.msra.mxu3 %v924_v35  ;;  %1565 = vmatpush.msrb.mxu2 %v867_v43  ;;  %v961_v42 = vld [vmem:[#allocation6 + $0x498] sm:$0xff]  ;;  %v847_v35 = vld [vmem:[#allocation6 + $0x108] sm:$0xff] }
 0x1c7   : > { %1601 = vmatpush.msrb.mxu0 %v939_v44  ;;  %1553 = vmatpush.msra.mxu1 %v819_v48  ;;  %v905_v43 = vld [vmem:[#allocation6 + $0x2d8] sm:$0xff]  ;;  %v919_v44 = vld [vmem:[#allocation6 + $0x348] sm:$0xff] }
 0x1c8   : > { %1509 = vmatpush.msra.mxu3 %v922_v49  ;;  %1566 = vmatpush.msrb.mxu2 %v865_v55  ;;  %v959_v48 = vld [vmem:[#allocation6 + $0x488] sm:$0xff]  ;;  %v917_v55 = vld [vmem:[#allocation6 + $0x338] sm:$0xff] }
 0x1c9   : > { %1602 = vmatpush.msrb.mxu0 %v937_v56  ;;  %1554 = vmatpush.msra.mxu1 %v817_v58  ;;  %v903_v49 = vld [vmem:[#allocation6 + $0x2c8] sm:$0xff]  ;;  %v957_v56 = vld [vmem:[#allocation6 + $0x478] sm:$0xff] }
 0x1ca   : > { %1510 = vmatpush.msra.mxu3 %v920_v60  ;;  %1567 = vmatpush.msrb.mxu2 %v863_v61  ;;  %v901_v58 = vld [vmem:[#allocation6 + $0x2b8] sm:$0xff]  ;;  %v915_v60 = vld [vmem:[#allocation6 + $0x328] sm:$0xff] }
 0x1cb   : > { %1603 = vmatpush.msrb.mxu0 %v935_v23  ;;  %1555 = vmatpush.msra.mxu1 %v815_v62  ;;  %v955_v61 = vld [vmem:[#allocation6 + $0x468] sm:$0xff]  ;;  %v913_v62 = vld [vmem:[#allocation6 + $0x318] sm:$0xff] }
 0x1cc   : > { %1511 = vmatpush.msra.mxu3 %v918_v63  ;;  %1556 = vmatmul.f32.vlgmr.msra.gmra.mxu1 %v3578_v25  ;;  %v910_v25 = vld [vmem:[#allocation6 + $0x300] sm:$0xff]  ;;  %v899_v23 = vld [vmem:[#allocation6 + $0x2a8] sm:$0xff]  ;;  %v953_v63 = vld [vmem:[#allocation6 + $0x458] sm:$0xff] }
 0x1cd   : > { %1568 = vmatpush.msrb.mxu2 %v861_v0  ;;  %1604 = vmatpush.msrb.mxu0 %v933_v47  ;;  %v897_v0 = vld [vmem:[#allocation6 + $0x298] sm:$0xff]  ;;  %v951_v47 = vld [vmem:[#allocation6 + $0x448] sm:$0xff] }
 0x1ce   : > { %1620 = vmatpush.msrb.mxu1 %v973_v1  ;;  %1512 = vmatpush.msra.mxu3 %v916_v2  ;;  %v895_v1 = vld [vmem:[#allocation6 + $0x288] sm:$0xff]  ;;  %v3173_v2 = vld [vmem:[%s3769_s4 + $0x8] sm:$0xf] }
 0x1cf   : > { %1569 = vmatpush.msrb.mxu2 %v859_v3  ;;  %1605 = vmatpush.msrb.mxu0 %v931_v5  ;;  %v949_v3 = vld [vmem:[#allocation6 + $0x438] sm:$0xff] }
 0x1d0   : > { %1621 = vmatpush.msrb.mxu1 %v971_v8  ;;  %1513 = vmatpush.msra.mxu3 %v914_v9  ;;  %v893_v5 = vld [vmem:[#allocation6 + $0x278] sm:$0xff]  ;;  %v947_v8 = vld [vmem:[#allocation6 + $0x428] sm:$0xff] }
 0x1d1   : > { %1570 = vmatpush.msrb.mxu2 %v857_v40  ;;  %1606 = vmatpush.msrb.mxu0 %v929_v16  ;;  %v891_v9 = vld [vmem:[#allocation6 + $0x268] sm:$0xff]  ;;  %v945_v40 = vld [vmem:[#allocation6 + $0x418] sm:$0xff] }
 0x1d2   : > { %1622 = vmatpush.msrb.mxu1 %v969_v17  ;;  %1514 = vmatpush.msra.mxu3 %v912_v18  ;;  %v889_v16 = vld [vmem:[#allocation6 + $0x258] sm:$0xff]  ;;  %v943_v17 = vld [vmem:[#allocation6 + $0x408] sm:$0xff] }
 0x1d3   : > { %1571 = vmatpush.msrb.mxu2 %v855_v20  ;;  %1607 = vmatpush.msrb.mxu0 %v927_v21  ;;  %v887_v18 = vld [vmem:[#allocation6 + $0x248] sm:$0xff]  ;;  %v881_v21 = vld [vmem:[#allocation6 + $0x218] sm:$0xff] }
 0x1d4   : > { %1623 = vmatpush.msrb.mxu1 %v967_v22  ;;  %1515 = vmatpush.msra.mxu3 %v910_v25  ;;  %v883_v20 = vld [vmem:[#allocation6 + $0x228] sm:$0xff]  ;;  %v1772_v25 = vld [vmem:[#allocation6 + $0xad0] sm:$0xff] }
 0x1d5   : > { %1572 = vmatpush.msrb.mxu2 %v853_v24  ;;  %1608 = vmatpush.msrb.mxu0 %v925_v26  ;;  %v879_v22 = vld [vmem:[#allocation6 + $0x208] sm:$0xff]  ;;  %v1872_v24 = vld [vmem:[#allocation6 + $0xdf0] sm:$0xff]  ;;  %v1770_v26 = vld [vmem:[#allocation6 + $0xac0] sm:$0xff] }
 0x1d6   : > { %1624 = vmatpush.msrb.mxu1 %v965_v28  ;;  %1516 = vmatmul.f32.vlgmr.msra.gmra.mxu3 %v3573_v19  ;;  %v1870_v28 = vld [vmem:[#allocation6 + $0xde0] sm:$0xff] }
 0x1d7   : > { %1573 = vmatpush.msrb.mxu2 %v851_v32  ;;  %1580 = vmatpush.msrb.mxu3 %v909_v34  ;;  %v1868_v32 = vld [vmem:[#allocation6 + $0xdd0] sm:$0xff] }
 0x1d8   : > { %1609 = vmatpush.msrb.mxu0 %v923_v36  ;;  %1625 = vmatpush.msrb.mxu1 %v963_v37  ;;  %v1768_v36 = vld [vmem:[#allocation6 + $0xab0] sm:$0xff] }
 0x1d9   : > { %1574 = vmatpush.msrb.mxu2 %v849_v38  ;;  %1581 = vmatpush.msrb.mxu3 %v907_v39  ;;  %v1766_v38 = vld [vmem:[#allocation6 + $0xaa0] sm:$0xff]  ;;  %v1764_v39 = vld [vmem:[#allocation6 + $0xa90] sm:$0xff] }
 0x1da   : > { %1610 = vmatpush.msrb.mxu0 %v921_v41  ;;  %1626 = vmatpush.msrb.mxu1 %v961_v42  ;;  %v1762_v41 = vld [vmem:[#allocation6 + $0xa80] sm:$0xff] }
 0x1db   : > { %1575 = vmatpush.msrb.mxu2 %v847_v35  ;;  %1582 = vmatpush.msrb.mxu3 %v905_v43 }
 0x1dc   : > { %1611 = vmatpush.msrb.mxu0 %v919_v44  ;;  %1627 = vmatpush.msrb.mxu1 %v959_v48 }
 0x1dd   : > { %1576 = vmatmul.f32.vlgmr.msrb.gmra.mxu2 %v3571_v4  ;;  %1583 = vmatpush.msrb.mxu3 %v903_v49  ;;  %v911_v4 = vld [vmem:[#allocation6 + $0x308] sm:$0xff] }
 0x1de   : > { %1657 = vmatpush.msra.mxu2 %v3463_v46  ;;  %1612 = vmatpush.msrb.mxu0 %v917_v55 }
 0x1df   : > { %1628 = vmatpush.msrb.mxu1 %v957_v56  ;;  %1584 = vmatpush.msrb.mxu3 %v901_v58  ;;  %v1760_v56 = vld [vmem:[#allocation6 + $0xa70] sm:$0xff]  ;;  %v1866_v58 = vld [vmem:[#allocation6 + $0xdc0] sm:$0xff] }
 0x1e0   : > { %1658 = vmatpush.msra.mxu2 %v3461_v45  ;;  %1613 = vmatpush.msrb.mxu0 %v915_v60  ;;  %v1758_v60 = vld [vmem:[#allocation6 + $0xa60] sm:$0xff] }
 0x1e1   : > { %1629 = vmatpush.msrb.mxu1 %v955_v61  ;;  %1585 = vmatpush.msrb.mxu3 %v899_v23  ;;  %v1864_v61 = vld [vmem:[#allocation6 + $0xdb0] sm:$0xff] }
 0x1e2   : > { %1659 = vmatpush.msra.mxu2 %v3465_v52  ;;  %1614 = vmatpush.msrb.mxu0 %v913_v62  ;;  %v1756_v62 = vld [vmem:[#allocation6 + $0xa50] sm:$0xff] }
 0x1e3   : > { %1630 = vmatpush.msrb.mxu1 %v953_v63  ;;  %1586 = vmatpush.msrb.mxu3 %v897_v0  ;;  %v1862_v63 = vld [vmem:[#allocation6 + $0xda0] sm:$0xff] }
 0x1e4   : > { %1660 = vmatpush.msra.mxu2 %v3472_v54  ;;  %1615 = vmatpush.msrb.mxu0 %v911_v4 }
 0x1e5   : > { %1631 = vmatpush.msrb.mxu1 %v951_v47  ;;  %1587 = vmatpush.msrb.mxu3 %v895_v1  ;;  %v1754_v1 = vld [vmem:[#allocation6 + $0xa40] sm:$0xff] }
 0x1e6   : > { %1737 = vmatpush.msrb.mxu2 %v3538_v27  ;;  %1616 = vmatmul.f32.vlgmr.msrb.gmra.mxu0 %v3573_v19  ;;  %v885_v19 = vld [vmem:[#allocation6 + $0x238] sm:$0xff] }
 0x1e7   : > { %3174 = vmatmul.msk.f32.vlgmr.msra.gmra.mxu2 %vm710_vm0, %v3173_v2  ;;  %1632 = vmatpush.msrb.mxu1 %v949_v3 }
 0x1e8   : > { %1738 = vmatpush.msrb.mxu2 %v3543_v29  ;;  %1588 = vmatpush.msrb.mxu3 %v893_v5 }
 0x1e9   : > { %1633 = vmatpush.msrb.mxu1 %v947_v8 }
 0x1ea   : > { %1739 = vmatpush.msrb.mxu2 %v3548_v31  ;;  %1589 = vmatpush.msrb.mxu3 %v891_v9  ;;  %v1752_v9 = vld [vmem:[#allocation6 + $0xa30] sm:$0xff] }
 0x1eb   : > { %1634 = vmatpush.msrb.mxu1 %v945_v40  ;;  %v1858_v40 = vld [vmem:[#allocation6 + $0xd80] sm:$0xff] }
 0x1ec   : > { %1740 = vmatpush.msrb.mxu2 %v3553_v33  ;;  %1590 = vmatpush.msrb.mxu3 %v889_v16  ;;  %v1808_v16 = vld [vmem:[#allocation6 + $0xbf0] sm:$0xff] }
 0x1ed   : > { %1635 = vmatpush.msrb.mxu1 %v943_v17  ;;  %1926 = vmatpush.msra.mxu0 %v1808_v16 }
 0x1ee   : > { %1591 = vmatpush.msrb.mxu3 %v887_v18  ;;  %1636 = vmatmul.f32.vlgmr.msrb.gmra.mxu1 %v3590_v51  ;;  %v1776_v51 = vld [vmem:[#allocation6 + $0xaf0] sm:$0xff]  ;;  %v1750_v18 = vld [vmem:[#allocation6 + $0xa20] sm:$0xff] }
 0x1ef   : > { %1717 = vmatpush.msra.mxu1 %v3503_v12  ;;  %3178 = vmatmul.msk.f32.vlgmr.msrb.gmra.mxu2 %vm710_vm0, %v3173_v2 }
 0x1f0   : > { %1592 = vmatpush.msrb.mxu3 %v885_v19  ;;  %1966 = vmatpush.msra.mxu2 %v1872_v24  ;;  %v1856_v19 = vld [vmem:[#allocation6 + $0xd70] sm:$0xff] }
 0x1f1   : > { %1718 = vmatpush.msra.mxu1 %v3501_v11  ;;  %v1852_v24 = vld [vmem:[#allocation6 + $0xd50] sm:$0xff] }
 0x1f2   : > { %1593 = vmatpush.msrb.mxu3 %v883_v20  ;;  %1967 = vmatpush.msra.mxu2 %v1870_v28  ;;  %v1806_v20 = vld [vmem:[#allocation6 + $0xbe0] sm:$0xff]  ;;  %v1904_v28 = vld [vmem:[#allocation6 + $0xef0] sm:$0xff] }
 0x1f3   : > { %1719 = vmatpush.msra.mxu1 %v3508_v14  ;;  %1927 = vmatpush.msra.mxu0 %v1806_v20  ;;  %v1888_v20 = vld [vmem:[#allocation6 + $0xe70] sm:$0xff] }
 0x1f4   : > { %1594 = vmatpush.msrb.mxu3 %v881_v21  ;;  %1968 = vmatpush.msra.mxu2 %v1868_v32 }
 0x1f5   : > { %1720 = vmatpush.msra.mxu1 %v3512_v15 }
 0x1f6   : > { %1595 = vmatpush.msrb.mxu3 %v879_v22  ;;  %3177 = vmatmul.msk.f32.vlgmr.msra.gmra.mxu1 %vm710_vm0, %v3173_v2  ;;  %v1748_v22 = vld [vmem:[#allocation6 + $0xa10] sm:$0xff] }
 0x1f7   : > { %1596 = vmatmul.f32.vlgmr.msrb.gmra.mxu3 %v3580_v30  ;;  %v1774_v30 = vld [vmem:[#allocation6 + $0xae0] sm:$0xff]  ;;  %1969 = vmatpush.msra.mxu2 %v1866_v58 }
 0x1f8   : > { %1677 = vmatpush.msra.mxu3 %v3470_v53  ;;  %v1794_v58 = vld [vmem:[#allocation6 + $0xb80] sm:$0xff] }
 0x1f9   : > { %1970 = vmatpush.msra.mxu2 %v1864_v61  ;;  %v1896_v61 = vld [vmem:[#allocation6 + $0xeb0] sm:$0xff] }
 0x1fa   : > { %1678 = vmatpush.msra.mxu3 %v3468_v50  ;;  %v1257_v37 = vpop.f32.mrf.mxu2 }
 0x1fb   : > { %1971 = vmatpush.msra.mxu2 %v1862_v63  ;;  %v1832_v63 = vld [vmem:[#allocation6 + $0xcb0] sm:$0xff] }
 0x1fc   : > { %1679 = vmatpush.msra.mxu3 %v3475_v57  ;;  %v1297_v34 = vpop.f32.mrf.mxu0 }
 0x1fe   : > { %1680 = vmatpush.msra.mxu3 %v3479_v59 }
 0x1ff   : > { %3175 = vmatmul.msk.f32.vlgmr.msra.gmra.mxu3 %vm710_vm0, %v3173_v2 }
 0x200   : > { %1697 = vmatpush.msrb.mxu3 %v3491_v7 }
 0x202   : > { %1698 = vmatpush.msrb.mxu3 %v3489_v6 }
 0x204   : > { %1699 = vmatpush.msrb.mxu3 %v3498_v10  ;;  %v1317_v43 = vpop.f32.mrf.mxu1 }
 0x206   : > { %1700 = vmatpush.msrb.mxu3 %v3505_v13 }
 0x207   : > { %3176 = vmatmul.msk.f32.vlgmr.msrb.gmra.mxu3 %vm710_vm0, %v3173_v2  ;;  %v1337_v49 = vpop.f32.mrf.mxu2  ;;  %v1860_v2 = vld [vmem:[#allocation6 + $0xd90] sm:$0xff] }
 0x208   : > { %1906 = vmatpush.msra.mxu3 %v1776_v51  ;;  %1972 = vmatpush.msra.mxu2 %v1860_v2  ;;  %v1854_v51 = vld [vmem:[#allocation6 + $0xd60] sm:$0xff]  ;;  %v1892_v2 = vld [vmem:[#allocation6 + $0xe90] sm:$0xff] }
 0x20a   : > { %1907 = vmatpush.msra.mxu3 %v1774_v30  ;;  %1973 = vmatpush.msra.mxu2 %v1858_v40  ;;  %v1804_v30 = vld [vmem:[#allocation6 + $0xbd0] sm:$0xff]  ;;  %v1837_v40 = vld [vmem:[#allocation6 + $0xcd8] sm:$0xff] }
 0x20b   : > { %1928 = vmatpush.msra.mxu0 %v1804_v30  ;;  %v1824_v30 = vld [vmem:[#allocation6 + $0xc70] sm:$0xff] }
 0x20c   : > { %1908 = vmatpush.msra.mxu3 %v1772_v25  ;;  %v1397_v3 = vpop.f32.mrf.mxu1  ;;  %1974 = vmatpush.msra.mxu2 %v1856_v19  ;;  %v1746_v25 = vld [vmem:[#allocation6 + $0xa00] sm:$0xff] }
 0x20d   : > { %v1826_v19 = vld [vmem:[#allocation6 + $0xc80] sm:$0xff] }
 0x20e   : > { %1909 = vmatpush.msra.mxu3 %v1770_v26  ;;  %1975 = vmatpush.msra.mxu2 %v1854_v51  ;;  %v1802_v26 = vld [vmem:[#allocation6 + $0xbc0] sm:$0xff]  ;;  %v1784_v51 = vld [vmem:[#allocation6 + $0xb30] sm:$0xff] }
 0x20f   : > { %v1377_v44 = vpop.f32.mrf.mxu0  ;;  %1929 = vmatpush.msra.mxu0 %v1802_v26  ;;  %v1833_v26 = vld [vmem:[#allocation6 + $0xcb8] sm:$0xff] }
 0x210   : > { %1910 = vmatpush.msra.mxu3 %v1768_v36  ;;  %1976 = vmatpush.msra.mxu2 %v1852_v24  ;;  %v1850_v36 = vld [vmem:[#allocation6 + $0xd40] sm:$0xff] }
 0x211   : > { %v1886_v24 = vld [vmem:[#allocation6 + $0xe60] sm:$0xff] }
 0x212   : > { %1911 = vmatpush.msra.mxu3 %v1766_v38  ;;  %v1840_v38 = vld [vmem:[#allocation6 + $0xcf0] sm:$0xff]  ;;  %1977 = vmatpush.msra.mxu2 %v1850_v36 }
 0x213   : > { %1946 = vmatpush.msrb.mxu1 %v1840_v38  ;;  %v1884_v36 = vld [vmem:[#allocation6 + $0xe50] sm:$0xff] }
 0x214   : > { %v1277_v42 = vpop.f32.mrf.mxu3  ;;  %1912 = vmatpush.msra.mxu3 %v1764_v39  ;;  %v1902_v39 = vld [vmem:[#allocation6 + $0xee0] sm:$0xff]  ;;  %v1780_v38 = vld [vmem:[#allocation6 + $0xb10] sm:$0xff] }
 0x215   : > { %v1278_v35 = vadd.f32 %v1277_v42, %v1257_v37  ;;  %v1800_v37 = vld [vmem:[#allocation6 + $0xbb0] sm:$0xff]  ;;  %v1798_v42 = vld [vmem:[#allocation6 + $0xba0] sm:$0xff] }
 0x216   : > { %1913 = vmatpush.msra.mxu3 %v1762_v41  ;;  %1930 = vmatpush.msra.mxu0 %v1800_v37  ;;  %v1848_v41 = vld [vmem:[#allocation6 + $0xd30] sm:$0xff]  ;;  %v1831_v37 = vld [vmem:[#allocation6 + $0xca8] sm:$0xff] }
 0x217   : > { %v1298_v48 = vadd.f32 %v1297_v34, %v1278_v35  ;;  %v1838_v35 = vld [vmem:[#allocation6 + $0xce0] sm:$0xff]  ;;  %1978 = vmatpush.msra.mxu2 %v1848_v41 }
 0x218   : > { %1914 = vmatpush.msra.mxu3 %v1760_v56  ;;  %1931 = vmatpush.msra.mxu0 %v1798_v42  ;;  %v1844_v56 = vld [vmem:[#allocation6 + $0xd10] sm:$0xff]  ;;  %v1882_v41 = vld [vmem:[#allocation6 + $0xe40] sm:$0xff]  ;;  %v1829_v42 = vld [vmem:[#allocation6 + $0xc98] sm:$0xff] }
 0x219   : > { %v1318_v55 = vadd.f32 %v1317_v43, %v1298_v48  ;;  %v1900_v43 = vld [vmem:[#allocation6 + $0xed0] sm:$0xff]  ;;  %1947 = vmatpush.msrb.mxu1 %v1838_v35  ;;  %v1818_v35 = vld [vmem:[#allocation6 + $0xc40] sm:$0xff] }
 0x21a   : > { %1915 = vmatpush.msra.mxu3 %v1758_v60  ;;  %v1796_v48 = vld [vmem:[#allocation6 + $0xb90] sm:$0xff]  ;;  %v1834_v60 = vld [vmem:[#allocation6 + $0xcc0] sm:$0xff] }
 0x21b   : > { %v1338_v23 = vadd.f32 %v1337_v49, %v1318_v55  ;;  %v1836_v49 = vld [vmem:[#allocation6 + $0xcd0] sm:$0xff]  ;;  %v1898_v55 = vld [vmem:[#allocation6 + $0xec0] sm:$0xff]  ;;  %1932 = vmatpush.msra.mxu0 %v1796_v48  ;;  %v1777_v48 = vld [vmem:[#allocation6 + $0xaf8] sm:$0xff] }
 0x21c   : > { %1916 = vmatpush.msra.mxu3 %v1756_v62  ;;  %1948 = vmatpush.msrb.mxu1 %v1836_v49  ;;  %v1792_v62 = vld [vmem:[#allocation6 + $0xb70] sm:$0xff] }
 0x21d   : > { %v1357_v0 = vpop.f32.mrf.mxu3  ;;  %1933 = vmatpush.msra.mxu0 %v1794_v58  ;;  %v1816_v49 = vld [vmem:[#allocation6 + $0xc30] sm:$0xff]  ;;  %v1775_v58 = vld [vmem:[#allocation6 + $0xae8] sm:$0xff] }
 0x21e   : > { %v1378_v4 = vadd.f32 %v1377_v44, %v1357_v0  ;;  %1917 = vmatpush.msra.mxu3 %v1754_v1  ;;  %v1846_v44 = vld [vmem:[#allocation6 + $0xd20] sm:$0xff]  ;;  %1949 = vmatpush.msrb.mxu1 %v1834_v60 }
 0x21f   : > { %v1457_v47 = vpop.f32.mrf.mxu0  ;;  %1979 = vmatpush.msra.mxu2 %v1846_v44  ;;  %v1894_v0 = vld [vmem:[#allocation6 + $0xea0] sm:$0xff]  ;;  %1934 = vmatpush.msra.mxu0 %v1792_v62  ;;  %v1827_v44 = vld [vmem:[#allocation6 + $0xc88] sm:$0xff]  ;;  %v1773_v62 = vld [vmem:[#allocation6 + $0xad8] sm:$0xff] }
 0x220   : > { %v1458_v5 = vadd.f32 %v1457_v47, %v1338_v23  ;;  %v1398_v8 = vadd.f32 %v1397_v3, %v1378_v4  ;;  %v1417_v17 = vpop.f32.mrf.mxu2  ;;  %1918 = vmatpush.msra.mxu3 %v1752_v9  ;;  %v1842_v23 = vld [vmem:[#allocation6 + $0xd00] sm:$0xff]  ;;  %v1841_v4 = vld [vmem:[#allocation6 + $0xcf8] sm:$0xff]  ;;  %1950 = vmatpush.msrb.mxu1 %v1832_v63  ;;  %v1839_v3 = vld [vmem:[#allocation6 + $0xce8] sm:$0xff] }
 0x221   : > { %1980 = vmatpush.msra.mxu2 %v1844_v56  ;;  %v1790_v47 = vld [vmem:[#allocation6 + $0xb60] sm:$0xff]  ;;  %v1825_v56 = vld [vmem:[#allocation6 + $0xc78] sm:$0xff] }
 0x222   : > { %v3635_v21 = vadd.f32 %v1417_v17, %v1398_v8  ;;  %1919 = vmatpush.msra.mxu3 %v1750_v18  ;;  %v1830_v1 = vld [vmem:[#allocation6 + $0xca0] sm:$0xff]  ;;  %1935 = vmatpush.msra.mxu0 %v1790_v47  ;;  %v1828_v8 = vld [vmem:[#allocation6 + $0xc90] sm:$0xff]  ;;  %v1821_v47 = vld [vmem:[#allocation6 + $0xc58] sm:$0xff] }
 0x223   : > { %1981 = vmatpush.msra.mxu2 %v1842_v23  ;;  %v1890_v9 = vld [vmem:[#allocation6 + $0xe80] sm:$0xff]  ;;  %1951 = vmatpush.msrb.mxu1 %v1830_v1  ;;  %v1823_v23 = vld [vmem:[#allocation6 + $0xc68] sm:$0xff] }
 0x224   : > { %1920 = vmatpush.msra.mxu3 %v1748_v22  ;;  %v1786_v18 = vld [vmem:[#allocation6 + $0xb40] sm:$0xff]  ;;  %v1835_v22 = vld [vmem:[#allocation6 + $0xcc8] sm:$0xff] }
 0x225   : > { %2046 = vmatpush.msrb.mxu2 %v1841_v4  ;;  %1952 = vmatpush.msrb.mxu1 %v1828_v8  ;;  %v1814_v60 = vld [vmem:[#allocation6 + $0xc20] sm:$0xff]  ;;  %v1769_v8 = vld [vmem:[#allocation6 + $0xab8] sm:$0xff] }
 0x226   : > { %1921 = vmatpush.msra.mxu3 %v1746_v25  ;;  %v1874_v4 = vld [vmem:[#allocation6 + $0xe00] sm:$0xff] }
 0x227   : > { %v1477_v32 = vpop.f32.mrf.mxu1  ;;  %2047 = vmatpush.msrb.mxu2 %v1839_v3  ;;  %1953 = vmatpush.msrb.mxu1 %v1826_v19  ;;  %v1810_v3 = vld [vmem:[#allocation6 + $0xc00] sm:$0xff]  ;;  %v1765_v19 = vld [vmem:[#allocation6 + $0xa98] sm:$0xff] }
 0x228   : > { %v3637_v34 = vadd.f32 %v1477_v32, %v1458_v5  ;;  %1986 = vmatpush.msrb.mxu3 %v1904_v28  ;;  %v1788_v5 = vld [vmem:[#allocation6 + $0xb50] sm:$0xff]  ;;  %v1782_v28 = vld [vmem:[#allocation6 + $0xb20] sm:$0xff] }
 0x229   : > { %1936 = vmatpush.msra.mxu0 %v1788_v5  ;;  %2048 = vmatpush.msrb.mxu2 %v1837_v40  ;;  %v1822_v32 = vld [vmem:[#allocation6 + $0xc60] sm:$0xff]  ;;  %v1819_v5 = vld [vmem:[#allocation6 + $0xc48] sm:$0xff]  ;;  %v1817_v40 = vld [vmem:[#allocation6 + $0xc38] sm:$0xff] }
 0x22a   : > { %1987 = vmatpush.msrb.mxu3 %v1902_v39  ;;  %1954 = vmatpush.msrb.mxu1 %v1824_v30  ;;  %v1820_v39 = vld [vmem:[#allocation6 + $0xc50] sm:$0xff]  ;;  %v1803_v30 = vld [vmem:[#allocation6 + $0xbc8] sm:$0xff] }
 0x22b   : > { %1937 = vmatpush.msra.mxu0 %v1786_v18  ;;  %2049 = vmatpush.msrb.mxu2 %v1835_v22  ;;  %v1807_v18 = vld [vmem:[#allocation6 + $0xbe8] sm:$0xff]  ;;  %v1813_v22 = vld [vmem:[#allocation6 + $0xc18] sm:$0xff] }
 0x22c   : > { %1988 = vmatpush.msrb.mxu3 %v1900_v43  ;;  %1955 = vmatpush.msrb.mxu1 %v1822_v32  ;;  %v1880_v43 = vld [vmem:[#allocation6 + $0xe30] sm:$0xff]  ;;  %v1799_v32 = vld [vmem:[#allocation6 + $0xba8] sm:$0xff] }
 0x22d   : > { %1938 = vmatpush.msra.mxu0 %v1784_v51  ;;  %2050 = vmatpush.msrb.mxu2 %v1833_v26  ;;  %v1763_v51 = vld [vmem:[#allocation6 + $0xa88] sm:$0xff]  ;;  %v1801_v26 = vld [vmem:[#allocation6 + $0xbb8] sm:$0xff] }
 0x22e   : > { %1989 = vmatpush.msrb.mxu3 %v1898_v55  ;;  %1956 = vmatpush.msrb.mxu1 %v1820_v39  ;;  %v1878_v55 = vld [vmem:[#allocation6 + $0xe20] sm:$0xff] }
 0x22f   : > { %1939 = vmatpush.msra.mxu0 %v1782_v28  ;;  %2051 = vmatpush.msrb.mxu2 %v1831_v37  ;;  %v1759_v28 = vld [vmem:[#allocation6 + $0xa68] sm:$0xff]  ;;  %v1797_v37 = vld [vmem:[#allocation6 + $0xb98] sm:$0xff] }
 0x230   : > { %1990 = vmatpush.msrb.mxu3 %v1896_v61  ;;  %1957 = vmatpush.msrb.mxu1 %v1818_v35  ;;  %v1876_v61 = vld [vmem:[#allocation6 + $0xe10] sm:$0xff] }
 0x231   : > { %1940 = vmatpush.msra.mxu0 %v1780_v38  ;;  %2052 = vmatpush.msrb.mxu2 %v1829_v42  ;;  %v1795_v42 = vld [vmem:[#allocation6 + $0xb88] sm:$0xff] }
 0x232   : > { %1991 = vmatpush.msrb.mxu3 %v1894_v0  ;;  %1958 = vmatpush.msrb.mxu1 %v1816_v49  ;;  %v1812_v0 = vld [vmem:[#allocation6 + $0xc10] sm:$0xff]  ;;  %v1791_v49 = vld [vmem:[#allocation6 + $0xb68] sm:$0xff] }
 0x233   : > { %2053 = vmatpush.msrb.mxu2 %v1827_v44  ;;  %v1793_v44 = vld [vmem:[#allocation6 + $0xb78] sm:$0xff] }
 0x234   : > { %1992 = vmatpush.msrb.mxu3 %v1892_v2  ;;  %1959 = vmatpush.msrb.mxu1 %v1814_v60  ;;  %v1771_v2 = vld [vmem:[#allocation6 + $0xac8] sm:$0xff] }
 0x235   : > { %2054 = vmatpush.msrb.mxu2 %v1825_v56  ;;  %v1749_v56 = vld [vmem:[#allocation6 + $0xa18] sm:$0xff]  ;;  %v1747_v60 = vld [vmem:[#allocation6 + $0xa08] sm:$0xff] }
 0x236   : > { %1993 = vmatpush.msrb.mxu3 %v1890_v9  ;;  %1960 = vmatpush.msrb.mxu1 %v1812_v0  ;;  %v1809_v9 = vld [vmem:[#allocation6 + $0xbf8] sm:$0xff] }
 0x237   : > { %v1437_v16 = vpop.f32.mrf.mxu3  ;;  %2055 = vmatpush.msrb.mxu2 %v1823_v23  ;;  %v1785_v23 = vld [vmem:[#allocation6 + $0xb38] sm:$0xff] }
 0x238   : > { %v3640_v17 = vadd.f32 %v1437_v16, %v3635_v21  ;;  %1994 = vmatpush.msrb.mxu3 %v1888_v20  ;;  %1961 = vmatpush.msrb.mxu1 %v1810_v3  ;;  %v1767_v16 = vld [vmem:[#allocation6 + $0xaa8] sm:$0xff]  ;;  %v1805_v20 = vld [vmem:[#allocation6 + $0xbd8] sm:$0xff] }
 0x239   : > { %2056 = vmatpush.msrb.mxu2 %v1821_v47  ;;  %v1871_v47 = vld [vmem:[#allocation6 + $0xde8] sm:$0xff]  ;;  %v1869_v3 = vld [vmem:[#allocation6 + $0xdd8] sm:$0xff] }
 0x23a   : > { %1995 = vmatpush.msrb.mxu3 %v1886_v24  ;;  %2026 = vmatpush.msra.mxu1 %v1809_v9  ;;  %v1761_v24 = vld [vmem:[#allocation6 + $0xa78] sm:$0xff]  ;;  %v1863_v9 = vld [vmem:[#allocation6 + $0xda8] sm:$0xff] }
 0x23b   : > { %2057 = vmatpush.msrb.mxu2 %v1819_v5  ;;  %v1867_v5 = vld [vmem:[#allocation6 + $0xdc8] sm:$0xff] }
 0x23c   : > { %1996 = vmatpush.msrb.mxu3 %v1884_v36  ;;  %2027 = vmatpush.msra.mxu1 %v1807_v18  ;;  %v1757_v36 = vld [vmem:[#allocation6 + $0xa58] sm:$0xff] }
 0x23d   : > { %2058 = vmatpush.msrb.mxu2 %v1817_v40  ;;  %v1861_v18 = vld [vmem:[#allocation6 + $0xd98] sm:$0xff] }
 0x23e   : > { %v1497_v25 = vpop.f32.mrf.mxu2  ;;  %1997 = vmatpush.msrb.mxu3 %v1882_v41  ;;  %2028 = vmatpush.msra.mxu1 %v1805_v20  ;;  %v1755_v41 = vld [vmem:[#allocation6 + $0xa48] sm:$0xff] }
 0x23f   : > { %v3643_v21 = vadd.f32 %v1497_v25, %v3637_v34  ;;  %v1778_v34 = vld [vmem:[#allocation6 + $0xb00] sm:$0xff]  ;;  %v1811_v25 = vld [vmem:[#allocation6 + $0xc08] sm:$0xff] }
 0x240   : > { %1941 = vmatpush.msra.mxu0 %v1778_v34  ;;  %1998 = vmatpush.msrb.mxu3 %v1880_v43  ;;  %v1753_v43 = vld [vmem:[#allocation6 + $0xa38] sm:$0xff] }
 0x241   : > { %2029 = vmatpush.msra.mxu1 %v1803_v30  ;;  %v1537_v34 = vpop.f32.mrf.mxu0 }
 0x242   : > { %2006 = vmatpush.msrb.mxu0 %v1777_v48  ;;  %1999 = vmatpush.msrb.mxu3 %v1878_v55  ;;  %v1751_v48 = vld [vmem:[#allocation6 + $0xa28] sm:$0xff] }
 0x243   : > { %2030 = vmatpush.msra.mxu1 %v1801_v26  ;;  %v1851_v26 = vld [vmem:[#allocation6 + $0xd48] sm:$0xff] }
 0x244   : > { %2007 = vmatpush.msrb.mxu0 %v1775_v58  ;;  %2000 = vmatpush.msrb.mxu3 %v1876_v61  ;;  %v1789_v58 = vld [vmem:[#allocation6 + $0xb58] sm:$0xff]  ;;  %v1787_v61 = vld [vmem:[#allocation6 + $0xb48] sm:$0xff] }
 0x245   : > { %2031 = vmatpush.msra.mxu1 %v1799_v32  ;;  %v1849_v32 = vld [vmem:[#allocation6 + $0xd38] sm:$0xff] }
 0x246   : > { %2008 = vmatpush.msrb.mxu0 %v1773_v62  ;;  %2001 = vmatpush.msrb.mxu3 %v1874_v4  ;;  %v1783_v62 = vld [vmem:[#allocation6 + $0xb28] sm:$0xff]  ;;  %v1781_v4 = vld [vmem:[#allocation6 + $0xb18] sm:$0xff] }
 0x247   : > { %2032 = vmatpush.msra.mxu1 %v1797_v37  ;;  %v1847_v37 = vld [vmem:[#allocation6 + $0xd28] sm:$0xff] }
 0x248   : > { %2009 = vmatpush.msrb.mxu0 %v1771_v2  ;;  %v1779_v2 = vld [vmem:[#allocation6 + $0xb08] sm:$0xff] }
 0x249   : > { %v1557_v63 = vpop.f32.mrf.mxu1  ;;  %2033 = vmatpush.msra.mxu1 %v1795_v42  ;;  %v1901_v42 = vld [vmem:[#allocation6 + $0xed8] sm:$0xff] }
 0x24a   : > { %v3646_v1 = vadd.f32 %v1557_v63, %v3640_v17  ;;  %2010 = vmatpush.msrb.mxu0 %v1769_v8  ;;  %v1815_v17 = vld [vmem:[#allocation6 + $0xc28] sm:$0xff]  ;;  %v1873_v63 = vld [vmem:[#allocation6 + $0xdf8] sm:$0xff] }
 0x24b   : > { %2059 = vmatpush.msrb.mxu2 %v1815_v17  ;;  %2034 = vmatpush.msra.mxu1 %v1793_v44  ;;  %v1865_v8 = vld [vmem:[#allocation6 + $0xdb8] sm:$0xff]  ;;  %v1859_v17 = vld [vmem:[#allocation6 + $0xd88] sm:$0xff] }
 0x24c   : > { %2011 = vmatpush.msrb.mxu0 %v1767_v16  ;;  %v1897_v44 = vld [vmem:[#allocation6 + $0xeb8] sm:$0xff] }
 0x24d   : > { %2060 = vmatpush.msrb.mxu2 %v1813_v22  ;;  %2035 = vmatpush.msra.mxu1 %v1791_v49  ;;  %v1855_v22 = vld [vmem:[#allocation6 + $0xd68] sm:$0xff] }
 0x24e   : > { %2012 = vmatpush.msrb.mxu0 %v1765_v19  ;;  %v1857_v19 = vld [vmem:[#allocation6 + $0xd78] sm:$0xff]  ;;  %v1895_v49 = vld [vmem:[#allocation6 + $0xea8] sm:$0xff] }
 0x24f   : > { %2061 = vmatpush.msrb.mxu2 %v1811_v25  ;;  %2036 = vmatpush.msra.mxu1 %v1789_v58  ;;  %v1853_v25 = vld [vmem:[#allocation6 + $0xd58] sm:$0xff]  ;;  %v1891_v58 = vld [vmem:[#allocation6 + $0xe88] sm:$0xff] }
 0x250   : > { %2013 = vmatpush.msrb.mxu0 %v1763_v51 }
 0x251   : > { %2037 = vmatpush.msra.mxu1 %v1787_v61  ;;  %v3674_v61 = vld [vmem:[%s3769_s4 + $0xc] sm:$0xf] }
 0x252   : > { %2014 = vmatpush.msrb.mxu0 %v1761_v24 }
 0x253   : > { %2038 = vmatpush.msra.mxu1 %v1785_v23  ;;  %v2244_v23 = vld [vmem:[#allocation6 + $0xff0] sm:$0xff] }
 0x254   : > { %2015 = vmatpush.msrb.mxu0 %v1759_v28 }
 0x255   : > { %2039 = vmatpush.msra.mxu1 %v1783_v62  ;;  %v1887_v62 = vld [vmem:[#allocation6 + $0xe68] sm:$0xff] }
 0x256   : > { %2016 = vmatpush.msrb.mxu0 %v1757_v36  ;;  %v1905_v36 = vld [vmem:[#allocation6 + $0xef8] sm:$0xff] }
 0x257   : > { %2040 = vmatpush.msra.mxu1 %v1781_v4  ;;  %v1885_v4 = vld [vmem:[#allocation6 + $0xe58] sm:$0xff] }
 0x258   : > { %2017 = vmatpush.msrb.mxu0 %v1755_v41  ;;  %v1845_v41 = vld [vmem:[#allocation6 + $0xd18] sm:$0xff] }
 0x259   : > { %v1517_v38 = vpop.f32.mrf.mxu3  ;;  %2041 = vmatpush.msra.mxu1 %v1779_v2  ;;  %v1883_v2 = vld [vmem:[#allocation6 + $0xe48] sm:$0xff] }
 0x25a   : > { %v1518_v39 = vadd.f32 %v1517_v38, %v3643_v21  ;;  %2018 = vmatpush.msrb.mxu0 %v1753_v43  ;;  %v1899_v43 = vld [vmem:[#allocation6 + $0xec8] sm:$0xff] }
 0x25c   : > { %v3649_v35 = vadd.f32 %v1537_v34, %v1518_v39  ;;  %2019 = vmatpush.msrb.mxu0 %v1751_v48  ;;  %v1903_v39 = vld [vmem:[#allocation6 + $0xee8] sm:$0xff] }
 0x25d   : > { %v1843_v34 = vld [vmem:[#allocation6 + $0xd08] sm:$0xff] }
 0x25e   : > { %2020 = vmatpush.msrb.mxu0 %v1749_v56  ;;  %v2308_v56 = vld [vmem:[#allocation6 + $0x11f0] sm:$0xff] }
 0x260   : > { %v1577_v55 = vpop.f32.mrf.mxu2  ;;  %2021 = vmatpush.msrb.mxu0 %v1747_v60  ;;  %v1889_v60 = vld [vmem:[#allocation6 + $0xe78] sm:$0xff] }
 0x261   : > { %v1578_v21 = vadd.f32 %v1577_v55, %v3646_v1  ;;  %v1893_v55 = vld [vmem:[#allocation6 + $0xe98] sm:$0xff] }
 0x263   : > { %v1617_v30 = vpop.f32.mrf.mxu0 }
 0x26a   : > { %v3652_v0 = vpop.f32.mrf.mxu2 }
 0x26b   : > { %1922 = vmatmul.f32.vlgmr.msra.gmra.mxu3 %v3652_v0  ;;  %v1637_v1 = vpop.f32.mrf.mxu1 }
 0x26c   : > { %2066 = vmatpush.msra.mxu3 %v1873_v63  ;;  %v2304_v63 = vld [vmem:[#allocation6 + $0x11d0] sm:$0xff] }
 0x26e   : > { %2067 = vmatpush.msra.mxu3 %v1871_v47  ;;  %v2302_v47 = vld [vmem:[#allocation6 + $0x11c0] sm:$0xff] }
 0x270   : > { %2068 = vmatpush.msra.mxu3 %v1869_v3  ;;  %v2300_v3 = vld [vmem:[#allocation6 + $0x11b0] sm:$0xff] }
 0x272   : > { %2069 = vmatpush.msra.mxu3 %v1867_v5  ;;  %v3655_v40 = vpop.f32.mrf.mxu2  ;;  %v2238_v5 = vld [vmem:[#allocation6 + $0xfc0] sm:$0xff] }
 0x273   : > { %v1722_v16 = vpop.f32.mrf.mxu1  ;;  %2002 = vmatmul.f32.vlgmr.msrb.gmra.mxu3 %v3655_v40 }
 0x274   : > { %2070 = vmatpush.msra.mxu3 %v1865_v8  ;;  %1982 = vmatmul.f32.vlgmr.msra.gmra.mxu2 %v1722_v16  ;;  %v1881_v8 = vld [vmem:[#allocation6 + $0xe38] sm:$0xff] }
 0x275   : > { %2145 = vmatpush.msra.mxu2 %v3470_v53 }
 0x276   : > { %2071 = vmatpush.msra.mxu3 %v1863_v9  ;;  %v1879_v9 = vld [vmem:[#allocation6 + $0xe28] sm:$0xff] }
 0x277   : > { %2146 = vmatpush.msra.mxu2 %v3468_v50 }
 0x278   : > { %2072 = vmatpush.msra.mxu3 %v1861_v18  ;;  %v2298_v18 = vld [vmem:[#allocation6 + $0x11a0] sm:$0xff] }
 0x279   : > { %2147 = vmatpush.msra.mxu2 %v3475_v57 }
 0x27a   : > { %2073 = vmatpush.msra.mxu3 %v1859_v17  ;;  %v1597_v20 = vpop.f32.mrf.mxu3  ;;  %v1877_v17 = vld [vmem:[#allocation6 + $0xe18] sm:$0xff] }
 0x27b   : > { %v1598_v51 = vadd.f32 %v1597_v20, %v1578_v21  ;;  %2148 = vmatpush.msra.mxu2 %v3479_v59  ;;  %v2306_v21 = vld [vmem:[#allocation6 + $0x11e0] sm:$0xff]  ;;  %v2296_v20 = vld [vmem:[#allocation6 + $0x1190] sm:$0xff] }
 0x27c   : > { %2074 = vmatpush.msra.mxu3 %v1857_v19  ;;  %v2234_v19 = vld [vmem:[#allocation6 + $0xfa0] sm:$0xff] }
 0x27d   : > { %v1618_v24 = vadd.f32 %v1617_v30, %v1598_v51  ;;  %v2232_v51 = vld [vmem:[#allocation6 + $0xf90] sm:$0xff] }
 0x27e   : > { %2075 = vmatpush.msra.mxu3 %v1855_v22  ;;  %v1875_v22 = vld [vmem:[#allocation6 + $0xe08] sm:$0xff]  ;;  %v2340_v30 = vld [vmem:[#allocation6 + $0x12f0] sm:$0xff] }
 0x27f   : > { %v3662_v28 = vadd.f32 %v1637_v1, %v1618_v24  ;;  %v2240_v1 = vld [vmem:[#allocation6 + $0xfd0] sm:$0xff]  ;;  %v2230_v24 = vld [vmem:[#allocation6 + $0xf80] sm:$0xff] }
 0x280   : > { %2076 = vmatpush.msra.mxu3 %v1853_v25  ;;  %v2276_v25 = vld [vmem:[#allocation6 + $0x10f0] sm:$0xff] }
 0x282   : > { %2077 = vmatpush.msra.mxu3 %v1851_v26  ;;  %v1682_v38 = vpop.f32.mrf.mxu3  ;;  %v2338_v26 = vld [vmem:[#allocation6 + $0x12e0] sm:$0xff] }
 0x283   : > { %1942 = vmatmul.f32.vlgmr.msra.gmra.mxu0 %v1682_v38 }
 0x284   : > { %2078 = vmatpush.msra.mxu3 %v1849_v32  ;;  %2086 = vmatpush.msra.mxu0 %v1905_v36  ;;  %v2294_v32 = vld [vmem:[#allocation6 + $0x1180] sm:$0xff] }
 0x285   : > { %v2274_v36 = vld [vmem:[#allocation6 + $0x10e0] sm:$0xff] }
 0x286   : > { %2079 = vmatpush.msra.mxu3 %v1847_v37  ;;  %2087 = vmatpush.msra.mxu0 %v1903_v39  ;;  %v2228_v37 = vld [vmem:[#allocation6 + $0xf70] sm:$0xff] }
 0x287   : > { %v2292_v39 = vld [vmem:[#allocation6 + $0x1170] sm:$0xff] }
 0x288   : > { %2080 = vmatpush.msra.mxu3 %v1845_v41  ;;  %2088 = vmatpush.msra.mxu0 %v1901_v42  ;;  %v2272_v41 = vld [vmem:[#allocation6 + $0x10d0] sm:$0xff]  ;;  %v2226_v42 = vld [vmem:[#allocation6 + $0xf60] sm:$0xff] }
 0x28a   : > { %2081 = vmatpush.msra.mxu3 %v1843_v34  ;;  %2089 = vmatpush.msra.mxu0 %v1899_v43  ;;  %v1702_v48 = vpop.f32.mrf.mxu3  ;;  %v2334_v34 = vld [vmem:[#allocation6 + $0x12c0] sm:$0xff] }
 0x28b   : > { %2082 = vmatmul.f32.vlgmr.msra.gmra.mxu3 %v1722_v16  ;;  %1962 = vmatmul.f32.vlgmr.msrb.gmra.mxu1 %v1702_v48  ;;  %v2236_v16 = vld [vmem:[#allocation6 + $0xfb0] sm:$0xff]  ;;  %v2270_v43 = vld [vmem:[#allocation6 + $0x10c0] sm:$0xff] }
 0x28c   : > { %2062 = vmatmul.f32.vlgmr.msrb.gmra.mxu2 %v1702_v48  ;;  %2090 = vmatpush.msra.mxu0 %v1897_v44  ;;  %v2224_v44 = vld [vmem:[#allocation6 + $0xf50] sm:$0xff] }
 0x28d   : > { %2125 = vmatpush.msrb.mxu1 %v3463_v46  ;;  %2185 = vmatpush.msrb.mxu2 %v3503_v12  ;;  %v2332_v48 = vld [vmem:[#allocation6 + $0x12b0] sm:$0xff] }
 0x28e   : > { %2022 = vmatmul.f32.vlgmr.msrb.gmra.mxu0 %v3652_v0  ;;  %2414 = vmatpush.msrb.mxu3 %v2308_v56  ;;  %v2242_v0 = vld [vmem:[#allocation6 + $0xfe0] sm:$0xff] }
 0x28f   : > { %2091 = vmatpush.msra.mxu0 %v1895_v49  ;;  %2126 = vmatpush.msrb.mxu1 %v3461_v45  ;;  %v2268_v49 = vld [vmem:[#allocation6 + $0x10b0] sm:$0xff]  ;;  %v2330_v56 = vld [vmem:[#allocation6 + $0x12a0] sm:$0xff] }
 0x290   : > { %2186 = vmatpush.msrb.mxu2 %v3501_v11  ;;  %2415 = vmatpush.msrb.mxu3 %v2306_v21  ;;  %v2266_v21 = vld [vmem:[#allocation6 + $0x10a0] sm:$0xff] }
 0x291   : > { %2092 = vmatpush.msra.mxu0 %v1893_v55  ;;  %2127 = vmatpush.msrb.mxu1 %v3465_v52  ;;  %v2222_v55 = vld [vmem:[#allocation6 + $0xf40] sm:$0xff] }
 0x292   : > { %2187 = vmatpush.msrb.mxu2 %v3508_v14  ;;  %2416 = vmatpush.msrb.mxu3 %v2304_v63  ;;  %v2264_v63 = vld [vmem:[#allocation6 + $0x1090] sm:$0xff] }
 0x293   : > { %2093 = vmatpush.msra.mxu0 %v1891_v58  ;;  %2128 = vmatpush.msrb.mxu1 %v3472_v54  ;;  %v2288_v58 = vld [vmem:[#allocation6 + $0x1150] sm:$0xff] }
 0x294   : > { %2188 = vmatpush.msrb.mxu2 %v3512_v15  ;;  %2042 = vmatmul.f32.vlgmr.msra.gmra.mxu1 %v1682_v38  ;;  %v2336_v38 = vld [vmem:[#allocation6 + $0x12d0] sm:$0xff] }
 0x295   : > { %2094 = vmatpush.msra.mxu0 %v1889_v60  ;;  %3181 = vmatmul.msk.f32.vlgmr.msra.gmra.mxu2 %vm710_vm0, %v3674_v61  ;;  %v2220_v60 = vld [vmem:[#allocation6 + $0xf30] sm:$0xff] }
 0x296   : > { %2165 = vmatpush.msra.mxu1 %v3491_v7  ;;  %2374 = vmatpush.msra.mxu2 %v2244_v23  ;;  %v2328_v23 = vld [vmem:[#allocation6 + $0x1290] sm:$0xff] }
 0x297   : > { %2095 = vmatpush.msra.mxu0 %v1887_v62  ;;  %2417 = vmatpush.msrb.mxu3 %v2302_v47  ;;  %v2286_v62 = vld [vmem:[#allocation6 + $0x1140] sm:$0xff]  ;;  %v2284_v47 = vld [vmem:[#allocation6 + $0x1130] sm:$0xff] }
 0x298   : > { %2166 = vmatpush.msra.mxu1 %v3489_v6  ;;  %2375 = vmatpush.msra.mxu2 %v2242_v0  ;;  %v2218_v0 = vld [vmem:[#allocation6 + $0xf20] sm:$0xff] }
 0x299   : > { %2096 = vmatpush.msra.mxu0 %v1885_v4  ;;  %2418 = vmatpush.msrb.mxu3 %v2300_v3  ;;  %v2326_v4 = vld [vmem:[#allocation6 + $0x1280] sm:$0xff]  ;;  %v2260_v3 = vld [vmem:[#allocation6 + $0x1070] sm:$0xff] }
 0x29a   : > { %2167 = vmatpush.msra.mxu1 %v3498_v10  ;;  %2376 = vmatpush.msra.mxu2 %v2240_v1  ;;  %v2262_v1 = vld [vmem:[#allocation6 + $0x1080] sm:$0xff] }
 0x29b   : > { %2097 = vmatpush.msra.mxu0 %v1883_v2  ;;  %2419 = vmatpush.msrb.mxu3 %v2298_v18  ;;  %v2216_v2 = vld [vmem:[#allocation6 + $0xf10] sm:$0xff] }
 0x29c   : > { %2168 = vmatpush.msra.mxu1 %v3505_v13  ;;  %2377 = vmatpush.msra.mxu2 %v2238_v5  ;;  %v2214_v5 = vld [vmem:[#allocation6 + $0xf00] sm:$0xff]  ;;  %v2320_v18 = vld [vmem:[#allocation6 + $0x1250] sm:$0xff] }
 0x29d   : > { %2098 = vmatpush.msra.mxu0 %v1881_v8  ;;  %3180 = vmatmul.msk.f32.vlgmr.msrb.gmra.mxu1 %vm710_vm0, %v3674_v61  ;;  %v2322_v8 = vld [vmem:[#allocation6 + $0x1260] sm:$0xff] }
 0x29e   : > { %3183 = vmatmul.msk.f32.vlgmr.msrb.gmra.mxu2 %vm710_vm0, %v3674_v61  ;;  %2205 = vmatpush.msrb.mxu1 %v3538_v27 }
 0x29f   : > { %2099 = vmatpush.msra.mxu0 %v1879_v9  ;;  %2378 = vmatpush.msra.mxu2 %v2236_v16  ;;  %v2372_v9 = vld [vmem:[#allocation6 + $0x13f0] sm:$0xff]  ;;  %v2258_v16 = vld [vmem:[#allocation6 + $0x1060] sm:$0xff] }
 0x2a0   : > { %2206 = vmatpush.msrb.mxu1 %v3543_v29  ;;  %2420 = vmatpush.msrb.mxu3 %v2296_v20  ;;  %v2254_v20 = vld [vmem:[#allocation6 + $0x1040] sm:$0xff] }
 0x2a1   : > { %2100 = vmatpush.msra.mxu0 %v1877_v17  ;;  %2379 = vmatpush.msra.mxu2 %v2234_v19  ;;  %v2256_v17 = vld [vmem:[#allocation6 + $0x1050] sm:$0xff]  ;;  %v2318_v19 = vld [vmem:[#allocation6 + $0x1240] sm:$0xff] }
 0x2a2   : > { %2207 = vmatpush.msrb.mxu1 %v3548_v31  ;;  %2421 = vmatpush.msrb.mxu3 %v2294_v32  ;;  %v2282_v32 = vld [vmem:[#allocation6 + $0x1120] sm:$0xff] }
 0x2a3   : > { %2101 = vmatpush.msra.mxu0 %v1875_v22  ;;  %2380 = vmatpush.msra.mxu2 %v2232_v51  ;;  %v2316_v22 = vld [vmem:[#allocation6 + $0x1230] sm:$0xff] }
 0x2a4   : > { %2208 = vmatpush.msrb.mxu1 %v3553_v33  ;;  %2102 = vmatmul.f32.vlgmr.msra.gmra.mxu0 %v3655_v40  ;;  %v2290_v40 = vld [vmem:[#allocation6 + $0x1160] sm:$0xff]  ;;  %v2252_v51 = vld [vmem:[#allocation6 + $0x1030] sm:$0xff] }
 0x2a5   : > { %3182 = vmatmul.msk.f32.vlgmr.msra.gmra.mxu1 %vm710_vm0, %v3674_v61  ;;  %2434 = vmatpush.msrb.mxu0 %v2340_v30  ;;  %v2314_v30 = vld [vmem:[#allocation6 + $0x1220] sm:$0xff] }
 0x2a6   : > { %2394 = vmatpush.msra.mxu1 %v2276_v25  ;;  %2381 = vmatpush.msra.mxu2 %v2230_v24  ;;  %v2250_v25 = vld [vmem:[#allocation6 + $0x1020] sm:$0xff] }
 0x2a7   : > { %2435 = vmatpush.msrb.mxu0 %v2338_v26  ;;  %2422 = vmatpush.msrb.mxu3 %v2292_v39  ;;  %v2370_v24 = vld [vmem:[#allocation6 + $0x13e0] sm:$0xff]  ;;  %v2248_v26 = vld [vmem:[#allocation6 + $0x1010] sm:$0xff] }
 0x2a8   : > { %2395 = vmatpush.msra.mxu1 %v2274_v36  ;;  %2382 = vmatpush.msra.mxu2 %v2228_v37  ;;  %v2312_v36 = vld [vmem:[#allocation6 + $0x1210] sm:$0xff] }
 0x2a9   : > { %2436 = vmatpush.msrb.mxu0 %v2336_v38  ;;  %2423 = vmatpush.msrb.mxu3 %v2290_v40  ;;  %v2368_v37 = vld [vmem:[#allocation6 + $0x13d0] sm:$0xff]  ;;  %v2246_v38 = vld [vmem:[#allocation6 + $0x1000] sm:$0xff]  ;;  %v2309_v40 = vld [vmem:[#allocation6 + $0x11f8] sm:$0xff] }
 0x2aa   : > { %2396 = vmatpush.msra.mxu1 %v2272_v41  ;;  %2383 = vmatpush.msra.mxu2 %v2226_v42  ;;  %v2280_v39 = vld [vmem:[#allocation6 + $0x1110] sm:$0xff]  ;;  %v2310_v41 = vld [vmem:[#allocation6 + $0x1200] sm:$0xff] }
 0x2ab   : > { %2437 = vmatpush.msrb.mxu0 %v2334_v34  ;;  %2424 = vmatpush.msrb.mxu3 %v2288_v58  ;;  %v2366_v42 = vld [vmem:[#allocation6 + $0x13c0] sm:$0xff]  ;;  %v2245_v34 = vld [vmem:[#allocation6 + $0xff8] sm:$0xff] }
 0x2ac   : > { %2397 = vmatpush.msra.mxu1 %v2270_v43  ;;  %2384 = vmatpush.msra.mxu2 %v2224_v44  ;;  %v2278_v43 = vld [vmem:[#allocation6 + $0x1100] sm:$0xff]  ;;  %v2364_v44 = vld [vmem:[#allocation6 + $0x13b0] sm:$0xff]  ;;  %v2241_v58 = vld [vmem:[#allocation6 + $0xfd8] sm:$0xff] }
 0x2ad   : > { %3184 = vmatmul.msk.f32.vlgmr.msrb.gmra.mxu1 %vm710_vm0, %v3674_v61  ;;  %2438 = vmatpush.msrb.mxu0 %v2332_v48  ;;  %v2324_v61 = vld [vmem:[#allocation6 + $0x1270] sm:$0xff]  ;;  %v2243_v48 = vld [vmem:[#allocation6 + $0xfe8] sm:$0xff] }
 0x2ae   : > { %2398 = vmatpush.msra.mxu1 %v2268_v49  ;;  %2385 = vmatpush.msra.mxu2 %v2222_v55  ;;  %v2277_v49 = vld [vmem:[#allocation6 + $0x10f8] sm:$0xff]  ;;  %v2307_v55 = vld [vmem:[#allocation6 + $0x11e8] sm:$0xff] }
 0x2af   : > { %2439 = vmatpush.msrb.mxu0 %v2330_v56  ;;  %2425 = vmatpush.msrb.mxu3 %v2286_v62  ;;  %v2362_v56 = vld [vmem:[#allocation6 + $0x13a0] sm:$0xff]  ;;  %v2239_v62 = vld [vmem:[#allocation6 + $0xfc8] sm:$0xff] }
 0x2b0   : > { %2399 = vmatpush.msra.mxu1 %v2266_v21  ;;  %2386 = vmatpush.msra.mxu2 %v2220_v60  ;;  %v2275_v21 = vld [vmem:[#allocation6 + $0x10e8] sm:$0xff]  ;;  %v2305_v60 = vld [vmem:[#allocation6 + $0x11d8] sm:$0xff] }
 0x2b1   : > { %2440 = vmatpush.msrb.mxu0 %v2328_v23  ;;  %2426 = vmatpush.msrb.mxu3 %v2284_v47  ;;  %v2360_v23 = vld [vmem:[#allocation6 + $0x1390] sm:$0xff]  ;;  %v2237_v47 = vld [vmem:[#allocation6 + $0xfb8] sm:$0xff] }
 0x2b2   : > { %2400 = vmatpush.msra.mxu1 %v2264_v63  ;;  %2387 = vmatpush.msra.mxu2 %v2218_v0  ;;  %v2273_v63 = vld [vmem:[#allocation6 + $0x10d8] sm:$0xff]  ;;  %v2303_v0 = vld [vmem:[#allocation6 + $0x11c8] sm:$0xff] }
 0x2b3   : > { %2441 = vmatpush.msrb.mxu0 %v2326_v4  ;;  %2427 = vmatpush.msrb.mxu3 %v2282_v32  ;;  %v2358_v4 = vld [vmem:[#allocation6 + $0x1380] sm:$0xff]  ;;  %v2348_v32 = vld [vmem:[#allocation6 + $0x1330] sm:$0xff] }
 0x2b4   : > { %2401 = vmatpush.msra.mxu1 %v2262_v1  ;;  %2388 = vmatpush.msra.mxu2 %v2216_v2  ;;  %v2271_v1 = vld [vmem:[#allocation6 + $0x10c8] sm:$0xff]  ;;  %v2301_v2 = vld [vmem:[#allocation6 + $0x11b8] sm:$0xff] }
 0x2b5   : > { %2442 = vmatpush.msrb.mxu0 %v2324_v61  ;;  %2428 = vmatpush.msrb.mxu3 %v2280_v39  ;;  %v2356_v61 = vld [vmem:[#allocation6 + $0x1370] sm:$0xff]  ;;  %v2346_v39 = vld [vmem:[#allocation6 + $0x1320] sm:$0xff] }
 0x2b6   : > { %2402 = vmatpush.msra.mxu1 %v2260_v3  ;;  %2389 = vmatpush.msra.mxu2 %v2214_v5  ;;  %v2235_v3 = vld [vmem:[#allocation6 + $0xfa8] sm:$0xff]  ;;  %v2269_v5 = vld [vmem:[#allocation6 + $0x10b8] sm:$0xff] }
 0x2b7   : > { %2443 = vmatpush.msrb.mxu0 %v2322_v8  ;;  %2429 = vmatpush.msrb.mxu3 %v2278_v43  ;;  %v2299_v8 = vld [vmem:[#allocation6 + $0x11a8] sm:$0xff] }
 0x2b8   : > { %2454 = vmatpush.msrb.mxu2 %v2372_v9  ;;  %2403 = vmatpush.msra.mxu1 %v2258_v16  ;;  %v2354_v9 = vld [vmem:[#allocation6 + $0x1360] sm:$0xff]  ;;  %v2233_v16 = vld [vmem:[#allocation6 + $0xf98] sm:$0xff]  ;;  %v2223_v43 = vld [vmem:[#allocation6 + $0xf48] sm:$0xff] }
 0x2b9   : > { %2444 = vmatpush.msrb.mxu0 %v2320_v18  ;;  %2494 = vmatpush.msra.mxu3 %v2277_v49  ;;  %v2267_v18 = vld [vmem:[#allocation6 + $0x10a8] sm:$0xff]  ;;  %v2342_v49 = vld [vmem:[#allocation6 + $0x1300] sm:$0xff] }
 0x2ba   : > { %2404 = vmatpush.msra.mxu1 %v2256_v17  ;;  %2455 = vmatpush.msrb.mxu2 %v2370_v24  ;;  %v2297_v17 = vld [vmem:[#allocation6 + $0x1198] sm:$0xff]  ;;  %v2263_v24 = vld [vmem:[#allocation6 + $0x1088] sm:$0xff] }
 0x2bb   : > { %2445 = vmatpush.msrb.mxu0 %v2318_v19  ;;  %2495 = vmatpush.msra.mxu3 %v2275_v21  ;;  %v2352_v19 = vld [vmem:[#allocation6 + $0x1350] sm:$0xff]  ;;  %v2219_v21 = vld [vmem:[#allocation6 + $0xf28] sm:$0xff] }
 0x2bc   : > { %2405 = vmatpush.msra.mxu1 %v2254_v20  ;;  %2456 = vmatpush.msrb.mxu2 %v2368_v37  ;;  %v2231_v20 = vld [vmem:[#allocation6 + $0xf88] sm:$0xff]  ;;  %v2261_v37 = vld [vmem:[#allocation6 + $0x1078] sm:$0xff] }
 0x2bd   : > { %2446 = vmatpush.msrb.mxu0 %v2316_v22  ;;  %2496 = vmatpush.msra.mxu3 %v2273_v63  ;;  %v2265_v22 = vld [vmem:[#allocation6 + $0x1098] sm:$0xff]  ;;  %v2251_v63 = vld [vmem:[#allocation6 + $0x1028] sm:$0xff] }
 0x2be   : > { %2406 = vmatpush.msra.mxu1 %v2252_v51  ;;  %2457 = vmatpush.msrb.mxu2 %v2366_v42  ;;  %v2295_v51 = vld [vmem:[#allocation6 + $0x1188] sm:$0xff] }
 0x2bf   : > { %2447 = vmatpush.msrb.mxu0 %v2314_v30  ;;  %2497 = vmatpush.msra.mxu3 %v2271_v1  ;;  %v2350_v30 = vld [vmem:[#allocation6 + $0x1340] sm:$0xff]  ;;  %v2259_v42 = vld [vmem:[#allocation6 + $0x1068] sm:$0xff] }
 0x2c0   : > { %2407 = vmatpush.msra.mxu1 %v2250_v25  ;;  %2458 = vmatpush.msrb.mxu2 %v2364_v44  ;;  %v2229_v25 = vld [vmem:[#allocation6 + $0xf78] sm:$0xff]  ;;  %v2279_v1 = vld [vmem:[#allocation6 + $0x1108] sm:$0xff] }
 0x2c1   : > { %2448 = vmatpush.msrb.mxu0 %v2312_v36  ;;  %2498 = vmatpush.msra.mxu3 %v2269_v5  ;;  %v2227_v36 = vld [vmem:[#allocation6 + $0xf68] sm:$0xff]  ;;  %v2257_v44 = vld [vmem:[#allocation6 + $0x1058] sm:$0xff] }
 0x2c2   : > { %2408 = vmatpush.msra.mxu1 %v2248_v26  ;;  %2459 = vmatpush.msrb.mxu2 %v2362_v56  ;;  %v2293_v26 = vld [vmem:[#allocation6 + $0x1178] sm:$0xff]  ;;  %v2255_v56 = vld [vmem:[#allocation6 + $0x1048] sm:$0xff] }
 0x2c3   : > { %2449 = vmatpush.msrb.mxu0 %v2310_v41  ;;  %2499 = vmatpush.msra.mxu3 %v2267_v18  ;;  %v2225_v41 = vld [vmem:[#allocation6 + $0xf58] sm:$0xff]  ;;  %v2247_v5 = vld [vmem:[#allocation6 + $0x1008] sm:$0xff] }
 0x2c4   : > { %2409 = vmatpush.msra.mxu1 %v2246_v38  ;;  %2460 = vmatpush.msrb.mxu2 %v2360_v23  ;;  %v2291_v38 = vld [vmem:[#allocation6 + $0x1168] sm:$0xff] }
 0x2c5   : > { %2514 = vmatpush.msra.mxu0 %v2309_v40  ;;  %2500 = vmatpush.msra.mxu3 %v2265_v22  ;;  %v2344_v40 = vld [vmem:[#allocation6 + $0x1310] sm:$0xff]  ;;  %v2283_v23 = vld [vmem:[#allocation6 + $0x1128] sm:$0xff] }
 0x2c6   : > { %2474 = vmatpush.msrb.mxu1 %v2245_v34  ;;  %2461 = vmatpush.msrb.mxu2 %v2358_v4  ;;  %v2289_v34 = vld [vmem:[#allocation6 + $0x1158] sm:$0xff]  ;;  %v2215_v4 = vld [vmem:[#allocation6 + $0xf08] sm:$0xff] }
 0x2c7   : > { %2515 = vmatpush.msra.mxu0 %v2307_v55  ;;  %2501 = vmatpush.msra.mxu3 %v2263_v24  ;;  %v2221_v55 = vld [vmem:[#allocation6 + $0xf38] sm:$0xff] }
 0x2c8   : > { %2475 = vmatpush.msrb.mxu1 %v2243_v48  ;;  %2462 = vmatpush.msrb.mxu2 %v2356_v61  ;;  %v2287_v48 = vld [vmem:[#allocation6 + $0x1148] sm:$0xff] }
 0x2c9   : > { %2516 = vmatpush.msra.mxu0 %v2305_v60  ;;  %2502 = vmatpush.msra.mxu3 %v2261_v37  ;;  %v2253_v60 = vld [vmem:[#allocation6 + $0x1038] sm:$0xff]  ;;  %v2371_v37 = vld [vmem:[#allocation6 + $0x13e8] sm:$0xff] }
 0x2ca   : > { %2476 = vmatpush.msrb.mxu1 %v2241_v58  ;;  %2463 = vmatpush.msrb.mxu2 %v2354_v9  ;;  %v2285_v58 = vld [vmem:[#allocation6 + $0x1138] sm:$0xff] }
 0x2cb   : > { %2517 = vmatpush.msra.mxu0 %v2303_v0  ;;  %2503 = vmatpush.msra.mxu3 %v2259_v42  ;;  %v2281_v0 = vld [vmem:[#allocation6 + $0x1118] sm:$0xff] }
 0x2cc   : > { %2477 = vmatpush.msrb.mxu1 %v2239_v62  ;;  %2464 = vmatpush.msrb.mxu2 %v2352_v19  ;;  %v2217_v62 = vld [vmem:[#allocation6 + $0xf18] sm:$0xff] }
 0x2cd   : > { %2518 = vmatpush.msra.mxu0 %v2301_v2  ;;  %2504 = vmatpush.msra.mxu3 %v2257_v44  ;;  %v2337_v42 = vld [vmem:[#allocation6 + $0x12d8] sm:$0xff] }
 0x2ce   : > { %2478 = vmatpush.msrb.mxu1 %v2237_v47  ;;  %2465 = vmatpush.msrb.mxu2 %v2350_v30  ;;  %v2249_v47 = vld [vmem:[#allocation6 + $0x1018] sm:$0xff] }
 0x2cf   : > { %2519 = vmatpush.msra.mxu0 %v2299_v8  ;;  %2505 = vmatpush.msra.mxu3 %v2255_v56 }
 0x2d0   : > { %2479 = vmatpush.msrb.mxu1 %v2235_v3  ;;  %2466 = vmatpush.msrb.mxu2 %v2348_v32 }
 0x2d1   : > { %2520 = vmatpush.msra.mxu0 %v2297_v17  ;;  %2506 = vmatpush.msra.mxu3 %v2253_v60 }
 0x2d2   : > { %2480 = vmatpush.msrb.mxu1 %v2233_v16  ;;  %2467 = vmatpush.msrb.mxu2 %v2346_v39  ;;  %v2339_v39 = vld [vmem:[#allocation6 + $0x12e8] sm:$0xff] }
 0x2d3   : > { %2521 = vmatpush.msra.mxu0 %v2295_v51  ;;  %2507 = vmatpush.msra.mxu3 %v2251_v63  ;;  %v2361_v63 = vld [vmem:[#allocation6 + $0x1398] sm:$0xff] }
 0x2d4   : > { %2481 = vmatpush.msrb.mxu1 %v2231_v20  ;;  %2468 = vmatpush.msrb.mxu2 %v2344_v40  ;;  %v2335_v40 = vld [vmem:[#allocation6 + $0x12c8] sm:$0xff] }
 0x2d5   : > { %2522 = vmatpush.msra.mxu0 %v2293_v26  ;;  %2508 = vmatpush.msra.mxu3 %v2249_v47  ;;  %v2373_v26 = vld [vmem:[#allocation6 + $0x13f8] sm:$0xff]  ;;  %v2347_v47 = vld [vmem:[#allocation6 + $0x1328] sm:$0xff] }
 0x2d6   : > { %2482 = vmatpush.msrb.mxu1 %v2229_v25  ;;  %2469 = vmatpush.msrb.mxu2 %v2342_v49  ;;  %v2333_v49 = vld [vmem:[#allocation6 + $0x12b8] sm:$0xff] }
 0x2d7   : > { %2523 = vmatpush.msra.mxu0 %v2291_v38  ;;  %2509 = vmatpush.msra.mxu3 %v2247_v5  ;;  %v2808_v5 = vld [vmem:[#allocation6 + $0x17f0] sm:$0xff] }
 0x2d8   : > { %2483 = vmatpush.msrb.mxu1 %v2227_v36  ;;  %v2341_v36 = vld [vmem:[#allocation6 + $0x12f8] sm:$0xff] }
 0x2d9   : > { %2524 = vmatpush.msra.mxu0 %v2289_v34  ;;  %v2367_v34 = vld [vmem:[#allocation6 + $0x13c8] sm:$0xff] }
 0x2da   : > { %2484 = vmatpush.msrb.mxu1 %v2225_v41  ;;  %v2369_v41 = vld [vmem:[#allocation6 + $0x13d8] sm:$0xff] }
 0x2db   : > { %2525 = vmatpush.msra.mxu0 %v2287_v48 }
 0x2dc   : > { %2485 = vmatpush.msrb.mxu1 %v2223_v43 }
 0x2dd   : > { %2526 = vmatpush.msra.mxu0 %v2285_v58  ;;  %v2365_v58 = vld [vmem:[#allocation6 + $0x13b8] sm:$0xff] }
 0x2de   : > { %2486 = vmatpush.msrb.mxu1 %v2221_v55 }
 0x2df   : > { %2527 = vmatpush.msra.mxu0 %v2283_v23  ;;  %v2363_v23 = vld [vmem:[#allocation6 + $0x13a8] sm:$0xff] }
 0x2e0   : > { %2487 = vmatpush.msrb.mxu1 %v2219_v21  ;;  %v2331_v21 = vld [vmem:[#allocation6 + $0x12a8] sm:$0xff] }
 0x2e1   : > { %2528 = vmatpush.msra.mxu0 %v2281_v0  ;;  %v2712_v0 = vld [vmem:[#allocation6 + $0x14f0] sm:$0xff] }
 0x2e2   : > { %2488 = vmatpush.msrb.mxu1 %v2217_v62  ;;  %v2329_v62 = vld [vmem:[#allocation6 + $0x1298] sm:$0xff] }
 0x2e3   : > { %2529 = vmatpush.msra.mxu0 %v2279_v1  ;;  %v2311_v1 = vld [vmem:[#allocation6 + $0x1208] sm:$0xff] }
 0x2e4   : > { %2489 = vmatpush.msrb.mxu1 %v2215_v4  ;;  %v2710_v4 = vld [vmem:[#allocation6 + $0x14e0] sm:$0xff] }
 0x2ee   : > { %v1923_v2 = vpop.f32.mrf.mxu3 }
 0x2f6   : > { %v2003_v17 = vpop.f32.mrf.mxu3 }
 0x2f7   : > { %v1983_v8 = vpop.f32.mrf.mxu2 }
 0x300   : > { %v1943_v61 = vpop.f32.mrf.mxu0 }
 0x301   : > { %v1944_v3 = vadd.f32 %v1943_v61, %v1923_v2  ;;  %v2708_v2 = vld [vmem:[#allocation6 + $0x14d0] sm:$0xff]  ;;  %v2343_v61 = vld [vmem:[#allocation6 + $0x1308] sm:$0xff] }
 0x308   : > { %v1963_v9 = vpop.f32.mrf.mxu1 }
 0x309   : > { %v1964_v16 = vadd.f32 %v1963_v9, %v1944_v3  ;;  %v2742_v3 = vld [vmem:[#allocation6 + $0x15e0] sm:$0xff] }
 0x30a   : > { %v2774_v9 = vld [vmem:[#allocation6 + $0x16e0] sm:$0xff] }
 0x30b   : > { %v1984_v18 = vadd.f32 %v1983_v8, %v1964_v16  ;;  %v2023_v22 = vpop.f32.mrf.mxu0  ;;  %v2740_v8 = vld [vmem:[#allocation6 + $0x15d0] sm:$0xff]  ;;  %v2806_v16 = vld [vmem:[#allocation6 + $0x17e0] sm:$0xff] }
 0x30d   : > { %v2004_v19 = vadd.f32 %v2003_v17, %v1984_v18  ;;  %v2738_v18 = vld [vmem:[#allocation6 + $0x15c0] sm:$0xff]  ;;  %v2772_v17 = vld [vmem:[#allocation6 + $0x16d0] sm:$0xff] }
 0x30f   : > { %v2063_v20 = vpop.f32.mrf.mxu2  ;;  %v3698_v51 = vadd.f32 %v2004_v19, %v3649_v35  ;;  %v2083_v35 = vpop.f32.mrf.mxu3  ;;  %v2702_v19 = vld [vmem:[#allocation6 + $0x14a0] sm:$0xff] }
 0x311   : > { %v2043_v30 = vpop.f32.mrf.mxu1 }
 0x312   : > { %v2044_v25 = vadd.f32 %v2043_v30, %v2023_v22  ;;  %v2804_v22 = vld [vmem:[#allocation6 + $0x17d0] sm:$0xff] }
 0x313   : > { %v2700_v30 = vld [vmem:[#allocation6 + $0x1490] sm:$0xff] }
 0x314   : > { %v2064_v24 = vadd.f32 %v2063_v20, %v2044_v25  ;;  %v2736_v20 = vld [vmem:[#allocation6 + $0x15b0] sm:$0xff]  ;;  %v2770_v25 = vld [vmem:[#allocation6 + $0x16c0] sm:$0xff] }
 0x316   : > { %v2084_v43 = vadd.f32 %v2083_v35, %v2064_v24  ;;  %v2734_v24 = vld [vmem:[#allocation6 + $0x15a0] sm:$0xff] }
 0x317   : > { %v2694_v35 = vld [vmem:[#allocation6 + $0x1460] sm:$0xff] }
 0x318   : > { %v2150_v32 = vpop.f32.mrf.mxu2 }
 0x319   : > { %2410 = vmatmul.f32.vlgmr.msra.gmra.mxu1 %v2150_v32 }
 0x31a   : > { %v2130_v38 = vpop.f32.mrf.mxu1  ;;  %2554 = vmatpush.msra.mxu1 %v2373_v26  ;;  %v2802_v26 = vld [vmem:[#allocation6 + $0x17c0] sm:$0xff] }
 0x31b   : > { %2390 = vmatmul.f32.vlgmr.msra.gmra.mxu2 %v2130_v38 }
 0x31c   : > { %2534 = vmatpush.msra.mxu2 %v2341_v36  ;;  %2555 = vmatpush.msra.mxu1 %v2371_v37  ;;  %v2768_v36 = vld [vmem:[#allocation6 + $0x16b0] sm:$0xff] }
 0x31d   : > { %v2732_v37 = vld [vmem:[#allocation6 + $0x1590] sm:$0xff] }
 0x31e   : > { %2535 = vmatpush.msra.mxu2 %v2339_v39  ;;  %2556 = vmatpush.msra.mxu1 %v2369_v41  ;;  %v2696_v39 = vld [vmem:[#allocation6 + $0x1470] sm:$0xff]  ;;  %v2766_v41 = vld [vmem:[#allocation6 + $0x16a0] sm:$0xff] }
 0x320   : > { %2536 = vmatpush.msra.mxu2 %v2337_v42  ;;  %2557 = vmatpush.msra.mxu1 %v2367_v34  ;;  %v2730_v42 = vld [vmem:[#allocation6 + $0x1580] sm:$0xff] }
 0x321   : > { %v3700_v44 = vpop.f32.mrf.mxu2  ;;  %v2103_v48 = vpop.f32.mrf.mxu0  ;;  %2490 = vmatmul.f32.vlgmr.msrb.gmra.mxu1 %v2130_v38  ;;  %v2800_v38 = vld [vmem:[#allocation6 + $0x17b0] sm:$0xff]  ;;  %v2798_v34 = vld [vmem:[#allocation6 + $0x17a0] sm:$0xff] }
 0x322   : > { %v2104_v55 = vadd.f32 %v2103_v48, %v2084_v43  ;;  %2450 = vmatmul.f32.vlgmr.msrb.gmra.mxu0 %v3700_v44  ;;  %2537 = vmatpush.msra.mxu2 %v2335_v40  ;;  %v2170_v56 = vpop.f32.mrf.mxu1  ;;  %v2764_v40 = vld [vmem:[#allocation6 + $0x1690] sm:$0xff] }
 0x323   : > { %2613 = vmatpush.msrb.mxu0 %v3470_v53  ;;  %2430 = vmatmul.f32.vlgmr.msrb.gmra.mxu3 %v2170_v56  ;;  %v2327_v53 = vld [vmem:[#allocation6 + $0x1288] sm:$0xff]  ;;  %v2728_v43 = vld [vmem:[#allocation6 + $0x1570] sm:$0xff] }
 0x324   : > { %v3705_v60 = vadd.f32 %v2104_v55, %v3662_v28  ;;  %2538 = vmatpush.msra.mxu2 %v2333_v49  ;;  %2593 = vmatpush.msrb.mxu3 %v3463_v46  ;;  %v2355_v28 = vld [vmem:[#allocation6 + $0x1368] sm:$0xff]  ;;  %v2692_v48 = vld [vmem:[#allocation6 + $0x1450] sm:$0xff]  ;;  %v2726_v49 = vld [vmem:[#allocation6 + $0x1560] sm:$0xff] }
 0x325   : > { %2614 = vmatpush.msrb.mxu0 %v3468_v50  ;;  %2558 = vmatpush.msra.mxu1 %v2365_v58  ;;  %v2325_v50 = vld [vmem:[#allocation6 + $0x1278] sm:$0xff]  ;;  %v2794_v55 = vld [vmem:[#allocation6 + $0x1780] sm:$0xff]  ;;  %v2724_v58 = vld [vmem:[#allocation6 + $0x1550] sm:$0xff] }
 0x326   : > { %2539 = vmatpush.msra.mxu2 %v2331_v21  ;;  %2594 = vmatpush.msrb.mxu3 %v3461_v45  ;;  %v2359_v45 = vld [vmem:[#allocation6 + $0x1388] sm:$0xff]  ;;  %v2688_v21 = vld [vmem:[#allocation6 + $0x1430] sm:$0xff] }
 0x327   : > { %2615 = vmatpush.msrb.mxu0 %v3475_v57  ;;  %2559 = vmatpush.msra.mxu1 %v2363_v23  ;;  %v2323_v57 = vld [vmem:[#allocation6 + $0x1268] sm:$0xff]  ;;  %v2722_v23 = vld [vmem:[#allocation6 + $0x1540] sm:$0xff] }
 0x328   : > { %2540 = vmatpush.msra.mxu2 %v2329_v62  ;;  %2595 = vmatpush.msrb.mxu3 %v3465_v52  ;;  %v2357_v52 = vld [vmem:[#allocation6 + $0x1378] sm:$0xff]  ;;  %v2686_v62 = vld [vmem:[#allocation6 + $0x1420] sm:$0xff] }
 0x329   : > { %2616 = vmatpush.msrb.mxu0 %v3479_v59  ;;  %2560 = vmatpush.msra.mxu1 %v2361_v63  ;;  %v2321_v59 = vld [vmem:[#allocation6 + $0x1258] sm:$0xff]  ;;  %v2720_v63 = vld [vmem:[#allocation6 + $0x1530] sm:$0xff] }
 0x32a   : > { %2530 = vmatmul.f32.vlgmr.msra.gmra.mxu0 %v2170_v56  ;;  %2541 = vmatpush.msra.mxu2 %v2327_v53  ;;  %v3713_v46 = vpop.f32.mrf.mxu1  ;;  %v2690_v56 = vld [vmem:[#allocation6 + $0x1440] sm:$0xff]  ;;  %v2684_v53 = vld [vmem:[#allocation6 + $0x1410] sm:$0xff] }
 0x32b   : > { %2596 = vmatpush.msrb.mxu3 %v3472_v54  ;;  %2653 = vmatpush.msra.mxu0 %v3503_v12  ;;  %v2319_v54 = vld [vmem:[#allocation6 + $0x1248] sm:$0xff]  ;;  %v3725_v12 = vld [vmem:[%s3769_s4 + $0x10] sm:$0xf] }
 0x32c   : > { %2470 = vmatmul.f32.vlgmr.msrb.gmra.mxu2 %v3713_v46  ;;  %2510 = vmatmul.f32.vlgmr.msra.gmra.mxu3 %v2150_v32  ;;  %v2698_v32 = vld [vmem:[#allocation6 + $0x1480] sm:$0xff] }
 0x32d   : > { %2542 = vmatpush.msra.mxu2 %v2325_v50  ;;  %2633 = vmatpush.msra.mxu3 %v3491_v7  ;;  %v2353_v7 = vld [vmem:[#allocation6 + $0x1358] sm:$0xff]  ;;  %v2716_v50 = vld [vmem:[#allocation6 + $0x1510] sm:$0xff] }
 0x32e   : > { %2654 = vmatpush.msra.mxu0 %v3501_v11  ;;  %2561 = vmatpush.msra.mxu1 %v2359_v45  ;;  %v2317_v11 = vld [vmem:[#allocation6 + $0x1238] sm:$0xff]  ;;  %v2714_v45 = vld [vmem:[#allocation6 + $0x1500] sm:$0xff] }
 0x32f   : > { %2543 = vmatpush.msra.mxu2 %v2323_v57  ;;  %2634 = vmatpush.msra.mxu3 %v3489_v6  ;;  %v2351_v6 = vld [vmem:[#allocation6 + $0x1348] sm:$0xff]  ;;  %v2713_v57 = vld [vmem:[#allocation6 + $0x14f8] sm:$0xff] }
 0x330   : > { %2655 = vmatpush.msra.mxu0 %v3508_v14  ;;  %2562 = vmatpush.msra.mxu1 %v2357_v52  ;;  %v2315_v14 = vld [vmem:[#allocation6 + $0x1228] sm:$0xff] }
 0x331   : > { %2544 = vmatpush.msra.mxu2 %v2321_v59  ;;  %2635 = vmatpush.msra.mxu3 %v3498_v10  ;;  %v2349_v10 = vld [vmem:[#allocation6 + $0x1338] sm:$0xff]  ;;  %v2711_v52 = vld [vmem:[#allocation6 + $0x14e8] sm:$0xff] }
 0x332   : > { %2656 = vmatpush.msra.mxu0 %v3512_v15  ;;  %2563 = vmatpush.msra.mxu1 %v2355_v28  ;;  %v2313_v15 = vld [vmem:[#allocation6 + $0x1218] sm:$0xff]  ;;  %v2792_v28 = vld [vmem:[#allocation6 + $0x1770] sm:$0xff] }
 0x333   : > { %2545 = vmatpush.msra.mxu2 %v2319_v54  ;;  %3187 = vmatmul.msk.f32.vlgmr.msrb.gmra.mxu0 %vm710_vm0, %v3725_v12  ;;  %v2709_v59 = vld [vmem:[#allocation6 + $0x14d8] sm:$0xff]  ;;  %v2707_v54 = vld [vmem:[#allocation6 + $0x14c8] sm:$0xff] }
 0x334   : > { %2636 = vmatpush.msra.mxu3 %v3505_v13  ;;  %2564 = vmatpush.msra.mxu1 %v2353_v7  ;;  %v2345_v13 = vld [vmem:[#allocation6 + $0x1318] sm:$0xff]  ;;  %v2762_v7 = vld [vmem:[#allocation6 + $0x1680] sm:$0xff] }
 0x335   : > { %2546 = vmatpush.msra.mxu2 %v2317_v11  ;;  %3186 = vmatmul.msk.f32.vlgmr.msrb.gmra.mxu3 %vm710_vm0, %v3725_v12  ;;  %v2790_v11 = vld [vmem:[#allocation6 + $0x1760] sm:$0xff] }
 0x336   : > { %2673 = vmatpush.msrb.mxu3 %v3538_v27  ;;  %2565 = vmatpush.msra.mxu1 %v2351_v6  ;;  %v2744_v27 = vld [vmem:[#allocation6 + $0x15f0] sm:$0xff] }
 0x337   : > { %2547 = vmatpush.msra.mxu2 %v2315_v14  ;;  %2842 = vmatpush.msrb.mxu0 %v2712_v0  ;;  %v2840_v6 = vld [vmem:[#allocation6 + $0x18f0] sm:$0xff]  ;;  %v2705_v14 = vld [vmem:[#allocation6 + $0x14b8] sm:$0xff] }
 0x338   : > { %2674 = vmatpush.msrb.mxu3 %v3543_v29  ;;  %2566 = vmatpush.msra.mxu1 %v2349_v10  ;;  %v2776_v29 = vld [vmem:[#allocation6 + $0x16f0] sm:$0xff] }
 0x339   : > { %2548 = vmatpush.msra.mxu2 %v2313_v15  ;;  %2843 = vmatpush.msrb.mxu0 %v2710_v4  ;;  %v2760_v0 = vld [vmem:[#allocation6 + $0x1670] sm:$0xff]  ;;  %v2838_v15 = vld [vmem:[#allocation6 + $0x18e0] sm:$0xff]  ;;  %v2703_v4 = vld [vmem:[#allocation6 + $0x14a8] sm:$0xff] }
 0x33a   : > { %2675 = vmatpush.msrb.mxu3 %v3548_v31  ;;  %2567 = vmatpush.msra.mxu1 %v2347_v47  ;;  %v2706_v31 = vld [vmem:[#allocation6 + $0x14c0] sm:$0xff]  ;;  %v2788_v10 = vld [vmem:[#allocation6 + $0x1750] sm:$0xff] }
 0x33b   : > { %2549 = vmatpush.msra.mxu2 %v2311_v1  ;;  %3189 = vmatmul.msk.f32.vlgmr.msra.gmra.mxu0 %vm710_vm0, %v3725_v12  ;;  %v2758_v47 = vld [vmem:[#allocation6 + $0x1660] sm:$0xff] }
 0x33c   : > { %2676 = vmatpush.msrb.mxu3 %v3553_v33  ;;  %2550 = vmatmul.f32.vlgmr.msra.gmra.mxu2 %v3700_v44  ;;  %v2704_v33 = vld [vmem:[#allocation6 + $0x14b0] sm:$0xff]  ;;  %v2786_v1 = vld [vmem:[#allocation6 + $0x1740] sm:$0xff] }
 0x33d   : > { %3188 = vmatmul.msk.f32.vlgmr.msra.gmra.mxu3 %vm710_vm0, %v3725_v12  ;;  %2568 = vmatpush.msra.mxu1 %v2345_v13  ;;  %v2796_v44 = vld [vmem:[#allocation6 + $0x1790] sm:$0xff] }
 0x33e   : > { %2862 = vmatpush.msrb.mxu2 %v2744_v27  ;;  %2844 = vmatpush.msrb.mxu0 %v2708_v2  ;;  %v2836_v13 = vld [vmem:[#allocation6 + $0x18d0] sm:$0xff]  ;;  %v2701_v27 = vld [vmem:[#allocation6 + $0x1498] sm:$0xff] }
 0x33f   : > { %2569 = vmatpush.msra.mxu1 %v2343_v61  ;;  %2882 = vmatpush.msra.mxu3 %v2776_v29  ;;  %v2756_v2 = vld [vmem:[#allocation6 + $0x1650] sm:$0xff]  ;;  %v2834_v29 = vld [vmem:[#allocation6 + $0x18c0] sm:$0xff] }
 0x340   : > { %2570 = vmatmul.f32.vlgmr.msra.gmra.mxu1 %v3713_v46  ;;  %2863 = vmatpush.msrb.mxu2 %v2742_v3  ;;  %v2718_v46 = vld [vmem:[#allocation6 + $0x1520] sm:$0xff]  ;;  %v2784_v61 = vld [vmem:[#allocation6 + $0x1730] sm:$0xff]  ;;  %v2699_v3 = vld [vmem:[#allocation6 + $0x1488] sm:$0xff] }
 0x341   : > { %2845 = vmatpush.msrb.mxu0 %v2706_v31  ;;  %2902 = vmatpush.msrb.mxu1 %v2808_v5  ;;  %v2754_v31 = vld [vmem:[#allocation6 + $0x1640] sm:$0xff] }
 0x342   : > { %2864 = vmatpush.msrb.mxu2 %v2740_v8  ;;  %2883 = vmatpush.msra.mxu3 %v2774_v9  ;;  %v2782_v5 = vld [vmem:[#allocation6 + $0x1720] sm:$0xff]  ;;  %v2832_v8 = vld [vmem:[#allocation6 + $0x18b0] sm:$0xff]  ;;  %v2697_v9 = vld [vmem:[#allocation6 + $0x1478] sm:$0xff] }
 0x343   : > { %2846 = vmatpush.msrb.mxu0 %v2704_v33  ;;  %2903 = vmatpush.msrb.mxu1 %v2806_v16  ;;  %v2752_v33 = vld [vmem:[#allocation6 + $0x1630] sm:$0xff] }
 0x344   : > { %2865 = vmatpush.msrb.mxu2 %v2738_v18  ;;  %2884 = vmatpush.msra.mxu3 %v2772_v17  ;;  %v2780_v16 = vld [vmem:[#allocation6 + $0x1710] sm:$0xff]  ;;  %v2830_v18 = vld [vmem:[#allocation6 + $0x18a0] sm:$0xff]  ;;  %v2695_v17 = vld [vmem:[#allocation6 + $0x1468] sm:$0xff] }
 0x345   : > { %3190 = vmatmul.msk.f32.vlgmr.msrb.gmra.mxu3 %vm710_vm0, %v3725_v12  ;;  %2847 = vmatpush.msrb.mxu0 %v2702_v19  ;;  %v2682_v12 = vld [vmem:[#allocation6 + $0x1400] sm:$0xff] }
 0x346   : > { %2866 = vmatpush.msrb.mxu2 %v2736_v20  ;;  %2904 = vmatpush.msrb.mxu1 %v2804_v22  ;;  %v2750_v19 = vld [vmem:[#allocation6 + $0x1620] sm:$0xff]  ;;  %v2828_v22 = vld [vmem:[#allocation6 + $0x1890] sm:$0xff] }
 0x347   : > { %2848 = vmatpush.msrb.mxu0 %v2700_v30  ;;  %2885 = vmatpush.msra.mxu3 %v2770_v25  ;;  %v2778_v20 = vld [vmem:[#allocation6 + $0x1700] sm:$0xff]  ;;  %v2693_v30 = vld [vmem:[#allocation6 + $0x1458] sm:$0xff]  ;;  %v2748_v25 = vld [vmem:[#allocation6 + $0x1610] sm:$0xff] }
 0x348   : > { %2867 = vmatpush.msrb.mxu2 %v2734_v24  ;;  %2905 = vmatpush.msrb.mxu1 %v2802_v26  ;;  %v2777_v24 = vld [vmem:[#allocation6 + $0x16f8] sm:$0xff]  ;;  %v2826_v26 = vld [vmem:[#allocation6 + $0x1880] sm:$0xff] }
 0x349   : > { %2849 = vmatpush.msrb.mxu0 %v2698_v32  ;;  %2886 = vmatpush.msra.mxu3 %v2768_v36  ;;  %v2691_v32 = vld [vmem:[#allocation6 + $0x1448] sm:$0xff]  ;;  %v2746_v36 = vld [vmem:[#allocation6 + $0x1600] sm:$0xff] }
 0x34a   : > { %2868 = vmatpush.msrb.mxu2 %v2732_v37  ;;  %2906 = vmatpush.msrb.mxu1 %v2800_v38  ;;  %v2775_v37 = vld [vmem:[#allocation6 + $0x16e8] sm:$0xff]  ;;  %v2824_v38 = vld [vmem:[#allocation6 + $0x1870] sm:$0xff] }
 0x34b   : > { %2850 = vmatpush.msrb.mxu0 %v2696_v39  ;;  %2887 = vmatpush.msra.mxu3 %v2766_v41  ;;  %v2689_v39 = vld [vmem:[#allocation6 + $0x1438] sm:$0xff] }
 0x34c   : > { %2869 = vmatpush.msrb.mxu2 %v2730_v42  ;;  %2907 = vmatpush.msrb.mxu1 %v2798_v34  ;;  %v2745_v41 = vld [vmem:[#allocation6 + $0x15f8] sm:$0xff]  ;;  %v2822_v34 = vld [vmem:[#allocation6 + $0x1860] sm:$0xff] }
 0x34d   : > { %2851 = vmatpush.msrb.mxu0 %v2694_v35  ;;  %2888 = vmatpush.msra.mxu3 %v2764_v40  ;;  %v2773_v42 = vld [vmem:[#allocation6 + $0x16d8] sm:$0xff]  ;;  %v2687_v35 = vld [vmem:[#allocation6 + $0x1428] sm:$0xff] }
 0x34e   : > { %2870 = vmatpush.msrb.mxu2 %v2728_v43  ;;  %2908 = vmatpush.msrb.mxu1 %v2796_v44  ;;  %v2743_v40 = vld [vmem:[#allocation6 + $0x15e8] sm:$0xff]  ;;  %v2820_v44 = vld [vmem:[#allocation6 + $0x1850] sm:$0xff] }
 0x34f   : > { %2852 = vmatpush.msrb.mxu0 %v2692_v48  ;;  %2889 = vmatpush.msra.mxu3 %v2762_v7  ;;  %v2771_v43 = vld [vmem:[#allocation6 + $0x16c8] sm:$0xff]  ;;  %v2685_v48 = vld [vmem:[#allocation6 + $0x1418] sm:$0xff] }
 0x350   : > { %2871 = vmatpush.msrb.mxu2 %v2726_v49  ;;  %2909 = vmatpush.msrb.mxu1 %v2794_v55  ;;  %v2741_v49 = vld [vmem:[#allocation6 + $0x15d8] sm:$0xff] }
 0x351   : > { %2853 = vmatpush.msrb.mxu0 %v2690_v56  ;;  %2890 = vmatpush.msra.mxu3 %v2760_v0  ;;  %v2769_v55 = vld [vmem:[#allocation6 + $0x16b8] sm:$0xff]  ;;  %v2818_v56 = vld [vmem:[#allocation6 + $0x1840] sm:$0xff] }
 0x352   : > { %2872 = vmatpush.msrb.mxu2 %v2724_v58  ;;  %2910 = vmatpush.msrb.mxu1 %v2792_v28  ;;  %v2683_v58 = vld [vmem:[#allocation6 + $0x1408] sm:$0xff]  ;;  %v2810_v28 = vld [vmem:[#allocation6 + $0x1800] sm:$0xff]  ;;  %v2729_v7 = vld [vmem:[#allocation6 + $0x1578] sm:$0xff] }
 0x353   : > { %2854 = vmatpush.msrb.mxu0 %v2688_v21  ;;  %2891 = vmatpush.msra.mxu3 %v2758_v47  ;;  %v2739_v21 = vld [vmem:[#allocation6 + $0x15c8] sm:$0xff]  ;;  %v2725_v0 = vld [vmem:[#allocation6 + $0x1558] sm:$0xff] }
 0x354   : > { %2873 = vmatpush.msrb.mxu2 %v2722_v23  ;;  %2911 = vmatpush.msrb.mxu1 %v2790_v11  ;;  %v2767_v23 = vld [vmem:[#allocation6 + $0x16a8] sm:$0xff]  ;;  %v2757_v11 = vld [vmem:[#allocation6 + $0x1658] sm:$0xff] }
 0x355   : > { %2855 = vmatpush.msrb.mxu0 %v2686_v62  ;;  %2892 = vmatpush.msra.mxu3 %v2756_v2  ;;  %v2816_v62 = vld [vmem:[#allocation6 + $0x1830] sm:$0xff]  ;;  %v2751_v47 = vld [vmem:[#allocation6 + $0x1628] sm:$0xff] }
 0x356   : > { %2874 = vmatpush.msrb.mxu2 %v2720_v63  ;;  %2912 = vmatpush.msrb.mxu1 %v2788_v10  ;;  %v2737_v63 = vld [vmem:[#allocation6 + $0x15b8] sm:$0xff] }
 0x357   : > { %2856 = vmatpush.msrb.mxu0 %v2684_v53  ;;  %2893 = vmatpush.msra.mxu3 %v2754_v31  ;;  %v2765_v53 = vld [vmem:[#allocation6 + $0x1698] sm:$0xff] }
 0x358   : > { %2875 = vmatpush.msrb.mxu2 %v2718_v46  ;;  %2913 = vmatpush.msrb.mxu1 %v2786_v1  ;;  %v2814_v46 = vld [vmem:[#allocation6 + $0x1820] sm:$0xff] }
 0x359   : > { %2857 = vmatpush.msrb.mxu0 %v2682_v12  ;;  %2894 = vmatpush.msra.mxu3 %v2752_v33  ;;  %v2759_v12 = vld [vmem:[#allocation6 + $0x1668] sm:$0xff] }
 0x35a   : > { %2876 = vmatpush.msrb.mxu2 %v2716_v50  ;;  %2914 = vmatpush.msrb.mxu1 %v2784_v61  ;;  %v2735_v50 = vld [vmem:[#allocation6 + $0x15a8] sm:$0xff] }
 0x35b   : > { %2922 = vmatpush.msra.mxu0 %v2840_v6  ;;  %2895 = vmatpush.msra.mxu3 %v2750_v19  ;;  %v2727_v6 = vld [vmem:[#allocation6 + $0x1568] sm:$0xff] }
 0x35c   : > { %2877 = vmatpush.msrb.mxu2 %v2714_v45  ;;  %2915 = vmatpush.msrb.mxu1 %v2782_v5  ;;  %v2763_v45 = vld [vmem:[#allocation6 + $0x1688] sm:$0xff]  ;;  %v2717_v5 = vld [vmem:[#allocation6 + $0x1518] sm:$0xff] }
 0x35d   : > { %2923 = vmatpush.msra.mxu0 %v2838_v15  ;;  %2896 = vmatpush.msra.mxu3 %v2748_v25  ;;  %v2753_v15 = vld [vmem:[#allocation6 + $0x1638] sm:$0xff]  ;;  %v2719_v61 = vld [vmem:[#allocation6 + $0x1528] sm:$0xff] }
 0x35e   : > { %2942 = vmatpush.msra.mxu2 %v2713_v57  ;;  %2916 = vmatpush.msrb.mxu1 %v2780_v16  ;;  %v2812_v57 = vld [vmem:[#allocation6 + $0x1810] sm:$0xff]  ;;  %v2715_v33 = vld [vmem:[#allocation6 + $0x1508] sm:$0xff] }
 0x35f   : > { %2924 = vmatpush.msra.mxu0 %v2836_v13  ;;  %2897 = vmatpush.msra.mxu3 %v2746_v36  ;;  %v2721_v13 = vld [vmem:[#allocation6 + $0x1538] sm:$0xff] }
 0x360   : > { %2943 = vmatpush.msra.mxu2 %v2711_v52  ;;  %2917 = vmatpush.msrb.mxu1 %v2778_v20  ;;  %v2733_v52 = vld [vmem:[#allocation6 + $0x1598] sm:$0xff] }
 0x361   : > { %2925 = vmatpush.msra.mxu0 %v2834_v29  ;;  %2962 = vmatpush.msrb.mxu3 %v2745_v41  ;;  %v2747_v29 = vld [vmem:[#allocation6 + $0x1608] sm:$0xff]  ;;  %v2841_v20 = vld [vmem:[#allocation6 + $0x18f8] sm:$0xff] }
 0x362   : > { %2944 = vmatpush.msra.mxu2 %v2709_v59  ;;  %2982 = vmatpush.msra.mxu1 %v2777_v24  ;;  %v2761_v59 = vld [vmem:[#allocation6 + $0x1678] sm:$0xff]  ;;  %v2839_v24 = vld [vmem:[#allocation6 + $0x18e8] sm:$0xff] }
 0x363   : > { %2926 = vmatpush.msra.mxu0 %v2832_v8  ;;  %2963 = vmatpush.msrb.mxu3 %v2743_v40  ;;  %v2837_v36 = vld [vmem:[#allocation6 + $0x18d8] sm:$0xff] }
 0x364   : > { %2945 = vmatpush.msra.mxu2 %v2707_v54  ;;  %2983 = vmatpush.msra.mxu1 %v2775_v37  ;;  %v2731_v54 = vld [vmem:[#allocation6 + $0x1588] sm:$0xff]  ;;  %v2805_v40 = vld [vmem:[#allocation6 + $0x17d8] sm:$0xff] }
 0x365   : > { %2927 = vmatpush.msra.mxu0 %v2830_v18  ;;  %2964 = vmatpush.msrb.mxu3 %v2741_v49  ;;  %v2835_v37 = vld [vmem:[#allocation6 + $0x18c8] sm:$0xff] }
 0x366   : > { %2946 = vmatpush.msra.mxu2 %v2705_v14  ;;  %2984 = vmatpush.msra.mxu1 %v2773_v42  ;;  %v2755_v14 = vld [vmem:[#allocation6 + $0x1648] sm:$0xff] }
 0x367   : > { %2928 = vmatpush.msra.mxu0 %v2828_v22  ;;  %2965 = vmatpush.msrb.mxu3 %v2739_v21  ;;  %v2827_v49 = vld [vmem:[#allocation6 + $0x1888] sm:$0xff]  ;;  %v2825_v21 = vld [vmem:[#allocation6 + $0x1878] sm:$0xff] }
 0x368   : > { %2947 = vmatpush.msra.mxu2 %v2703_v4  ;;  %2985 = vmatpush.msra.mxu1 %v2771_v43  ;;  %v2723_v4 = vld [vmem:[#allocation6 + $0x1548] sm:$0xff]  ;;  %v2829_v43 = vld [vmem:[#allocation6 + $0x1898] sm:$0xff] }
 0x369   : > { %2929 = vmatpush.msra.mxu0 %v2826_v26  ;;  %2966 = vmatpush.msrb.mxu3 %v2737_v63  ;;  %v2799_v63 = vld [vmem:[#allocation6 + $0x17a8] sm:$0xff] }
 0x36a   : > { %2948 = vmatpush.msra.mxu2 %v2701_v27  ;;  %2986 = vmatpush.msra.mxu1 %v2769_v55  ;;  %v2749_v27 = vld [vmem:[#allocation6 + $0x1618] sm:$0xff] }
 0x36b   : > { %2930 = vmatpush.msra.mxu0 %v2824_v38  ;;  %2967 = vmatpush.msrb.mxu3 %v2735_v50  ;;  %v2809_v38 = vld [vmem:[#allocation6 + $0x17f8] sm:$0xff] }
 0x36c   : > { %2949 = vmatpush.msra.mxu2 %v2699_v3  ;;  %2987 = vmatpush.msra.mxu1 %v2767_v23  ;;  %v2797_v50 = vld [vmem:[#allocation6 + $0x1798] sm:$0xff] }
 0x36d   : > { %2931 = vmatpush.msra.mxu0 %v2822_v34  ;;  %2968 = vmatpush.msrb.mxu3 %v2733_v52  ;;  %v2807_v34 = vld [vmem:[#allocation6 + $0x17e8] sm:$0xff] }
 0x36e   : > { %2950 = vmatpush.msra.mxu2 %v2697_v9  ;;  %2988 = vmatpush.msra.mxu1 %v2765_v53  ;;  %v2823_v53 = vld [vmem:[#allocation6 + $0x1868] sm:$0xff] }
 0x36f   : > { %2932 = vmatpush.msra.mxu0 %v2820_v44  ;;  %2969 = vmatpush.msrb.mxu3 %v2731_v54  ;;  %v3353_v44 = vmov 0   ;;  %v2795_v52 = vld [vmem:[#allocation6 + $0x1788] sm:$0xff]  ;;  %v2817_v54 = vld [vmem:[#allocation6 + $0x1838] sm:$0xff] }
 0x370   : > { %2951 = vmatpush.msra.mxu2 %v2695_v17  ;;  %2989 = vmatpush.msra.mxu1 %v2763_v45  ;;  %v2821_v45 = vld [vmem:[#allocation6 + $0x1858] sm:$0xff] }
 0x371   : > { %2933 = vmatpush.msra.mxu0 %v2818_v56  ;;  %2970 = vmatpush.msrb.mxu3 %v2729_v7  ;;  %v2791_v7 = vld [vmem:[#allocation6 + $0x1768] sm:$0xff] }
 0x372   : > { %2952 = vmatpush.msra.mxu2 %v2693_v30  ;;  %2990 = vmatpush.msra.mxu1 %v2761_v59  ;;  %v2819_v59 = vld [vmem:[#allocation6 + $0x1848] sm:$0xff] }
 0x373   : > { %2934 = vmatpush.msra.mxu0 %v2816_v62  ;;  %2971 = vmatpush.msrb.mxu3 %v2727_v6  ;;  %v2789_v6 = vld [vmem:[#allocation6 + $0x1758] sm:$0xff] }
 0x374   : > { %2953 = vmatpush.msra.mxu2 %v2691_v32  ;;  %2991 = vmatpush.msra.mxu1 %v2759_v12 }
 0x375   : > { %2935 = vmatpush.msra.mxu0 %v2814_v46  ;;  %2972 = vmatpush.msrb.mxu3 %v2725_v0  ;;  %v2811_v0 = vld [vmem:[#allocation6 + $0x1808] sm:$0xff] }
 0x376   : > { %2954 = vmatpush.msra.mxu2 %v2689_v39  ;;  %2992 = vmatpush.msra.mxu1 %v2757_v11  ;;  %v2833_v39 = vld [vmem:[#allocation6 + $0x18b8] sm:$0xff]  ;;  %v2815_v11 = vld [vmem:[#allocation6 + $0x1828] sm:$0xff] }
 0x377   : > { %2936 = vmatpush.msra.mxu0 %v2812_v57  ;;  %2973 = vmatpush.msrb.mxu3 %v2723_v4  ;;  %v2781_v4 = vld [vmem:[#allocation6 + $0x1718] sm:$0xff] }
 0x378   : > { %2955 = vmatpush.msra.mxu2 %v2687_v35  ;;  %2993 = vmatpush.msra.mxu1 %v2755_v14  ;;  %v2831_v35 = vld [vmem:[#allocation6 + $0x18a8] sm:$0xff]  ;;  %v2813_v14 = vld [vmem:[#allocation6 + $0x1818] sm:$0xff] }
 0x379   : > { %2937 = vmatpush.msra.mxu0 %v2810_v28  ;;  %2974 = vmatpush.msrb.mxu3 %v2721_v13  ;;  %v2793_v28 = vld [vmem:[#allocation6 + $0x1778] sm:$0xff] }
 0x37a   : > { %2956 = vmatpush.msra.mxu2 %v2685_v48  ;;  %2994 = vmatpush.msra.mxu1 %v2753_v15  ;;  %v2803_v48 = vld [vmem:[#allocation6 + $0x17c8] sm:$0xff] }
 0x37b   : > { %2975 = vmatpush.msrb.mxu3 %v2719_v61  ;;  %3239 = vset.pattern.permute.xlu0 %v3353_v44  ;;  %v2783_v15 = vld [vmem:[#allocation6 + $0x1728] sm:$0xff] }
 0x37c   : > { %2957 = vmatpush.msra.mxu2 %v2683_v58  ;;  %2995 = vmatpush.msra.mxu1 %v2751_v47  ;;  %v2801_v58 = vld [vmem:[#allocation6 + $0x17b8] sm:$0xff]  ;;  %v2779_v47 = vld [vmem:[#allocation6 + $0x1708] sm:$0xff] }
 0x37d   : > { %2976 = vmatpush.msrb.mxu3 %v2717_v5 }
 0x37e   : > { %2996 = vmatpush.msra.mxu1 %v2749_v27 }
 0x37f   : > { %2977 = vmatpush.msrb.mxu3 %v2715_v33 }
 0x380   : > { %2997 = vmatpush.msra.mxu1 %v2747_v29 }
 0x396   : > { %v2411_v2 = vpop.f32.mrf.mxu1 }
 0x39e   : > { %v2391_v1 = vpop.f32.mrf.mxu2  ;;  %v2491_v18 = vpop.f32.mrf.mxu1 }
 0x39f   : > { %v2451_v10 = vpop.f32.mrf.mxu0  ;;  %v2412_v3 = vadd.f32 %v2411_v2, %v2391_v1 }
 0x3a6   : > { %v2431_v31 = vpop.f32.mrf.mxu3 }
 0x3a7   : > { %v2432_v8 = vadd.f32 %v2431_v31, %v2412_v3  ;;  %v2531_v9 = vpop.f32.mrf.mxu0 }
 0x3a9   : > { %v2452_v16 = vadd.f32 %v2451_v10, %v2432_v8  ;;  %v2785_v10 = vld [vmem:[#allocation6 + $0x1738] sm:$0xff] }
 0x3af   : > { %v2471_v17 = vpop.f32.mrf.mxu2  ;;  %v2511_v19 = vpop.f32.mrf.mxu3 }
 0x3b0   : > { %v2472_v22 = vadd.f32 %v2471_v17, %v2452_v16  ;;  %v2512_v30 = vadd.f32 %v2511_v19, %v2491_v18  ;;  %v2618_v25 = vpop.f32.mrf.mxu0 }
 0x3b1   : > { %2878 = vmatmul.f32.vlgmr.msrb.gmra.mxu2 %v2618_v25 }
 0x3b2   : > { %v3747_v26 = vadd.f32 %v2472_v22, %v3698_v51  ;;  %3022 = vmatpush.msrb.mxu2 %v2841_v20  ;;  %v2532_v32 = vadd.f32 %v2531_v9, %v2512_v30  ;;  %v3044_v51 = vld [vmem:[%s3770_s5] sm:$0xf] }
 0x3b3   : > { %3047 = vperm.xlu0 %3239, %v3044_v51  }
 0x3b4   : > { %3023 = vmatpush.msrb.mxu2 %v2839_v24 }
 0x3b6   : > { %3024 = vmatpush.msrb.mxu2 %v2837_v36 }
 0x3b8   : > { %3025 = vmatpush.msrb.mxu2 %v2835_v37  ;;  %v2598_v41 = vpop.f32.mrf.mxu3  ;;  %v3749_v42 = vpop.f32.mrf.mxu0 }
 0x3b9   : > { %2858 = vmatmul.f32.vlgmr.msrb.gmra.mxu0 %v2598_v41  ;;  %2958 = vmatmul.f32.vlgmr.msra.gmra.mxu2 %v2598_v41 }
 0x3ba   : > { %3002 = vmatpush.msrb.mxu0 %v2809_v38  ;;  %3026 = vmatpush.msrb.mxu2 %v2833_v39 }
 0x3bb   : > { %2918 = vmatmul.f32.vlgmr.msrb.gmra.mxu1 %v3749_v42 }
 0x3bc   : > { %3003 = vmatpush.msrb.mxu0 %v2807_v34  ;;  %3027 = vmatpush.msrb.mxu2 %v2831_v35 }
 0x3bd   : > { %v2571_v56 = vpop.f32.mrf.mxu1 }
 0x3be   : > { %3004 = vmatpush.msrb.mxu0 %v2805_v40  ;;  %3028 = vmatpush.msrb.mxu2 %v2829_v43 }
 0x3bf   : > { %v2551_v55 = vpop.f32.mrf.mxu2 }
 0x3c0   : > { %v2552_v23 = vadd.f32 %v2551_v55, %v2532_v32  ;;  %3005 = vmatpush.msrb.mxu0 %v2803_v48  ;;  %3029 = vmatpush.msrb.mxu2 %v2827_v49  ;;  %v2638_v62 = vpop.f32.mrf.mxu3 }
 0x3c1   : > { %2898 = vmatmul.f32.vlgmr.msra.gmra.mxu3 %v2638_v62 }
 0x3c2   : > { %v2572_v46 = vadd.f32 %v2571_v56, %v2552_v23  ;;  %3006 = vmatpush.msrb.mxu0 %v2801_v58  ;;  %3030 = vmatpush.msrb.mxu2 %v2825_v21 }
 0x3c3   : > { %2998 = vmatmul.f32.vlgmr.msra.gmra.mxu1 %v2638_v62 }
 0x3c4   : > { %v2575_v57 = vadd.f32 %v2572_v46, %v3705_v60  ;;  %3007 = vmatpush.msrb.mxu0 %v2799_v63  ;;  %3031 = vmatpush.msrb.mxu2 %v2823_v53  ;;  %v2787_v60 = vld [vmem:[#allocation6 + $0x1748] sm:$0xff] }
 0x3c6   : > { %3008 = vmatpush.msrb.mxu0 %v2797_v50  ;;  %3032 = vmatpush.msrb.mxu2 %v2821_v45 }
 0x3c8   : > { %3009 = vmatpush.msrb.mxu0 %v2795_v52  ;;  %3033 = vmatpush.msrb.mxu2 %v2819_v59  ;;  %v2678_v12 = vpop.f32.mrf.mxu3 }
 0x3c9   : > { %2978 = vmatmul.f32.vlgmr.msrb.gmra.mxu3 %v2618_v25  ;;  %2938 = vmatmul.f32.vlgmr.msra.gmra.mxu0 %v2678_v12 }
 0x3ca   : > { %3010 = vmatpush.msrb.mxu0 %v2793_v28  ;;  %3034 = vmatpush.msrb.mxu2 %v2817_v54 }
 0x3cc   : > { %3011 = vmatpush.msrb.mxu0 %v2791_v7  ;;  %3035 = vmatpush.msrb.mxu2 %v2815_v11 }
 0x3ce   : > { %3012 = vmatpush.msrb.mxu0 %v2789_v6  ;;  %3036 = vmatpush.msrb.mxu2 %v2813_v14 }
 0x3d0   : > { %3013 = vmatpush.msrb.mxu0 %v2787_v60  ;;  %3037 = vmatpush.msrb.mxu2 %v2811_v0 }
 0x3d1   : > { %3038 = vmatmul.f32.vlgmr.msrb.gmra.mxu2 %v2678_v12 }
 0x3d2   : > { %3014 = vmatpush.msrb.mxu0 %v2785_v10 }
 0x3d4   : > { %3015 = vmatpush.msrb.mxu0 %v2783_v15 }
 0x3d6   : > { %3016 = vmatpush.msrb.mxu0 %v2781_v4 }
 0x3d8   : > { %3017 = vmatpush.msrb.mxu0 %v2779_v47 }
 0x3d9   : > { %3018 = vmatmul.f32.vlgmr.msrb.gmra.mxu0 %v3749_v42 }
 0x425   : > { %v3048_v25 = vpop.permute.xlu0 %3047 }
 0x434   : > { %v2879_v13 = vpop.f32.mrf.mxu2 }
 0x436   : > { %v2859_v27 = vpop.f32.mrf.mxu0 }
 0x437   : > { %v2880_v61 = vadd.f32 %v2879_v13, %v2859_v27 }
 0x438   : > { %v2919_v2 = vpop.f32.mrf.mxu1 }
 0x43c   : > { %v2959_v5 = vpop.f32.mrf.mxu2 }
 0x440   : > { %v2999_v33 = vpop.f32.mrf.mxu1 }
 0x444   : > { %v2899_v1 = vpop.f32.mrf.mxu3 }
 0x445   : > { %v2900_v29 = vadd.f32 %v2899_v1, %v2880_v61 }
 0x446   : > { %v2939_v3 = vpop.f32.mrf.mxu0 }
 0x447   : > { %v2920_v8 = vadd.f32 %v2919_v2, %v2900_v29 }
 0x449   : > { %v2940_v16 = vadd.f32 %v2939_v3, %v2920_v8 }
 0x44b   : > { %v3042_v22 = vadd.f32 %v2940_v16, %v3747_v26 }
 0x44c   : > { %v2979_v31 = vpop.f32.mrf.mxu3 }
 0x44d   : > { %v2980_v9 = vadd.f32 %v2979_v31, %v2959_v5  ;;  %v3050_v32 = vadd.f32 %v3048_v25, %v3042_v22 }
 0x44f   : > { %v3000_v18 = vadd.f32 %v2999_v33, %v2980_v9  ;;  %v3052_v38 = vmax.f32 %v3050_v32, 0.0 }
 0x454   : > { %v3039_v20 = vpop.f32.mrf.mxu2 }
 0x456   : > { %v3019_v17 = vpop.f32.mrf.mxu0 }
 0x457   : > { %v3020_v19 = vadd.f32 %v3019_v17, %v3000_v18 }
 0x459   : > { %v3040_v30 = vadd.f32 %v3039_v20, %v3020_v19 }
 0x45b   : > { %v3043_v24 = vadd.f32 %v3040_v30, %v2575_v57 }
 0x45d   : > { %v3051_v36 = vadd.f32 %v3048_v25, %v3043_v24 }
 0x45f   : > { %v3053_v37 = vmax.f32 %v3051_v36, 0.0 }
 0x461   : > { %v3056_v39 = vrot.slane %v3053_v37, 4 }
 0x463   : > { %v3058_v41 = vsel %vm3057_vm1, %v3052_v38, %v3056_v39 }
 0x464   : > { %3060 = vst [vmem:[%s301_s17] sm:$0xff] %v3058_v41 }
 0x465 PF: > { %s18_s21 = sadd.s32 1, %s3344_s21  }
 0x466   : > { %p15_p7 = scmp.ge.s32.totalorder %s18_s21, 6  }
 0x468   :  { %17 = sbr.rel (!%p15_p7) target bundleno = 2 (0x2), region = 95 }
 0x46d   :  { %3082 = vsyncpa [#allocation3], 1 }
 0x46e   :  { %3084 = vsyncpa [#allocation3 + $0x1], 1 }
 0x46f   :  { %3085 = vsyncpa [#allocation5], 1 }

// kernel: setnet_4to4_forward.3
= control target key start
LH: loop header
LB: loop body
LE: loop exit
PB: predicated region body
PF: predicated region fallthrough
CT: control target
= control target key end

     0   :  { %s3949_s27 = smov 0   ;;  %s7365_s0 = inlined_call_operand.vmem [shape: f32[4,4,256], index: 0, kind: input, shape index: {}]   ;;  %s7366_s1 = inlined_call_operand.vmem [shape: f32[256,640], index: 1, kind: input, shape index: {}]   ;;  %s7367_s2 = inlined_call_operand.vmem [shape: f32[16,640], index: 2, kind: input, shape index: {}]   ;;  %s7368_s3 = inlined_call_operand.vmem [shape: f32[5,640,256], index: 3, kind: input, shape index: {}]   ;;  %s7369_s4 = inlined_call_operand.vmem [shape: f32[5,8,64], index: 4, kind: input, shape index: {}]   ;;  %s7370_s5 = inlined_call_operand.vmem [shape: f32[8,1], index: 5, kind: input, shape index: {}]   ;;  %s7371_s6 = inlined_call_operand.vmem [shape: f32[3,8], index: 6, kind: input, shape index: {}]   ;;  %s7372_s7 = inlined_call_operand.vmem [shape: f32[3,1], index: 7, kind: input, shape index: {}]   ;;  %s7373_s8 = inlined_call_operand.vmem [shape: f32[4,3,256], index: 8, kind: output, shape index: {}]  }
   0x1 LB: > { %s3201_s28 = sadd.s32 4294967295, %s3901_s27   ;;  %p3205_p0 = scmp.ge.s32.totalorder %s3901_s27, 1  ;;  %s3901_s27 = sphi %s3949_s27, %s18_s27  }
   0x2   : > { %p262_p1 = scmp.lt.s32.totalorder %s3901_s27, 5 }
   0x4   : > { %p263_p2 = pnand %p3205_p0, %p262_p1 }
   0x5   : > { %p4085_p3 = scmp.lt.s32.totalorder (!%p263_p2), %s3201_s28, 3 }
   0x6   : > { %266 = sbr.rel (%p263_p2) target bundleno = 1269 (0x4f5), region = 52 }
   0xb   : > { %v382_v0 = vld [vmem:[%s7366_s1 + $0x258] sm:$0xff]  ;;  %v383_v2 = vld [vmem:[%s7366_s1 + $0x260] sm:$0xff]  ;;  %v377_v4 = vld [vmem:[%s7366_s1 + $0x230] sm:$0xff]  ;;  %s7376_s28 = smov (!%p4085_p3, %s3201_s28), 3  ;;  %vm744_vm0 = vcmask 523264   ;;  %vm3095_vm1 = vcmask 64512  }
   0xc   : > { %v462_v1 = vld [vmem:[%s7366_s1 + $0x4d8] sm:$0xff]  ;;  %473 = vmatpush.msra.mxu0 %v382_v0  ;;  %v463_v3 = vld [vmem:[%s7366_s1 + $0x4e0] sm:$0xff]  ;;  %v457_v5 = vld [vmem:[%s7366_s1 + $0x4b0] sm:$0xff]  ;;  %513 = vmatpush.msra.mxu2 %v383_v2  ;;  %s3883_s24 = sshll.u32 %s7376_s28, 3  ;;  %vm3142_vm2 = vcmask 1043456  }
   0xd   : > { %493 = vmatpush.msra.mxu1 %v462_v1  ;;  %533 = vmatpush.msra.mxu3 %v463_v3  ;;  %v378_v6 = vld [vmem:[%s7366_s1 + $0x238] sm:$0xff]  ;;  %v372_v8 = vld [vmem:[%s7366_s1 + $0x208] sm:$0xff]  ;;  %v373_v10 = vld [vmem:[%s7366_s1 + $0x210] sm:$0xff]  ;;  %s300_s19 = scalar_lea.vmem %s7365_s0, %s3883_s24  ;;  %s305_s29 = scalar_lea.vmem %s7373_s8, %s3883_s24 }
   0xe   : > { %v458_v7 = vld [vmem:[%s7366_s1 + $0x4b8] sm:$0xff]  ;;  %474 = vmatpush.msra.mxu0 %v377_v4  ;;  %v452_v9 = vld [vmem:[%s7366_s1 + $0x488] sm:$0xff]  ;;  %v453_v11 = vld [vmem:[%s7366_s1 + $0x490] sm:$0xff]  ;;  %514 = vmatpush.msra.mxu2 %v378_v6 }
   0xf   : > { %494 = vmatpush.msra.mxu1 %v457_v5  ;;  %534 = vmatpush.msra.mxu3 %v458_v7  ;;  %v367_v12 = vld [vmem:[%s7366_s1 + $0x1e0] sm:$0xff]  ;;  %v368_v14 = vld [vmem:[%s7366_s1 + $0x1e8] sm:$0xff]  ;;  %v362_v16 = vld [vmem:[%s7366_s1 + $0x1b8] sm:$0xff] }
  0x10   : > { %v447_v13 = vld [vmem:[%s7366_s1 + $0x460] sm:$0xff]  ;;  %475 = vmatpush.msra.mxu0 %v372_v8  ;;  %v448_v15 = vld [vmem:[%s7366_s1 + $0x468] sm:$0xff]  ;;  %515 = vmatpush.msra.mxu2 %v373_v10  ;;  %v442_v17 = vld [vmem:[%s7366_s1 + $0x438] sm:$0xff] }
  0x11   : > { %495 = vmatpush.msra.mxu1 %v452_v9  ;;  %535 = vmatpush.msra.mxu3 %v453_v11  ;;  %v363_v18 = vld [vmem:[%s7366_s1 + $0x1c0] sm:$0xff]  ;;  %v357_v20 = vld [vmem:[%s7366_s1 + $0x190] sm:$0xff]  ;;  %v358_v22 = vld [vmem:[%s7366_s1 + $0x198] sm:$0xff] }
  0x12   : > { %476 = vmatpush.msra.mxu0 %v367_v12  ;;  %v443_v19 = vld [vmem:[%s7366_s1 + $0x440] sm:$0xff]  ;;  %516 = vmatpush.msra.mxu2 %v368_v14  ;;  %v437_v21 = vld [vmem:[%s7366_s1 + $0x410] sm:$0xff]  ;;  %v438_v23 = vld [vmem:[%s7366_s1 + $0x418] sm:$0xff] }
  0x13   : > { %496 = vmatpush.msra.mxu1 %v447_v13  ;;  %536 = vmatpush.msra.mxu3 %v448_v15  ;;  %v352_v24 = vld [vmem:[%s7366_s1 + $0x168] sm:$0xff]  ;;  %v353_v26 = vld [vmem:[%s7366_s1 + $0x170] sm:$0xff]  ;;  %v347_v28 = vld [vmem:[%s7366_s1 + $0x140] sm:$0xff] }
  0x14   : > { %477 = vmatpush.msra.mxu0 %v362_v16  ;;  %517 = vmatpush.msra.mxu2 %v363_v18  ;;  %v432_v25 = vld [vmem:[%s7366_s1 + $0x3e8] sm:$0xff]  ;;  %v433_v27 = vld [vmem:[%s7366_s1 + $0x3f0] sm:$0xff]  ;;  %v427_v29 = vld [vmem:[%s7366_s1 + $0x3c0] sm:$0xff] }
  0x15   : > { %497 = vmatpush.msra.mxu1 %v442_v17  ;;  %537 = vmatpush.msra.mxu3 %v443_v19  ;;  %v348_v30 = vld [vmem:[%s7366_s1 + $0x148] sm:$0xff]  ;;  %v342_v32 = vld [vmem:[%s7366_s1 + $0x118] sm:$0xff]  ;;  %v343_v34 = vld [vmem:[%s7366_s1 + $0x120] sm:$0xff] }
  0x16   : > { %478 = vmatpush.msra.mxu0 %v357_v20  ;;  %518 = vmatpush.msra.mxu2 %v358_v22  ;;  %v428_v31 = vld [vmem:[%s7366_s1 + $0x3c8] sm:$0xff]  ;;  %v422_v33 = vld [vmem:[%s7366_s1 + $0x398] sm:$0xff]  ;;  %v423_v35 = vld [vmem:[%s7366_s1 + $0x3a0] sm:$0xff] }
  0x17   : > { %498 = vmatpush.msra.mxu1 %v437_v21  ;;  %538 = vmatpush.msra.mxu3 %v438_v23  ;;  %v337_v36 = vld [vmem:[%s7366_s1 + $0xf0] sm:$0xff]  ;;  %v338_v38 = vld [vmem:[%s7366_s1 + $0xf8] sm:$0xff]  ;;  %v332_v40 = vld [vmem:[%s7366_s1 + $0xc8] sm:$0xff] }
  0x18   : > { %479 = vmatpush.msra.mxu0 %v352_v24  ;;  %519 = vmatpush.msra.mxu2 %v353_v26  ;;  %v417_v37 = vld [vmem:[%s7366_s1 + $0x370] sm:$0xff]  ;;  %v418_v39 = vld [vmem:[%s7366_s1 + $0x378] sm:$0xff]  ;;  %v412_v41 = vld [vmem:[%s7366_s1 + $0x348] sm:$0xff] }
  0x19   : > { %499 = vmatpush.msra.mxu1 %v432_v25  ;;  %539 = vmatpush.msra.mxu3 %v433_v27  ;;  %v333_v42 = vld [vmem:[%s7366_s1 + $0xd0] sm:$0xff]  ;;  %v327_v44 = vld [vmem:[%s7366_s1 + $0xa0] sm:$0xff]  ;;  %v328_v46 = vld [vmem:[%s7366_s1 + $0xa8] sm:$0xff] }
  0x1a   : > { %480 = vmatpush.msra.mxu0 %v347_v28  ;;  %520 = vmatpush.msra.mxu2 %v348_v30  ;;  %v413_v43 = vld [vmem:[%s7366_s1 + $0x350] sm:$0xff]  ;;  %v407_v45 = vld [vmem:[%s7366_s1 + $0x320] sm:$0xff]  ;;  %v408_v47 = vld [vmem:[%s7366_s1 + $0x328] sm:$0xff] }
  0x1b   : > { %500 = vmatpush.msra.mxu1 %v427_v29  ;;  %540 = vmatpush.msra.mxu3 %v428_v31  ;;  %v322_v48 = vld [vmem:[%s7366_s1 + $0x78] sm:$0xff]  ;;  %v323_v50 = vld [vmem:[%s7366_s1 + $0x80] sm:$0xff]  ;;  %v317_v52 = vld [vmem:[%s7366_s1 + $0x50] sm:$0xff] }
  0x1c   : > { %481 = vmatpush.msra.mxu0 %v342_v32  ;;  %521 = vmatpush.msra.mxu2 %v343_v34  ;;  %v402_v49 = vld [vmem:[%s7366_s1 + $0x2f8] sm:$0xff]  ;;  %v403_v51 = vld [vmem:[%s7366_s1 + $0x300] sm:$0xff]  ;;  %v397_v53 = vld [vmem:[%s7366_s1 + $0x2d0] sm:$0xff] }
  0x1d   : > { %501 = vmatpush.msra.mxu1 %v422_v33  ;;  %541 = vmatpush.msra.mxu3 %v423_v35  ;;  %v318_v54 = vld [vmem:[%s7366_s1 + $0x58] sm:$0xff]  ;;  %v312_v56 = vld [vmem:[%s7366_s1 + $0x28] sm:$0xff]  ;;  %v313_v58 = vld [vmem:[%s7366_s1 + $0x30] sm:$0xff] }
  0x1e   : > { %482 = vmatpush.msra.mxu0 %v337_v36  ;;  %522 = vmatpush.msra.mxu2 %v338_v38  ;;  %v398_v55 = vld [vmem:[%s7366_s1 + $0x2d8] sm:$0xff]  ;;  %v392_v57 = vld [vmem:[%s7366_s1 + $0x2a8] sm:$0xff]  ;;  %v393_v59 = vld [vmem:[%s7366_s1 + $0x2b0] sm:$0xff] }
  0x1f   : > { %502 = vmatpush.msra.mxu1 %v417_v37  ;;  %542 = vmatpush.msra.mxu3 %v418_v39  ;;  %v307_v60 = vld [vmem:[%s7366_s1] sm:$0xff]  ;;  %v308_v62 = vld [vmem:[%s7366_s1 + $0x8] sm:$0xff]  ;;  %v385_v2 = vld [vmem:[%s7366_s1 + $0x270] sm:$0xff] }
  0x20   : > { %483 = vmatpush.msra.mxu0 %v332_v40  ;;  %523 = vmatpush.msra.mxu2 %v333_v42  ;;  %v387_v61 = vld [vmem:[%s7366_s1 + $0x280] sm:$0xff]  ;;  %v388_v63 = vld [vmem:[%s7366_s1 + $0x288] sm:$0xff]  ;;  %v465_v3 = vld [vmem:[%s7366_s1 + $0x4f0] sm:$0xff] }
  0x21   : > { %503 = vmatpush.msra.mxu1 %v412_v41  ;;  %543 = vmatpush.msra.mxu3 %v413_v43  ;;  %v384_v0 = vld [vmem:[%s7366_s1 + $0x268] sm:$0xff]  ;;  %v379_v4 = vld [vmem:[%s7366_s1 + $0x240] sm:$0xff]  ;;  %v374_v9 = vld [vmem:[%s7366_s1 + $0x218] sm:$0xff] }
  0x22   : > { %484 = vmatpush.msra.mxu0 %v327_v44  ;;  %524 = vmatpush.msra.mxu2 %v328_v46  ;;  %v464_v1 = vld [vmem:[%s7366_s1 + $0x4e8] sm:$0xff]  ;;  %v459_v5 = vld [vmem:[%s7366_s1 + $0x4c0] sm:$0xff]  ;;  %v454_v10 = vld [vmem:[%s7366_s1 + $0x498] sm:$0xff] }
  0x23   : > { %504 = vmatpush.msra.mxu1 %v407_v45  ;;  %544 = vmatpush.msra.mxu3 %v408_v47  ;;  %v306_v6 = vld [vmem:[%s300_s19] sm:$0xff]  ;;  %v380_v7 = vld [vmem:[%s7366_s1 + $0x248] sm:$0xff]  ;;  %v369_v13 = vld [vmem:[%s7366_s1 + $0x1f0] sm:$0xff] }
  0x24   : > { %485 = vmatpush.msra.mxu0 %v322_v48  ;;  %525 = vmatpush.msra.mxu2 %v323_v50  ;;  %v460_v8 = vld [vmem:[%s7366_s1 + $0x4c8] sm:$0xff]  ;;  %468 = vst [vmem:[#allocation1] ss:$2 sm:$0xff] %v306_v6  ;;  %v375_v11 = vld [vmem:[%s7366_s1 + $0x220] sm:$0xff]  ;;  %v449_v14 = vld [vmem:[%s7366_s1 + $0x470] sm:$0xff] }
  0x25   : > { %505 = vmatpush.msra.mxu1 %v402_v49  ;;  %545 = vmatpush.msra.mxu3 %v403_v51  ;;  %v455_v12 = vld [vmem:[%s7366_s1 + $0x4a0] sm:$0xff]  ;;  %v370_v15 = vld [vmem:[%s7366_s1 + $0x1f8] sm:$0xff]  ;;  %v364_v17 = vld [vmem:[%s7366_s1 + $0x1c8] sm:$0xff] }
  0x26   : > { %486 = vmatpush.msra.mxu0 %v317_v52  ;;  %526 = vmatpush.msra.mxu2 %v318_v54  ;;  %v450_v16 = vld [vmem:[%s7366_s1 + $0x478] sm:$0xff]  ;;  %v444_v18 = vld [vmem:[%s7366_s1 + $0x448] sm:$0xff]  ;;  %v365_v19 = vld [vmem:[%s7366_s1 + $0x1d0] sm:$0xff] }
  0x27   : > { %506 = vmatpush.msra.mxu1 %v397_v53  ;;  %546 = vmatpush.msra.mxu3 %v398_v55  ;;  %v445_v20 = vld [vmem:[%s7366_s1 + $0x450] sm:$0xff]  ;;  %v359_v21 = vld [vmem:[%s7366_s1 + $0x1a0] sm:$0xff]  ;;  %v360_v23 = vld [vmem:[%s7366_s1 + $0x1a8] sm:$0xff] }
  0x28   : > { %487 = vmatpush.msra.mxu0 %v312_v56  ;;  %527 = vmatpush.msra.mxu2 %v313_v58  ;;  %v439_v22 = vld [vmem:[%s7366_s1 + $0x420] sm:$0xff]  ;;  %v440_v24 = vld [vmem:[%s7366_s1 + $0x428] sm:$0xff]  ;;  %v354_v25 = vld [vmem:[%s7366_s1 + $0x178] sm:$0xff] }
  0x29   : > { %507 = vmatpush.msra.mxu1 %v392_v57  ;;  %547 = vmatpush.msra.mxu3 %v393_v59  ;;  %v434_v26 = vld [vmem:[%s7366_s1 + $0x3f8] sm:$0xff]  ;;  %v355_v27 = vld [vmem:[%s7366_s1 + $0x180] sm:$0xff]  ;;  %v349_v29 = vld [vmem:[%s7366_s1 + $0x150] sm:$0xff] }
  0x2a   : > { %488 = vmatpush.msra.mxu0 %v307_v60  ;;  %528 = vmatpush.msra.mxu2 %v308_v62  ;;  %v435_v28 = vld [vmem:[%s7366_s1 + $0x400] sm:$0xff]  ;;  %v429_v30 = vld [vmem:[%s7366_s1 + $0x3d0] sm:$0xff]  ;;  %v350_v31 = vld [vmem:[%s7366_s1 + $0x158] sm:$0xff] }
  0x2b   : > { %508 = vmatpush.msra.mxu1 %v387_v61  ;;  %548 = vmatpush.msra.mxu3 %v388_v63  ;;  %v430_v32 = vld [vmem:[%s7366_s1 + $0x3d8] sm:$0xff]  ;;  %v4263_v33 = vld.sshfl [vmem:[#allocation1] sm:$0xff pattern:$0x75316420]  ;;  %v344_v35 = vld [vmem:[%s7366_s1 + $0x128] sm:$0xff] }
  0x2c   : > { %553 = vmatpush.msrb.mxu0 %v384_v0  ;;  %593 = vmatpush.msrb.mxu2 %v385_v2  ;;  %v4265_v34 = vld.sshfl [vmem:[#allocation1 + $0x8] sm:$0xff pattern:$0x75316420]  ;;  %v345_v37 = vld [vmem:[%s7366_s1 + $0x130] sm:$0xff]  ;;  %v339_v39 = vld [vmem:[%s7366_s1 + $0x100] sm:$0xff] }
  0x2d   : > { %573 = vmatpush.msrb.mxu1 %v464_v1  ;;  %613 = vmatpush.msrb.mxu3 %v465_v3  ;;  %v424_v36 = vld [vmem:[%s7366_s1 + $0x3a8] sm:$0xff]  ;;  %v425_v38 = vld [vmem:[%s7366_s1 + $0x3b0] sm:$0xff]  ;;  %v419_v40 = vld [vmem:[%s7366_s1 + $0x380] sm:$0xff] }
  0x2e   : > { %554 = vmatpush.msrb.mxu0 %v379_v4  ;;  %594 = vmatpush.msrb.mxu2 %v380_v7  ;;  %v340_v41 = vld [vmem:[%s7366_s1 + $0x108] sm:$0xff]  ;;  %v334_v43 = vld [vmem:[%s7366_s1 + $0xd8] sm:$0xff]  ;;  %v335_v45 = vld [vmem:[%s7366_s1 + $0xe0] sm:$0xff] }
  0x2f   : > { %574 = vmatpush.msrb.mxu1 %v459_v5  ;;  %614 = vmatpush.msrb.mxu3 %v460_v8  ;;  %v420_v42 = vld [vmem:[%s7366_s1 + $0x388] sm:$0xff]  ;;  %v414_v44 = vld [vmem:[%s7366_s1 + $0x358] sm:$0xff]  ;;  %v415_v46 = vld [vmem:[%s7366_s1 + $0x360] sm:$0xff] }
  0x30   : > { %555 = vmatpush.msrb.mxu0 %v374_v9  ;;  %595 = vmatpush.msrb.mxu2 %v375_v11  ;;  %v329_v47 = vld [vmem:[%s7366_s1 + $0xb0] sm:$0xff]  ;;  %v330_v49 = vld [vmem:[%s7366_s1 + $0xb8] sm:$0xff]  ;;  %v324_v51 = vld [vmem:[%s7366_s1 + $0x88] sm:$0xff] }
  0x31   : > { %575 = vmatpush.msrb.mxu1 %v454_v10  ;;  %615 = vmatpush.msrb.mxu3 %v455_v12  ;;  %v409_v48 = vld [vmem:[%s7366_s1 + $0x330] sm:$0xff]  ;;  %v410_v50 = vld [vmem:[%s7366_s1 + $0x338] sm:$0xff]  ;;  %v404_v52 = vld [vmem:[%s7366_s1 + $0x308] sm:$0xff] }
  0x32   : > { %556 = vmatpush.msrb.mxu0 %v369_v13  ;;  %596 = vmatpush.msrb.mxu2 %v370_v15  ;;  %v325_v53 = vld [vmem:[%s7366_s1 + $0x90] sm:$0xff]  ;;  %v319_v55 = vld [vmem:[%s7366_s1 + $0x60] sm:$0xff]  ;;  %v320_v57 = vld [vmem:[%s7366_s1 + $0x68] sm:$0xff] }
  0x33   : > { %576 = vmatpush.msrb.mxu1 %v449_v14  ;;  %616 = vmatpush.msrb.mxu3 %v450_v16  ;;  %v405_v54 = vld [vmem:[%s7366_s1 + $0x310] sm:$0xff]  ;;  %v399_v56 = vld [vmem:[%s7366_s1 + $0x2e0] sm:$0xff]  ;;  %v400_v58 = vld [vmem:[%s7366_s1 + $0x2e8] sm:$0xff] }
  0x34   : > { %557 = vmatpush.msrb.mxu0 %v364_v17  ;;  %597 = vmatpush.msrb.mxu2 %v365_v19  ;;  %v314_v59 = vld [vmem:[%s7366_s1 + $0x38] sm:$0xff]  ;;  %v315_v61 = vld [vmem:[%s7366_s1 + $0x40] sm:$0xff]  ;;  %v309_v63 = vld [vmem:[%s7366_s1 + $0x10] sm:$0xff] }
  0x35   : > { %577 = vmatpush.msrb.mxu1 %v444_v18  ;;  %617 = vmatpush.msrb.mxu3 %v445_v20  ;;  %v394_v60 = vld [vmem:[%s7366_s1 + $0x2b8] sm:$0xff]  ;;  %v395_v62 = vld [vmem:[%s7366_s1 + $0x2c0] sm:$0xff]  ;;  %v389_v0 = vld [vmem:[%s7366_s1 + $0x290] sm:$0xff] }
  0x36   : > { %558 = vmatpush.msrb.mxu0 %v359_v21  ;;  %598 = vmatpush.msrb.mxu2 %v360_v23  ;;  %v310_v1 = vld [vmem:[%s7366_s1 + $0x18] sm:$0xff]  ;;  %v381_v5 = vld [vmem:[%s7366_s1 + $0x250] sm:$0xff]  ;;  %v376_v7 = vld [vmem:[%s7366_s1 + $0x228] sm:$0xff] }
  0x37   : > { %578 = vmatpush.msrb.mxu1 %v439_v22  ;;  %618 = vmatpush.msrb.mxu3 %v440_v24  ;;  %v390_v2 = vld [vmem:[%s7366_s1 + $0x298] sm:$0xff]  ;;  %v461_v6 = vld [vmem:[%s7366_s1 + $0x4d0] sm:$0xff]  ;;  %v456_v8 = vld [vmem:[%s7366_s1 + $0x4a8] sm:$0xff] }
  0x38   : > { %559 = vmatpush.msrb.mxu0 %v354_v25  ;;  %599 = vmatpush.msrb.mxu2 %v355_v27  ;;  %v386_v3 = vld [vmem:[%s7366_s1 + $0x278] sm:$0xff]  ;;  %v371_v9 = vld [vmem:[%s7366_s1 + $0x200] sm:$0xff]  ;;  %v361_v13 = vld [vmem:[%s7366_s1 + $0x1b0] sm:$0xff] }
  0x39   : > { %579 = vmatpush.msrb.mxu1 %v434_v26  ;;  %619 = vmatpush.msrb.mxu3 %v435_v28  ;;  %v466_v4 = vld [vmem:[%s7366_s1 + $0x4f8] sm:$0xff]  ;;  %v451_v10 = vld [vmem:[%s7366_s1 + $0x480] sm:$0xff]  ;;  %v441_v14 = vld [vmem:[%s7366_s1 + $0x430] sm:$0xff] }
  0x3a   : > { %560 = vmatpush.msrb.mxu0 %v349_v29  ;;  %600 = vmatpush.msrb.mxu2 %v350_v31  ;;  %v366_v11 = vld [vmem:[%s7366_s1 + $0x1d8] sm:$0xff]  ;;  %v356_v15 = vld [vmem:[%s7366_s1 + $0x188] sm:$0xff]  ;;  %v351_v17 = vld [vmem:[%s7366_s1 + $0x160] sm:$0xff] }
  0x3b   : > { %580 = vmatpush.msrb.mxu1 %v429_v30  ;;  %620 = vmatpush.msrb.mxu3 %v430_v32  ;;  %v446_v12 = vld [vmem:[%s7366_s1 + $0x458] sm:$0xff]  ;;  %v436_v16 = vld [vmem:[%s7366_s1 + $0x408] sm:$0xff]  ;;  %v431_v18 = vld [vmem:[%s7366_s1 + $0x3e0] sm:$0xff] }
  0x3c   : > { %489 = vmatmul.f32.vlgmr.msra.gmra.mxu0 %v4263_v33  ;;  %509 = vmatmul.f32.vlgmr.msra.gmra.mxu1 %v4265_v34  ;;  %v346_v19 = vld [vmem:[%s7366_s1 + $0x138] sm:$0xff]  ;;  %v341_v21 = vld [vmem:[%s7366_s1 + $0x110] sm:$0xff]  ;;  %v336_v23 = vld [vmem:[%s7366_s1 + $0xe8] sm:$0xff] }
  0x3d   : > { %529 = vmatmul.f32.vlgmr.msra.gmra.mxu2 %v4263_v33  ;;  %549 = vmatmul.f32.vlgmr.msra.gmra.mxu3 %v4265_v34  ;;  %v426_v20 = vld [vmem:[%s7366_s1 + $0x3b8] sm:$0xff]  ;;  %v421_v22 = vld [vmem:[%s7366_s1 + $0x390] sm:$0xff]  ;;  %v416_v24 = vld [vmem:[%s7366_s1 + $0x368] sm:$0xff] }
  0x3e   : > { %561 = vmatpush.msrb.mxu0 %v344_v35  ;;  %581 = vmatpush.msrb.mxu1 %v424_v36  ;;  %v331_v25 = vld [vmem:[%s7366_s1 + $0xc0] sm:$0xff]  ;;  %v326_v27 = vld [vmem:[%s7366_s1 + $0x98] sm:$0xff]  ;;  %v321_v29 = vld [vmem:[%s7366_s1 + $0x70] sm:$0xff] }
  0x3f   : > { %601 = vmatpush.msrb.mxu2 %v345_v37  ;;  %621 = vmatpush.msrb.mxu3 %v425_v38  ;;  %v411_v26 = vld [vmem:[%s7366_s1 + $0x340] sm:$0xff]  ;;  %v406_v28 = vld [vmem:[%s7366_s1 + $0x318] sm:$0xff]  ;;  %v401_v30 = vld [vmem:[%s7366_s1 + $0x2f0] sm:$0xff] }
  0x40   : > { %562 = vmatpush.msrb.mxu0 %v339_v39  ;;  %582 = vmatpush.msrb.mxu1 %v419_v40  ;;  %v316_v31 = vld [vmem:[%s7366_s1 + $0x48] sm:$0xff]  ;;  %v311_v35 = vld [vmem:[%s7366_s1 + $0x20] sm:$0xff] }
  0x41   : > { %602 = vmatpush.msrb.mxu2 %v340_v41  ;;  %622 = vmatpush.msrb.mxu3 %v420_v42  ;;  %v396_v32 = vld [vmem:[%s7366_s1 + $0x2c8] sm:$0xff]  ;;  %v391_v36 = vld [vmem:[%s7366_s1 + $0x2a0] sm:$0xff] }
  0x42   : > { %563 = vmatpush.msrb.mxu0 %v334_v43  ;;  %583 = vmatpush.msrb.mxu1 %v414_v44  ;;  %v673_v40 = vld [vmem:[%s7367_s2] sm:$0xff]  ;;  %v678_v41 = vld [vmem:[%s7367_s2 + $0x28] sm:$0xff] }
  0x43   : > { %603 = vmatpush.msrb.mxu2 %v335_v45  ;;  %623 = vmatpush.msrb.mxu3 %v415_v46 }
  0x44   : > { %564 = vmatpush.msrb.mxu0 %v329_v47  ;;  %584 = vmatpush.msrb.mxu1 %v409_v48 }
  0x45   : > { %604 = vmatpush.msrb.mxu2 %v330_v49  ;;  %624 = vmatpush.msrb.mxu3 %v410_v50  ;;  %v674_v50 = vld [vmem:[%s7367_s2 + $0x8] sm:$0xff] }
  0x46   : > { %565 = vmatpush.msrb.mxu0 %v324_v51  ;;  %585 = vmatpush.msrb.mxu1 %v404_v52  ;;  %v679_v51 = vld [vmem:[%s7367_s2 + $0x30] sm:$0xff] }
  0x47   : > { %605 = vmatpush.msrb.mxu2 %v325_v53  ;;  %625 = vmatpush.msrb.mxu3 %v405_v54 }
  0x48   : > { %566 = vmatpush.msrb.mxu0 %v319_v55  ;;  %586 = vmatpush.msrb.mxu1 %v399_v56 }
  0x49   : > { %606 = vmatpush.msrb.mxu2 %v320_v57  ;;  %626 = vmatpush.msrb.mxu3 %v400_v58 }
  0x4a   : > { %567 = vmatpush.msrb.mxu0 %v314_v59  ;;  %587 = vmatpush.msrb.mxu1 %v394_v60 }
  0x4b   : > { %607 = vmatpush.msrb.mxu2 %v315_v61  ;;  %627 = vmatpush.msrb.mxu3 %v395_v62 }
  0x4c   : > { %568 = vmatpush.msrb.mxu0 %v309_v63  ;;  %588 = vmatpush.msrb.mxu1 %v389_v0 }
  0x4d   : > { %608 = vmatpush.msrb.mxu2 %v310_v1  ;;  %628 = vmatpush.msrb.mxu3 %v390_v2 }
  0x4e   : > { %569 = vmatmul.f32.vlgmr.msrb.gmra.mxu0 %v4263_v33  ;;  %589 = vmatmul.f32.vlgmr.msrb.gmra.mxu1 %v4265_v34 }
  0x4f   : > { %609 = vmatmul.f32.vlgmr.msrb.gmra.mxu2 %v4263_v33  ;;  %629 = vmatmul.f32.vlgmr.msrb.gmra.mxu3 %v4265_v34 }
  0x50   : > { %633 = vmatpush.msra.mxu0 %v386_v3  ;;  %653 = vmatpush.msra.mxu1 %v466_v4 }
  0x52   : > { %634 = vmatpush.msra.mxu0 %v381_v5  ;;  %654 = vmatpush.msra.mxu1 %v461_v6  ;;  %v675_v6 = vld [vmem:[%s7367_s2 + $0x10] sm:$0xff] }
  0x54   : > { %635 = vmatpush.msra.mxu0 %v376_v7  ;;  %655 = vmatpush.msra.mxu1 %v456_v8  ;;  %v680_v7 = vld [vmem:[%s7367_s2 + $0x38] sm:$0xff] }
  0x56   : > { %636 = vmatpush.msra.mxu0 %v371_v9  ;;  %656 = vmatpush.msra.mxu1 %v451_v10  ;;  %v4537_v10 = vld [vmem:[%s7369_s4] sm:$0xff] }
  0x58   : > { %637 = vmatpush.msra.mxu0 %v366_v11  ;;  %657 = vmatpush.msra.mxu1 %v446_v12  ;;  %v4545_v12 = vld [vmem:[%s7369_s4 + $0x8] sm:$0xff] }
  0x5a   : > { %638 = vmatpush.msra.mxu0 %v361_v13  ;;  %658 = vmatpush.msra.mxu1 %v441_v14 }
  0x5c   : > { %639 = vmatpush.msra.mxu0 %v356_v15  ;;  %659 = vmatpush.msra.mxu1 %v436_v16 }
  0x5e   : > { %640 = vmatpush.msra.mxu0 %v351_v17  ;;  %660 = vmatpush.msra.mxu1 %v431_v18 }
  0x60   : > { %641 = vmatpush.msra.mxu0 %v346_v19  ;;  %661 = vmatpush.msra.mxu1 %v426_v20 }
  0x62   : > { %642 = vmatpush.msra.mxu0 %v341_v21  ;;  %662 = vmatpush.msra.mxu1 %v421_v22  ;;  %v676_v22 = vld [vmem:[%s7367_s2 + $0x18] sm:$0xff] }
  0x64   : > { %643 = vmatpush.msra.mxu0 %v336_v23  ;;  %663 = vmatpush.msra.mxu1 %v416_v24  ;;  %v681_v23 = vld [vmem:[%s7367_s2 + $0x40] sm:$0xff] }
  0x66   : > { %644 = vmatpush.msra.mxu0 %v331_v25  ;;  %664 = vmatpush.msra.mxu1 %v411_v26 }
  0x68   : > { %645 = vmatpush.msra.mxu0 %v326_v27  ;;  %665 = vmatpush.msra.mxu1 %v406_v28 }
  0x6a   : > { %646 = vmatpush.msra.mxu0 %v321_v29  ;;  %666 = vmatpush.msra.mxu1 %v401_v30 }
  0x6c   : > { %647 = vmatpush.msra.mxu0 %v316_v31  ;;  %667 = vmatpush.msra.mxu1 %v396_v32 }
  0x6e   : > { %648 = vmatpush.msra.mxu0 %v311_v35  ;;  %668 = vmatpush.msra.mxu1 %v391_v36 }
  0x6f   : > { %649 = vmatmul.f32.vlgmr.msra.gmra.mxu0 %v4263_v33  ;;  %669 = vmatmul.f32.vlgmr.msra.gmra.mxu1 %v4265_v34 }
  0xb9   : > { %v490_v37 = vpop.f32.mrf.mxu0  ;;  %v510_v38 = vpop.f32.mrf.mxu1 }
  0xba   : > { %v511_v39 = vadd.f32 %v510_v38, %v490_v37 }
  0xbc   : > { %v728_v42 = vperm.slane %v511_v39, 3  ;;  %v713_v43 = vperm.slane %v511_v39, 2  ;;  %v698_v34 = vperm.slane %v511_v39, 1  ;;  %v683_v54 = vperm.slane %v511_v39, 0 }
  0xbe   : > { %v4475_v44 = vmul.f32 %v728_v42, %v673_v40  ;;  %v4477_v45 = vmul.f32 %v728_v42, %v678_v41  ;;  %v4479_v47 = vmul.f32 %v713_v43, %v678_v41  ;;  %v4483_v49 = vmul.f32 %v713_v43, %v673_v40 }
  0xbf   : > { %v4493_v55 = vmul.f32 %v698_v34, %v678_v41  ;;  %v4501_v58 = vmul.f32 %v698_v34, %v673_v40  ;;  %v4508_v61 = vmul.f32 %v683_v54, %v678_v41  ;;  %v4515_v63 = vmul.f32 %v683_v54, %v673_v40  ;;  %v682_v34 = vld [vmem:[%s7367_s2 + $0x48] sm:$0xff]  ;;  %v3249_v54 = vld [vmem:[%s7368_s3 + $0x5e0] sm:$0xff] }
  0xc0   : > { %v530_v33 = vpop.f32.mrf.mxu2  ;;  %v550_v46 = vpop.f32.mrf.mxu3  ;;  %756 = vmatpush.msra.mxu2 %v4477_v45  ;;  %1021 = vmatpush.msrb.mxu1 %v4477_v45 }
  0xc1   : > { %v551_v48 = vadd.f32 %v550_v46, %v530_v33 }
  0xc2   : > { %757 = vmatpush.msra.mxu2 %v4475_v44  ;;  %1022 = vmatpush.msrb.mxu1 %v4475_v44 }
  0xc3   : > { %v729_v52 = vperm.slane %v551_v48, 3  ;;  %v714_v53 = vperm.slane %v551_v48, 2  ;;  %v699_v59 = vperm.slane %v551_v48, 1  ;;  %v684_v2 = vperm.slane %v551_v48, 0 }
  0xc4   : > { %758 = vmatpush.msra.mxu2 %v4479_v47  ;;  %1023 = vmatpush.msrb.mxu1 %v4479_v47 }
  0xc5   : > { %v4496_v56 = vmul.f32 %v729_v52, %v674_v50  ;;  %v4498_v57 = vmul.f32 %v729_v52, %v679_v51  ;;  %v4504_v60 = vmul.f32 %v714_v53, %v679_v51  ;;  %v4511_v62 = vmul.f32 %v714_v53, %v674_v50  ;;  %v3251_v53 = vld [vmem:[%s7368_s3 + $0x5f0] sm:$0xff] }
  0xc6   : > { %759 = vmatpush.msra.mxu2 %v4483_v49  ;;  %1024 = vmatpush.msrb.mxu1 %v4483_v49  ;;  %v4518_v3 = vmul.f32 %v699_v59, %v679_v51  ;;  %v4523_v5 = vmul.f32 %v699_v59, %v674_v50  ;;  %v4539_v11 = vmul.f32 %v684_v2, %v679_v51 }
  0xc7   : > { %776 = vmatpush.msra.mxu3 %v4498_v57  ;;  %v4552_v15 = vmul.f32 %v684_v2, %v674_v50  ;;  %v677_v50 = vld [vmem:[%s7367_s2 + $0x20] sm:$0xff] }
  0xc8   : > { %760 = vmatpush.msra.mxu2 %v4493_v55  ;;  %1025 = vmatpush.msrb.mxu1 %v4493_v55 }
  0xc9   : > { %777 = vmatpush.msra.mxu3 %v4496_v56 }
  0xca   : > { %761 = vmatpush.msra.mxu2 %v4501_v58  ;;  %1026 = vmatpush.msrb.mxu1 %v4501_v58 }
  0xcb   : > { %v570_v0 = vpop.f32.mrf.mxu0  ;;  %v590_v1 = vpop.f32.mrf.mxu1  ;;  %778 = vmatpush.msra.mxu3 %v4504_v60 }
  0xcc   : > { %v591_v4 = vadd.f32 %v590_v1, %v570_v0  ;;  %762 = vmatpush.msra.mxu2 %v4508_v61  ;;  %1027 = vmatpush.msrb.mxu1 %v4508_v61  ;;  %v3247_v0 = vld [vmem:[%s7368_s3 + $0x5d0] sm:$0xff] }
  0xcd   : > { %779 = vmatpush.msra.mxu3 %v4511_v62 }
  0xce   : > { %v730_v8 = vperm.slane %v591_v4, 3  ;;  %v715_v9 = vperm.slane %v591_v4, 2  ;;  %763 = vmatpush.msra.mxu2 %v4515_v63  ;;  %1028 = vmatpush.msrb.mxu1 %v4515_v63  ;;  %v700_v18 = vperm.slane %v591_v4, 1  ;;  %v685_v26 = vperm.slane %v591_v4, 0  ;;  %v3245_v4 = vld [vmem:[%s7368_s3 + $0x5c0] sm:$0xff] }
  0xcf   : > { %780 = vmatpush.msra.mxu3 %v4518_v3  ;;  %3210 = vmatmul.msk.f32.vlgmr.msra.gmra.mxu2 %vm744_vm0, %v4537_v10 }
  0xd0   : > { %v4547_v13 = vmul.f32 %v730_v8, %v675_v6  ;;  %v4549_v14 = vmul.f32 %v730_v8, %v680_v7  ;;  %v4557_v19 = vmul.f32 %v715_v9, %v680_v7  ;;  %3216 = vmatmul.msk.f32.vlgmr.msrb.gmra.mxu1 %vm744_vm0, %v4545_v12  ;;  %v4563_v21 = vmul.f32 %v715_v9, %v675_v6  ;;  %v3283_v8 = vld [vmem:[%s7368_s3 + $0x6f0] sm:$0xff] }
  0xd1   : > { %781 = vmatpush.msra.mxu3 %v4523_v5  ;;  %v4573_v27 = vmul.f32 %v700_v18, %v680_v7  ;;  %v4582_v30 = vmul.f32 %v700_v18, %v675_v6  ;;  %v4588_v35 = vmul.f32 %v685_v26, %v680_v7  ;;  %v4594_v37 = vmul.f32 %v685_v26, %v675_v6  ;;  %v3243_v7 = vld [vmem:[%s7368_s3 + $0x5b0] sm:$0xff]  ;;  %v3281_v18 = vld [vmem:[%s7368_s3 + $0x6e0] sm:$0xff] }
  0xd2   : > { %v610_v16 = vpop.f32.mrf.mxu2  ;;  %v630_v17 = vpop.f32.mrf.mxu3  ;;  %796 = vmatpush.msrb.mxu2 %v4549_v14  ;;  %v3277_v26 = vld [vmem:[%s7368_s3 + $0x6c0] sm:$0xff] }
  0xd3   : > { %v631_v20 = vadd.f32 %v630_v17, %v610_v16  ;;  %782 = vmatpush.msra.mxu3 %v4539_v11  ;;  %v3241_v17 = vld [vmem:[%s7368_s3 + $0x5a0] sm:$0xff] }
  0xd4   : > { %797 = vmatpush.msrb.mxu2 %v4547_v13 }
  0xd5   : > { %v731_v24 = vperm.slane %v631_v20, 3  ;;  %v716_v25 = vperm.slane %v631_v20, 2  ;;  %783 = vmatpush.msra.mxu3 %v4552_v15  ;;  %v701_v31 = vperm.slane %v631_v20, 1  ;;  %v686_v38 = vperm.slane %v631_v20, 0 }
  0xd6   : > { %798 = vmatpush.msrb.mxu2 %v4557_v19  ;;  %3211 = vmatmul.msk.f32.vlgmr.msra.gmra.mxu3 %vm744_vm0, %v4537_v10 }
  0xd7   : > { %v4576_v28 = vmul.f32 %v731_v24, %v676_v22  ;;  %v4578_v29 = vmul.f32 %v731_v24, %v681_v23  ;;  %v4585_v32 = vmul.f32 %v716_v25, %v681_v23  ;;  %v4591_v36 = vmul.f32 %v716_v25, %v676_v22  ;;  %v3237_v25 = vld [vmem:[%s7368_s3 + $0x580] sm:$0xff] }
  0xd8   : > { %799 = vmatpush.msrb.mxu2 %v4563_v21  ;;  %v4597_v39 = vmul.f32 %v701_v31, %v681_v23  ;;  %v4601_v40 = vmul.f32 %v701_v31, %v676_v22  ;;  %v4605_v41 = vmul.f32 %v686_v38, %v681_v23  ;;  %v4611_v42 = vmul.f32 %v686_v38, %v676_v22  ;;  %v3239_v22 = vld [vmem:[%s7368_s3 + $0x590] sm:$0xff] }
  0xd9   : > { %816 = vmatpush.msrb.mxu3 %v4578_v29  ;;  %v3279_v23 = vld [vmem:[%s7368_s3 + $0x6d0] sm:$0xff] }
  0xda   : > { %800 = vmatpush.msrb.mxu2 %v4573_v27  ;;  %v3235_v38 = vld [vmem:[%s7368_s3 + $0x570] sm:$0xff] }
  0xdb   : > { %817 = vmatpush.msrb.mxu3 %v4576_v28 }
  0xdc   : > { %801 = vmatpush.msrb.mxu2 %v4582_v30 }
  0xdd   : > { %818 = vmatpush.msrb.mxu3 %v4585_v32 }
  0xde   : > { %802 = vmatpush.msrb.mxu2 %v4588_v35 }
  0xdf   : > { %819 = vmatpush.msrb.mxu3 %v4591_v36 }
  0xe0   : > { %803 = vmatpush.msrb.mxu2 %v4594_v37 }
  0xe1   : > { %820 = vmatpush.msrb.mxu3 %v4597_v39  ;;  %3212 = vmatmul.msk.f32.vlgmr.msrb.gmra.mxu2 %vm744_vm0, %v4537_v10 }
  0xe2   : > { %1041 = vmatpush.msra.mxu2 %v4498_v57 }
  0xe3   : > { %821 = vmatpush.msrb.mxu3 %v4601_v40 }
  0xe4   : > { %1042 = vmatpush.msra.mxu2 %v4496_v56 }
  0xe5   : > { %822 = vmatpush.msrb.mxu3 %v4605_v41 }
  0xe6   : > { %1043 = vmatpush.msra.mxu2 %v4504_v60 }
  0xe7   : > { %823 = vmatpush.msrb.mxu3 %v4611_v42 }
  0xe8   : > { %1044 = vmatpush.msra.mxu2 %v4511_v62  ;;  %3213 = vmatmul.msk.f32.vlgmr.msrb.gmra.mxu3 %vm744_vm0, %v4537_v10 }
  0xe9   : > { %1061 = vmatpush.msra.mxu3 %v4549_v14 }
  0xea   : > { %1045 = vmatpush.msra.mxu2 %v4518_v3 }
  0xeb   : > { %1062 = vmatpush.msra.mxu3 %v4547_v13 }
  0xec   : > { %v650_v43 = vpop.f32.mrf.mxu0  ;;  %v670_v33 = vpop.f32.mrf.mxu1  ;;  %1046 = vmatpush.msra.mxu2 %v4523_v5 }
  0xed   : > { %v671_v46 = vadd.f32 %v670_v33, %v650_v43  ;;  %1063 = vmatpush.msra.mxu3 %v4557_v19  ;;  %v3275_v43 = vld [vmem:[%s7368_s3 + $0x6b0] sm:$0xff]  ;;  %v3233_v33 = vld [vmem:[%s7368_s3 + $0x560] sm:$0xff] }
  0xee   : > { %1047 = vmatpush.msra.mxu2 %v4539_v11 }
  0xef   : > { %v732_v48 = vperm.slane %v671_v46, 3  ;;  %1064 = vmatpush.msra.mxu3 %v4563_v21  ;;  %v717_v51 = vperm.slane %v671_v46, 2  ;;  %v702_v1 = vperm.slane %v671_v46, 1  ;;  %v687_v9 = vperm.slane %v671_v46, 0  ;;  %v3273_v46 = vld [vmem:[%s7368_s3 + $0x6a0] sm:$0xff] }
  0xf0   : > { %1048 = vmatpush.msra.mxu2 %v4552_v15 }
  0xf1   : > { %1065 = vmatpush.msra.mxu3 %v4573_v27  ;;  %v4636_v52 = vmul.f32 %v732_v48, %v682_v34  ;;  %3217 = vmatmul.msk.f32.vlgmr.msra.gmra.mxu2 %vm744_vm0, %v4545_v12  ;;  %v4647_v59 = vmul.f32 %v732_v48, %v677_v50  ;;  %v4655_v2 = vmul.f32 %v717_v51, %v682_v34  ;;  %v3347_v48 = vld [vmem:[%s7368_s3 + $0x8f0] sm:$0xff] }
  0xf2   : > { %1274 = vmatpush.msrb.mxu2 %v3251_v53  ;;  %v4663_v6 = vmul.f32 %v717_v51, %v677_v50  ;;  %v4675_v16 = vmul.f32 %v702_v1, %v682_v34  ;;  %v4685_v20 = vmul.f32 %v702_v1, %v677_v50  ;;  %v4695_v24 = vmul.f32 %v687_v9, %v682_v34  ;;  %v3231_v34 = vld [vmem:[%s7368_s3 + $0x550] sm:$0xff]  ;;  %v3345_v51 = vld [vmem:[%s7368_s3 + $0x8e0] sm:$0xff] }
  0xf3   : > { %1066 = vmatpush.msra.mxu3 %v4582_v30  ;;  %836 = vmatpush.msrb.mxu0 %v4636_v52  ;;  %v4705_v31 = vmul.f32 %v687_v9, %v677_v50  ;;  %v3229_v50 = vld [vmem:[%s7368_s3 + $0x540] sm:$0xff]  ;;  %v3267_v1 = vld [vmem:[%s7368_s3 + $0x670] sm:$0xff] }
  0xf4   : > { %1101 = vmatpush.msra.mxu1 %v4636_v52  ;;  %1275 = vmatpush.msrb.mxu2 %v3249_v54  ;;  %v3269_v53 = vld [vmem:[%s7368_s3 + $0x680] sm:$0xff]  ;;  %v3227_v54 = vld [vmem:[%s7368_s3 + $0x530] sm:$0xff] }
  0xf5   : > { %1067 = vmatpush.msra.mxu3 %v4588_v35  ;;  %837 = vmatpush.msrb.mxu0 %v4647_v59  ;;  %v3223_v9 = vld [vmem:[%s7368_s3 + $0x510] sm:$0xff] }
  0xf6   : > { %1102 = vmatpush.msra.mxu1 %v4647_v59  ;;  %1276 = vmatpush.msrb.mxu2 %v3247_v0  ;;  %v3343_v0 = vld [vmem:[%s7368_s3 + $0x8d0] sm:$0xff] }
  0xf7   : > { %1068 = vmatpush.msra.mxu3 %v4594_v37  ;;  %838 = vmatpush.msrb.mxu0 %v4655_v2 }
  0xf8   : > { %1103 = vmatpush.msra.mxu1 %v4655_v2  ;;  %3218 = vmatmul.msk.f32.vlgmr.msra.gmra.mxu3 %vm744_vm0, %v4545_v12 }
  0xf9   : > { %1277 = vmatpush.msrb.mxu2 %v3245_v4  ;;  %839 = vmatpush.msrb.mxu0 %v4663_v6  ;;  %v3225_v4 = vld [vmem:[%s7368_s3 + $0x520] sm:$0xff] }
  0xfa   : > { %1104 = vmatpush.msra.mxu1 %v4663_v6  ;;  %1294 = vmatpush.msrb.mxu3 %v3283_v8  ;;  %v3265_v8 = vld [vmem:[%s7368_s3 + $0x660] sm:$0xff] }
  0xfb   : > { %1278 = vmatpush.msrb.mxu2 %v3243_v7  ;;  %840 = vmatpush.msrb.mxu0 %v4675_v16  ;;  %v3341_v7 = vld [vmem:[%s7368_s3 + $0x8c0] sm:$0xff] }
  0xfc   : > { %1105 = vmatpush.msra.mxu1 %v4675_v16  ;;  %1295 = vmatpush.msrb.mxu3 %v3281_v18  ;;  %v3263_v18 = vld [vmem:[%s7368_s3 + $0x650] sm:$0xff] }
  0xfd   : > { %1279 = vmatpush.msrb.mxu2 %v3241_v17  ;;  %841 = vmatpush.msrb.mxu0 %v4685_v20  ;;  %v3339_v17 = vld [vmem:[%s7368_s3 + $0x8b0] sm:$0xff] }
  0xfe   : > { %1106 = vmatpush.msra.mxu1 %v4685_v20  ;;  %1296 = vmatpush.msrb.mxu3 %v3279_v23  ;;  %v3337_v23 = vld [vmem:[%s7368_s3 + $0x8a0] sm:$0xff] }
  0xff   : > { %1280 = vmatpush.msrb.mxu2 %v3239_v22  ;;  %842 = vmatpush.msrb.mxu0 %v4695_v24  ;;  %v3221_v22 = vld [vmem:[%s7368_s3 + $0x500] sm:$0xff] }
 0x100   : > { %1107 = vmatpush.msra.mxu1 %v4695_v24  ;;  %1297 = vmatpush.msrb.mxu3 %v3277_v26  ;;  %v3379_v26 = vld [vmem:[%s7368_s3 + $0x9f0] sm:$0xff] }
 0x101   : > { %1281 = vmatpush.msrb.mxu2 %v3237_v25  ;;  %843 = vmatpush.msrb.mxu0 %v4705_v31  ;;  %v3315_v25 = vld [vmem:[%s7368_s3 + $0x7f0] sm:$0xff] }
 0x102   : > { %1108 = vmatpush.msra.mxu1 %v4705_v31  ;;  %3214 = vmatmul.msk.f32.vlgmr.msrb.gmra.mxu0 %vm744_vm0, %v4537_v10  ;;  %v3271_v10 = vld [vmem:[%s7368_s3 + $0x690] sm:$0xff] }
 0x103   : > { %1081 = vmatpush.msra.mxu0 %v4578_v29  ;;  %3220 = vmatmul.msk.f32.vlgmr.msra.gmra.mxu1 %vm744_vm0, %v4545_v12 }
 0x104   : > { %1282 = vmatpush.msrb.mxu2 %v3235_v38  ;;  %1298 = vmatpush.msrb.mxu3 %v3275_v43  ;;  %v3261_v38 = vld [vmem:[%s7368_s3 + $0x640] sm:$0xff]  ;;  %v3335_v43 = vld [vmem:[%s7368_s3 + $0x890] sm:$0xff] }
 0x105   : > { %1082 = vmatpush.msra.mxu0 %v4576_v28  ;;  %1334 = vmatpush.msrb.mxu1 %v3347_v48  ;;  %v3333_v48 = vld [vmem:[%s7368_s3 + $0x880] sm:$0xff] }
 0x106   : > { %1283 = vmatpush.msrb.mxu2 %v3233_v33  ;;  %1299 = vmatpush.msrb.mxu3 %v3273_v46  ;;  %v3313_v33 = vld [vmem:[%s7368_s3 + $0x7e0] sm:$0xff] }
 0x107   : > { %1083 = vmatpush.msra.mxu0 %v4585_v32  ;;  %1335 = vmatpush.msrb.mxu1 %v3345_v51  ;;  %v3377_v46 = vld [vmem:[%s7368_s3 + $0x9e0] sm:$0xff] }
 0x108   : > { %1284 = vmatpush.msrb.mxu2 %v3231_v34  ;;  %1300 = vmatpush.msrb.mxu3 %v3271_v10  ;;  %v3259_v34 = vld [vmem:[%s7368_s3 + $0x630] sm:$0xff]  ;;  %v3309_v51 = vld [vmem:[%s7368_s3 + $0x7c0] sm:$0xff] }
 0x109   : > { %1084 = vmatpush.msra.mxu0 %v4591_v36  ;;  %1336 = vmatpush.msrb.mxu1 %v3343_v0  ;;  %v3375_v10 = vld [vmem:[%s7368_s3 + $0x9d0] sm:$0xff] }
 0x10a   : > { %1285 = vmatpush.msrb.mxu2 %v3229_v50  ;;  %1301 = vmatpush.msrb.mxu3 %v3269_v53  ;;  %v3257_v50 = vld [vmem:[%s7368_s3 + $0x620] sm:$0xff]  ;;  %v3307_v0 = vld [vmem:[%s7368_s3 + $0x7b0] sm:$0xff] }
 0x10b   : > { %1085 = vmatpush.msra.mxu0 %v4597_v39  ;;  %1337 = vmatpush.msrb.mxu1 %v3341_v7  ;;  %v3373_v53 = vld [vmem:[%s7368_s3 + $0x9c0] sm:$0xff] }
 0x10c   : > { %1286 = vmatpush.msrb.mxu2 %v3227_v54  ;;  %1302 = vmatpush.msrb.mxu3 %v3267_v1  ;;  %v3255_v54 = vld [vmem:[%s7368_s3 + $0x610] sm:$0xff]  ;;  %v3305_v7 = vld [vmem:[%s7368_s3 + $0x7a0] sm:$0xff] }
 0x10d   : > { %1086 = vmatpush.msra.mxu0 %v4601_v40  ;;  %1338 = vmatpush.msrb.mxu1 %v3339_v17  ;;  %v3371_v1 = vld [vmem:[%s7368_s3 + $0x9b0] sm:$0xff] }
 0x10e   : > { %1287 = vmatpush.msrb.mxu2 %v3225_v4  ;;  %1303 = vmatpush.msrb.mxu3 %v3265_v8  ;;  %v3253_v4 = vld [vmem:[%s7368_s3 + $0x600] sm:$0xff]  ;;  %v3303_v17 = vld [vmem:[%s7368_s3 + $0x790] sm:$0xff] }
 0x10f   : > { %1087 = vmatpush.msra.mxu0 %v4605_v41  ;;  %1339 = vmatpush.msrb.mxu1 %v3337_v23  ;;  %v3369_v8 = vld [vmem:[%s7368_s3 + $0x9a0] sm:$0xff] }
 0x110   : > { %1288 = vmatpush.msrb.mxu2 %v3223_v9  ;;  %1304 = vmatpush.msrb.mxu3 %v3263_v18  ;;  %v3252_v9 = vld [vmem:[%s7368_s3 + $0x5f8] sm:$0xff]  ;;  %v3367_v18 = vld [vmem:[%s7368_s3 + $0x990] sm:$0xff]  ;;  %v3301_v23 = vld [vmem:[%s7368_s3 + $0x780] sm:$0xff] }
 0x111   : > { %1088 = vmatpush.msra.mxu0 %v4611_v42  ;;  %1340 = vmatpush.msrb.mxu1 %v3335_v43  ;;  %v3363_v43 = vld [vmem:[%s7368_s3 + $0x970] sm:$0xff] }
 0x112   : > { %3219 = vmatmul.msk.f32.vlgmr.msra.gmra.mxu0 %vm744_vm0, %v4545_v12  ;;  %1289 = vmatpush.msrb.mxu2 %v3221_v22  ;;  %v3311_v12 = vld [vmem:[%s7368_s3 + $0x7d0] sm:$0xff]  ;;  %v3250_v22 = vld [vmem:[%s7368_s3 + $0x5e8] sm:$0xff] }
 0x113   : > { %1314 = vmatpush.msrb.mxu0 %v3315_v25  ;;  %1305 = vmatpush.msrb.mxu3 %v3261_v38  ;;  %v3365_v25 = vld [vmem:[%s7368_s3 + $0x980] sm:$0xff]  ;;  %v3299_v38 = vld [vmem:[%s7368_s3 + $0x770] sm:$0xff] }
 0x114   : > { %1354 = vmatpush.msra.mxu2 %v3379_v26  ;;  %1341 = vmatpush.msrb.mxu1 %v3333_v48  ;;  %v3248_v26 = vld [vmem:[%s7368_s3 + $0x5d8] sm:$0xff] }
 0x115   : > { %1315 = vmatpush.msrb.mxu0 %v3313_v33  ;;  %1306 = vmatpush.msrb.mxu3 %v3259_v34  ;;  %v3246_v33 = vld [vmem:[%s7368_s3 + $0x5c8] sm:$0xff]  ;;  %v3361_v34 = vld [vmem:[%s7368_s3 + $0x960] sm:$0xff]  ;;  %v3244_v48 = vld [vmem:[%s7368_s3 + $0x5b8] sm:$0xff] }
 0x116   : > { %1355 = vmatpush.msra.mxu2 %v3377_v46  ;;  %v3297_v46 = vld [vmem:[%s7368_s3 + $0x760] sm:$0xff] }
 0x117   : > { %1316 = vmatpush.msrb.mxu0 %v3311_v12  ;;  %1307 = vmatpush.msrb.mxu3 %v3257_v50  ;;  %v3295_v12 = vld [vmem:[%s7368_s3 + $0x750] sm:$0xff]  ;;  %v3293_v50 = vld [vmem:[%s7368_s3 + $0x740] sm:$0xff] }
 0x118   : > { %1356 = vmatpush.msra.mxu2 %v3375_v10  ;;  %v3359_v10 = vld [vmem:[%s7368_s3 + $0x950] sm:$0xff] }
 0x119   : > { %1317 = vmatpush.msrb.mxu0 %v3309_v51  ;;  %1308 = vmatpush.msrb.mxu3 %v3255_v54  ;;  %v3357_v51 = vld [vmem:[%s7368_s3 + $0x940] sm:$0xff]  ;;  %v3355_v54 = vld [vmem:[%s7368_s3 + $0x930] sm:$0xff] }
 0x11a   : > { %1357 = vmatpush.msra.mxu2 %v3373_v53  ;;  %v3291_v53 = vld [vmem:[%s7368_s3 + $0x730] sm:$0xff] }
 0x11b   : > { %1318 = vmatpush.msrb.mxu0 %v3307_v0  ;;  %1309 = vmatpush.msrb.mxu3 %v3253_v4  ;;  %v3289_v0 = vld [vmem:[%s7368_s3 + $0x720] sm:$0xff]  ;;  %v3287_v4 = vld [vmem:[%s7368_s3 + $0x710] sm:$0xff] }
 0x11c   : > { %1358 = vmatpush.msra.mxu2 %v3371_v1  ;;  %v3353_v1 = vld [vmem:[%s7368_s3 + $0x920] sm:$0xff] }
 0x11d   : > { %1319 = vmatpush.msrb.mxu0 %v3305_v7  ;;  %1374 = vmatpush.msra.mxu3 %v3252_v9  ;;  %v3351_v7 = vld [vmem:[%s7368_s3 + $0x910] sm:$0xff]  ;;  %v3284_v9 = vld [vmem:[%s7368_s3 + $0x6f8] sm:$0xff] }
 0x11e   : > { %1359 = vmatpush.msra.mxu2 %v3369_v8  ;;  %v3285_v8 = vld [vmem:[%s7368_s3 + $0x700] sm:$0xff] }
 0x11f   : > { %1320 = vmatpush.msrb.mxu0 %v3303_v17  ;;  %1375 = vmatpush.msra.mxu3 %v3250_v22  ;;  %v3349_v17 = vld [vmem:[%s7368_s3 + $0x900] sm:$0xff]  ;;  %v3331_v22 = vld [vmem:[%s7368_s3 + $0x870] sm:$0xff] }
 0x120   : > { %1360 = vmatpush.msra.mxu2 %v3367_v18  ;;  %v3282_v18 = vld [vmem:[%s7368_s3 + $0x6e8] sm:$0xff]  ;;  %1342 = vmatpush.msrb.mxu1 %v3331_v22  ;;  %v3316_v22 = vld [vmem:[%s7368_s3 + $0x7f8] sm:$0xff] }
 0x121   : > { %1321 = vmatpush.msrb.mxu0 %v3301_v23  ;;  %1376 = vmatpush.msra.mxu3 %v3248_v26  ;;  %v3242_v23 = vld [vmem:[%s7368_s3 + $0x5a8] sm:$0xff]  ;;  %v3240_v26 = vld [vmem:[%s7368_s3 + $0x598] sm:$0xff] }
 0x122   : > { %1361 = vmatpush.msra.mxu2 %v3365_v25  ;;  %v3329_v25 = vld [vmem:[%s7368_s3 + $0x860] sm:$0xff] }
 0x123   : > { %1322 = vmatpush.msrb.mxu0 %v3299_v38  ;;  %1377 = vmatpush.msra.mxu3 %v3246_v33  ;;  %v3280_v38 = vld [vmem:[%s7368_s3 + $0x6d8] sm:$0xff]  ;;  %v3327_v33 = vld [vmem:[%s7368_s3 + $0x850] sm:$0xff] }
 0x124   : > { %1362 = vmatpush.msra.mxu2 %v3363_v43  ;;  %1343 = vmatpush.msrb.mxu1 %v3329_v25  ;;  %v3278_v43 = vld [vmem:[%s7368_s3 + $0x6c8] sm:$0xff]  ;;  %v3264_v25 = vld [vmem:[%s7368_s3 + $0x658] sm:$0xff] }
 0x125   : > { %1323 = vmatpush.msrb.mxu0 %v3297_v46  ;;  %1378 = vmatpush.msra.mxu3 %v3244_v48  ;;  %v3238_v46 = vld [vmem:[%s7368_s3 + $0x588] sm:$0xff]  ;;  %v3236_v48 = vld [vmem:[%s7368_s3 + $0x578] sm:$0xff] }
 0x126   : > { %1363 = vmatpush.msra.mxu2 %v3361_v34  ;;  %1344 = vmatpush.msrb.mxu1 %v3327_v33  ;;  %v3325_v34 = vld [vmem:[%s7368_s3 + $0x840] sm:$0xff]  ;;  %v3312_v33 = vld [vmem:[%s7368_s3 + $0x7d8] sm:$0xff] }
 0x127   : > { %1324 = vmatpush.msrb.mxu0 %v3295_v12  ;;  %1379 = vmatpush.msra.mxu3 %v3242_v23  ;;  %v3276_v12 = vld [vmem:[%s7368_s3 + $0x6b8] sm:$0xff]  ;;  %v3226_v23 = vld [vmem:[%s7368_s3 + $0x528] sm:$0xff] }
 0x128   : > { %1364 = vmatpush.msra.mxu2 %v3359_v10  ;;  %1345 = vmatpush.msrb.mxu1 %v3325_v34  ;;  %v3323_v10 = vld [vmem:[%s7368_s3 + $0x830] sm:$0xff] }
 0x129   : > { %1325 = vmatpush.msrb.mxu0 %v3293_v50  ;;  %1380 = vmatpush.msra.mxu3 %v3240_v26  ;;  %v3234_v50 = vld [vmem:[%s7368_s3 + $0x568] sm:$0xff] }
 0x12a   : > { %1365 = vmatpush.msra.mxu2 %v3357_v51  ;;  %v3274_v51 = vld [vmem:[%s7368_s3 + $0x6a8] sm:$0xff]  ;;  %1346 = vmatpush.msrb.mxu1 %v3323_v10 }
 0x12b   : > { %1326 = vmatpush.msrb.mxu0 %v3291_v53  ;;  %1381 = vmatpush.msra.mxu3 %v3238_v46  ;;  %v3272_v53 = vld [vmem:[%s7368_s3 + $0x698] sm:$0xff]  ;;  %v3314_v26 = vld [vmem:[%s7368_s3 + $0x7e8] sm:$0xff] }
 0x12c   : > { %1366 = vmatpush.msra.mxu2 %v3355_v54  ;;  %v3321_v54 = vld [vmem:[%s7368_s3 + $0x820] sm:$0xff]  ;;  %v3348_v46 = vld [vmem:[%s7368_s3 + $0x8f8] sm:$0xff]  ;;  %v3342_v10 = vld [vmem:[%s7368_s3 + $0x8c8] sm:$0xff] }
 0x12d   : > { %1327 = vmatpush.msrb.mxu0 %v3289_v0  ;;  %1382 = vmatpush.msra.mxu3 %v3236_v48  ;;  %v3232_v0 = vld [vmem:[%s7368_s3 + $0x558] sm:$0xff]  ;;  %v3346_v48 = vld [vmem:[%s7368_s3 + $0x8e8] sm:$0xff] }
 0x12e   : > { %1367 = vmatpush.msra.mxu2 %v3353_v1  ;;  %1347 = vmatpush.msrb.mxu1 %v3321_v54  ;;  %v3270_v1 = vld [vmem:[%s7368_s3 + $0x688] sm:$0xff]  ;;  %v3340_v54 = vld [vmem:[%s7368_s3 + $0x8b8] sm:$0xff] }
 0x12f   : > { %1328 = vmatpush.msrb.mxu0 %v3287_v4  ;;  %1383 = vmatpush.msra.mxu3 %v3234_v50  ;;  %v3319_v4 = vld [vmem:[%s7368_s3 + $0x810] sm:$0xff]  ;;  %v3222_v50 = vld [vmem:[%s7368_s3 + $0x508] sm:$0xff] }
 0x130   : > { %1368 = vmatpush.msra.mxu2 %v3351_v7  ;;  %v3230_v7 = vld [vmem:[%s7368_s3 + $0x548] sm:$0xff]  ;;  %1348 = vmatpush.msrb.mxu1 %v3319_v4 }
 0x131   : > { %1329 = vmatpush.msrb.mxu0 %v3285_v8  ;;  %1384 = vmatpush.msra.mxu3 %v3232_v0  ;;  %v3268_v8 = vld [vmem:[%s7368_s3 + $0x678] sm:$0xff]  ;;  %v3258_v0 = vld [vmem:[%s7368_s3 + $0x628] sm:$0xff] }
 0x132   : > { %1369 = vmatpush.msra.mxu2 %v3349_v17  ;;  %v3228_v17 = vld [vmem:[%s7368_s3 + $0x538] sm:$0xff]  ;;  %v3338_v4 = vld [vmem:[%s7368_s3 + $0x8a8] sm:$0xff] }
 0x133   : > { %1394 = vmatpush.msra.mxu0 %v3284_v9  ;;  %1385 = vmatpush.msra.mxu3 %v3230_v7  ;;  %v3317_v9 = vld [vmem:[%s7368_s3 + $0x800] sm:$0xff]  ;;  %v3256_v7 = vld [vmem:[%s7368_s3 + $0x618] sm:$0xff] }
 0x134   : > { %1349 = vmatpush.msrb.mxu1 %v3317_v9  ;;  %v3336_v9 = vld [vmem:[%s7368_s3 + $0x898] sm:$0xff] }
 0x135   : > { %1395 = vmatpush.msra.mxu0 %v3282_v18  ;;  %v3266_v18 = vld [vmem:[%s7368_s3 + $0x668] sm:$0xff]  ;;  %1386 = vmatpush.msra.mxu3 %v3228_v17 }
 0x136   : > { %1414 = vmatpush.msra.mxu1 %v3316_v22  ;;  %v3254_v17 = vld [vmem:[%s7368_s3 + $0x608] sm:$0xff] }
 0x137   : > { %1396 = vmatpush.msra.mxu0 %v3280_v38  ;;  %1387 = vmatpush.msra.mxu3 %v3226_v23  ;;  %v3224_v38 = vld [vmem:[%s7368_s3 + $0x518] sm:$0xff]  ;;  %v3334_v22 = vld [vmem:[%s7368_s3 + $0x888] sm:$0xff] }
 0x138   : > { %1415 = vmatpush.msra.mxu1 %v3314_v26  ;;  %v3302_v23 = vld [vmem:[%s7368_s3 + $0x788] sm:$0xff] }
 0x139   : > { %1397 = vmatpush.msra.mxu0 %v3278_v43  ;;  %v3262_v43 = vld [vmem:[%s7368_s3 + $0x648] sm:$0xff]  ;;  %1388 = vmatpush.msra.mxu3 %v3224_v38 }
 0x13a   : > { %1416 = vmatpush.msra.mxu1 %v3312_v33  ;;  %v3330_v38 = vld [vmem:[%s7368_s3 + $0x868] sm:$0xff] }
 0x13b   : > { %1398 = vmatpush.msra.mxu0 %v3276_v12  ;;  %v3344_v12 = vld [vmem:[%s7368_s3 + $0x8d8] sm:$0xff]  ;;  %1389 = vmatpush.msra.mxu3 %v3222_v50  ;;  %v3298_v33 = vld [vmem:[%s7368_s3 + $0x768] sm:$0xff] }
 0x13c   : > { %v3324_v50 = vld [vmem:[%s7368_s3 + $0x838] sm:$0xff] }
 0x13d   : > { %1399 = vmatpush.msra.mxu0 %v3274_v51  ;;  %v3260_v51 = vld [vmem:[%s7368_s3 + $0x638] sm:$0xff] }
 0x13f   : > { %1400 = vmatpush.msra.mxu0 %v3272_v53  ;;  %v3310_v53 = vld [vmem:[%s7368_s3 + $0x7c8] sm:$0xff] }
 0x140   : > { %1417 = vmatpush.msra.mxu1 %v3310_v53  ;;  %v3292_v53 = vld [vmem:[%s7368_s3 + $0x738] sm:$0xff] }
 0x141   : > { %1401 = vmatpush.msra.mxu0 %v3270_v1  ;;  %v3308_v1 = vld [vmem:[%s7368_s3 + $0x7b8] sm:$0xff] }
 0x142   : > { %1418 = vmatpush.msra.mxu1 %v3308_v1 }
 0x143   : > { %1402 = vmatpush.msra.mxu0 %v3268_v8  ;;  %v3306_v8 = vld [vmem:[%s7368_s3 + $0x7a8] sm:$0xff] }
 0x144   : > { %1419 = vmatpush.msra.mxu1 %v3306_v8  ;;  %v3318_v8 = vld [vmem:[%s7368_s3 + $0x808] sm:$0xff] }
 0x145   : > { %1403 = vmatpush.msra.mxu0 %v3266_v18  ;;  %v3304_v18 = vld [vmem:[%s7368_s3 + $0x798] sm:$0xff] }
 0x146   : > { %1420 = vmatpush.msra.mxu1 %v3304_v18  ;;  %v3380_v18 = vld [vmem:[%s7368_s3 + $0x9f8] sm:$0xff] }
 0x147   : > { %1404 = vmatpush.msra.mxu0 %v3264_v25  ;;  %v3332_v25 = vld [vmem:[%s7368_s3 + $0x878] sm:$0xff] }
 0x148   : > { %1421 = vmatpush.msra.mxu1 %v3302_v23  ;;  %v3378_v23 = vld [vmem:[%s7368_s3 + $0x9e8] sm:$0xff] }
 0x149   : > { %1405 = vmatpush.msra.mxu0 %v3262_v43  ;;  %v3300_v43 = vld [vmem:[%s7368_s3 + $0x778] sm:$0xff] }
 0x14a   : > { %1422 = vmatpush.msra.mxu1 %v3300_v43  ;;  %v878_v43 = vld [vmem:[%s7368_s3 + $0xf0] sm:$0xff] }
 0x14b   : > { %1406 = vmatpush.msra.mxu0 %v3260_v51 }
 0x14c   : > { %1423 = vmatpush.msra.mxu1 %v3298_v33 }
 0x14d   : > { %v5022_v34 = vpop.f32.mrf.mxu1  ;;  %1407 = vmatpush.msra.mxu0 %v3258_v0  ;;  %v3290_v0 = vld [vmem:[%s7368_s3 + $0x728] sm:$0xff] }
 0x14e   : > { %1290 = vmatmul.f32.vlgmr.msrb.gmra.mxu2 %v5022_v34 }
 0x14f   : > { %1434 = vmatpush.msrb.mxu2 %v3348_v46  ;;  %1408 = vmatpush.msra.mxu0 %v3256_v7  ;;  %v3328_v46 = vld [vmem:[%s7368_s3 + $0x858] sm:$0xff] }
 0x150   : > { %v3288_v7 = vld [vmem:[%s7368_s3 + $0x718] sm:$0xff] }
 0x151   : > { %1435 = vmatpush.msrb.mxu2 %v3346_v48  ;;  %1409 = vmatpush.msra.mxu0 %v3254_v17  ;;  %v3296_v48 = vld [vmem:[%s7368_s3 + $0x758] sm:$0xff] }
 0x152   : > { %v5079_v26 = vpop.f32.mrf.mxu2  ;;  %1424 = vmatpush.msra.mxu1 %v3296_v48  ;;  %v876_v48 = vld [vmem:[%s7368_s3 + $0xe0] sm:$0xff] }
 0x153   : > { %1436 = vmatpush.msrb.mxu2 %v3344_v12  ;;  %v3326_v12 = vld [vmem:[%s7368_s3 + $0x848] sm:$0xff] }
 0x155   : > { %1437 = vmatpush.msrb.mxu2 %v3342_v10  ;;  %v3294_v10 = vld [vmem:[%s7368_s3 + $0x748] sm:$0xff] }
 0x156   : > { %1425 = vmatpush.msra.mxu1 %v3294_v10  ;;  %v874_v10 = vld [vmem:[%s7368_s3 + $0xd0] sm:$0xff] }
 0x157   : > { %1438 = vmatpush.msrb.mxu2 %v3340_v54  ;;  %v3322_v54 = vld [vmem:[%s7368_s3 + $0x828] sm:$0xff] }
 0x158   : > { %1426 = vmatpush.msra.mxu1 %v3292_v53 }
 0x159   : > { %1439 = vmatpush.msrb.mxu2 %v3338_v4  ;;  %v5105_v51 = vpop.f32.mrf.mxu3  ;;  %v3320_v4 = vld [vmem:[%s7368_s3 + $0x818] sm:$0xff] }
 0x15a   : > { %1427 = vmatpush.msra.mxu1 %v3290_v0  ;;  %v940_v0 = vld [vmem:[%s7368_s3 + $0x2e0] sm:$0xff] }
 0x15b   : > { %1440 = vmatpush.msrb.mxu2 %v3336_v9  ;;  %v3286_v9 = vld [vmem:[%s7368_s3 + $0x708] sm:$0xff] }
 0x15c   : > { %1428 = vmatpush.msra.mxu1 %v3288_v7  ;;  %v870_v7 = vld [vmem:[%s7368_s3 + $0xb0] sm:$0xff] }
 0x15d   : > { %1441 = vmatpush.msrb.mxu2 %v3334_v22 }
 0x15e   : > { %1429 = vmatpush.msra.mxu1 %v3286_v9  ;;  %v3364_v9 = vld [vmem:[%s7368_s3 + $0x978] sm:$0xff] }
 0x15f   : > { %1442 = vmatpush.msrb.mxu2 %v3332_v25  ;;  %v3376_v25 = vld [vmem:[%s7368_s3 + $0x9d8] sm:$0xff] }
 0x161   : > { %1443 = vmatpush.msrb.mxu2 %v3330_v38  ;;  %v3374_v38 = vld [vmem:[%s7368_s3 + $0x9c8] sm:$0xff] }
 0x163   : > { %1444 = vmatpush.msrb.mxu2 %v3328_v46  ;;  %v3372_v46 = vld [vmem:[%s7368_s3 + $0x9b8] sm:$0xff] }
 0x164   : > { %v5116_v1 = vpop.f32.mrf.mxu2 }
 0x165   : > { %1445 = vmatpush.msrb.mxu2 %v3326_v12  ;;  %v3370_v12 = vld [vmem:[%s7368_s3 + $0x9a8] sm:$0xff] }
 0x167   : > { %1446 = vmatpush.msrb.mxu2 %v3324_v50  ;;  %v942_v50 = vld [vmem:[%s7368_s3 + $0x2f0] sm:$0xff] }
 0x169   : > { %1447 = vmatpush.msrb.mxu2 %v3322_v54  ;;  %v3368_v54 = vld [vmem:[%s7368_s3 + $0x998] sm:$0xff] }
 0x16b   : > { %1448 = vmatpush.msrb.mxu2 %v3320_v4  ;;  %v5130_v17 = vpop.f32.mrf.mxu3  ;;  %v3366_v4 = vld [vmem:[%s7368_s3 + $0x988] sm:$0xff] }
 0x16d   : > { %1449 = vmatpush.msrb.mxu2 %v3318_v8  ;;  %v938_v8 = vld [vmem:[%s7368_s3 + $0x2d0] sm:$0xff] }
 0x174   : > { %v1050_v22 = vpop.f32.mrf.mxu2 }
 0x175   : > { %1310 = vmatmul.f32.vlgmr.msrb.gmra.mxu3 %v1050_v22 }
 0x176   : > { %1454 = vmatpush.msrb.mxu3 %v3380_v18 }
 0x178   : > { %1455 = vmatpush.msrb.mxu3 %v3378_v23  ;;  %v868_v23 = vld [vmem:[%s7368_s3 + $0xa0] sm:$0xff] }
 0x17a   : > { %1456 = vmatpush.msrb.mxu3 %v3376_v25  ;;  %v936_v25 = vld [vmem:[%s7368_s3 + $0x2c0] sm:$0xff] }
 0x17b   : > { %v5147_v33 = vpop.f32.mrf.mxu3 }
 0x17c   : > { %1330 = vmatmul.f32.vlgmr.msrb.gmra.mxu0 %v5147_v33  ;;  %1457 = vmatpush.msrb.mxu3 %v3374_v38  ;;  %v3362_v38 = vld [vmem:[%s7368_s3 + $0x968] sm:$0xff] }
 0x17d   : > { %1474 = vmatpush.msrb.mxu0 %v878_v43  ;;  %1390 = vmatmul.f32.vlgmr.msra.gmra.mxu3 %v5022_v34  ;;  %v872_v34 = vld [vmem:[%s7368_s3 + $0xc0] sm:$0xff]  ;;  %v866_v43 = vld [vmem:[%s7368_s3 + $0x90] sm:$0xff] }
 0x17e   : > { %1458 = vmatpush.msrb.mxu3 %v3372_v46  ;;  %v934_v46 = vld [vmem:[%s7368_s3 + $0x2b0] sm:$0xff] }
 0x17f   : > { %1475 = vmatpush.msrb.mxu0 %v876_v48  ;;  %v5190_v18 = vpop.f32.mrf.mxu0  ;;  %v864_v48 = vld [vmem:[%s7368_s3 + $0x80] sm:$0xff] }
 0x180   : > { %v5166_v53 = vpop.f32.mrf.mxu1  ;;  %1459 = vmatpush.msrb.mxu3 %v3370_v12  ;;  %v932_v12 = vld [vmem:[%s7368_s3 + $0x2a0] sm:$0xff] }
 0x181   : > { %1370 = vmatmul.f32.vlgmr.msra.gmra.mxu2 %v5166_v53  ;;  %1476 = vmatpush.msrb.mxu0 %v874_v10  ;;  %v3358_v10 = vld [vmem:[%s7368_s3 + $0x948] sm:$0xff] }
 0x182   : > { %1514 = vmatpush.msra.mxu2 %v942_v50  ;;  %1460 = vmatpush.msrb.mxu3 %v3368_v54  ;;  %v862_v50 = vld [vmem:[%s7368_s3 + $0x70] sm:$0xff] }
 0x183   : > { %1477 = vmatpush.msrb.mxu0 %v872_v34  ;;  %v930_v54 = vld [vmem:[%s7368_s3 + $0x290] sm:$0xff]  ;;  %v3356_v34 = vld [vmem:[%s7368_s3 + $0x938] sm:$0xff] }
 0x184   : > { %1515 = vmatpush.msra.mxu2 %v940_v0  ;;  %1461 = vmatpush.msrb.mxu3 %v3366_v4  ;;  %v860_v0 = vld [vmem:[%s7368_s3 + $0x60] sm:$0xff] }
 0x185   : > { %1410 = vmatmul.f32.vlgmr.msra.gmra.mxu0 %v1050_v22  ;;  %v3360_v22 = vld [vmem:[%s7368_s3 + $0x958] sm:$0xff]  ;;  %v928_v4 = vld [vmem:[%s7368_s3 + $0x280] sm:$0xff] }
 0x186   : > { %1478 = vmatpush.msrb.mxu0 %v870_v7  ;;  %1516 = vmatpush.msra.mxu2 %v938_v8  ;;  %v910_v8 = vld [vmem:[%s7368_s3 + $0x1f0] sm:$0xff] }
 0x187   : > { %1462 = vmatpush.msrb.mxu3 %v3364_v9  ;;  %v3354_v9 = vld [vmem:[%s7368_s3 + $0x928] sm:$0xff] }
 0x188   : > { %1479 = vmatpush.msrb.mxu0 %v868_v23  ;;  %1517 = vmatpush.msra.mxu2 %v936_v25  ;;  %v858_v23 = vld [vmem:[%s7368_s3 + $0x50] sm:$0xff] }
 0x189   : > { %1463 = vmatpush.msrb.mxu3 %v3362_v38  ;;  %v926_v25 = vld [vmem:[%s7368_s3 + $0x270] sm:$0xff]  ;;  %v908_v38 = vld [vmem:[%s7368_s3 + $0x1e0] sm:$0xff] }
 0x18a   : > { %1480 = vmatpush.msrb.mxu0 %v866_v43  ;;  %1518 = vmatpush.msra.mxu2 %v934_v46  ;;  %v3352_v43 = vld [vmem:[%s7368_s3 + $0x918] sm:$0xff]  ;;  %v856_v46 = vld [vmem:[%s7368_s3 + $0x40] sm:$0xff] }
 0x18b   : > { %1464 = vmatpush.msrb.mxu3 %v3360_v22  ;;  %v924_v22 = vld [vmem:[%s7368_s3 + $0x260] sm:$0xff] }
 0x18c   : > { %1481 = vmatpush.msrb.mxu0 %v864_v48  ;;  %1519 = vmatpush.msra.mxu2 %v932_v12  ;;  %v906_v48 = vld [vmem:[%s7368_s3 + $0x1d0] sm:$0xff]  ;;  %v3350_v12 = vld [vmem:[%s7368_s3 + $0x908] sm:$0xff] }
 0x18d   : > { %1465 = vmatpush.msrb.mxu3 %v3358_v10  ;;  %v854_v10 = vld [vmem:[%s7368_s3 + $0x30] sm:$0xff] }
 0x18e   : > { %1482 = vmatpush.msrb.mxu0 %v862_v50  ;;  %1520 = vmatpush.msra.mxu2 %v930_v54  ;;  %v922_v50 = vld [vmem:[%s7368_s3 + $0x250] sm:$0xff]  ;;  %v904_v54 = vld [vmem:[%s7368_s3 + $0x1c0] sm:$0xff] }
 0x18f   : > { %v1090_v7 = vpop.f32.mrf.mxu0  ;;  %1466 = vmatpush.msrb.mxu3 %v3356_v34  ;;  %v974_v34 = vld [vmem:[%s7368_s3 + $0x3f0] sm:$0xff] }
 0x190   : > { %1483 = vmatpush.msrb.mxu0 %v860_v0  ;;  %1521 = vmatpush.msra.mxu2 %v928_v4  ;;  %v852_v0 = vld [vmem:[%s7368_s3 + $0x20] sm:$0xff] }
 0x191   : > { %1350 = vmatmul.f32.vlgmr.msrb.gmra.mxu1 %v1090_v7  ;;  %1450 = vmatmul.f32.vlgmr.msrb.gmra.mxu2 %v1090_v7  ;;  %v920_v4 = vld [vmem:[%s7368_s3 + $0x240] sm:$0xff]  ;;  %v902_v7 = vld [vmem:[%s7368_s3 + $0x1b0] sm:$0xff] }
 0x192   : > { %1494 = vmatpush.msrb.mxu1 %v910_v8  ;;  %1467 = vmatpush.msrb.mxu3 %v3354_v9  ;;  %v972_v8 = vld [vmem:[%s7368_s3 + $0x3e0] sm:$0xff]  ;;  %v850_v9 = vld [vmem:[%s7368_s3 + $0x10] sm:$0xff] }
 0x193   : > { %1484 = vmatpush.msrb.mxu0 %v858_v23  ;;  %1522 = vmatpush.msra.mxu2 %v926_v25  ;;  %v918_v23 = vld [vmem:[%s7368_s3 + $0x230] sm:$0xff] }
 0x194   : > { %1495 = vmatpush.msrb.mxu1 %v908_v38  ;;  %1468 = vmatpush.msrb.mxu3 %v3352_v43  ;;  %v970_v25 = vld [vmem:[%s7368_s3 + $0x3d0] sm:$0xff]  ;;  %v848_v38 = vld [vmem:[%s7368_s3] sm:$0xff] }
 0x195   : > { %1485 = vmatpush.msrb.mxu0 %v856_v46  ;;  %1523 = vmatpush.msra.mxu2 %v924_v22  ;;  %v916_v43 = vld [vmem:[%s7368_s3 + $0x220] sm:$0xff]  ;;  %v1006_v22 = vld [vmem:[%s7368_s3 + $0x4f0] sm:$0xff] }
 0x196   : > { %1496 = vmatpush.msrb.mxu1 %v906_v48  ;;  %1469 = vmatpush.msrb.mxu3 %v3350_v12  ;;  %v968_v46 = vld [vmem:[%s7368_s3 + $0x3c0] sm:$0xff]  ;;  %v914_v48 = vld [vmem:[%s7368_s3 + $0x210] sm:$0xff] }
 0x197   : > { %1486 = vmatpush.msrb.mxu0 %v854_v10  ;;  %1524 = vmatpush.msra.mxu2 %v922_v50  ;;  %v896_v12 = vld [vmem:[%s7368_s3 + $0x180] sm:$0xff]  ;;  %v966_v10 = vld [vmem:[%s7368_s3 + $0x3b0] sm:$0xff] }
 0x198   : > { %1470 = vmatmul.f32.vlgmr.msrb.gmra.mxu3 %v5166_v53  ;;  %1497 = vmatpush.msrb.mxu1 %v904_v54  ;;  %v900_v53 = vld [vmem:[%s7368_s3 + $0x1a0] sm:$0xff] }
 0x199   : > { %1534 = vmatpush.msra.mxu3 %v974_v34  ;;  %1487 = vmatpush.msrb.mxu0 %v852_v0  ;;  %v1004_v50 = vld [vmem:[%s7368_s3 + $0x4e0] sm:$0xff]  ;;  %v894_v34 = vld [vmem:[%s7368_s3 + $0x170] sm:$0xff] }
 0x19a   : > { %1525 = vmatpush.msra.mxu2 %v920_v4  ;;  %1430 = vmatmul.f32.vlgmr.msra.gmra.mxu1 %v5147_v33  ;;  %v898_v33 = vld [vmem:[%s7368_s3 + $0x190] sm:$0xff]  ;;  %v912_v54 = vld [vmem:[%s7368_s3 + $0x200] sm:$0xff] }
 0x19b   : > { %1498 = vmatpush.msrb.mxu1 %v902_v7  ;;  %1535 = vmatpush.msra.mxu3 %v972_v8  ;;  %v964_v0 = vld [vmem:[%s7368_s3 + $0x3a0] sm:$0xff]  ;;  %v1002_v4 = vld [vmem:[%s7368_s3 + $0x4d0] sm:$0xff]  ;;  %v911_v7 = vld [vmem:[%s7368_s3 + $0x1f8] sm:$0xff] }
 0x19c   : > { %1488 = vmatpush.msrb.mxu0 %v850_v9  ;;  %1526 = vmatpush.msra.mxu2 %v918_v23  ;;  %v892_v8 = vld [vmem:[%s7368_s3 + $0x160] sm:$0xff]  ;;  %v962_v9 = vld [vmem:[%s7368_s3 + $0x390] sm:$0xff] }
 0x19d   : > { %1499 = vmatpush.msrb.mxu1 %v900_v53  ;;  %1536 = vmatpush.msra.mxu3 %v970_v25  ;;  %v1000_v23 = vld [vmem:[%s7368_s3 + $0x4c0] sm:$0xff]  ;;  %v909_v53 = vld [vmem:[%s7368_s3 + $0x1e8] sm:$0xff]  ;;  %v890_v25 = vld [vmem:[%s7368_s3 + $0x150] sm:$0xff] }
 0x19e   : > { %1489 = vmatpush.msrb.mxu0 %v848_v38  ;;  %1527 = vmatpush.msra.mxu2 %v916_v43  ;;  %v960_v38 = vld [vmem:[%s7368_s3 + $0x380] sm:$0xff]  ;;  %v998_v43 = vld [vmem:[%s7368_s3 + $0x4b0] sm:$0xff] }
 0x19f   : > { %1490 = vmatmul.f32.vlgmr.msrb.gmra.mxu0 %v5079_v26  ;;  %1500 = vmatpush.msrb.mxu1 %v898_v33  ;;  %v907_v33 = vld [vmem:[%s7368_s3 + $0x1d8] sm:$0xff] }
 0x1a0   : > { %1537 = vmatpush.msra.mxu3 %v968_v46  ;;  %1554 = vmatpush.msra.mxu0 %v1006_v22  ;;  %v888_v46 = vld [vmem:[%s7368_s3 + $0x140] sm:$0xff]  ;;  %v958_v22 = vld [vmem:[%s7368_s3 + $0x370] sm:$0xff] }
 0x1a1   : > { %1528 = vmatpush.msra.mxu2 %v914_v48  ;;  %1501 = vmatpush.msrb.mxu1 %v896_v12  ;;  %v996_v48 = vld [vmem:[%s7368_s3 + $0x4a0] sm:$0xff]  ;;  %v905_v12 = vld [vmem:[%s7368_s3 + $0x1c8] sm:$0xff] }
 0x1a2   : > { %1538 = vmatpush.msra.mxu3 %v966_v10  ;;  %1555 = vmatpush.msra.mxu0 %v1004_v50  ;;  %v886_v10 = vld [vmem:[%s7368_s3 + $0x130] sm:$0xff]  ;;  %v956_v50 = vld [vmem:[%s7368_s3 + $0x360] sm:$0xff] }
 0x1a3   : > { %1529 = vmatpush.msra.mxu2 %v912_v54  ;;  %1502 = vmatpush.msrb.mxu1 %v894_v34  ;;  %v994_v54 = vld [vmem:[%s7368_s3 + $0x490] sm:$0xff]  ;;  %v903_v34 = vld [vmem:[%s7368_s3 + $0x1b8] sm:$0xff] }
 0x1a4   : > { %1530 = vmatmul.f32.vlgmr.msra.gmra.mxu2 %v5116_v1  ;;  %1539 = vmatpush.msra.mxu3 %v964_v0  ;;  %v884_v0 = vld [vmem:[%s7368_s3 + $0x120] sm:$0xff] }
 0x1a5   : > { %1556 = vmatpush.msra.mxu0 %v1002_v4  ;;  %1594 = vmatpush.msrb.mxu2 %v911_v7  ;;  %v954_v4 = vld [vmem:[%s7368_s3 + $0x350] sm:$0xff]  ;;  %v992_v7 = vld [vmem:[%s7368_s3 + $0x480] sm:$0xff] }
 0x1a6   : > { %1503 = vmatpush.msrb.mxu1 %v892_v8  ;;  %1540 = vmatpush.msra.mxu3 %v962_v9  ;;  %v901_v8 = vld [vmem:[%s7368_s3 + $0x1a8] sm:$0xff]  ;;  %v882_v9 = vld [vmem:[%s7368_s3 + $0x110] sm:$0xff] }
 0x1a7   : > { %1557 = vmatpush.msra.mxu0 %v1000_v23  ;;  %1595 = vmatpush.msrb.mxu2 %v909_v53  ;;  %v952_v23 = vld [vmem:[%s7368_s3 + $0x340] sm:$0xff]  ;;  %v990_v53 = vld [vmem:[%s7368_s3 + $0x470] sm:$0xff] }
 0x1a8   : > { %1504 = vmatpush.msrb.mxu1 %v890_v25  ;;  %1541 = vmatpush.msra.mxu3 %v960_v38  ;;  %v899_v25 = vld [vmem:[%s7368_s3 + $0x198] sm:$0xff]  ;;  %v880_v38 = vld [vmem:[%s7368_s3 + $0x100] sm:$0xff] }
 0x1a9   : > { %1558 = vmatpush.msra.mxu0 %v998_v43  ;;  %1596 = vmatpush.msrb.mxu2 %v907_v33  ;;  %v950_v43 = vld [vmem:[%s7368_s3 + $0x330] sm:$0xff]  ;;  %v988_v33 = vld [vmem:[%s7368_s3 + $0x460] sm:$0xff] }
 0x1aa   : > { %1505 = vmatpush.msrb.mxu1 %v888_v46  ;;  %1542 = vmatpush.msra.mxu3 %v958_v22  ;;  %v897_v46 = vld [vmem:[%s7368_s3 + $0x188] sm:$0xff]  ;;  %v948_v22 = vld [vmem:[%s7368_s3 + $0x320] sm:$0xff] }
 0x1ab   : > { %1559 = vmatpush.msra.mxu0 %v996_v48  ;;  %1597 = vmatpush.msrb.mxu2 %v905_v12  ;;  %v879_v48 = vld [vmem:[%s7368_s3 + $0xf8] sm:$0xff]  ;;  %v986_v12 = vld [vmem:[%s7368_s3 + $0x450] sm:$0xff] }
 0x1ac   : > { %1506 = vmatpush.msrb.mxu1 %v886_v10  ;;  %1543 = vmatpush.msra.mxu3 %v956_v50  ;;  %v895_v10 = vld [vmem:[%s7368_s3 + $0x178] sm:$0xff]  ;;  %v946_v50 = vld [vmem:[%s7368_s3 + $0x310] sm:$0xff] }
 0x1ad   : > { %1560 = vmatpush.msra.mxu0 %v994_v54  ;;  %1598 = vmatpush.msrb.mxu2 %v903_v34  ;;  %v877_v54 = vld [vmem:[%s7368_s3 + $0xe8] sm:$0xff]  ;;  %v984_v34 = vld [vmem:[%s7368_s3 + $0x440] sm:$0xff] }
 0x1ae   : > { %1507 = vmatpush.msrb.mxu1 %v884_v0  ;;  %1544 = vmatpush.msra.mxu3 %v954_v4  ;;  %v893_v0 = vld [vmem:[%s7368_s3 + $0x168] sm:$0xff]  ;;  %v944_v4 = vld [vmem:[%s7368_s3 + $0x300] sm:$0xff] }
 0x1af   : > { %1561 = vmatpush.msra.mxu0 %v992_v7  ;;  %1599 = vmatpush.msrb.mxu2 %v901_v8  ;;  %v875_v7 = vld [vmem:[%s7368_s3 + $0xd8] sm:$0xff]  ;;  %v982_v8 = vld [vmem:[%s7368_s3 + $0x430] sm:$0xff] }
 0x1b0   : > { %1508 = vmatpush.msrb.mxu1 %v882_v9  ;;  %1545 = vmatpush.msra.mxu3 %v952_v23  ;;  %v891_v9 = vld [vmem:[%s7368_s3 + $0x158] sm:$0xff]  ;;  %v873_v23 = vld [vmem:[%s7368_s3 + $0xc8] sm:$0xff] }
 0x1b1   : > { %1562 = vmatpush.msra.mxu0 %v990_v53  ;;  %1600 = vmatpush.msrb.mxu2 %v899_v25  ;;  %v943_v53 = vld [vmem:[%s7368_s3 + $0x2f8] sm:$0xff]  ;;  %v980_v25 = vld [vmem:[%s7368_s3 + $0x420] sm:$0xff] }
 0x1b2   : > { %1509 = vmatpush.msrb.mxu1 %v880_v38  ;;  %1546 = vmatpush.msra.mxu3 %v950_v43  ;;  %v889_v38 = vld [vmem:[%s7368_s3 + $0x148] sm:$0xff]  ;;  %v871_v43 = vld [vmem:[%s7368_s3 + $0xb8] sm:$0xff] }
 0x1b3   : > { %1563 = vmatpush.msra.mxu0 %v988_v33  ;;  %1601 = vmatpush.msrb.mxu2 %v897_v46  ;;  %v941_v33 = vld [vmem:[%s7368_s3 + $0x2e8] sm:$0xff]  ;;  %v978_v46 = vld [vmem:[%s7368_s3 + $0x410] sm:$0xff] }
 0x1b4   : > { %1510 = vmatmul.f32.vlgmr.msrb.gmra.mxu1 %v5105_v51  ;;  %1547 = vmatpush.msra.mxu3 %v948_v22  ;;  %v887_v22 = vld [vmem:[%s7368_s3 + $0x138] sm:$0xff] }
 0x1b5   : > { %1574 = vmatpush.msra.mxu1 %v879_v48  ;;  %1564 = vmatpush.msra.mxu0 %v986_v12  ;;  %v869_v48 = vld [vmem:[%s7368_s3 + $0xa8] sm:$0xff]  ;;  %v939_v12 = vld [vmem:[%s7368_s3 + $0x2d8] sm:$0xff] }
 0x1b6   : > { %1602 = vmatpush.msrb.mxu2 %v895_v10  ;;  %1548 = vmatpush.msra.mxu3 %v946_v50  ;;  %v976_v10 = vld [vmem:[%s7368_s3 + $0x400] sm:$0xff]  ;;  %v885_v50 = vld [vmem:[%s7368_s3 + $0x128] sm:$0xff] }
 0x1b7   : > { %1575 = vmatpush.msra.mxu1 %v877_v54  ;;  %1565 = vmatpush.msra.mxu0 %v984_v34  ;;  %v867_v54 = vld [vmem:[%s7368_s3 + $0x98] sm:$0xff]  ;;  %v937_v34 = vld [vmem:[%s7368_s3 + $0x2c8] sm:$0xff] }
 0x1b8   : > { %1603 = vmatpush.msrb.mxu2 %v893_v0  ;;  %1549 = vmatpush.msra.mxu3 %v944_v4  ;;  %v975_v0 = vld [vmem:[%s7368_s3 + $0x3f8] sm:$0xff] }
 0x1b9   : > { %1576 = vmatpush.msra.mxu1 %v875_v7  ;;  %1566 = vmatpush.msra.mxu0 %v982_v8  ;;  %v883_v4 = vld [vmem:[%s7368_s3 + $0x118] sm:$0xff]  ;;  %v865_v7 = vld [vmem:[%s7368_s3 + $0x88] sm:$0xff] }
 0x1ba   : > { %1604 = vmatpush.msrb.mxu2 %v891_v9  ;;  %1550 = vmatmul.f32.vlgmr.msra.gmra.mxu3 %v5130_v17  ;;  %v935_v8 = vld [vmem:[%s7368_s3 + $0x2b8] sm:$0xff]  ;;  %v973_v9 = vld [vmem:[%s7368_s3 + $0x3e8] sm:$0xff] }
 0x1bb   : > { %1577 = vmatpush.msra.mxu1 %v873_v23  ;;  %1614 = vmatpush.msrb.mxu3 %v943_v53  ;;  %v881_v23 = vld [vmem:[%s7368_s3 + $0x108] sm:$0xff]  ;;  %v863_v53 = vld [vmem:[%s7368_s3 + $0x78] sm:$0xff] }
 0x1bc   : > { %1567 = vmatpush.msra.mxu0 %v980_v25  ;;  %1605 = vmatpush.msrb.mxu2 %v889_v38  ;;  %v933_v25 = vld [vmem:[%s7368_s3 + $0x2a8] sm:$0xff]  ;;  %v971_v38 = vld [vmem:[%s7368_s3 + $0x3d8] sm:$0xff] }
 0x1bd   : > { %1578 = vmatpush.msra.mxu1 %v871_v43  ;;  %1615 = vmatpush.msrb.mxu3 %v941_v33  ;;  %v861_v43 = vld [vmem:[%s7368_s3 + $0x68] sm:$0xff]  ;;  %v931_v33 = vld [vmem:[%s7368_s3 + $0x298] sm:$0xff] }
 0x1be   : > { %1568 = vmatpush.msra.mxu0 %v978_v46  ;;  %1606 = vmatpush.msrb.mxu2 %v887_v22  ;;  %v969_v46 = vld [vmem:[%s7368_s3 + $0x3c8] sm:$0xff]  ;;  %v859_v22 = vld [vmem:[%s7368_s3 + $0x58] sm:$0xff] }
 0x1bf   : > { %1579 = vmatpush.msra.mxu1 %v869_v48  ;;  %1616 = vmatpush.msrb.mxu3 %v939_v12  ;;  %v929_v48 = vld [vmem:[%s7368_s3 + $0x288] sm:$0xff] }
 0x1c0   : > { %1569 = vmatpush.msra.mxu0 %v976_v10  ;;  %1607 = vmatpush.msrb.mxu2 %v885_v50  ;;  %v857_v12 = vld [vmem:[%s7368_s3 + $0x48] sm:$0xff]  ;;  %v927_v10 = vld [vmem:[%s7368_s3 + $0x278] sm:$0xff] }
 0x1c1   : > { %1570 = vmatmul.f32.vlgmr.msra.gmra.mxu0 %v5190_v18  ;;  %1580 = vmatpush.msra.mxu1 %v867_v54  ;;  %v965_v50 = vld [vmem:[%s7368_s3 + $0x3a8] sm:$0xff]  ;;  %v855_v54 = vld [vmem:[%s7368_s3 + $0x38] sm:$0xff] }
 0x1c2   : > { %1617 = vmatpush.msrb.mxu3 %v937_v34  ;;  %1634 = vmatpush.msrb.mxu0 %v975_v0  ;;  %v925_v34 = vld [vmem:[%s7368_s3 + $0x268] sm:$0xff]  ;;  %v963_v0 = vld [vmem:[%s7368_s3 + $0x398] sm:$0xff] }
 0x1c3   : > { %1608 = vmatpush.msrb.mxu2 %v883_v4  ;;  %1581 = vmatpush.msra.mxu1 %v865_v7  ;;  %v853_v4 = vld [vmem:[%s7368_s3 + $0x28] sm:$0xff]  ;;  %v923_v7 = vld [vmem:[%s7368_s3 + $0x258] sm:$0xff] }
 0x1c4   : > { %1618 = vmatpush.msrb.mxu3 %v935_v8  ;;  %1635 = vmatpush.msrb.mxu0 %v973_v9  ;;  %v961_v8 = vld [vmem:[%s7368_s3 + $0x388] sm:$0xff]  ;;  %v851_v9 = vld [vmem:[%s7368_s3 + $0x18] sm:$0xff] }
 0x1c5   : > { %1609 = vmatpush.msrb.mxu2 %v881_v23  ;;  %1582 = vmatpush.msra.mxu1 %v863_v53  ;;  %v921_v23 = vld [vmem:[%s7368_s3 + $0x248] sm:$0xff]  ;;  %v959_v53 = vld [vmem:[%s7368_s3 + $0x378] sm:$0xff] }
 0x1c6   : > { %1610 = vmatmul.f32.vlgmr.msrb.gmra.mxu2 %v5105_v51  ;;  %1619 = vmatpush.msrb.mxu3 %v933_v25  ;;  %v967_v51 = vld [vmem:[%s7368_s3 + $0x3b8] sm:$0xff]  ;;  %v849_v25 = vld [vmem:[%s7368_s3 + $0x8] sm:$0xff] }
 0x1c7   : > { %1636 = vmatpush.msrb.mxu0 %v971_v38  ;;  %1687 = vmatpush.msra.mxu2 %v4477_v45  ;;  %v919_v38 = vld [vmem:[%s7368_s3 + $0x238] sm:$0xff] }
 0x1c8   : > { %1583 = vmatpush.msra.mxu1 %v861_v43  ;;  %1620 = vmatpush.msrb.mxu3 %v931_v33  ;;  %v957_v43 = vld [vmem:[%s7368_s3 + $0x368] sm:$0xff]  ;;  %v5612_v33 = vld [vmem:[%s7369_s4 + $0x10] sm:$0xff] }
 0x1c9   : > { %1637 = vmatpush.msrb.mxu0 %v969_v46  ;;  %1688 = vmatpush.msra.mxu2 %v4475_v44  ;;  %v1007_v46 = vld [vmem:[%s7368_s3 + $0x4f8] sm:$0xff] }
 0x1ca   : > { %1584 = vmatpush.msra.mxu1 %v859_v22  ;;  %1621 = vmatpush.msrb.mxu3 %v929_v48  ;;  %v917_v22 = vld [vmem:[%s7368_s3 + $0x228] sm:$0xff]  ;;  %v955_v48 = vld [vmem:[%s7368_s3 + $0x358] sm:$0xff] }
 0x1cb   : > { %1638 = vmatpush.msrb.mxu0 %v967_v51  ;;  %1689 = vmatpush.msra.mxu2 %v4479_v47  ;;  %v1005_v51 = vld [vmem:[%s7368_s3 + $0x4e8] sm:$0xff] }
 0x1cc   : > { %1585 = vmatpush.msra.mxu1 %v857_v12  ;;  %1622 = vmatpush.msrb.mxu3 %v927_v10  ;;  %v915_v12 = vld [vmem:[%s7368_s3 + $0x218] sm:$0xff]  ;;  %v953_v10 = vld [vmem:[%s7368_s3 + $0x348] sm:$0xff] }
 0x1cd   : > { %1639 = vmatpush.msrb.mxu0 %v965_v50  ;;  %1690 = vmatpush.msra.mxu2 %v4483_v49  ;;  %v913_v50 = vld [vmem:[%s7368_s3 + $0x208] sm:$0xff] }
 0x1ce   : > { %1586 = vmatpush.msra.mxu1 %v855_v54  ;;  %1623 = vmatpush.msrb.mxu3 %v925_v34  ;;  %v951_v54 = vld [vmem:[%s7368_s3 + $0x338] sm:$0xff]  ;;  %v1001_v34 = vld [vmem:[%s7368_s3 + $0x4c8] sm:$0xff] }
 0x1cf   : > { %1640 = vmatpush.msrb.mxu0 %v963_v0  ;;  %1691 = vmatpush.msra.mxu2 %v4493_v55  ;;  %v949_v0 = vld [vmem:[%s7368_s3 + $0x328] sm:$0xff] }
 0x1d0   : > { %1587 = vmatpush.msra.mxu1 %v853_v4  ;;  %1624 = vmatpush.msrb.mxu3 %v923_v7  ;;  %v999_v4 = vld [vmem:[%s7368_s3 + $0x4b8] sm:$0xff] }
 0x1d1   : > { %1641 = vmatpush.msrb.mxu0 %v961_v8  ;;  %1692 = vmatpush.msra.mxu2 %v4501_v58  ;;  %v947_v7 = vld [vmem:[%s7368_s3 + $0x318] sm:$0xff]  ;;  %v997_v8 = vld [vmem:[%s7368_s3 + $0x4a8] sm:$0xff] }
 0x1d2   : > { %1588 = vmatpush.msra.mxu1 %v851_v9  ;;  %1625 = vmatpush.msrb.mxu3 %v921_v23  ;;  %v995_v9 = vld [vmem:[%s7368_s3 + $0x498] sm:$0xff]  ;;  %v993_v23 = vld [vmem:[%s7368_s3 + $0x488] sm:$0xff] }
 0x1d3   : > { %1642 = vmatpush.msrb.mxu0 %v959_v53  ;;  %1693 = vmatpush.msra.mxu2 %v4508_v61  ;;  %v991_v53 = vld [vmem:[%s7368_s3 + $0x478] sm:$0xff] }
 0x1d4   : > { %1589 = vmatpush.msra.mxu1 %v849_v25  ;;  %1626 = vmatpush.msrb.mxu3 %v919_v38  ;;  %v987_v25 = vld [vmem:[%s7368_s3 + $0x458] sm:$0xff]  ;;  %v985_v38 = vld [vmem:[%s7368_s3 + $0x448] sm:$0xff] }
 0x1d5   : > { %1643 = vmatpush.msrb.mxu0 %v957_v43  ;;  %1694 = vmatpush.msra.mxu2 %v4515_v63  ;;  %v983_v43 = vld [vmem:[%s7368_s3 + $0x438] sm:$0xff] }
 0x1d6   : > { %1590 = vmatmul.f32.vlgmr.msra.gmra.mxu1 %v5079_v26  ;;  %3382 = vmatmul.msk.f32.vlgmr.msra.gmra.mxu2 %vm744_vm0, %v5612_v33  ;;  %v1003_v26 = vld [vmem:[%s7368_s3 + $0x4d8] sm:$0xff] }
 0x1d7   : > { %1654 = vmatpush.msrb.mxu1 %v1007_v46  ;;  %1767 = vmatpush.msrb.mxu2 %v4636_v52  ;;  %v981_v46 = vld [vmem:[%s7368_s3 + $0x428] sm:$0xff] }
 0x1d8   : > { %1627 = vmatpush.msrb.mxu3 %v917_v22  ;;  %1644 = vmatpush.msrb.mxu0 %v955_v48  ;;  %v979_v22 = vld [vmem:[%s7368_s3 + $0x418] sm:$0xff]  ;;  %v977_v48 = vld [vmem:[%s7368_s3 + $0x408] sm:$0xff] }
 0x1d9   : > { %1655 = vmatpush.msrb.mxu1 %v1005_v51  ;;  %1768 = vmatpush.msrb.mxu2 %v4647_v59  ;;  %v3417_v51 = vld [vmem:[%s7368_s3 + $0xaf0] sm:$0xff] }
 0x1da   : > { %1628 = vmatpush.msrb.mxu3 %v915_v12  ;;  %1645 = vmatpush.msrb.mxu0 %v953_v10  ;;  %v3415_v12 = vld [vmem:[%s7368_s3 + $0xae0] sm:$0xff]  ;;  %v3413_v10 = vld [vmem:[%s7368_s3 + $0xad0] sm:$0xff] }
 0x1db   : > { %1656 = vmatpush.msrb.mxu1 %v1003_v26  ;;  %1769 = vmatpush.msrb.mxu2 %v4655_v2  ;;  %v1291_v26 = vpop.f32.mrf.mxu2 }
 0x1dc   : > { %1629 = vmatpush.msrb.mxu3 %v913_v50  ;;  %1646 = vmatpush.msrb.mxu0 %v951_v54 }
 0x1dd   : > { %1630 = vmatmul.f32.vlgmr.msrb.gmra.mxu3 %v5116_v1  ;;  %1657 = vmatpush.msrb.mxu1 %v1001_v34  ;;  %v945_v1 = vld [vmem:[%s7368_s3 + $0x308] sm:$0xff] }
 0x1de   : > { %1707 = vmatpush.msra.mxu3 %v4498_v57  ;;  %1770 = vmatpush.msrb.mxu2 %v4663_v6 }
 0x1df   : > { %1647 = vmatpush.msrb.mxu0 %v949_v0  ;;  %1658 = vmatpush.msrb.mxu1 %v999_v4  ;;  %v3411_v0 = vld [vmem:[%s7368_s3 + $0xac0] sm:$0xff]  ;;  %v3409_v4 = vld [vmem:[%s7368_s3 + $0xab0] sm:$0xff] }
 0x1e0   : > { %1708 = vmatpush.msra.mxu3 %v4496_v56  ;;  %1771 = vmatpush.msrb.mxu2 %v4675_v16 }
 0x1e1   : > { %1648 = vmatpush.msrb.mxu0 %v947_v7  ;;  %1659 = vmatpush.msrb.mxu1 %v997_v8  ;;  %v3407_v7 = vld [vmem:[%s7368_s3 + $0xaa0] sm:$0xff]  ;;  %v3405_v8 = vld [vmem:[%s7368_s3 + $0xa90] sm:$0xff] }
 0x1e2   : > { %1709 = vmatpush.msra.mxu3 %v4504_v60  ;;  %1772 = vmatpush.msrb.mxu2 %v4685_v20 }
 0x1e3   : > { %1649 = vmatpush.msrb.mxu0 %v945_v1  ;;  %1660 = vmatpush.msrb.mxu1 %v995_v9 }
 0x1e4   : > { %1650 = vmatmul.f32.vlgmr.msrb.gmra.mxu0 %v5130_v17  ;;  %1710 = vmatpush.msra.mxu3 %v4511_v62  ;;  %v989_v17 = vld [vmem:[%s7368_s3 + $0x468] sm:$0xff] }
 0x1e5   : > { %1727 = vmatpush.msra.mxu0 %v4549_v14  ;;  %1773 = vmatpush.msrb.mxu2 %v4695_v24 }
 0x1e6   : > { %1661 = vmatpush.msrb.mxu1 %v993_v23  ;;  %1711 = vmatpush.msra.mxu3 %v4518_v3 }
 0x1e7   : > { %1728 = vmatpush.msra.mxu0 %v4547_v13  ;;  %1774 = vmatpush.msrb.mxu2 %v4705_v31 }
 0x1e8   : > { %1662 = vmatpush.msrb.mxu1 %v991_v53  ;;  %1712 = vmatpush.msra.mxu3 %v4523_v5  ;;  %v3403_v53 = vld [vmem:[%s7368_s3 + $0xa80] sm:$0xff] }
 0x1e9   : > { %1729 = vmatpush.msra.mxu0 %v4557_v19  ;;  %3386 = vmatmul.msk.f32.vlgmr.msrb.gmra.mxu2 %vm744_vm0, %v5612_v33 }
 0x1ea   : > { %1663 = vmatpush.msrb.mxu1 %v989_v17  ;;  %1713 = vmatpush.msra.mxu3 %v4539_v11  ;;  %v3401_v17 = vld [vmem:[%s7368_s3 + $0xa70] sm:$0xff] }
 0x1eb   : > { %1730 = vmatpush.msra.mxu0 %v4563_v21 }
 0x1ec   : > { %1664 = vmatpush.msrb.mxu1 %v987_v25  ;;  %1714 = vmatpush.msra.mxu3 %v4552_v15  ;;  %v3399_v25 = vld [vmem:[%s7368_s3 + $0xa60] sm:$0xff] }
 0x1ed   : > { %1731 = vmatpush.msra.mxu0 %v4573_v27  ;;  %3383 = vmatmul.msk.f32.vlgmr.msra.gmra.mxu3 %vm744_vm0, %v5612_v33 }
 0x1ee   : > { %1665 = vmatpush.msrb.mxu1 %v985_v38  ;;  %1940 = vmatpush.msrb.mxu3 %v3417_v51  ;;  %v3481_v38 = vld [vmem:[%s7368_s3 + $0xcf0] sm:$0xff] }
 0x1ef   : > { %1732 = vmatpush.msra.mxu0 %v4582_v30 }
 0x1f0   : > { %1666 = vmatpush.msrb.mxu1 %v983_v43  ;;  %1941 = vmatpush.msrb.mxu3 %v3415_v12  ;;  %v3479_v43 = vld [vmem:[%s7368_s3 + $0xce0] sm:$0xff] }
 0x1f1   : > { %1733 = vmatpush.msra.mxu0 %v4588_v35 }
 0x1f2   : > { %1667 = vmatpush.msrb.mxu1 %v981_v46  ;;  %1942 = vmatpush.msrb.mxu3 %v3413_v10  ;;  %v3395_v46 = vld [vmem:[%s7368_s3 + $0xa40] sm:$0xff]  ;;  %v3393_v10 = vld [vmem:[%s7368_s3 + $0xa30] sm:$0xff] }
 0x1f3   : > { %1734 = vmatpush.msra.mxu0 %v4594_v37 }
 0x1f4   : > { %3384 = vmatmul.msk.f32.vlgmr.msra.gmra.mxu0 %vm744_vm0, %v5612_v33  ;;  %1668 = vmatpush.msrb.mxu1 %v979_v22 }
 0x1f5   : > { %1943 = vmatpush.msrb.mxu3 %v3411_v0  ;;  %v3447_v0 = vld [vmem:[%s7368_s3 + $0xbe0] sm:$0xff] }
 0x1f6   : > { %1669 = vmatpush.msrb.mxu1 %v977_v48 }
 0x1f7   : > { %1670 = vmatmul.f32.vlgmr.msrb.gmra.mxu1 %v5190_v18  ;;  %1944 = vmatpush.msrb.mxu3 %v3409_v4  ;;  %v3473_v4 = vld [vmem:[%s7368_s3 + $0xcb0] sm:$0xff] }
 0x1f8   : > { %1747 = vmatpush.msra.mxu1 %v4578_v29  ;;  %v1311_v50 = vpop.f32.mrf.mxu3 }
 0x1f9   : > { %v1312_v54 = vadd.f32 %v1311_v50, %v1291_v26  ;;  %v1331_v34 = vpop.f32.mrf.mxu0  ;;  %1945 = vmatpush.msrb.mxu3 %v3407_v7  ;;  %v3477_v26 = vld [vmem:[%s7368_s3 + $0xcd0] sm:$0xff]  ;;  %v3391_v50 = vld [vmem:[%s7368_s3 + $0xa20] sm:$0xff] }
 0x1fa   : > { %1748 = vmatpush.msra.mxu1 %v4576_v28  ;;  %v3445_v7 = vld [vmem:[%s7368_s3 + $0xbd0] sm:$0xff] }
 0x1fb   : > { %v1332_v18 = vadd.f32 %v1331_v34, %v1312_v54  ;;  %1946 = vmatpush.msrb.mxu3 %v3405_v8  ;;  %v3449_v54 = vld [vmem:[%s7368_s3 + $0xbf0] sm:$0xff]  ;;  %v3475_v34 = vld [vmem:[%s7368_s3 + $0xcc0] sm:$0xff] }
 0x1fc   : > { %1749 = vmatpush.msra.mxu1 %v4585_v32  ;;  %1960 = vmatpush.msrb.mxu0 %v3449_v54  ;;  %v3387_v8 = vld [vmem:[%s7368_s3 + $0xa00] sm:$0xff] }
 0x1fd   : > { %1947 = vmatpush.msrb.mxu3 %v3403_v53  ;;  %v3545_v53 = vld [vmem:[%s7368_s3 + $0xef0] sm:$0xff]  ;;  %v3439_v54 = vld [vmem:[%s7368_s3 + $0xba0] sm:$0xff] }
 0x1fe   : > { %1750 = vmatpush.msra.mxu1 %v4591_v36  ;;  %1961 = vmatpush.msrb.mxu0 %v3447_v0  ;;  %v3463_v0 = vld [vmem:[%s7368_s3 + $0xc60] sm:$0xff] }
 0x1ff   : > { %1948 = vmatpush.msrb.mxu3 %v3401_v17  ;;  %v3443_v17 = vld [vmem:[%s7368_s3 + $0xbc0] sm:$0xff] }
 0x200   : > { %1751 = vmatpush.msra.mxu1 %v4597_v39  ;;  %v1391_v1 = vpop.f32.mrf.mxu3  ;;  %1962 = vmatpush.msrb.mxu0 %v3445_v7  ;;  %v3513_v7 = vld [vmem:[%s7368_s3 + $0xdf0] sm:$0xff] }
 0x201   : > { %1949 = vmatpush.msrb.mxu3 %v3399_v25  ;;  %2000 = vmatpush.msra.mxu2 %v3513_v7  ;;  %v3451_v7 = vld [vmem:[%s7368_s3 + $0xc00] sm:$0xff] }
 0x202   : > { %1752 = vmatpush.msra.mxu1 %v4601_v40  ;;  %v1411_v9 = vpop.f32.mrf.mxu0  ;;  %1963 = vmatpush.msrb.mxu0 %v3443_v17  ;;  %v3433_v17 = vld [vmem:[%s7368_s3 + $0xb70] sm:$0xff] }
 0x203   : > { %v1412_v23 = vadd.f32 %v1411_v9, %v1391_v1  ;;  %v3471_v1 = vld [vmem:[%s7368_s3 + $0xca0] sm:$0xff] }
 0x204   : > { %1753 = vmatpush.msra.mxu1 %v4605_v41  ;;  %v1371_v48 = vpop.f32.mrf.mxu2 }
 0x206   : > { %1754 = vmatpush.msra.mxu1 %v4611_v42 }
 0x207   : > { %3385 = vmatmul.msk.f32.vlgmr.msra.gmra.mxu1 %vm744_vm0, %v5612_v33  ;;  %v3397_v33 = vld [vmem:[%s7368_s3 + $0xa50] sm:$0xff] }
 0x208   : > { %1980 = vmatpush.msrb.mxu1 %v3481_v38  ;;  %1950 = vmatpush.msrb.mxu3 %v3397_v33  ;;  %v3469_v38 = vld [vmem:[%s7368_s3 + $0xc90] sm:$0xff]  ;;  %v3543_v33 = vld [vmem:[%s7368_s3 + $0xee0] sm:$0xff] }
 0x20a   : > { %1981 = vmatpush.msrb.mxu1 %v3479_v43  ;;  %1951 = vmatpush.msrb.mxu3 %v3395_v46  ;;  %v3441_v46 = vld [vmem:[%s7368_s3 + $0xbb0] sm:$0xff] }
 0x20b   : > { %1964 = vmatpush.msrb.mxu0 %v3441_v46  ;;  %v3457_v46 = vld [vmem:[%s7368_s3 + $0xc30] sm:$0xff] }
 0x20c   : > { %1952 = vmatpush.msrb.mxu3 %v3393_v10  ;;  %1982 = vmatpush.msrb.mxu1 %v3477_v26 }
 0x20d   : > { %1965 = vmatpush.msrb.mxu0 %v3439_v54  ;;  %v3505_v54 = vld [vmem:[%s7368_s3 + $0xdb0] sm:$0xff] }
 0x20e   : > { %v1351_v22 = vpop.f32.mrf.mxu1  ;;  %1953 = vmatpush.msrb.mxu3 %v3391_v50  ;;  %1983 = vmatpush.msrb.mxu1 %v3475_v34  ;;  %v3465_v34 = vld [vmem:[%s7368_s3 + $0xc70] sm:$0xff] }
 0x20f   : > { %v1352_v51 = vadd.f32 %v1351_v22, %v1332_v18  ;;  %v3389_v18 = vld [vmem:[%s7368_s3 + $0xa10] sm:$0xff] }
 0x210   : > { %1954 = vmatpush.msrb.mxu3 %v3389_v18  ;;  %1984 = vmatpush.msrb.mxu1 %v3473_v4  ;;  %v3539_v18 = vld [vmem:[%s7368_s3 + $0xec0] sm:$0xff]  ;;  %v3537_v4 = vld [vmem:[%s7368_s3 + $0xeb0] sm:$0xff] }
 0x211   : > { %v1372_v12 = vadd.f32 %v1371_v48, %v1352_v51  ;;  %v3541_v51 = vld [vmem:[%s7368_s3 + $0xed0] sm:$0xff] }
 0x212   : > { %1955 = vmatpush.msrb.mxu3 %v3387_v8  ;;  %1985 = vmatpush.msrb.mxu1 %v3471_v1  ;;  %v3435_v8 = vld [vmem:[%s7368_s3 + $0xb80] sm:$0xff]  ;;  %v3461_v1 = vld [vmem:[%s7368_s3 + $0xc50] sm:$0xff] }
 0x214   : > { %v1451_v43 = vpop.f32.mrf.mxu2  ;;  %2020 = vmatpush.msra.mxu3 %v3545_v53  ;;  %1986 = vmatpush.msrb.mxu1 %v3469_v38  ;;  %v3511_v53 = vld [vmem:[%s7368_s3 + $0xde0] sm:$0xff]  ;;  %v3533_v38 = vld [vmem:[%s7368_s3 + $0xe90] sm:$0xff] }
 0x215   : > { %2001 = vmatpush.msra.mxu2 %v3511_v53  ;;  %v3423_v53 = vld [vmem:[%s7368_s3 + $0xb20] sm:$0xff] }
 0x216   : > { %2021 = vmatpush.msra.mxu3 %v3543_v33  ;;  %v3431_v33 = vld [vmem:[%s7368_s3 + $0xb60] sm:$0xff] }
 0x217   : > { %v1431_v9 = vpop.f32.mrf.mxu1 }
 0x218   : > { %v1432_v25 = vadd.f32 %v1431_v9, %v1412_v23  ;;  %v3467_v23 = vld [vmem:[%s7368_s3 + $0xc80] sm:$0xff]  ;;  %2022 = vmatpush.msra.mxu3 %v3541_v51 }
 0x219   : > { %1987 = vmatpush.msrb.mxu1 %v3467_v23  ;;  %v3535_v9 = vld [vmem:[%s7368_s3 + $0xea0] sm:$0xff] }
 0x21a   : > { %v1452_v22 = vadd.f32 %v1451_v43, %v1432_v25  ;;  %2023 = vmatpush.msra.mxu3 %v3539_v18  ;;  %v3459_v25 = vld [vmem:[%s7368_s3 + $0xc40] sm:$0xff]  ;;  %v3509_v43 = vld [vmem:[%s7368_s3 + $0xdd0] sm:$0xff] }
 0x21b   : > { %v1471_v48 = vpop.f32.mrf.mxu3  ;;  %1988 = vmatpush.msrb.mxu1 %v3465_v34  ;;  %2002 = vmatpush.msra.mxu2 %v3509_v43  ;;  %v3507_v23 = vld [vmem:[%s7368_s3 + $0xdc0] sm:$0xff]  ;;  %v3453_v18 = vld [vmem:[%s7368_s3 + $0xc10] sm:$0xff] }
 0x21c   : > { %v5832_v10 = vadd.f32 %v1471_v48, %v1452_v22  ;;  %v1491_v26 = vpop.f32.mrf.mxu0  ;;  %2024 = vmatpush.msra.mxu3 %v3537_v4  ;;  %v3531_v22 = vld [vmem:[%s7368_s3 + $0xe80] sm:$0xff]  ;;  %v3429_v48 = vld [vmem:[%s7368_s3 + $0xb50] sm:$0xff] }
 0x21d   : > { %v5834_v50 = vadd.f32 %v1491_v26, %v1372_v12  ;;  %v3437_v12 = vld [vmem:[%s7368_s3 + $0xb90] sm:$0xff]  ;;  %1989 = vmatpush.msrb.mxu1 %v3463_v0  ;;  %v3455_v51 = vld [vmem:[%s7368_s3 + $0xc20] sm:$0xff]  ;;  %2003 = vmatpush.msra.mxu2 %v3507_v23 }
 0x21e   : > { %1966 = vmatpush.msrb.mxu0 %v3437_v12  ;;  %2025 = vmatpush.msra.mxu3 %v3535_v9  ;;  %v3529_v26 = vld [vmem:[%s7368_s3 + $0xe70] sm:$0xff]  ;;  %v3427_v34 = vld [vmem:[%s7368_s3 + $0xb40] sm:$0xff]  ;;  %v3450_v9 = vld [vmem:[%s7368_s3 + $0xbf8] sm:$0xff] }
 0x21f   : > { %1990 = vmatpush.msrb.mxu1 %v3461_v1  ;;  %v3527_v12 = vld [vmem:[%s7368_s3 + $0xe60] sm:$0xff]  ;;  %2004 = vmatpush.msra.mxu2 %v3505_v54  ;;  %v3425_v4 = vld [vmem:[%s7368_s3 + $0xb30] sm:$0xff] }
 0x220   : > { %1967 = vmatpush.msrb.mxu0 %v3435_v8  ;;  %2026 = vmatpush.msra.mxu3 %v3533_v38  ;;  %v3503_v0 = vld [vmem:[%s7368_s3 + $0xda0] sm:$0xff]  ;;  %v3525_v8 = vld [vmem:[%s7368_s3 + $0xe50] sm:$0xff]  ;;  %v3448_v38 = vld [vmem:[%s7368_s3 + $0xbe8] sm:$0xff] }
 0x221   : > { %1991 = vmatpush.msrb.mxu1 %v3459_v25  ;;  %v3501_v1 = vld [vmem:[%s7368_s3 + $0xd90] sm:$0xff]  ;;  %2005 = vmatpush.msra.mxu2 %v3503_v0  ;;  %v3499_v25 = vld [vmem:[%s7368_s3 + $0xd80] sm:$0xff] }
 0x222   : > { %1968 = vmatpush.msrb.mxu0 %v3433_v17  ;;  %2027 = vmatpush.msra.mxu3 %v3531_v22  ;;  %v3523_v17 = vld [vmem:[%s7368_s3 + $0xe40] sm:$0xff]  ;;  %v3421_v23 = vld [vmem:[%s7368_s3 + $0xb10] sm:$0xff] }
 0x223   : > { %1992 = vmatpush.msrb.mxu1 %v3457_v46  ;;  %2006 = vmatpush.msra.mxu2 %v3501_v1  ;;  %v3519_v54 = vld [vmem:[%s7368_s3 + $0xe20] sm:$0xff]  ;;  %v3517_v0 = vld [vmem:[%s7368_s3 + $0xe10] sm:$0xff] }
 0x224   : > { %1969 = vmatpush.msrb.mxu0 %v3431_v33  ;;  %2028 = vmatpush.msra.mxu3 %v3529_v26  ;;  %v3419_v26 = vld [vmem:[%s7368_s3 + $0xb00] sm:$0xff] }
 0x225   : > { %1993 = vmatpush.msrb.mxu1 %v3455_v51  ;;  %2007 = vmatpush.msra.mxu2 %v3499_v25  ;;  %v3497_v51 = vld [vmem:[%s7368_s3 + $0xd70] sm:$0xff]  ;;  %v3515_v1 = vld [vmem:[%s7368_s3 + $0xe00] sm:$0xff] }
 0x226   : > { %1970 = vmatpush.msrb.mxu0 %v3429_v48  ;;  %2029 = vmatpush.msra.mxu3 %v3527_v12  ;;  %v3521_v48 = vld [vmem:[%s7368_s3 + $0xe30] sm:$0xff]  ;;  %v3444_v12 = vld [vmem:[%s7368_s3 + $0xbc8] sm:$0xff] }
 0x227   : > { %1994 = vmatpush.msrb.mxu1 %v3453_v18  ;;  %v1531_v46 = vpop.f32.mrf.mxu2  ;;  %2008 = vmatpush.msra.mxu2 %v3497_v51  ;;  %v3418_v18 = vld [vmem:[%s7368_s3 + $0xaf8] sm:$0xff]  ;;  %v3489_v25 = vld [vmem:[%s7368_s3 + $0xd30] sm:$0xff]  ;;  %v3436_v51 = vld [vmem:[%s7368_s3 + $0xb88] sm:$0xff] }
 0x228   : > { %1971 = vmatpush.msrb.mxu0 %v3427_v34  ;;  %2030 = vmatpush.msra.mxu3 %v3525_v8  ;;  %v3495_v34 = vld [vmem:[%s7368_s3 + $0xd60] sm:$0xff]  ;;  %v3442_v8 = vld [vmem:[%s7368_s3 + $0xbb8] sm:$0xff] }
 0x229   : > { %1995 = vmatpush.msrb.mxu1 %v3451_v7  ;;  %v3416_v7 = vld [vmem:[%s7368_s3 + $0xae8] sm:$0xff]  ;;  %2009 = vmatpush.msra.mxu2 %v3495_v34  ;;  %v3434_v34 = vld [vmem:[%s7368_s3 + $0xb78] sm:$0xff] }
 0x22a   : > { %1972 = vmatpush.msrb.mxu0 %v3425_v4  ;;  %2031 = vmatpush.msra.mxu3 %v3523_v17  ;;  %v3493_v4 = vld [vmem:[%s7368_s3 + $0xd50] sm:$0xff]  ;;  %v3440_v17 = vld [vmem:[%s7368_s3 + $0xba8] sm:$0xff] }
 0x22b   : > { %2060 = vmatpush.msra.mxu1 %v3450_v9  ;;  %2010 = vmatpush.msra.mxu2 %v3493_v4  ;;  %v3491_v9 = vld [vmem:[%s7368_s3 + $0xd40] sm:$0xff]  ;;  %v3482_v4 = vld [vmem:[%s7368_s3 + $0xcf8] sm:$0xff] }
 0x22c   : > { %1973 = vmatpush.msrb.mxu0 %v3423_v53  ;;  %2032 = vmatpush.msra.mxu3 %v3521_v48  ;;  %v3414_v53 = vld [vmem:[%s7368_s3 + $0xad8] sm:$0xff] }
 0x22d   : > { %2061 = vmatpush.msra.mxu1 %v3448_v38  ;;  %v3412_v38 = vld [vmem:[%s7368_s3 + $0xac8] sm:$0xff]  ;;  %2011 = vmatpush.msra.mxu2 %v3491_v9  ;;  %v3402_v9 = vld [vmem:[%s7368_s3 + $0xa78] sm:$0xff] }
 0x22e   : > { %1974 = vmatpush.msrb.mxu0 %v3421_v23  ;;  %2033 = vmatpush.msra.mxu3 %v3519_v54  ;;  %v3410_v23 = vld [vmem:[%s7368_s3 + $0xab8] sm:$0xff]  ;;  %v3485_v54 = vld [vmem:[%s7368_s3 + $0xd10] sm:$0xff] }
 0x22f   : > { %2012 = vmatpush.msra.mxu2 %v3489_v25  ;;  %v3400_v25 = vld [vmem:[%s7368_s3 + $0xa68] sm:$0xff] }
 0x230   : > { %1975 = vmatpush.msrb.mxu0 %v3419_v26  ;;  %2034 = vmatpush.msra.mxu3 %v3517_v0  ;;  %v3432_v0 = vld [vmem:[%s7368_s3 + $0xb68] sm:$0xff] }
 0x231   : > { %v1511_v43 = vpop.f32.mrf.mxu1 }
 0x232   : > { %v1512_v33 = vadd.f32 %v1511_v43, %v5834_v50  ;;  %v3446_v50 = vld [vmem:[%s7368_s3 + $0xbd8] sm:$0xff]  ;;  %2040 = vmatpush.msra.mxu0 %v3418_v18  ;;  %2035 = vmatpush.msra.mxu3 %v3515_v1  ;;  %v3483_v18 = vld [vmem:[%s7368_s3 + $0xd00] sm:$0xff]  ;;  %v3480_v1 = vld [vmem:[%s7368_s3 + $0xce8] sm:$0xff] }
 0x233   : > { %2062 = vmatpush.msra.mxu1 %v3446_v50  ;;  %v3438_v43 = vld [vmem:[%s7368_s3 + $0xb98] sm:$0xff] }
 0x234   : > { %v1532_v22 = vadd.f32 %v1531_v46, %v1512_v33  ;;  %2041 = vmatpush.msra.mxu0 %v3416_v7  ;;  %v3487_v46 = vld [vmem:[%s7368_s3 + $0xd20] sm:$0xff]  ;;  %v3404_v7 = vld [vmem:[%s7368_s3 + $0xa88] sm:$0xff] }
 0x235   : > { %2063 = vmatpush.msra.mxu1 %v3444_v12  ;;  %2013 = vmatpush.msra.mxu2 %v3487_v46  ;;  %v3406_v12 = vld [vmem:[%s7368_s3 + $0xa98] sm:$0xff]  ;;  %v3424_v46 = vld [vmem:[%s7368_s3 + $0xb28] sm:$0xff] }
 0x236   : > { %2042 = vmatpush.msra.mxu0 %v3414_v53  ;;  %v3428_v53 = vld [vmem:[%s7368_s3 + $0xb48] sm:$0xff] }
 0x237   : > { %2064 = vmatpush.msra.mxu1 %v3442_v8  ;;  %2014 = vmatpush.msra.mxu2 %v3485_v54  ;;  %v3430_v8 = vld [vmem:[%s7368_s3 + $0xb58] sm:$0xff] }
 0x238   : > { %2043 = vmatpush.msra.mxu0 %v3412_v38  ;;  %v3426_v38 = vld [vmem:[%s7368_s3 + $0xb38] sm:$0xff] }
 0x239   : > { %2065 = vmatpush.msra.mxu1 %v3440_v17  ;;  %2015 = vmatpush.msra.mxu2 %v3483_v18  ;;  %v3478_v17 = vld [vmem:[%s7368_s3 + $0xcd8] sm:$0xff] }
 0x23a   : > { %2044 = vmatpush.msra.mxu0 %v3410_v23  ;;  %v3474_v23 = vld [vmem:[%s7368_s3 + $0xcb8] sm:$0xff] }
 0x23b   : > { %2066 = vmatpush.msra.mxu1 %v3438_v43  ;;  %2080 = vmatpush.msrb.mxu2 %v3482_v4  ;;  %v3476_v43 = vld [vmem:[%s7368_s3 + $0xcc8] sm:$0xff]  ;;  %v3394_v54 = vld [vmem:[%s7368_s3 + $0xa38] sm:$0xff] }
 0x23c   : > { %v3470_v18 = vld [vmem:[%s7368_s3 + $0xc98] sm:$0xff]  ;;  %v3468_v4 = vld [vmem:[%s7368_s3 + $0xc88] sm:$0xff] }
 0x23d   : > { %v1551_v33 = vpop.f32.mrf.mxu3  ;;  %2067 = vmatpush.msra.mxu1 %v3436_v51  ;;  %2081 = vmatpush.msrb.mxu2 %v3480_v1  ;;  %v3422_v51 = vld [vmem:[%s7368_s3 + $0xb18] sm:$0xff] }
 0x23e   : > { %v1552_v48 = vadd.f32 %v1551_v33, %v1532_v22  ;;  %v1571_v50 = vpop.f32.mrf.mxu0  ;;  %v3408_v22 = vld [vmem:[%s7368_s3 + $0xaa8] sm:$0xff]  ;;  %v3398_v33 = vld [vmem:[%s7368_s3 + $0xa58] sm:$0xff] }
 0x23f   : > { %2045 = vmatpush.msra.mxu0 %v3408_v22  ;;  %2068 = vmatpush.msra.mxu1 %v3434_v34  ;;  %v3420_v22 = vld [vmem:[%s7368_s3 + $0xb08] sm:$0xff]  ;;  %v3466_v1 = vld [vmem:[%s7368_s3 + $0xc78] sm:$0xff] }
 0x240   : > { %v6014_v26 = vadd.f32 %v1571_v50, %v1552_v48  ;;  %2082 = vmatpush.msrb.mxu2 %v3478_v17  ;;  %v3396_v48 = vld [vmem:[%s7368_s3 + $0xa48] sm:$0xff]  ;;  %v3514_v17 = vld [vmem:[%s7368_s3 + $0xdf8] sm:$0xff] }
 0x241   : > { %2046 = vmatpush.msra.mxu0 %v3406_v12  ;;  %2069 = vmatpush.msra.mxu1 %v3432_v0  ;;  %v3472_v50 = vld [vmem:[%s7368_s3 + $0xca8] sm:$0xff] }
 0x242   : > { %2083 = vmatpush.msrb.mxu2 %v3476_v43  ;;  %v3392_v0 = vld [vmem:[%s7368_s3 + $0xa28] sm:$0xff]  ;;  %v3462_v43 = vld [vmem:[%s7368_s3 + $0xc58] sm:$0xff] }
 0x243   : > { %2047 = vmatpush.msra.mxu0 %v3404_v7  ;;  %2070 = vmatpush.msra.mxu1 %v3430_v8  ;;  %v3390_v8 = vld [vmem:[%s7368_s3 + $0xa18] sm:$0xff] }
 0x244   : > { %2084 = vmatpush.msrb.mxu2 %v3474_v23  ;;  %v3458_v23 = vld [vmem:[%s7368_s3 + $0xc38] sm:$0xff] }
 0x245   : > { %2048 = vmatpush.msra.mxu0 %v3402_v9  ;;  %2071 = vmatpush.msra.mxu1 %v3428_v53  ;;  %v3388_v53 = vld [vmem:[%s7368_s3 + $0xa08] sm:$0xff] }
 0x246   : > { %2085 = vmatpush.msrb.mxu2 %v3472_v50 }
 0x247   : > { %2049 = vmatpush.msra.mxu0 %v3400_v25  ;;  %2072 = vmatpush.msra.mxu1 %v3426_v38  ;;  %v3512_v38 = vld [vmem:[%s7368_s3 + $0xde8] sm:$0xff] }
 0x248   : > { %2086 = vmatpush.msrb.mxu2 %v3470_v18  ;;  %v3504_v18 = vld [vmem:[%s7368_s3 + $0xda8] sm:$0xff] }
 0x249   : > { %2050 = vmatpush.msra.mxu0 %v3398_v33  ;;  %2073 = vmatpush.msra.mxu1 %v3424_v46  ;;  %v1611_v34 = vpop.f32.mrf.mxu2  ;;  %v3460_v33 = vld [vmem:[%s7368_s3 + $0xc48] sm:$0xff]  ;;  %v3510_v46 = vld [vmem:[%s7368_s3 + $0xdd8] sm:$0xff] }
 0x24a   : > { %2087 = vmatpush.msrb.mxu2 %v3468_v4  ;;  %v3502_v4 = vld [vmem:[%s7368_s3 + $0xd98] sm:$0xff] }
 0x24b   : > { %2051 = vmatpush.msra.mxu0 %v3396_v48  ;;  %2074 = vmatpush.msra.mxu1 %v3422_v51  ;;  %v3508_v48 = vld [vmem:[%s7368_s3 + $0xdc8] sm:$0xff] }
 0x24c   : > { %2088 = vmatpush.msrb.mxu2 %v3466_v1  ;;  %v3456_v51 = vld [vmem:[%s7368_s3 + $0xc28] sm:$0xff]  ;;  %v3498_v1 = vld [vmem:[%s7368_s3 + $0xd78] sm:$0xff] }
 0x24d   : > { %2052 = vmatpush.msra.mxu0 %v3394_v54  ;;  %2075 = vmatpush.msra.mxu1 %v3420_v22  ;;  %v3506_v54 = vld [vmem:[%s7368_s3 + $0xdb8] sm:$0xff] }
 0x24f   : > { %2053 = vmatpush.msra.mxu0 %v3392_v0 }
 0x251   : > { %2054 = vmatpush.msra.mxu0 %v3390_v8  ;;  %v3500_v8 = vld [vmem:[%s7368_s3 + $0xd88] sm:$0xff] }
 0x253   : > { %v1591_v12 = vpop.f32.mrf.mxu1  ;;  %2055 = vmatpush.msra.mxu0 %v3388_v53  ;;  %v3494_v53 = vld [vmem:[%s7368_s3 + $0xd58] sm:$0xff] }
 0x254   : > { %v1592_v7 = vadd.f32 %v1591_v12, %v5832_v10  ;;  %v3464_v10 = vld [vmem:[%s7368_s3 + $0xc68] sm:$0xff]  ;;  %v3454_v12 = vld [vmem:[%s7368_s3 + $0xc18] sm:$0xff] }
 0x255   : > { %2089 = vmatpush.msrb.mxu2 %v3464_v10 }
 0x256   : > { %v1612_v9 = vadd.f32 %v1611_v34, %v1592_v7  ;;  %v3452_v7 = vld [vmem:[%s7368_s3 + $0xc08] sm:$0xff] }
 0x257   : > { %2090 = vmatpush.msrb.mxu2 %v3462_v43  ;;  %v3490_v43 = vld [vmem:[%s7368_s3 + $0xd38] sm:$0xff] }
 0x259   : > { %v6113_v25 = vpop.f32.mrf.mxu2  ;;  %2091 = vmatpush.msrb.mxu2 %v3460_v33 }
 0x25a   : > { %1956 = vmatmul.f32.vlgmr.msrb.gmra.mxu3 %v6113_v25 }
 0x25b   : > { %2100 = vmatpush.msrb.mxu3 %v3514_v17  ;;  %2092 = vmatpush.msrb.mxu2 %v3458_v23  ;;  %v3492_v17 = vld [vmem:[%s7368_s3 + $0xd48] sm:$0xff] }
 0x25c   : > { %v3544_v23 = vld [vmem:[%s7368_s3 + $0xee8] sm:$0xff] }
 0x25d   : > { %2101 = vmatpush.msrb.mxu3 %v3512_v38  ;;  %2093 = vmatpush.msrb.mxu2 %v3456_v51  ;;  %v3546_v38 = vld [vmem:[%s7368_s3 + $0xef8] sm:$0xff] }
 0x25e   : > { %v3542_v51 = vld [vmem:[%s7368_s3 + $0xed8] sm:$0xff] }
 0x25f   : > { %2102 = vmatpush.msrb.mxu3 %v3510_v46  ;;  %2094 = vmatpush.msrb.mxu2 %v3454_v12  ;;  %v3538_v12 = vld [vmem:[%s7368_s3 + $0xeb8] sm:$0xff] }
 0x260   : > { %v1631_v50 = vpop.f32.mrf.mxu3 }
 0x261   : > { %v1632_v22 = vadd.f32 %v1631_v50, %v1612_v9  ;;  %2103 = vmatpush.msrb.mxu3 %v3508_v48  ;;  %v1651_v34 = vpop.f32.mrf.mxu0  ;;  %2095 = vmatpush.msrb.mxu2 %v3452_v7  ;;  %v3496_v9 = vld [vmem:[%s7368_s3 + $0xd68] sm:$0xff] }
 0x262   : > { %v3488_v48 = vld [vmem:[%s7368_s3 + $0xd28] sm:$0xff] }
 0x263   : > { %v1652_v0 = vadd.f32 %v1651_v34, %v1632_v22  ;;  %2104 = vmatpush.msrb.mxu3 %v3506_v54  ;;  %v3486_v54 = vld [vmem:[%s7368_s3 + $0xd18] sm:$0xff]  ;;  %v3540_v34 = vld [vmem:[%s7368_s3 + $0xec8] sm:$0xff] }
 0x264   : > { %v3532_v7 = vld [vmem:[%s7368_s3 + $0xe88] sm:$0xff] }
 0x265   : > { %2105 = vmatpush.msrb.mxu3 %v3504_v18  ;;  %v3484_v18 = vld [vmem:[%s7368_s3 + $0xd08] sm:$0xff] }
 0x267   : > { %2106 = vmatpush.msrb.mxu3 %v3502_v4  ;;  %v3534_v4 = vld [vmem:[%s7368_s3 + $0xe98] sm:$0xff] }
 0x269   : > { %2107 = vmatpush.msrb.mxu3 %v3500_v8  ;;  %v6225_v8 = vld [vmem:[%s7369_s4 + $0x18] sm:$0xff] }
 0x26b   : > { %2108 = vmatpush.msrb.mxu3 %v3498_v1 }
 0x26c   : > { %v6164_v10 = vpop.f32.mrf.mxu2 }
 0x26d   : > { %2109 = vmatpush.msrb.mxu3 %v3496_v9  ;;  %v3528_v9 = vld [vmem:[%s7368_s3 + $0xe68] sm:$0xff] }
 0x26e   : > { %2036 = vmatmul.f32.vlgmr.msra.gmra.mxu3 %v6164_v10 }
 0x26f   : > { %2110 = vmatpush.msrb.mxu3 %v3494_v53  ;;  %v3526_v53 = vld [vmem:[%s7368_s3 + $0xe58] sm:$0xff] }
 0x270   : > { %v1716_v33 = vpop.f32.mrf.mxu3 }
 0x271   : > { %v6176_v46 = vpop.f32.mrf.mxu0  ;;  %2111 = vmatpush.msrb.mxu3 %v3492_v17  ;;  %1976 = vmatmul.f32.vlgmr.msrb.gmra.mxu0 %v1716_v33  ;;  %v3524_v17 = vld [vmem:[%s7368_s3 + $0xe48] sm:$0xff] }
 0x272   : > { %1996 = vmatmul.f32.vlgmr.msrb.gmra.mxu1 %v6176_v46  ;;  %2120 = vmatpush.msrb.mxu0 %v3546_v38  ;;  %v3522_v38 = vld [vmem:[%s7368_s3 + $0xe38] sm:$0xff] }
 0x273   : > { %2155 = vmatpush.msrb.mxu1 %v4477_v45  ;;  %2112 = vmatpush.msrb.mxu3 %v3490_v43  ;;  %v3520_v43 = vld [vmem:[%s7368_s3 + $0xe28] sm:$0xff] }
 0x274   : > { %v1671_v50 = vpop.f32.mrf.mxu1  ;;  %2121 = vmatpush.msrb.mxu0 %v3544_v23  ;;  %v3615_v23 = vld [vmem:[%s7368_s3 + $0x10f0] sm:$0xff] }
 0x275   : > { %2156 = vmatpush.msrb.mxu1 %v4475_v44  ;;  %v6193_v22 = vadd.f32 %v1671_v50, %v1652_v0  ;;  %2113 = vmatpush.msrb.mxu3 %v3488_v48  ;;  %v3536_v0 = vld [vmem:[%s7368_s3 + $0xea8] sm:$0xff]  ;;  %v3583_v48 = vld [vmem:[%s7368_s3 + $0xff0] sm:$0xff]  ;;  %v3581_v50 = vld [vmem:[%s7368_s3 + $0xfe0] sm:$0xff] }
 0x276   : > { %2122 = vmatpush.msrb.mxu0 %v3542_v51  ;;  %v3613_v51 = vld [vmem:[%s7368_s3 + $0x10e0] sm:$0xff] }
 0x277   : > { %2157 = vmatpush.msrb.mxu1 %v4479_v47  ;;  %2114 = vmatpush.msrb.mxu3 %v3486_v54  ;;  %v3611_v54 = vld [vmem:[%s7368_s3 + $0x10d0] sm:$0xff] }
 0x278   : > { %2123 = vmatpush.msrb.mxu0 %v3540_v34  ;;  %v3579_v34 = vld [vmem:[%s7368_s3 + $0xfd0] sm:$0xff] }
 0x279   : > { %2158 = vmatpush.msrb.mxu1 %v4483_v49  ;;  %2115 = vmatpush.msrb.mxu3 %v3484_v18  ;;  %v3577_v18 = vld [vmem:[%s7368_s3 + $0xfc0] sm:$0xff] }
 0x27a   : > { %2076 = vmatmul.f32.vlgmr.msra.gmra.mxu1 %v1716_v33  ;;  %2124 = vmatpush.msrb.mxu0 %v3538_v12  ;;  %v3518_v33 = vld [vmem:[%s7368_s3 + $0xe18] sm:$0xff]  ;;  %v3607_v12 = vld [vmem:[%s7368_s3 + $0x10b0] sm:$0xff] }
 0x27b   : > { %2235 = vmatpush.msra.mxu3 %v4636_v52  ;;  %2159 = vmatpush.msrb.mxu1 %v4493_v55 }
 0x27c   : > { %2056 = vmatmul.f32.vlgmr.msra.gmra.mxu0 %v6113_v25  ;;  %v3530_v25 = vld [vmem:[%s7368_s3 + $0xe78] sm:$0xff] }
 0x27d   : > { %2236 = vmatpush.msra.mxu3 %v4647_v59  ;;  %2160 = vmatpush.msrb.mxu1 %v4501_v58 }
 0x27e   : > { %2125 = vmatpush.msrb.mxu0 %v3536_v0  ;;  %v3575_v0 = vld [vmem:[%s7368_s3 + $0xfb0] sm:$0xff] }
 0x27f   : > { %2237 = vmatpush.msra.mxu3 %v4655_v2  ;;  %2161 = vmatpush.msrb.mxu1 %v4508_v61 }
 0x280   : > { %2126 = vmatpush.msrb.mxu0 %v3534_v4  ;;  %v3605_v4 = vld [vmem:[%s7368_s3 + $0x10a0] sm:$0xff] }
 0x281   : > { %2238 = vmatpush.msra.mxu3 %v4663_v6  ;;  %2162 = vmatpush.msrb.mxu1 %v4515_v63 }
 0x282   : > { %2127 = vmatpush.msrb.mxu0 %v3532_v7  ;;  %3548 = vmatmul.msk.f32.vlgmr.msrb.gmra.mxu1 %vm744_vm0, %v6225_v8  ;;  %v3573_v7 = vld [vmem:[%s7368_s3 + $0xfa0] sm:$0xff] }
 0x283   : > { %2195 = vmatpush.msra.mxu1 %v4549_v14  ;;  %2239 = vmatpush.msra.mxu3 %v4675_v16 }
 0x284   : > { %2128 = vmatpush.msrb.mxu0 %v3530_v25  ;;  %v1756_v1 = vpop.f32.mrf.mxu1  ;;  %v3603_v25 = vld [vmem:[%s7368_s3 + $0x1090] sm:$0xff] }
 0x285   : > { %2196 = vmatpush.msra.mxu1 %v4547_v13  ;;  %2240 = vmatpush.msra.mxu3 %v4685_v20 }
 0x286   : > { %2016 = vmatmul.f32.vlgmr.msra.gmra.mxu2 %v1756_v1  ;;  %2116 = vmatmul.f32.vlgmr.msrb.gmra.mxu3 %v1756_v1  ;;  %v3679_v1 = vld [vmem:[%s7368_s3 + $0x12f0] sm:$0xff] }
 0x287   : > { %2175 = vmatpush.msra.mxu2 %v4498_v57  ;;  %2197 = vmatpush.msra.mxu1 %v4557_v19 }
 0x288   : > { %2241 = vmatpush.msra.mxu3 %v4695_v24  ;;  %2129 = vmatpush.msrb.mxu0 %v3528_v9  ;;  %v3571_v9 = vld [vmem:[%s7368_s3 + $0xf90] sm:$0xff] }
 0x289   : > { %2176 = vmatpush.msra.mxu2 %v4496_v56  ;;  %2198 = vmatpush.msra.mxu1 %v4563_v21 }
 0x28a   : > { %2242 = vmatpush.msra.mxu3 %v4705_v31  ;;  %2130 = vmatpush.msrb.mxu0 %v3526_v53  ;;  %v3601_v53 = vld [vmem:[%s7368_s3 + $0x1080] sm:$0xff] }
 0x28b   : > { %2177 = vmatpush.msra.mxu2 %v4504_v60  ;;  %2199 = vmatpush.msra.mxu1 %v4573_v27 }
 0x28c   : > { %2131 = vmatpush.msrb.mxu0 %v3524_v17  ;;  %2468 = vmatpush.msrb.mxu3 %v3679_v1  ;;  %v3677_v17 = vld [vmem:[%s7368_s3 + $0x12e0] sm:$0xff] }
 0x28d   : > { %2178 = vmatpush.msra.mxu2 %v4511_v62  ;;  %2200 = vmatpush.msra.mxu1 %v4582_v30  ;;  %v3633_v1 = vld [vmem:[%s7368_s3 + $0x1180] sm:$0xff] }
 0x28e   : > { %2096 = vmatmul.f32.vlgmr.msrb.gmra.mxu2 %v6176_v46  ;;  %2132 = vmatpush.msrb.mxu0 %v3522_v38  ;;  %v3516_v46 = vld [vmem:[%s7368_s3 + $0xe08] sm:$0xff]  ;;  %v3569_v38 = vld [vmem:[%s7368_s3 + $0xf80] sm:$0xff] }
 0x28f   : > { %2179 = vmatpush.msra.mxu2 %v4518_v3  ;;  %2201 = vmatpush.msra.mxu1 %v4588_v35 }
 0x290   : > { %2133 = vmatpush.msrb.mxu0 %v3520_v43  ;;  %3552 = vmatmul.msk.f32.vlgmr.msra.gmra.mxu3 %vm744_vm0, %v6225_v8  ;;  %v3599_v43 = vld [vmem:[%s7368_s3 + $0x1070] sm:$0xff] }
 0x291   : > { %2180 = vmatpush.msra.mxu2 %v4523_v5  ;;  %2202 = vmatpush.msra.mxu1 %v4594_v37 }
 0x292   : > { %3550 = vmatmul.msk.f32.vlgmr.msra.gmra.mxu1 %vm744_vm0, %v6225_v8  ;;  %2134 = vmatpush.msrb.mxu0 %v3518_v33  ;;  %v3675_v33 = vld [vmem:[%s7368_s3 + $0x12d0] sm:$0xff] }
 0x293   : > { %2181 = vmatpush.msra.mxu2 %v4539_v11  ;;  %2428 = vmatpush.msrb.mxu1 %v3615_v23  ;;  %v3647_v23 = vld [vmem:[%s7368_s3 + $0x11f0] sm:$0xff] }
 0x294   : > { %2135 = vmatpush.msrb.mxu0 %v3516_v46  ;;  %2469 = vmatpush.msrb.mxu3 %v3677_v17  ;;  %v3567_v46 = vld [vmem:[%s7368_s3 + $0xf70] sm:$0xff] }
 0x295   : > { %2182 = vmatpush.msra.mxu2 %v4552_v15  ;;  %2136 = vmatmul.f32.vlgmr.msrb.gmra.mxu0 %v6164_v10  ;;  %v3609_v10 = vld [vmem:[%s7368_s3 + $0x10c0] sm:$0xff]  ;;  %v3631_v17 = vld [vmem:[%s7368_s3 + $0x1170] sm:$0xff] }
 0x296   : > { %2408 = vmatpush.msra.mxu0 %v3583_v48  ;;  %3549 = vmatmul.msk.f32.vlgmr.msra.gmra.mxu2 %vm744_vm0, %v6225_v8  ;;  %v3597_v48 = vld [vmem:[%s7368_s3 + $0x1060] sm:$0xff] }
 0x297   : > { %2215 = vmatpush.msrb.mxu2 %v4578_v29  ;;  %2429 = vmatpush.msrb.mxu1 %v3613_v51  ;;  %v3645_v51 = vld [vmem:[%s7368_s3 + $0x11e0] sm:$0xff] }
 0x298   : > { %2409 = vmatpush.msra.mxu0 %v3581_v50  ;;  %2470 = vmatpush.msrb.mxu3 %v3675_v33  ;;  %v3565_v50 = vld [vmem:[%s7368_s3 + $0xf60] sm:$0xff]  ;;  %v3707_v33 = vld [vmem:[%s7368_s3 + $0x13d0] sm:$0xff] }
 0x299   : > { %2216 = vmatpush.msrb.mxu2 %v4576_v28  ;;  %2430 = vmatpush.msrb.mxu1 %v3611_v54  ;;  %v3643_v54 = vld [vmem:[%s7368_s3 + $0x11d0] sm:$0xff] }
 0x29a   : > { %2410 = vmatpush.msra.mxu0 %v3579_v34  ;;  %v3563_v34 = vld [vmem:[%s7368_s3 + $0xf50] sm:$0xff] }
 0x29b   : > { %2217 = vmatpush.msrb.mxu2 %v4585_v32  ;;  %2431 = vmatpush.msrb.mxu1 %v3609_v10  ;;  %v3561_v10 = vld [vmem:[%s7368_s3 + $0xf40] sm:$0xff] }
 0x29c   : > { %2411 = vmatpush.msra.mxu0 %v3577_v18  ;;  %v3639_v18 = vld [vmem:[%s7368_s3 + $0x11b0] sm:$0xff] }
 0x29d   : > { %2218 = vmatpush.msrb.mxu2 %v4591_v36  ;;  %2432 = vmatpush.msrb.mxu1 %v3607_v12  ;;  %v3559_v12 = vld [vmem:[%s7368_s3 + $0xf30] sm:$0xff] }
 0x29e   : > { %2412 = vmatpush.msra.mxu0 %v3575_v0  ;;  %v3637_v0 = vld [vmem:[%s7368_s3 + $0x11a0] sm:$0xff] }
 0x29f   : > { %2219 = vmatpush.msrb.mxu2 %v4597_v39  ;;  %2433 = vmatpush.msrb.mxu1 %v3605_v4  ;;  %v3557_v4 = vld [vmem:[%s7368_s3 + $0xf20] sm:$0xff] }
 0x2a0   : > { %2413 = vmatpush.msra.mxu0 %v3573_v7  ;;  %v3635_v7 = vld [vmem:[%s7368_s3 + $0x1190] sm:$0xff] }
 0x2a1   : > { %2220 = vmatpush.msrb.mxu2 %v4601_v40  ;;  %2434 = vmatpush.msrb.mxu1 %v3603_v25  ;;  %v3555_v25 = vld [vmem:[%s7368_s3 + $0xf10] sm:$0xff] }
 0x2a2   : > { %2414 = vmatpush.msra.mxu0 %v3571_v9  ;;  %v3553_v9 = vld [vmem:[%s7368_s3 + $0xf00] sm:$0xff] }
 0x2a3   : > { %2221 = vmatpush.msrb.mxu2 %v4605_v41  ;;  %2435 = vmatpush.msrb.mxu1 %v3601_v53  ;;  %v3711_v53 = vld [vmem:[%s7368_s3 + $0x13f0] sm:$0xff] }
 0x2a4   : > { %2415 = vmatpush.msra.mxu0 %v3569_v38  ;;  %v3709_v38 = vld [vmem:[%s7368_s3 + $0x13e0] sm:$0xff] }
 0x2a5   : > { %2222 = vmatpush.msrb.mxu2 %v4611_v42  ;;  %2436 = vmatpush.msrb.mxu1 %v3599_v43  ;;  %v3629_v43 = vld [vmem:[%s7368_s3 + $0x1160] sm:$0xff] }
 0x2a6   : > { %3551 = vmatmul.msk.f32.vlgmr.msrb.gmra.mxu2 %vm744_vm0, %v6225_v8  ;;  %2416 = vmatpush.msra.mxu0 %v3567_v46  ;;  %v3641_v8 = vld [vmem:[%s7368_s3 + $0x11c0] sm:$0xff] }
 0x2a7   : > { %2448 = vmatpush.msra.mxu2 %v3647_v23  ;;  %2437 = vmatpush.msrb.mxu1 %v3597_v48  ;;  %v3627_v23 = vld [vmem:[%s7368_s3 + $0x1150] sm:$0xff]  ;;  %v3705_v46 = vld [vmem:[%s7368_s3 + $0x13c0] sm:$0xff] }
 0x2a8   : > { %2417 = vmatpush.msra.mxu0 %v3565_v50  ;;  %v3625_v48 = vld [vmem:[%s7368_s3 + $0x1140] sm:$0xff]  ;;  %v3623_v50 = vld [vmem:[%s7368_s3 + $0x1130] sm:$0xff] }
 0x2a9   : > { %2449 = vmatpush.msra.mxu2 %v3645_v51  ;;  %v3703_v51 = vld [vmem:[%s7368_s3 + $0x13b0] sm:$0xff] }
 0x2aa   : > { %2418 = vmatpush.msra.mxu0 %v3563_v34  ;;  %v3621_v34 = vld [vmem:[%s7368_s3 + $0x1120] sm:$0xff] }
 0x2ab   : > { %2450 = vmatpush.msra.mxu2 %v3643_v54  ;;  %v3701_v54 = vld [vmem:[%s7368_s3 + $0x13a0] sm:$0xff] }
 0x2ac   : > { %2419 = vmatpush.msra.mxu0 %v3561_v10  ;;  %v3619_v10 = vld [vmem:[%s7368_s3 + $0x1110] sm:$0xff] }
 0x2ad   : > { %2451 = vmatpush.msra.mxu2 %v3641_v8  ;;  %v3699_v8 = vld [vmem:[%s7368_s3 + $0x1390] sm:$0xff] }
 0x2ae   : > { %2420 = vmatpush.msra.mxu0 %v3559_v12  ;;  %v3673_v12 = vld [vmem:[%s7368_s3 + $0x12c0] sm:$0xff] }
 0x2af   : > { %2452 = vmatpush.msra.mxu2 %v3639_v18  ;;  %v3617_v18 = vld [vmem:[%s7368_s3 + $0x1100] sm:$0xff]  ;;  %2471 = vmatpush.msrb.mxu3 %v3673_v12  ;;  %v3606_v12 = vld [vmem:[%s7368_s3 + $0x10a8] sm:$0xff] }
 0x2b0   : > { %2421 = vmatpush.msra.mxu0 %v3557_v4  ;;  %v3616_v4 = vld [vmem:[%s7368_s3 + $0x10f8] sm:$0xff] }
 0x2b1   : > { %2453 = vmatpush.msra.mxu2 %v3637_v0  ;;  %v3697_v0 = vld [vmem:[%s7368_s3 + $0x1380] sm:$0xff] }
 0x2b2   : > { %2422 = vmatpush.msra.mxu0 %v3555_v25  ;;  %v3671_v25 = vld [vmem:[%s7368_s3 + $0x12b0] sm:$0xff] }
 0x2b3   : > { %2454 = vmatpush.msra.mxu2 %v3635_v7  ;;  %v3595_v7 = vld [vmem:[%s7368_s3 + $0x1050] sm:$0xff]  ;;  %2472 = vmatpush.msrb.mxu3 %v3671_v25  ;;  %v3584_v25 = vld [vmem:[%s7368_s3 + $0xff8] sm:$0xff] }
 0x2b4   : > { %2423 = vmatpush.msra.mxu0 %v3553_v9  ;;  %2438 = vmatpush.msrb.mxu1 %v3595_v7  ;;  %v3614_v9 = vld [vmem:[%s7368_s3 + $0x10e8] sm:$0xff]  ;;  %v3685_v7 = vld [vmem:[%s7368_s3 + $0x1320] sm:$0xff] }
 0x2b5   : > { %2455 = vmatpush.msra.mxu2 %v3633_v1  ;;  %v3695_v1 = vld [vmem:[%s7368_s3 + $0x1370] sm:$0xff] }
 0x2b6   : > { %2488 = vmatpush.msrb.mxu0 %v3711_v53  ;;  %v3593_v53 = vld [vmem:[%s7368_s3 + $0x1040] sm:$0xff] }
 0x2b7   : > { %2456 = vmatpush.msra.mxu2 %v3631_v17  ;;  %v3669_v17 = vld [vmem:[%s7368_s3 + $0x12a0] sm:$0xff]  ;;  %2439 = vmatpush.msrb.mxu1 %v3593_v53  ;;  %v3683_v53 = vld [vmem:[%s7368_s3 + $0x1310] sm:$0xff] }
 0x2b8   : > { %2489 = vmatpush.msrb.mxu0 %v3709_v38  ;;  %v3693_v38 = vld [vmem:[%s7368_s3 + $0x1360] sm:$0xff]  ;;  %2473 = vmatpush.msrb.mxu3 %v3669_v17  ;;  %v3582_v17 = vld [vmem:[%s7368_s3 + $0xfe8] sm:$0xff] }
 0x2b9   : > { %2457 = vmatpush.msra.mxu2 %v3629_v43  ;;  %v3612_v43 = vld [vmem:[%s7368_s3 + $0x10d8] sm:$0xff] }
 0x2ba   : > { %2490 = vmatpush.msrb.mxu0 %v3707_v33  ;;  %v3591_v33 = vld [vmem:[%s7368_s3 + $0x1030] sm:$0xff] }
 0x2bb   : > { %2458 = vmatpush.msra.mxu2 %v3627_v23  ;;  %v3667_v23 = vld [vmem:[%s7368_s3 + $0x1290] sm:$0xff]  ;;  %2440 = vmatpush.msrb.mxu1 %v3591_v33  ;;  %v3681_v33 = vld [vmem:[%s7368_s3 + $0x1300] sm:$0xff] }
 0x2bc   : > { %2491 = vmatpush.msrb.mxu0 %v3705_v46  ;;  %v3691_v46 = vld [vmem:[%s7368_s3 + $0x1350] sm:$0xff]  ;;  %2474 = vmatpush.msrb.mxu3 %v3667_v23  ;;  %v3580_v23 = vld [vmem:[%s7368_s3 + $0xfd8] sm:$0xff] }
 0x2bd   : > { %2459 = vmatpush.msra.mxu2 %v3625_v48  ;;  %v3610_v48 = vld [vmem:[%s7368_s3 + $0x10c8] sm:$0xff] }
 0x2be   : > { %2492 = vmatpush.msrb.mxu0 %v3703_v51  ;;  %v3589_v51 = vld [vmem:[%s7368_s3 + $0x1020] sm:$0xff] }
 0x2bf   : > { %2460 = vmatpush.msra.mxu2 %v3623_v50  ;;  %2441 = vmatpush.msrb.mxu1 %v3589_v51  ;;  %v3665_v50 = vld [vmem:[%s7368_s3 + $0x1280] sm:$0xff]  ;;  %v3578_v51 = vld [vmem:[%s7368_s3 + $0xfc8] sm:$0xff] }
 0x2c0   : > { %2493 = vmatpush.msrb.mxu0 %v3701_v54  ;;  %v3689_v54 = vld [vmem:[%s7368_s3 + $0x1340] sm:$0xff]  ;;  %2475 = vmatpush.msrb.mxu3 %v3665_v50  ;;  %v3598_v50 = vld [vmem:[%s7368_s3 + $0x1068] sm:$0xff] }
 0x2c1   : > { %2461 = vmatpush.msra.mxu2 %v3621_v34  ;;  %v3608_v34 = vld [vmem:[%s7368_s3 + $0x10b8] sm:$0xff] }
 0x2c2   : > { %2494 = vmatpush.msrb.mxu0 %v3699_v8  ;;  %v3587_v8 = vld [vmem:[%s7368_s3 + $0x1010] sm:$0xff] }
 0x2c3   : > { %2462 = vmatpush.msra.mxu2 %v3619_v10  ;;  %v3663_v10 = vld [vmem:[%s7368_s3 + $0x1270] sm:$0xff]  ;;  %2442 = vmatpush.msrb.mxu1 %v3587_v8  ;;  %v3596_v8 = vld [vmem:[%s7368_s3 + $0x1058] sm:$0xff] }
 0x2c4   : > { %2495 = vmatpush.msrb.mxu0 %v3697_v0  ;;  %v3585_v0 = vld [vmem:[%s7368_s3 + $0x1000] sm:$0xff]  ;;  %2476 = vmatpush.msrb.mxu3 %v3663_v10  ;;  %v3651_v10 = vld [vmem:[%s7368_s3 + $0x1210] sm:$0xff] }
 0x2c5   : > { %2463 = vmatpush.msra.mxu2 %v3617_v18  ;;  %v3687_v18 = vld [vmem:[%s7368_s3 + $0x1330] sm:$0xff]  ;;  %2443 = vmatpush.msrb.mxu1 %v3585_v0  ;;  %v3649_v0 = vld [vmem:[%s7368_s3 + $0x1200] sm:$0xff] }
 0x2c6   : > { %2496 = vmatpush.msrb.mxu0 %v3695_v1  ;;  %v3604_v1 = vld [vmem:[%s7368_s3 + $0x1098] sm:$0xff] }
 0x2c7   : > { %2528 = vmatpush.msrb.mxu2 %v3616_v4  ;;  %v3661_v4 = vld [vmem:[%s7368_s3 + $0x1260] sm:$0xff]  ;;  %2508 = vmatpush.msra.mxu1 %v3584_v25  ;;  %v3648_v25 = vld [vmem:[%s7368_s3 + $0x11f8] sm:$0xff] }
 0x2c8   : > { %2497 = vmatpush.msrb.mxu0 %v3693_v38  ;;  %2477 = vmatpush.msrb.mxu3 %v3661_v4  ;;  %v3602_v38 = vld [vmem:[%s7368_s3 + $0x1088] sm:$0xff]  ;;  %v3572_v4 = vld [vmem:[%s7368_s3 + $0xf98] sm:$0xff] }
 0x2c9   : > { %2529 = vmatpush.msrb.mxu2 %v3614_v9  ;;  %v3659_v9 = vld [vmem:[%s7368_s3 + $0x1250] sm:$0xff]  ;;  %2509 = vmatpush.msra.mxu1 %v3582_v17  ;;  %v3568_v17 = vld [vmem:[%s7368_s3 + $0xf78] sm:$0xff] }
 0x2ca   : > { %2498 = vmatpush.msrb.mxu0 %v3691_v46  ;;  %2478 = vmatpush.msrb.mxu3 %v3659_v9  ;;  %v3600_v46 = vld [vmem:[%s7368_s3 + $0x1078] sm:$0xff]  ;;  %v3590_v9 = vld [vmem:[%s7368_s3 + $0x1028] sm:$0xff] }
 0x2cb   : > { %2530 = vmatpush.msrb.mxu2 %v3612_v43  ;;  %v3657_v43 = vld [vmem:[%s7368_s3 + $0x1240] sm:$0xff]  ;;  %2510 = vmatpush.msra.mxu1 %v3580_v23 }
 0x2cc   : > { %2499 = vmatpush.msrb.mxu0 %v3689_v54  ;;  %2479 = vmatpush.msrb.mxu3 %v3657_v43  ;;  %v3653_v54 = vld [vmem:[%s7368_s3 + $0x1220] sm:$0xff]  ;;  %v3644_v43 = vld [vmem:[%s7368_s3 + $0x11d8] sm:$0xff] }
 0x2cd   : > { %2531 = vmatpush.msrb.mxu2 %v3610_v48  ;;  %v3655_v48 = vld [vmem:[%s7368_s3 + $0x1230] sm:$0xff]  ;;  %2511 = vmatpush.msra.mxu1 %v3578_v51 }
 0x2ce   : > { %2500 = vmatpush.msrb.mxu0 %v3687_v18  ;;  %2480 = vmatpush.msrb.mxu3 %v3655_v48  ;;  %v3574_v18 = vld [vmem:[%s7368_s3 + $0xfa8] sm:$0xff] }
 0x2cf   : > { %2532 = vmatpush.msrb.mxu2 %v3608_v34  ;;  %v3576_v34 = vld [vmem:[%s7368_s3 + $0xfb8] sm:$0xff]  ;;  %v3586_v48 = vld [vmem:[%s7368_s3 + $0x1008] sm:$0xff] }
 0x2d0   : > { %2501 = vmatpush.msrb.mxu0 %v3685_v7  ;;  %2481 = vmatpush.msrb.mxu3 %v3653_v54  ;;  %v3592_v7 = vld [vmem:[%s7368_s3 + $0x1038] sm:$0xff]  ;;  %v3642_v54 = vld [vmem:[%s7368_s3 + $0x11c8] sm:$0xff] }
 0x2d1   : > { %2533 = vmatpush.msrb.mxu2 %v3606_v12  ;;  %2512 = vmatpush.msra.mxu1 %v3576_v34  ;;  %v3594_v12 = vld [vmem:[%s7368_s3 + $0x1048] sm:$0xff]  ;;  %v3564_v34 = vld [vmem:[%s7368_s3 + $0xf58] sm:$0xff] }
 0x2d2   : > { %2502 = vmatpush.msrb.mxu0 %v3683_v53  ;;  %2482 = vmatpush.msrb.mxu3 %v3651_v10  ;;  %v3646_v53 = vld [vmem:[%s7368_s3 + $0x11e8] sm:$0xff]  ;;  %v3640_v10 = vld [vmem:[%s7368_s3 + $0x11b8] sm:$0xff] }
 0x2d3   : > { %2534 = vmatpush.msrb.mxu2 %v3604_v1  ;;  %2513 = vmatpush.msra.mxu1 %v3574_v18  ;;  %v3570_v1 = vld [vmem:[%s7368_s3 + $0xf88] sm:$0xff] }
 0x2d4   : > { %2503 = vmatpush.msrb.mxu0 %v3681_v33  ;;  %2483 = vmatpush.msrb.mxu3 %v3649_v0  ;;  %v3562_v18 = vld [vmem:[%s7368_s3 + $0xf48] sm:$0xff]  ;;  %v3560_v0 = vld [vmem:[%s7368_s3 + $0xf38] sm:$0xff] }
 0x2d5   : > { %2535 = vmatpush.msrb.mxu2 %v3602_v38  ;;  %2514 = vmatpush.msra.mxu1 %v3572_v4  ;;  %v3588_v38 = vld [vmem:[%s7368_s3 + $0x1018] sm:$0xff] }
 0x2d6   : > { %2548 = vmatpush.msra.mxu3 %v3648_v25  ;;  %v3636_v4 = vld [vmem:[%s7368_s3 + $0x1198] sm:$0xff] }
 0x2d7   : > { %2536 = vmatpush.msrb.mxu2 %v3600_v46  ;;  %2515 = vmatpush.msra.mxu1 %v3570_v1  ;;  %v3566_v46 = vld [vmem:[%s7368_s3 + $0xf68] sm:$0xff] }
 0x2d8   : > { %2549 = vmatpush.msra.mxu3 %v3646_v53  ;;  %v3634_v1 = vld [vmem:[%s7368_s3 + $0x1188] sm:$0xff]  ;;  %v3632_v53 = vld [vmem:[%s7368_s3 + $0x1178] sm:$0xff] }
 0x2d9   : > { %2537 = vmatpush.msrb.mxu2 %v3598_v50  ;;  %2516 = vmatpush.msra.mxu1 %v3568_v17 }
 0x2da   : > { %2550 = vmatpush.msra.mxu3 %v3644_v43  ;;  %v3554_v43 = vld [vmem:[%s7368_s3 + $0xf08] sm:$0xff] }
 0x2db   : > { %2538 = vmatpush.msrb.mxu2 %v3596_v8  ;;  %2517 = vmatpush.msra.mxu1 %v3566_v46  ;;  %v3680_v46 = vld [vmem:[%s7368_s3 + $0x12f8] sm:$0xff] }
 0x2dc   : > { %2551 = vmatpush.msra.mxu3 %v3642_v54  ;;  %v3678_v54 = vld [vmem:[%s7368_s3 + $0x12e8] sm:$0xff] }
 0x2dd   : > { %2539 = vmatpush.msrb.mxu2 %v3594_v12  ;;  %v1957_v33 = vpop.f32.mrf.mxu3  ;;  %2518 = vmatpush.msra.mxu1 %v3564_v34  ;;  %v3638_v12 = vld [vmem:[%s7368_s3 + $0x11a8] sm:$0xff]  ;;  %v3624_v34 = vld [vmem:[%s7368_s3 + $0x1138] sm:$0xff] }
 0x2de   : > { %2552 = vmatpush.msra.mxu3 %v3640_v10  ;;  %v3676_v10 = vld [vmem:[%s7368_s3 + $0x12d8] sm:$0xff] }
 0x2df   : > { %2540 = vmatpush.msrb.mxu2 %v3592_v7  ;;  %2519 = vmatpush.msra.mxu1 %v3562_v18  ;;  %v3558_v7 = vld [vmem:[%s7368_s3 + $0xf28] sm:$0xff] }
 0x2e0   : > { %2553 = vmatpush.msra.mxu3 %v3638_v12  ;;  %v3622_v18 = vld [vmem:[%s7368_s3 + $0x1128] sm:$0xff] }
 0x2e1   : > { %2541 = vmatpush.msrb.mxu2 %v3590_v9  ;;  %2520 = vmatpush.msra.mxu1 %v3560_v0  ;;  %v3556_v9 = vld [vmem:[%s7368_s3 + $0xf18] sm:$0xff]  ;;  %v3674_v12 = vld [vmem:[%s7368_s3 + $0x12c8] sm:$0xff] }
 0x2e2   : > { %2554 = vmatpush.msra.mxu3 %v3636_v4  ;;  %v3620_v0 = vld [vmem:[%s7368_s3 + $0x1118] sm:$0xff] }
 0x2e3   : > { %2542 = vmatpush.msrb.mxu2 %v3588_v38  ;;  %2521 = vmatpush.msra.mxu1 %v3558_v7  ;;  %v3672_v4 = vld [vmem:[%s7368_s3 + $0x12b8] sm:$0xff] }
 0x2e4   : > { %2555 = vmatpush.msra.mxu3 %v3634_v1 }
 0x2e5   : > { %2543 = vmatpush.msrb.mxu2 %v3586_v48  ;;  %2522 = vmatpush.msra.mxu1 %v3556_v9  ;;  %v3670_v9 = vld [vmem:[%s7368_s3 + $0x12a8] sm:$0xff] }
 0x2e6   : > { %2556 = vmatpush.msra.mxu3 %v3632_v53 }
 0x2e7   : > { %2523 = vmatpush.msra.mxu1 %v3554_v43  ;;  %v3668_v43 = vld [vmem:[%s7368_s3 + $0x1298] sm:$0xff] }
 0x2ee   : > { %v1977_v23 = vpop.f32.mrf.mxu0 }
 0x2ef   : > { %v1997_v51 = vpop.f32.mrf.mxu1  ;;  %v1978_v50 = vadd.f32 %v1977_v23, %v1957_v33  ;;  %v3630_v33 = vld [vmem:[%s7368_s3 + $0x1168] sm:$0xff]  ;;  %v3628_v23 = vld [vmem:[%s7368_s3 + $0x1158] sm:$0xff] }
 0x2f0   : > { %2557 = vmatpush.msra.mxu3 %v3630_v33 }
 0x2f1   : > { %v1998_v8 = vadd.f32 %v1997_v51, %v1978_v50  ;;  %v2037_v51 = vpop.f32.mrf.mxu3  ;;  %v3626_v50 = vld [vmem:[%s7368_s3 + $0x1148] sm:$0xff] }
 0x2f2   : > { %2558 = vmatpush.msra.mxu3 %v3628_v23 }
 0x2f4   : > { %2559 = vmatpush.msra.mxu3 %v3626_v50 }
 0x2f6   : > { %2560 = vmatpush.msra.mxu3 %v3624_v34 }
 0x2f7   : > { %v2077_v25 = vpop.f32.mrf.mxu1 }
 0x2f8   : > { %2561 = vmatpush.msra.mxu3 %v3622_v18  ;;  %v3660_v18 = vld [vmem:[%s7368_s3 + $0x1258] sm:$0xff] }
 0x2f9   : > { %v2057_v17 = vpop.f32.mrf.mxu0 }
 0x2fa   : > { %v2078_v38 = vadd.f32 %v2077_v25, %v2057_v17  ;;  %2562 = vmatpush.msra.mxu3 %v3620_v0  ;;  %v3618_v25 = vld [vmem:[%s7368_s3 + $0x1108] sm:$0xff] }
 0x2fc   : > { %2563 = vmatpush.msra.mxu3 %v3618_v25  ;;  %v3761_v25 = vld [vmem:[%s7368_s3 + $0x1550] sm:$0xff] }
 0x2ff   : > { %v6665_v48 = vpop.f32.mrf.mxu1 }
 0x300   : > { %2424 = vmatmul.f32.vlgmr.msra.gmra.mxu0 %v6665_v48 }
 0x301   : > { %2568 = vmatpush.msra.mxu0 %v3680_v46  ;;  %v3664_v46 = vld [vmem:[%s7368_s3 + $0x1278] sm:$0xff] }
 0x303   : > { %2569 = vmatpush.msra.mxu0 %v3678_v54 }
 0x305   : > { %2570 = vmatpush.msra.mxu0 %v3676_v10 }
 0x307   : > { %2571 = vmatpush.msra.mxu0 %v3674_v12  ;;  %v3656_v12 = vld [vmem:[%s7368_s3 + $0x1238] sm:$0xff] }
 0x309   : > { %v2017_v7 = vpop.f32.mrf.mxu2  ;;  %v2117_v53 = vpop.f32.mrf.mxu3  ;;  %2572 = vmatpush.msra.mxu0 %v3672_v4  ;;  %v3712_v4 = vld [vmem:[%s7368_s3 + $0x13f8] sm:$0xff] }
 0x30a   : > { %v2018_v1 = vadd.f32 %v2017_v7, %v1998_v8  ;;  %v3666_v8 = vld [vmem:[%s7368_s3 + $0x1288] sm:$0xff] }
 0x30b   : > { %2573 = vmatpush.msra.mxu0 %v3670_v9  ;;  %v3706_v7 = vld [vmem:[%s7368_s3 + $0x13c8] sm:$0xff]  ;;  %v3759_v9 = vld [vmem:[%s7368_s3 + $0x1540] sm:$0xff] }
 0x30c   : > { %v2038_v17 = vadd.f32 %v2037_v51, %v2018_v1  ;;  %v3809_v1 = vld [vmem:[%s7368_s3 + $0x16d0] sm:$0xff] }
 0x30d   : > { %2574 = vmatpush.msra.mxu0 %v3668_v43  ;;  %v3731_v43 = vld [vmem:[%s7368_s3 + $0x1460] sm:$0xff] }
 0x30e   : > { %v6702_v33 = vadd.f32 %v2038_v17, %v6014_v26  ;;  %v3662_v26 = vld [vmem:[%s7368_s3 + $0x1268] sm:$0xff]  ;;  %v3807_v17 = vld [vmem:[%s7368_s3 + $0x16c0] sm:$0xff] }
 0x30f   : > { %v6707_v23 = vpop.f32.mrf.mxu1  ;;  %2575 = vmatpush.msra.mxu0 %v3666_v8  ;;  %v3805_v8 = vld [vmem:[%s7368_s3 + $0x16b0] sm:$0xff] }
 0x310   : > { %2464 = vmatmul.f32.vlgmr.msra.gmra.mxu2 %v6707_v23 }
 0x311   : > { %2623 = vmatpush.msra.mxu2 %v4477_v45  ;;  %v2097_v51 = vpop.f32.mrf.mxu2  ;;  %2576 = vmatpush.msra.mxu0 %v3664_v46  ;;  %v3803_v46 = vld [vmem:[%s7368_s3 + $0x16a0] sm:$0xff] }
 0x312   : > { %v2098_v50 = vadd.f32 %v2097_v51, %v2078_v38  ;;  %v2137_v54 = vpop.f32.mrf.mxu0  ;;  %v3658_v38 = vld [vmem:[%s7368_s3 + $0x1248] sm:$0xff]  ;;  %v3727_v51 = vld [vmem:[%s7368_s3 + $0x1440] sm:$0xff] }
 0x313   : > { %2624 = vmatpush.msra.mxu2 %v4475_v44  ;;  %v6718_v34 = vpop.f32.mrf.mxu3  ;;  %2577 = vmatpush.msra.mxu0 %v3662_v26  ;;  %v3725_v26 = vld [vmem:[%s7368_s3 + $0x1430] sm:$0xff] }
 0x314   : > { %v2118_v10 = vadd.f32 %v2117_v53, %v2098_v50  ;;  %2504 = vmatmul.f32.vlgmr.msrb.gmra.mxu0 %v6718_v34  ;;  %v3733_v53 = vld [vmem:[%s7368_s3 + $0x1470] sm:$0xff] }
 0x315   : > { %2625 = vmatpush.msra.mxu2 %v4479_v47  ;;  %2578 = vmatpush.msra.mxu0 %v3660_v18  ;;  %v3654_v47 = vld [vmem:[%s7368_s3 + $0x1228] sm:$0xff]  ;;  %v3801_v50 = vld [vmem:[%s7368_s3 + $0x1690] sm:$0xff] }
 0x316   : > { %v2138_v45 = vadd.f32 %v2137_v54, %v2118_v10  ;;  %v3799_v54 = vld [vmem:[%s7368_s3 + $0x1680] sm:$0xff]  ;;  %v3797_v10 = vld [vmem:[%s7368_s3 + $0x1670] sm:$0xff] }
 0x317   : > { %2626 = vmatpush.msra.mxu2 %v4483_v49  ;;  %2579 = vmatpush.msra.mxu0 %v3658_v38  ;;  %v3652_v49 = vld [vmem:[%s7368_s3 + $0x1218] sm:$0xff]  ;;  %v3721_v18 = vld [vmem:[%s7368_s3 + $0x1410] sm:$0xff] }
 0x318   : > { %v6730_v44 = vadd.f32 %v2138_v45, %v6193_v22  ;;  %v3650_v22 = vld [vmem:[%s7368_s3 + $0x1208] sm:$0xff]  ;;  %v3795_v45 = vld [vmem:[%s7368_s3 + $0x1660] sm:$0xff]  ;;  %v3793_v38 = vld [vmem:[%s7368_s3 + $0x1650] sm:$0xff] }
 0x319   : > { %2627 = vmatpush.msra.mxu2 %v4493_v55  ;;  %v2184_v0 = vpop.f32.mrf.mxu2  ;;  %2580 = vmatpush.msra.mxu0 %v3656_v12  ;;  %v3710_v55 = vld [vmem:[%s7368_s3 + $0x13e8] sm:$0xff]  ;;  %v3791_v12 = vld [vmem:[%s7368_s3 + $0x1640] sm:$0xff] }
 0x31a   : > { %2444 = vmatmul.f32.vlgmr.msrb.gmra.mxu1 %v2184_v0  ;;  %2544 = vmatmul.f32.vlgmr.msrb.gmra.mxu2 %v2184_v0  ;;  %v3719_v0 = vld [vmem:[%s7368_s3 + $0x1400] sm:$0xff] }
 0x31b   : > { %2628 = vmatpush.msra.mxu2 %v4501_v58  ;;  %2581 = vmatpush.msra.mxu0 %v3654_v47  ;;  %v3708_v58 = vld [vmem:[%s7368_s3 + $0x13d8] sm:$0xff]  ;;  %v3757_v47 = vld [vmem:[%s7368_s3 + $0x1530] sm:$0xff] }
 0x31c   : > { %2588 = vmatpush.msrb.mxu1 %v3712_v4  ;;  %v3789_v4 = vld [vmem:[%s7368_s3 + $0x1630] sm:$0xff] }
 0x31d   : > { %2629 = vmatpush.msra.mxu2 %v4508_v61  ;;  %2582 = vmatpush.msra.mxu0 %v3652_v49  ;;  %v3704_v61 = vld [vmem:[%s7368_s3 + $0x13b8] sm:$0xff]  ;;  %v3843_v49 = vld [vmem:[%s7368_s3 + $0x17e0] sm:$0xff] }
 0x31e   : > { %2589 = vmatpush.msrb.mxu1 %v3710_v55  ;;  %v3877_v55 = vld [vmem:[%s7368_s3 + $0x18f0] sm:$0xff] }
 0x31f   : > { %2630 = vmatpush.msra.mxu2 %v4515_v63  ;;  %2583 = vmatpush.msra.mxu0 %v3650_v22  ;;  %v3702_v63 = vld [vmem:[%s7368_s3 + $0x13a8] sm:$0xff]  ;;  %v3755_v22 = vld [vmem:[%s7368_s3 + $0x1520] sm:$0xff] }
 0x320   : > { %2590 = vmatpush.msrb.mxu1 %v3708_v58  ;;  %v3787_v58 = vld [vmem:[%s7368_s3 + $0x1620] sm:$0xff] }
 0x321   : > { %2663 = vmatpush.msrb.mxu2 %v4549_v14  ;;  %2703 = vmatpush.msrb.mxu0 %v4636_v52  ;;  %v3694_v52 = vld [vmem:[%s7368_s3 + $0x1368] sm:$0xff] }
 0x322   : > { %2591 = vmatpush.msrb.mxu1 %v3706_v7  ;;  %v3841_v7 = vld [vmem:[%s7368_s3 + $0x17d0] sm:$0xff] }
 0x323   : > { %2664 = vmatpush.msrb.mxu2 %v4547_v13  ;;  %2704 = vmatpush.msrb.mxu0 %v4647_v59  ;;  %v3700_v13 = vld [vmem:[%s7368_s3 + $0x1398] sm:$0xff]  ;;  %v3747_v59 = vld [vmem:[%s7368_s3 + $0x14e0] sm:$0xff] }
 0x324   : > { %2524 = vmatmul.f32.vlgmr.msra.gmra.mxu1 %v6665_v48  ;;  %v3811_v48 = vld [vmem:[%s7368_s3 + $0x16e0] sm:$0xff] }
 0x325   : > { %2665 = vmatpush.msrb.mxu2 %v4557_v19  ;;  %2592 = vmatpush.msrb.mxu1 %v3704_v61  ;;  %v6781_v19 = vld [vmem:[%s7369_s4 + $0x20] sm:$0xff] }
 0x326   : > { %2705 = vmatpush.msrb.mxu0 %v4655_v2  ;;  %3714 = vmatmul.msk.f32.vlgmr.msra.gmra.mxu2 %vm744_vm0, %v6781_v19  ;;  %v3745_v2 = vld [vmem:[%s7368_s3 + $0x14d0] sm:$0xff]  ;;  %v3875_v61 = vld [vmem:[%s7368_s3 + $0x18e0] sm:$0xff] }
 0x327   : > { %2666 = vmatpush.msrb.mxu2 %v4563_v21  ;;  %2593 = vmatpush.msrb.mxu1 %v3702_v63  ;;  %v3698_v21 = vld [vmem:[%s7368_s3 + $0x1388] sm:$0xff]  ;;  %v3753_v63 = vld [vmem:[%s7368_s3 + $0x1510] sm:$0xff] }
 0x328   : > { %2706 = vmatpush.msrb.mxu0 %v4663_v6  ;;  %v3845_v6 = vld [vmem:[%s7368_s3 + $0x17f0] sm:$0xff] }
 0x329   : > { %v2224_v14 = vpop.f32.mrf.mxu2  ;;  %2667 = vmatpush.msrb.mxu2 %v4573_v27  ;;  %2594 = vmatpush.msrb.mxu1 %v3700_v13  ;;  %v3696_v27 = vld [vmem:[%s7368_s3 + $0x1378] sm:$0xff]  ;;  %v3785_v13 = vld [vmem:[%s7368_s3 + $0x1610] sm:$0xff] }
 0x32a   : > { %2484 = vmatmul.f32.vlgmr.msrb.gmra.mxu3 %v2224_v14  ;;  %2584 = vmatmul.f32.vlgmr.msra.gmra.mxu0 %v2224_v14  ;;  %v3839_v14 = vld [vmem:[%s7368_s3 + $0x17c0] sm:$0xff] }
 0x32b   : > { %2643 = vmatpush.msrb.mxu3 %v4498_v57  ;;  %2668 = vmatpush.msrb.mxu2 %v4582_v30  ;;  %v3692_v57 = vld [vmem:[%s7368_s3 + $0x1358] sm:$0xff]  ;;  %v3686_v30 = vld [vmem:[%s7368_s3 + $0x1328] sm:$0xff] }
 0x32c   : > { %2707 = vmatpush.msrb.mxu0 %v4675_v16  ;;  %2595 = vmatpush.msrb.mxu1 %v3698_v21  ;;  %v3767_v16 = vld [vmem:[%s7368_s3 + $0x1580] sm:$0xff] }
 0x32d   : > { %2644 = vmatpush.msrb.mxu3 %v4496_v56  ;;  %2669 = vmatpush.msrb.mxu2 %v4588_v35  ;;  %v3690_v56 = vld [vmem:[%s7368_s3 + $0x1348] sm:$0xff]  ;;  %v3777_v35 = vld [vmem:[%s7368_s3 + $0x15d0] sm:$0xff]  ;;  %v3751_v21 = vld [vmem:[%s7368_s3 + $0x1500] sm:$0xff] }
 0x32e   : > { %2708 = vmatpush.msrb.mxu0 %v4685_v20  ;;  %2596 = vmatpush.msrb.mxu1 %v3696_v27  ;;  %v3741_v20 = vld [vmem:[%s7368_s3 + $0x14b0] sm:$0xff]  ;;  %v3783_v27 = vld [vmem:[%s7368_s3 + $0x1600] sm:$0xff] }
 0x32f   : > { %2645 = vmatpush.msrb.mxu3 %v4504_v60  ;;  %2670 = vmatpush.msrb.mxu2 %v4594_v37  ;;  %v3781_v60 = vld [vmem:[%s7368_s3 + $0x15f0] sm:$0xff]  ;;  %v3775_v37 = vld [vmem:[%s7368_s3 + $0x15c0] sm:$0xff] }
 0x330   : > { %2709 = vmatpush.msrb.mxu0 %v4695_v24  ;;  %2597 = vmatpush.msrb.mxu1 %v3694_v52  ;;  %v3739_v24 = vld [vmem:[%s7368_s3 + $0x14a0] sm:$0xff]  ;;  %v3837_v52 = vld [vmem:[%s7368_s3 + $0x17b0] sm:$0xff] }
 0x331   : > { %2646 = vmatpush.msrb.mxu3 %v4511_v62  ;;  %3716 = vmatmul.msk.f32.vlgmr.msrb.gmra.mxu2 %vm744_vm0, %v6781_v19  ;;  %v3688_v62 = vld [vmem:[%s7368_s3 + $0x1338] sm:$0xff] }
 0x332   : > { %2710 = vmatpush.msrb.mxu0 %v4705_v31  ;;  %2564 = vmatmul.f32.vlgmr.msra.gmra.mxu3 %v6707_v23  ;;  %v3763_v31 = vld [vmem:[%s7368_s3 + $0x1560] sm:$0xff]  ;;  %v3729_v23 = vld [vmem:[%s7368_s3 + $0x1450] sm:$0xff] }
 0x333   : > { %2598 = vmatpush.msrb.mxu1 %v3692_v57  ;;  %2647 = vmatpush.msrb.mxu3 %v4518_v3  ;;  %v3779_v3 = vld [vmem:[%s7368_s3 + $0x15e0] sm:$0xff] }
 0x334   : > { %3718 = vmatmul.msk.f32.vlgmr.msrb.gmra.mxu0 %vm744_vm0, %v6781_v19  ;;  %2896 = vmatpush.msra.mxu2 %v3781_v60  ;;  %v3871_v57 = vld [vmem:[%s7368_s3 + $0x18c0] sm:$0xff]  ;;  %v3782_v60 = vld [vmem:[%s7368_s3 + $0x15f8] sm:$0xff] }
 0x335   : > { %2599 = vmatpush.msrb.mxu1 %v3690_v56  ;;  %2648 = vmatpush.msrb.mxu3 %v4523_v5  ;;  %v3684_v5 = vld [vmem:[%s7368_s3 + $0x1318] sm:$0xff] }
 0x336   : > { %2897 = vmatpush.msra.mxu2 %v3779_v3  ;;  %2936 = vmatpush.msra.mxu0 %v3845_v6  ;;  %v3750_v56 = vld [vmem:[%s7368_s3 + $0x14f8] sm:$0xff]  ;;  %v3869_v3 = vld [vmem:[%s7368_s3 + $0x18b0] sm:$0xff]  ;;  %v3863_v6 = vld [vmem:[%s7368_s3 + $0x1880] sm:$0xff] }
 0x337   : > { %2600 = vmatpush.msrb.mxu1 %v3688_v62  ;;  %2649 = vmatpush.msrb.mxu3 %v4539_v11  ;;  %v3682_v11 = vld [vmem:[%s7368_s3 + $0x1308] sm:$0xff]  ;;  %v3835_v62 = vld [vmem:[%s7368_s3 + $0x17a0] sm:$0xff] }
 0x338   : > { %2898 = vmatpush.msra.mxu2 %v3777_v35  ;;  %2937 = vmatpush.msra.mxu0 %v3843_v49  ;;  %v3780_v35 = vld [vmem:[%s7368_s3 + $0x15e8] sm:$0xff] }
 0x339   : > { %2601 = vmatpush.msrb.mxu1 %v3686_v30  ;;  %2650 = vmatpush.msrb.mxu3 %v4552_v15  ;;  %v3749_v15 = vld [vmem:[%s7368_s3 + $0x14f0] sm:$0xff]  ;;  %v3748_v30 = vld [vmem:[%s7368_s3 + $0x14e8] sm:$0xff] }
 0x33a   : > { %3715 = vmatmul.msk.f32.vlgmr.msrb.gmra.mxu3 %vm744_vm0, %v6781_v19  ;;  %2899 = vmatpush.msra.mxu2 %v3775_v37  ;;  %v3867_v37 = vld [vmem:[%s7368_s3 + $0x18a0] sm:$0xff] }
 0x33b   : > { %2683 = vmatpush.msra.mxu3 %v4578_v29  ;;  %2602 = vmatpush.msrb.mxu1 %v3684_v5  ;;  %v3773_v29 = vld [vmem:[%s7368_s3 + $0x15b0] sm:$0xff] }
 0x33c   : > { %2900 = vmatpush.msra.mxu2 %v3773_v29  ;;  %2938 = vmatpush.msra.mxu0 %v3841_v7  ;;  %v3833_v5 = vld [vmem:[%s7368_s3 + $0x1790] sm:$0xff]  ;;  %v3831_v29 = vld [vmem:[%s7368_s3 + $0x1780] sm:$0xff] }
 0x33d   : > { %2684 = vmatpush.msra.mxu3 %v4576_v28  ;;  %2603 = vmatpush.msrb.mxu1 %v3682_v11  ;;  %v3771_v28 = vld [vmem:[%s7368_s3 + $0x15a0] sm:$0xff]  ;;  %v3746_v11 = vld [vmem:[%s7368_s3 + $0x14d8] sm:$0xff] }
 0x33e   : > { %2604 = vmatmul.f32.vlgmr.msrb.gmra.mxu1 %v6718_v34  ;;  %2901 = vmatpush.msra.mxu2 %v3771_v28  ;;  %v3723_v34 = vld [vmem:[%s7368_s3 + $0x1420] sm:$0xff]  ;;  %v3744_v28 = vld [vmem:[%s7368_s3 + $0x14c8] sm:$0xff] }
 0x33f   : > { %2685 = vmatpush.msra.mxu3 %v4585_v32  ;;  %2876 = vmatpush.msra.mxu1 %v3749_v15  ;;  %v3769_v32 = vld [vmem:[%s7368_s3 + $0x1590] sm:$0xff]  ;;  %v3778_v15 = vld [vmem:[%s7368_s3 + $0x15d8] sm:$0xff] }
 0x340   : > { %2902 = vmatpush.msra.mxu2 %v3769_v32  ;;  %2939 = vmatpush.msra.mxu0 %v3839_v14  ;;  %v3829_v32 = vld [vmem:[%s7368_s3 + $0x1770] sm:$0xff]  ;;  %v3810_v14 = vld [vmem:[%s7368_s3 + $0x16d8] sm:$0xff] }
 0x341   : > { %2686 = vmatpush.msra.mxu3 %v4591_v36  ;;  %2877 = vmatpush.msra.mxu1 %v3747_v59  ;;  %v3743_v36 = vld [vmem:[%s7368_s3 + $0x14c0] sm:$0xff]  ;;  %v3865_v59 = vld [vmem:[%s7368_s3 + $0x1890] sm:$0xff] }
 0x342   : > { %2903 = vmatpush.msra.mxu2 %v3767_v16  ;;  %2940 = vmatpush.msra.mxu0 %v3837_v52  ;;  %v3774_v16 = vld [vmem:[%s7368_s3 + $0x15b8] sm:$0xff] }
 0x343   : > { %2687 = vmatpush.msra.mxu3 %v4597_v39  ;;  %2878 = vmatpush.msra.mxu1 %v3745_v2  ;;  %v3765_v39 = vld [vmem:[%s7368_s3 + $0x1570] sm:$0xff]  ;;  %v3776_v2 = vld [vmem:[%s7368_s3 + $0x15c8] sm:$0xff]  ;;  %v3754_v52 = vld [vmem:[%s7368_s3 + $0x1518] sm:$0xff] }
 0x344   : > { %2904 = vmatpush.msra.mxu2 %v3765_v39  ;;  %2941 = vmatpush.msra.mxu0 %v3835_v62  ;;  %v3861_v39 = vld [vmem:[%s7368_s3 + $0x1870] sm:$0xff]  ;;  %v3806_v62 = vld [vmem:[%s7368_s3 + $0x16b8] sm:$0xff] }
 0x345   : > { %2688 = vmatpush.msra.mxu3 %v4601_v40  ;;  %2879 = vmatpush.msra.mxu1 %v3743_v36  ;;  %v3813_v40 = vld [vmem:[%s7368_s3 + $0x16f0] sm:$0xff]  ;;  %v3742_v36 = vld [vmem:[%s7368_s3 + $0x14b8] sm:$0xff] }
 0x346   : > { %2905 = vmatpush.msra.mxu2 %v3763_v31  ;;  %2942 = vmatpush.msra.mxu0 %v3833_v5  ;;  %v3825_v31 = vld [vmem:[%s7368_s3 + $0x1750] sm:$0xff]  ;;  %v3800_v5 = vld [vmem:[%s7368_s3 + $0x1688] sm:$0xff] }
 0x347   : > { %2689 = vmatpush.msra.mxu3 %v4605_v41  ;;  %2880 = vmatpush.msra.mxu1 %v3741_v20  ;;  %v3737_v41 = vld [vmem:[%s7368_s3 + $0x1490] sm:$0xff]  ;;  %v3827_v20 = vld [vmem:[%s7368_s3 + $0x1760] sm:$0xff] }
 0x348   : > { %2906 = vmatpush.msra.mxu2 %v3761_v25  ;;  %2943 = vmatpush.msra.mxu0 %v3831_v29  ;;  %v3770_v25 = vld [vmem:[%s7368_s3 + $0x1598] sm:$0xff] }
 0x349   : > { %2690 = vmatpush.msra.mxu3 %v4611_v42  ;;  %2881 = vmatpush.msra.mxu1 %v3739_v24  ;;  %v3735_v42 = vld [vmem:[%s7368_s3 + $0x1480] sm:$0xff]  ;;  %v3740_v24 = vld [vmem:[%s7368_s3 + $0x14a8] sm:$0xff]  ;;  %v3794_v29 = vld [vmem:[%s7368_s3 + $0x1658] sm:$0xff] }
 0x34a   : > { %3717 = vmatmul.msk.f32.vlgmr.msra.gmra.mxu3 %vm744_vm0, %v6781_v19  ;;  %2907 = vmatpush.msra.mxu2 %v3759_v9  ;;  %v3873_v19 = vld [vmem:[%s7368_s3 + $0x18d0] sm:$0xff]  ;;  %v3736_v9 = vld [vmem:[%s7368_s3 + $0x1488] sm:$0xff] }
 0x34b   : > { %2916 = vmatpush.msrb.mxu3 %v3813_v40  ;;  %2882 = vmatpush.msra.mxu1 %v3737_v41  ;;  %v3772_v40 = vld [vmem:[%s7368_s3 + $0x15a8] sm:$0xff]  ;;  %v3859_v41 = vld [vmem:[%s7368_s3 + $0x1860] sm:$0xff] }
 0x34c   : > { %2908 = vmatpush.msra.mxu2 %v3757_v47  ;;  %2944 = vmatpush.msra.mxu0 %v3829_v32  ;;  %v3814_v47 = vld [vmem:[%s7368_s3 + $0x16f8] sm:$0xff] }
 0x34d   : > { %2917 = vmatpush.msrb.mxu3 %v3811_v48  ;;  %2883 = vmatpush.msra.mxu1 %v3735_v42  ;;  %v3738_v48 = vld [vmem:[%s7368_s3 + $0x1498] sm:$0xff]  ;;  %v3823_v42 = vld [vmem:[%s7368_s3 + $0x1740] sm:$0xff] }
 0x34e   : > { %2909 = vmatpush.msra.mxu2 %v3755_v22  ;;  %2945 = vmatpush.msra.mxu0 %v3827_v20  ;;  %v3758_v22 = vld [vmem:[%s7368_s3 + $0x1538] sm:$0xff] }
 0x34f   : > { %2918 = vmatpush.msrb.mxu3 %v3809_v1  ;;  %2884 = vmatpush.msra.mxu1 %v3733_v53  ;;  %v3857_v1 = vld [vmem:[%s7368_s3 + $0x1850] sm:$0xff]  ;;  %v3768_v53 = vld [vmem:[%s7368_s3 + $0x1588] sm:$0xff] }
 0x350   : > { %2910 = vmatpush.msra.mxu2 %v3753_v63  ;;  %2946 = vmatpush.msra.mxu0 %v3825_v31  ;;  %v3724_v63 = vld [vmem:[%s7368_s3 + $0x1428] sm:$0xff]  ;;  %v3842_v31 = vld [vmem:[%s7368_s3 + $0x17d8] sm:$0xff] }
 0x351   : > { %2919 = vmatpush.msrb.mxu3 %v3807_v17  ;;  %2885 = vmatpush.msra.mxu1 %v3731_v43  ;;  %v3821_v17 = vld [vmem:[%s7368_s3 + $0x1730] sm:$0xff]  ;;  %v3855_v43 = vld [vmem:[%s7368_s3 + $0x1840] sm:$0xff] }
 0x352   : > { %2911 = vmatpush.msra.mxu2 %v3751_v21  ;;  %2947 = vmatpush.msra.mxu0 %v3823_v42 }
 0x353   : > { %2920 = vmatpush.msrb.mxu3 %v3805_v8  ;;  %2886 = vmatpush.msra.mxu1 %v3729_v23  ;;  %v3734_v8 = vld [vmem:[%s7368_s3 + $0x1478] sm:$0xff] }
 0x354   : > { %2976 = vmatpush.msrb.mxu2 %v3750_v56  ;;  %v3766_v23 = vld [vmem:[%s7368_s3 + $0x1578] sm:$0xff]  ;;  %2948 = vmatpush.msra.mxu0 %v3821_v17  ;;  %v3720_v56 = vld [vmem:[%s7368_s3 + $0x1408] sm:$0xff] }
 0x355   : > { %2921 = vmatpush.msrb.mxu3 %v3803_v46  ;;  %2887 = vmatpush.msra.mxu1 %v3727_v51  ;;  %v3819_v46 = vld [vmem:[%s7368_s3 + $0x1720] sm:$0xff]  ;;  %v3853_v51 = vld [vmem:[%s7368_s3 + $0x1830] sm:$0xff] }
 0x356   : > { %2977 = vmatpush.msrb.mxu2 %v3748_v30  ;;  %2949 = vmatpush.msra.mxu0 %v3819_v46  ;;  %v3834_v46 = vld [vmem:[%s7368_s3 + $0x1798] sm:$0xff] }
 0x357   : > { %2922 = vmatpush.msrb.mxu3 %v3801_v50  ;;  %2888 = vmatpush.msra.mxu1 %v3725_v26  ;;  %v3732_v50 = vld [vmem:[%s7368_s3 + $0x1468] sm:$0xff] }
 0x358   : > { %2978 = vmatpush.msrb.mxu2 %v3746_v11  ;;  %v3764_v26 = vld [vmem:[%s7368_s3 + $0x1568] sm:$0xff]  ;;  %v3798_v11 = vld [vmem:[%s7368_s3 + $0x1678] sm:$0xff] }
 0x359   : > { %2923 = vmatpush.msrb.mxu3 %v3799_v54  ;;  %2889 = vmatpush.msra.mxu1 %v3723_v34  ;;  %v3817_v54 = vld [vmem:[%s7368_s3 + $0x1710] sm:$0xff]  ;;  %v3851_v34 = vld [vmem:[%s7368_s3 + $0x1820] sm:$0xff] }
 0x35a   : > { %2979 = vmatpush.msrb.mxu2 %v3744_v28  ;;  %2950 = vmatpush.msra.mxu0 %v3817_v54  ;;  %v3878_v54 = vld [vmem:[%s7368_s3 + $0x18f8] sm:$0xff] }
 0x35b   : > { %2924 = vmatpush.msrb.mxu3 %v3797_v10  ;;  %2890 = vmatpush.msra.mxu1 %v3721_v18  ;;  %v3730_v10 = vld [vmem:[%s7368_s3 + $0x1458] sm:$0xff] }
 0x35c   : > { %2980 = vmatpush.msrb.mxu2 %v3742_v36  ;;  %v3762_v18 = vld [vmem:[%s7368_s3 + $0x1558] sm:$0xff] }
 0x35d   : > { %2925 = vmatpush.msrb.mxu3 %v3795_v45  ;;  %2891 = vmatpush.msra.mxu1 %v3719_v0  ;;  %v3815_v45 = vld [vmem:[%s7368_s3 + $0x1700] sm:$0xff]  ;;  %v3760_v0 = vld [vmem:[%s7368_s3 + $0x1548] sm:$0xff] }
 0x35e   : > { %2981 = vmatpush.msrb.mxu2 %v3740_v24  ;;  %2951 = vmatpush.msra.mxu0 %v3815_v45  ;;  %v3788_v24 = vld [vmem:[%s7368_s3 + $0x1628] sm:$0xff]  ;;  %v3830_v45 = vld [vmem:[%s7368_s3 + $0x1778] sm:$0xff] }
 0x35f   : > { %2926 = vmatpush.msrb.mxu3 %v3793_v38  ;;  %2956 = vmatpush.msrb.mxu1 %v3877_v55  ;;  %v3849_v38 = vld [vmem:[%s7368_s3 + $0x1810] sm:$0xff]  ;;  %v3726_v55 = vld [vmem:[%s7368_s3 + $0x1438] sm:$0xff] }
 0x360   : > { %2982 = vmatpush.msrb.mxu2 %v3738_v48  ;;  %3016 = vmatpush.msrb.mxu0 %v3814_v47  ;;  %v3786_v48 = vld [vmem:[%s7368_s3 + $0x1618] sm:$0xff] }
 0x361   : > { %2927 = vmatpush.msrb.mxu3 %v3791_v12  ;;  %2957 = vmatpush.msrb.mxu1 %v3875_v61  ;;  %v3728_v12 = vld [vmem:[%s7368_s3 + $0x1448] sm:$0xff]  ;;  %v3826_v47 = vld [vmem:[%s7368_s3 + $0x1758] sm:$0xff] }
 0x362   : > { %2983 = vmatpush.msrb.mxu2 %v3736_v9  ;;  %v3784_v9 = vld [vmem:[%s7368_s3 + $0x1608] sm:$0xff] }
 0x363   : > { %2928 = vmatpush.msrb.mxu3 %v3789_v4  ;;  %2958 = vmatpush.msrb.mxu1 %v3873_v19  ;;  %v3847_v4 = vld [vmem:[%s7368_s3 + $0x1800] sm:$0xff] }
 0x364   : > { %2984 = vmatpush.msrb.mxu2 %v3734_v8  ;;  %v3836_v8 = vld [vmem:[%s7368_s3 + $0x17a8] sm:$0xff] }
 0x365   : > { %2929 = vmatpush.msrb.mxu3 %v3787_v58  ;;  %2959 = vmatpush.msrb.mxu1 %v3871_v57  ;;  %v3812_v58 = vld [vmem:[%s7368_s3 + $0x16e8] sm:$0xff] }
 0x366   : > { %2985 = vmatpush.msrb.mxu2 %v3732_v50  ;;  %3017 = vmatpush.msrb.mxu0 %v3812_v58  ;;  %v3808_v57 = vld [vmem:[%s7368_s3 + $0x16c8] sm:$0xff]  ;;  %v3822_v58 = vld [vmem:[%s7368_s3 + $0x1738] sm:$0xff] }
 0x367   : > { %2930 = vmatpush.msrb.mxu3 %v3785_v13  ;;  %2960 = vmatpush.msrb.mxu1 %v3869_v3  ;;  %v3756_v13 = vld [vmem:[%s7368_s3 + $0x1528] sm:$0xff] }
 0x368   : > { %2986 = vmatpush.msrb.mxu2 %v3730_v10  ;;  %3018 = vmatpush.msrb.mxu0 %v3810_v14  ;;  %v3804_v3 = vld [vmem:[%s7368_s3 + $0x16a8] sm:$0xff] }
 0x369   : > { %2931 = vmatpush.msrb.mxu3 %v3783_v27  ;;  %2961 = vmatpush.msrb.mxu1 %v3867_v37  ;;  %v3722_v27 = vld [vmem:[%s7368_s3 + $0x1418] sm:$0xff]  ;;  %v3832_v50 = vld [vmem:[%s7368_s3 + $0x1788] sm:$0xff] }
 0x36a   : > { %2987 = vmatpush.msrb.mxu2 %v3728_v12  ;;  %3019 = vmatpush.msrb.mxu0 %v3808_v57  ;;  %v3876_v12 = vld [vmem:[%s7368_s3 + $0x18e8] sm:$0xff]  ;;  %v3858_v57 = vld [vmem:[%s7368_s3 + $0x1858] sm:$0xff] }
 0x36b   : > { %2996 = vmatpush.msra.mxu3 %v3782_v60  ;;  %2962 = vmatpush.msrb.mxu1 %v3865_v59  ;;  %v3752_v60 = vld [vmem:[%s7368_s3 + $0x1508] sm:$0xff] }
 0x36c   : > { %2988 = vmatpush.msrb.mxu2 %v3726_v55  ;;  %3020 = vmatpush.msrb.mxu0 %v3806_v62  ;;  %v3870_v55 = vld [vmem:[%s7368_s3 + $0x18b8] sm:$0xff]  ;;  %v3864_v14 = vld [vmem:[%s7368_s3 + $0x1888] sm:$0xff] }
 0x36d   : > { %2997 = vmatpush.msra.mxu3 %v3780_v35  ;;  %2963 = vmatpush.msrb.mxu1 %v3863_v6  ;;  %v3802_v35 = vld [vmem:[%s7368_s3 + $0x1698] sm:$0xff]  ;;  %v3852_v62 = vld [vmem:[%s7368_s3 + $0x1828] sm:$0xff] }
 0x36e   : > { %2989 = vmatpush.msrb.mxu2 %v3724_v63  ;;  %3021 = vmatpush.msrb.mxu0 %v3804_v3  ;;  %v3846_v6 = vld [vmem:[%s7368_s3 + $0x17f8] sm:$0xff] }
 0x36f   : > { %2998 = vmatpush.msra.mxu3 %v3778_v15  ;;  %2964 = vmatpush.msrb.mxu1 %v3861_v39  ;;  %v3796_v15 = vld [vmem:[%s7368_s3 + $0x1668] sm:$0xff]  ;;  %v3866_v63 = vld [vmem:[%s7368_s3 + $0x1898] sm:$0xff] }
 0x370   : > { %2990 = vmatpush.msrb.mxu2 %v3722_v27  ;;  %3022 = vmatpush.msrb.mxu0 %v3802_v35  ;;  %v3844_v39 = vld [vmem:[%s7368_s3 + $0x17e8] sm:$0xff]  ;;  %v3862_v27 = vld [vmem:[%s7368_s3 + $0x1878] sm:$0xff] }
 0x371   : > { %2999 = vmatpush.msra.mxu3 %v3776_v2  ;;  %2965 = vmatpush.msrb.mxu1 %v3859_v41  ;;  %v3792_v2 = vld [vmem:[%s7368_s3 + $0x1648] sm:$0xff]  ;;  %v3850_v3 = vld [vmem:[%s7368_s3 + $0x1818] sm:$0xff] }
 0x372   : > { %2991 = vmatpush.msrb.mxu2 %v3720_v56  ;;  %3023 = vmatpush.msrb.mxu0 %v3800_v5  ;;  %v3856_v56 = vld [vmem:[%s7368_s3 + $0x1848] sm:$0xff] }
 0x373   : > { %3000 = vmatpush.msra.mxu3 %v3774_v16  ;;  %2966 = vmatpush.msrb.mxu1 %v3857_v1  ;;  %v3790_v16 = vld [vmem:[%s7368_s3 + $0x1638] sm:$0xff] }
 0x374   : > { %3024 = vmatpush.msrb.mxu0 %v3798_v11 }
 0x375   : > { %3001 = vmatpush.msra.mxu3 %v3772_v40  ;;  %2967 = vmatpush.msrb.mxu1 %v3855_v43 }
 0x376   : > { %3025 = vmatpush.msrb.mxu0 %v3796_v15 }
 0x377   : > { %3002 = vmatpush.msra.mxu3 %v3770_v25  ;;  %2968 = vmatpush.msrb.mxu1 %v3853_v51  ;;  %v3840_v25 = vld [vmem:[%s7368_s3 + $0x17c8] sm:$0xff] }
 0x378   : > { %3026 = vmatpush.msrb.mxu0 %v3794_v29 }
 0x379   : > { %3003 = vmatpush.msra.mxu3 %v3768_v53  ;;  %2969 = vmatpush.msrb.mxu1 %v3851_v34  ;;  %v3838_v53 = vld [vmem:[%s7368_s3 + $0x17b8] sm:$0xff]  ;;  %v3903_v34 = vmov 0  }
 0x37a   : > { %3027 = vmatpush.msrb.mxu0 %v3792_v2  ;;  %3894 = vset.pattern.permute.xlu0 %v3903_v34 }
 0x37b   : > { %3004 = vmatpush.msra.mxu3 %v3766_v23  ;;  %2970 = vmatpush.msrb.mxu1 %v3849_v38  ;;  %v3078_v38 = vld [vmem:[%s7370_s5] sm:$0xff] }
 0x37c   : > { %3028 = vmatpush.msrb.mxu0 %v3790_v16  ;;  %3081 = vperm.xlu0 %3894, %v3078_v38  }
 0x37d   : > { %3005 = vmatpush.msra.mxu3 %v3764_v26  ;;  %v2425_v49 = vpop.f32.mrf.mxu0  ;;  %2971 = vmatpush.msrb.mxu1 %v3847_v4  ;;  %v3872_v4 = vld [vmem:[%s7368_s3 + $0x18c8] sm:$0xff] }
 0x37e   : > { %3029 = vmatpush.msrb.mxu0 %v3788_v24 }
 0x37f   : > { %3006 = vmatpush.msra.mxu3 %v3762_v18 }
 0x380   : > { %3030 = vmatpush.msrb.mxu0 %v3786_v48 }
 0x381   : > { %3007 = vmatpush.msra.mxu3 %v3760_v0  ;;  %v3874_v0 = vld [vmem:[%s7368_s3 + $0x18d8] sm:$0xff] }
 0x382   : > { %3031 = vmatpush.msrb.mxu0 %v3784_v9 }
 0x383   : > { %3008 = vmatpush.msra.mxu3 %v3758_v22  ;;  %v3089_v22 = vld [vmem:[%s7372_s7] sm:$0x7] }
 0x384   : > { %3092 = vperm.xlu0 %3894, %v3089_v22  }
 0x385   : > { %3009 = vmatpush.msra.mxu3 %v3756_v13  ;;  %v3818_v13 = vld [vmem:[%s7368_s3 + $0x1718] sm:$0xff] }
 0x387   : > { %3010 = vmatpush.msra.mxu3 %v3754_v52  ;;  %v3860_v52 = vld [vmem:[%s7368_s3 + $0x1868] sm:$0xff] }
 0x389   : > { %3011 = vmatpush.msra.mxu3 %v3752_v60  ;;  %v3854_v60 = vld [vmem:[%s7368_s3 + $0x1838] sm:$0xff] }
 0x391   : > { %v2505_v30 = vpop.f32.mrf.mxu0 }
 0x393   : > { %v2465_v19 = vpop.f32.mrf.mxu2 }
 0x397   : > { %v2445_v7 = vpop.f32.mrf.mxu1 }
 0x398   : > { %v2446_v61 = vadd.f32 %v2445_v7, %v2425_v49  ;;  %v3824_v49 = vld [vmem:[%s7368_s3 + $0x1748] sm:$0xff] }
 0x399   : > { %v3868_v7 = vld [vmem:[%s7368_s3 + $0x18a8] sm:$0xff] }
 0x39a   : > { %v2466_v21 = vadd.f32 %v2465_v19, %v2446_v61  ;;  %v3820_v61 = vld [vmem:[%s7368_s3 + $0x1728] sm:$0xff] }
 0x39d   : > { %v2545_v37 = vpop.f32.mrf.mxu2 }
 0x3a1   : > { %v2525_v40 = vpop.f32.mrf.mxu1 }
 0x3a2   : > { %v2546_v42 = vadd.f32 %v2545_v37, %v2525_v40 }
 0x3a7   : > { %v2585_v59 = vpop.f32.mrf.mxu0 }
 0x3a9   : > { %v7221_v36 = vpop.f32.mrf.mxu2 }
 0x3aa   : > { %2892 = vmatmul.f32.vlgmr.msra.gmra.mxu1 %v7221_v36 }
 0x3ab   : > { %3036 = vmatpush.msra.mxu1 %v3846_v6 }
 0x3ad   : > { %v2485_v28 = vpop.f32.mrf.mxu3  ;;  %3037 = vmatpush.msra.mxu1 %v3844_v39 }
 0x3ae   : > { %v2486_v32 = vadd.f32 %v2485_v28, %v2466_v21  ;;  %v3816_v21 = vld [vmem:[%s7368_s3 + $0x1708] sm:$0xff] }
 0x3af   : > { %3038 = vmatpush.msra.mxu1 %v3842_v31 }
 0x3b0   : > { %v2506_v20 = vadd.f32 %v2505_v30, %v2486_v32  ;;  %v3848_v30 = vld [vmem:[%s7368_s3 + $0x1808] sm:$0xff] }
 0x3b1   : > { %v7245_v1 = vpop.f32.mrf.mxu0  ;;  %3039 = vmatpush.msra.mxu1 %v3840_v25 }
 0x3b2   : > { %v7237_v41 = vadd.f32 %v2506_v20, %v6702_v33  ;;  %2972 = vmatmul.f32.vlgmr.msrb.gmra.mxu1 %v7245_v1  ;;  %v3088_v20 = vld [vmem:[%s7371_s6] sm:$0x7] }
 0x3b3   : > { %3040 = vmatpush.msra.mxu1 %v3838_v53 }
 0x3b4   : > { %v7253_v43 = vpop.f32.mrf.mxu2 }
 0x3b5   : > { %v2565_v33 = vpop.f32.mrf.mxu3  ;;  %2932 = vmatmul.f32.vlgmr.msrb.gmra.mxu3 %v7253_v43  ;;  %3041 = vmatpush.msra.mxu1 %v3836_v8 }
 0x3b6   : > { %v2566_v17 = vadd.f32 %v2565_v33, %v2546_v42 }
 0x3b7   : > { %3042 = vmatpush.msra.mxu1 %v3834_v46 }
 0x3b8   : > { %v2586_v23 = vadd.f32 %v2585_v59, %v2566_v17 }
 0x3b9   : > { %3043 = vmatpush.msra.mxu1 %v3832_v50 }
 0x3bb   : > { %v2605_v51 = vpop.f32.mrf.mxu1  ;;  %3044 = vmatpush.msra.mxu1 %v3830_v45 }
 0x3bc   : > { %v2606_v26 = vadd.f32 %v2605_v51, %v2586_v23 }
 0x3bd   : > { %v2652_v18 = vpop.f32.mrf.mxu3 }
 0x3be   : > { %v7270_v10 = vadd.f32 %v2606_v26, %v6730_v44  ;;  %2912 = vmatmul.f32.vlgmr.msra.gmra.mxu2 %v2652_v18  ;;  %3012 = vmatmul.f32.vlgmr.msra.gmra.mxu3 %v2652_v18  ;;  %v3828_v44 = vld [vmem:[%s7368_s3 + $0x1768] sm:$0xff] }
 0x3bf   : > { %3056 = vmatpush.msra.mxu2 %v3878_v54  ;;  %3045 = vmatpush.msra.mxu1 %v3828_v44 }
 0x3c1   : > { %3057 = vmatpush.msra.mxu2 %v3876_v12  ;;  %3046 = vmatpush.msra.mxu1 %v3826_v47 }
 0x3c3   : > { %3058 = vmatpush.msra.mxu2 %v3874_v0  ;;  %3047 = vmatpush.msra.mxu1 %v3824_v49 }
 0x3c5   : > { %3059 = vmatpush.msra.mxu2 %v3872_v4  ;;  %3048 = vmatpush.msra.mxu1 %v3822_v58 }
 0x3c6   : > { %2992 = vmatmul.f32.vlgmr.msrb.gmra.mxu2 %v7221_v36 }
 0x3c7   : > { %3060 = vmatpush.msra.mxu2 %v3870_v55  ;;  %3049 = vmatpush.msra.mxu1 %v3820_v61 }
 0x3c9   : > { %3061 = vmatpush.msra.mxu2 %v3868_v7  ;;  %3050 = vmatpush.msra.mxu1 %v3818_v13 }
 0x3cb   : > { %3062 = vmatpush.msra.mxu2 %v3866_v63  ;;  %3051 = vmatpush.msra.mxu1 %v3816_v21 }
 0x3cd   : > { %v2692_v19 = vpop.f32.mrf.mxu3  ;;  %3063 = vmatpush.msra.mxu2 %v3864_v14 }
 0x3ce   : > { %2952 = vmatmul.f32.vlgmr.msra.gmra.mxu0 %v2692_v19  ;;  %3052 = vmatmul.f32.vlgmr.msra.gmra.mxu1 %v2692_v19 }
 0x3cf   : > { %3064 = vmatpush.msra.mxu2 %v3862_v27 }
 0x3d1   : > { %3065 = vmatpush.msra.mxu2 %v3860_v52 }
 0x3d3   : > { %3066 = vmatpush.msra.mxu2 %v3858_v57 }
 0x3d5   : > { %3067 = vmatpush.msra.mxu2 %v3856_v56 }
 0x3d6   : > { %3032 = vmatmul.f32.vlgmr.msrb.gmra.mxu0 %v7253_v43 }
 0x3d7   : > { %3068 = vmatpush.msra.mxu2 %v3854_v60 }
 0x3d9   : > { %3069 = vmatpush.msra.mxu2 %v3852_v62 }
 0x3db   : > { %3070 = vmatpush.msra.mxu2 %v3850_v3 }
 0x3dd   : > { %3071 = vmatpush.msra.mxu2 %v3848_v30 }
 0x3de   : > { %3072 = vmatmul.f32.vlgmr.msra.gmra.mxu2 %v7245_v1 }
 0x3ee   : > { %v3082_v32 = vpop.permute.xlu0 %3081 }
 0x3f6   : > { %v3093_v43 = vpop.permute.xlu0 %3092 }
 0x427   : > { %v2893_v35 = vpop.f32.mrf.mxu1 }
 0x42f   : > { %v2973_v59 = vpop.f32.mrf.mxu1 }
 0x438   : > { %v2933_v11 = vpop.f32.mrf.mxu3 }
 0x441   : > { %v2913_v5 = vpop.f32.mrf.mxu2  ;;  %v3013_v24 = vpop.f32.mrf.mxu3 }
 0x442   : > { %v2914_v37 = vadd.f32 %v2913_v5, %v2893_v35 }
 0x444   : > { %v2934_v15 = vadd.f32 %v2933_v11, %v2914_v37 }
 0x449   : > { %v2993_v39 = vpop.f32.mrf.mxu2 }
 0x44a   : > { %v3014_v31 = vadd.f32 %v3013_v24, %v2993_v39 }
 0x44b   : > { %v2953_v29 = vpop.f32.mrf.mxu0  ;;  %v3053_v25 = vpop.f32.mrf.mxu1 }
 0x44c   : > { %v2954_v28 = vadd.f32 %v2953_v29, %v2934_v15 }
 0x44e   : > { %v2974_v2 = vadd.f32 %v2973_v59, %v2954_v28 }
 0x450   : > { %v3076_v6 = vadd.f32 %v2974_v2, %v7237_v41 }
 0x452   : > { %v3084_v36 = vadd.f32 %v3082_v32, %v3076_v6 }
 0x453   : > { %v3033_v40 = vpop.f32.mrf.mxu0 }
 0x454   : > { %v3086_v16 = vmax.f32 %v3084_v36, 0.0  ;;  %v3034_v48 = vadd.f32 %v3033_v40, %v3014_v31 }
 0x456   : > { %3114 = vmatpush.msrb.mxu3 %v3086_v16  ;;  %v3054_v42 = vadd.f32 %v3053_v25, %v3034_v48 }
 0x457   : > { %3879 = vmatmul.msk.f32.vlgmr.msrb.gmra.mxu3 %vm3095_vm1, %v3088_v20 }
 0x461   : > { %v3073_v1 = vpop.f32.mrf.mxu2 }
 0x462   : > { %v3074_v41 = vadd.f32 %v3073_v1, %v3054_v42 }
 0x464   : > { %v3077_v9 = vadd.f32 %v3074_v41, %v7270_v10 }
 0x466   : > { %v3085_v33 = vadd.f32 %v3082_v32, %v3077_v9 }
 0x468   : > { %v3087_v53 = vmax.f32 %v3085_v33, 0.0 }
 0x46a   : > { %3134 = vmatpush.msra.mxu3 %v3087_v53 }
 0x46b   : > { %3880 = vmatmul.msk.f32.vlgmr.msra.gmra.mxu3 %vm3095_vm1, %v3088_v20 }
 0x4da   : > { %v3116_v17 = vpop.f32.mrf.mxu3 }
 0x4db   : > { %v3117_v46 = vadd.f32 %v3116_v17, %v3093_v43 }
 0x4ee   : > { %v3136_v8 = vpop.f32.mrf.mxu3 }
 0x4ef   : > { %v3137_v23 = vadd.f32 %v3136_v8, %v3093_v43 }
 0x4f1   : > { %v3141_v51 = vrot.slane %v3137_v23, 4 }
 0x4f3   : > { %v3143_v50 = vsel %vm3142_vm2, %v3117_v46, %v3141_v51 }
 0x4f4   : > { %3145 = vst [vmem:[%s305_s29] sm:$0x77] %v3143_v50 }
 0x4f5 PF: > { %s18_s27 = sadd.s32 1, %s3901_s27  }
 0x4f6   : > { %p15_p4 = scmp.ge.s32.totalorder %s18_s27, 6  }
 0x4f8   :  { %17 = sbr.rel (!%p15_p4) target bundleno = 1 (0x1), region = 90 }

</bundles_post_ra>
